<compile_context>
chip_gen: v5e
topology: v5e:2x2
jax: 0.10.0
libtpu: 0.0.40
codegen_flags: <defaults>
</compile_context>

<pallas_src>
import numpy as np

import jax
import jax.numpy as jnp
from jax.experimental import pallas as pl
from jax.experimental.pallas import tpu as pltpu

NEG_SLOPE = 0.01   # F.leaky_relu default negative_slope
GUARD = 128        # zero guard columns flanking each guarded flat activation


# ---------------------------------------------------------------------------
# In-kernel helpers
# ---------------------------------------------------------------------------
def _leaky_relu(x):
    return jnp.where(x > 0, x, NEG_SLOPE * x)


def _conv3x3(src_ref, cin, w_ref, patch_ref, M, Wp):
    """3x3 conv (stride 1, padding 1) over a guarded flat activation.

    src_ref:   (cin, GUARD + M + GUARD) -- columns ordered (h, w) over the
               zero-padded (Hp, Wp) grid of ONE image; ring + guards are zero.
    w_ref:     (Cout, 9*cin) fused-K weight, K index = (ky*3+kx)*cin + ci.
    patch_ref: (>=9*cin, >=M) VMEM scratch used as the im2col buffer.
    Returns the (Cout, M) float32 pre-activation (bias not added).
    """
    for ky in range(3):
        for kx in range(3):
            t = ky * 3 + kx
            off = GUARD + (ky - 1) * Wp + (kx - 1)
            patch_ref[t * cin:(t + 1) * cin, 0:M] = src_ref[:, off:off + M]
    return jnp.dot(w_ref[...], patch_ref[0:9 * cin, 0:M],
                   preferred_element_type=jnp.float32)


# ---------------------------------------------------------------------------
# The single fused kernel (whole network, one image per grid step)
# ---------------------------------------------------------------------------
def _make_kernel(C, cin_pad, M1, Wp1, M2, Wp2, fch_pad):
    # TODO(synk): networks/parts.py not provided; InConv is assumed to be
    #             Conv2d(in, out, 3, padding=1) + leaky_relu, and ResBlock is
    #             assumed to be h = lrelu(conv1(x)); out = lrelu(conv2(h) + x).
    def kernel(x_ref, m1_ref, m2_ref,
               wi_ref, bi_ref, w11_ref, b11_ref, w12_ref, b12_ref,
               w21_ref, b21_ref, w22_ref, b22_ref,
               p1_ref, wf_ref, fb1_ref, wh_ref, bh_ref,
               out_ref,
               a_ref, h1_ref, x2_ref, h2_ref, patch_ref):
        # Only the guard strips need zeroing; ring columns inside the interior
        # span are re-zeroed by the interior-mask multiply after every conv.
        zg = jnp.zeros((C, GUARD), jnp.float32)
        a_ref[:, 0:GUARD] = zg
        a_ref[:, GUARD + M1:] = zg
        h1_ref[:, 0:GUARD] = zg
        h1_ref[:, GUARD + M1:] = zg
        x2_ref[:, 0:GUARD] = zg
        x2_ref[:, GUARD + M2:] = zg
        h2_ref[:, 0:GUARD] = zg
        h2_ref[:, GUARD + M2:] = zg

        # Read + broadcast the interior masks once.
        m1 = jnp.broadcast_to(m1_ref[...], (C, M1))
        m2 = jnp.broadcast_to(m2_ref[...], (C, M2))

        # ---- InConv: conv3x3 + leaky_relu ----
        y = _conv3x3(x_ref, cin_pad, wi_ref, patch_ref, M1, Wp1) + bi_ref[...]
        a_ref[:, GUARD:GUARD + M1] = _leaky_relu(y) * m1

        # ---- ResBlock1: h = act(conv1(a)); out = act(conv2(h) + a) ----
        y = _conv3x3(a_ref, C, w11_ref, patch_ref, M1, Wp1) + b11_ref[...]
        h1_ref[:, GUARD:GUARD + M1] = _leaky_relu(y) * m1
        y = (_conv3x3(h1_ref, C, w12_ref, patch_ref, M1, Wp1) + b12_ref[...]
             + a_ref[:, GUARD:GUARD + M1])
        r1 = _leaky_relu(y)            # (C, M1); ring cols ignored by pool matmul

        # ---- Pool1 (2x2 avg, stride 2) + ring re-pad as one MXU matmul ----
        x2_ref[:, GUARD:GUARD + M2] = jnp.dot(
            r1, p1_ref[...], preferred_element_type=jnp.float32)

        # ---- ResBlock2 ----
        y = _conv3x3(x2_ref, C, w21_ref, patch_ref, M2, Wp2) + b21_ref[...]
        h2_ref[:, GUARD:GUARD + M2] = _leaky_relu(y) * m2
        y = (_conv3x3(h2_ref, C, w22_ref, patch_ref, M2, Wp2) + b22_ref[...]
             + x2_ref[:, GUARD:GUARD + M2])
        r2 = _leaky_relu(y)            # (C, M2); ring cols ignored by folded fc

        # ---- Pool2 + NCHW flatten + fc1 folded into per-channel weights ----
        acc = jnp.zeros((1, fch_pad), jnp.float32)
        for c in range(C):
            acc = acc + jnp.dot(r2[c:c + 1, :], wf_ref[c],
                                preferred_element_type=jnp.float32)
        h = _leaky_relu(acc + fb1_ref[...])

        # ---- [fc_mean | fc_sigma] as one matmul ----
        out = jnp.dot(h, wh_ref[...], preferred_element_type=jnp.float32) + bh_ref[...]
        out_ref[...] = out

    return kernel


# ---------------------------------------------------------------------------
# Forward pass wrapper (single pallas_call)
# ---------------------------------------------------------------------------
def proposal_net_mini(image, mask, kp):
    """image/mask: NCHW float32 (28x28); kp: prepare_params() output."""
    B, _, H, W = image.shape
    assert (H, W) == (28, 28), "fc1 expects n_hidden*7*7 => 28x28 inputs"
    Hp, Wp = H + 2, W + 2
    M1 = Hp * Wp                               # 900
    Hp2, Wp2 = H // 2 + 2, W // 2 + 2
    M2 = Hp2 * Wp2                             # 256

    C = kp["in_w"].shape[0]                    # n_hidden
    cin_pad = kp["in_w"].shape[1] // 9         # input channels padded to 8
    fch_pad = kp["fc_w"].shape[2]              # fc_hidden padded (64)
    n_head = kp["head_b"].shape[1]             # 2 * fc_out

    # --- input prep: cat channels, pad channels + conv ring, flatten, guards ---
    x = jnp.concatenate([image, mask], axis=1).astype(jnp.float32)   # (B,cin,H,W)
    cin = x.shape[1]
    x = jnp.pad(x, ((0, 0), (0, cin_pad - cin), (1, 1), (1, 1)))     # chan + ring
    x = x.reshape(B, cin_pad, M1)
    x = jnp.pad(x, ((0, 0), (0, 0), (GUARD, GUARD)))                 # lane guards

    def full(shape):
        nd = len(shape)
        return pl.BlockSpec(shape, lambda b, _nd=nd: (0,) * _nd)

    out = pl.pallas_call(
        _make_kernel(C, cin_pad, M1, Wp, M2, Wp2, fch_pad),
        out_shape=jax.ShapeDtypeStruct((B, 1, n_head), jnp.float32),
        grid=(B,),
        in_specs=[
            pl.BlockSpec((None, cin_pad, M1 + 2 * GUARD), lambda b: (b, 0, 0)),
            full(kp["m1"].shape), full(kp["m2"].shape),
            full(kp["in_w"].shape), full(kp["in_b"].shape),
            full(kp["rb1_w1"].shape), full(kp["rb1_b1"].shape),
            full(kp["rb1_w2"].shape), full(kp["rb1_b2"].shape),
            full(kp["rb2_w1"].shape), full(kp["rb2_b1"].shape),
            full(kp["rb2_w2"].shape), full(kp["rb2_b2"].shape),
            full(kp["pool1"].shape), full(kp["fc_w"].shape),
            full(kp["fc_b"].shape), full(kp["head_w"].shape),
            full(kp["head_b"].shape),
        ],
        out_specs=pl.BlockSpec((None, 1, n_head), lambda b: (b, 0, 0)),
        scratch_shapes=[
            pltpu.VMEM((C, M1 + 2 * GUARD), jnp.float32),       # a1 (InConv out)
            pltpu.VMEM((C, M1 + 2 * GUARD), jnp.float32),       # h (resblock1)
            pltpu.VMEM((C, M2 + 2 * GUARD), jnp.float32),       # pooled input
            pltpu.VMEM((C, M2 + 2 * GUARD), jnp.float32),       # h (resblock2)
            pltpu.VMEM((9 * max(C, cin_pad), M1), jnp.float32),  # im2col patches
        ],
        compiler_params=pltpu.CompilerParams(
            dimension_semantics=("parallel",)),
    )(x, kp["m1"], kp["m2"],
      kp["in_w"], kp["in_b"],
      kp["rb1_w1"], kp["rb1_b1"], kp["rb1_w2"], kp["rb1_b2"],
      kp["rb2_w1"], kp["rb2_b1"], kp["rb2_w2"], kp["rb2_b2"],
      kp["pool1"], kp["fc_w"], kp["fc_b"], kp["head_w"], kp["head_b"])

    n_out = n_head // 2
    return out[:, 0, :n_out], out[:, 0, n_out:]


# ---------------------------------------------------------------------------
# One-time parameter re-layout (PyTorch layout -> kernel layout)
# ---------------------------------------------------------------------------
def prepare_params(p):
    """Pre-transpose/fold all weights once so nothing is re-laid-out per call."""
    n_hidden = int(p["in_w"].shape[0])
    cin = int(p["in_w"].shape[1])
    cin_pad = ((cin + 7) // 8) * 8
    fc_hidden = int(p["fc1_w"].shape[0])
    fch_pad = ((fc_hidden + 63) // 64) * 64

    Hp = Wp = 30                     # padded 28x28
    H2 = W2 = 14
    Hp2 = Wp2 = 16                   # padded 14x14
    H3 = W3 = 7

    def conv_w(w, pad_to=None):
        w = np.asarray(w, np.float32)
        co, ci = w.shape[0], w.shape[1]
        if pad_to is not None and pad_to > ci:
            w = np.pad(w, ((0, 0), (0, pad_to - ci), (0, 0), (0, 0)))
            ci = pad_to
        # (Cout, Cin, 3, 3) -> (Cout, 9*Cin), K index = (ky*3+kx)*Cin + ci
        return jnp.asarray(np.transpose(w, (0, 2, 3, 1)).reshape(co, 9 * ci))

    def conv_b(b):
        return jnp.asarray(np.asarray(b, np.float32).reshape(-1, 1))

    def interior_mask(Hpad, Wpad):
        m = np.zeros((Hpad, Wpad), np.float32)
        m[1:-1, 1:-1] = 1.0
        return jnp.asarray(m.reshape(1, Hpad * Wpad))

    # pool1 matrix: padded 30x30 -> 2x2 avg -> re-padded 16x16 (zero ring)
    P1 = np.zeros((Hp * Wp, Hp2 * Wp2), np.float32)
    for ph in range(H2):
        for pw in range(W2):
            m2 = (ph + 1) * Wp2 + (pw + 1)
            for dh in range(2):
                for dw in range(2):
                    m1 = (2 * ph + 1 + dh) * Wp + (2 * pw + 1 + dw)
                    P1[m1, m2] = 0.25

    # pool2 matrix: padded 16x16 -> 2x2 avg -> 7x7 (used only to fold fc1)
    P2 = np.zeros((Hp2 * Wp2, H3 * W3), np.float32)
    for ph in range(H3):
        for pw in range(W3):
            s = ph * W3 + pw
            for dh in range(2):
                for dw in range(2):
                    m = (2 * ph + 1 + dh) * Wp2 + (2 * pw + 1 + dw)
                    P2[m, s] = 0.25

    # fold pool2 + NCHW flatten + fc1 into per-channel (256, fch_pad) weights
    w1 = np.asarray(p["fc1_w"], np.float32).reshape(fc_hidden, n_hidden, H3 * W3)
    wf = np.einsum("ms,jcs->cmj", P2, w1)                      # (C, 256, fc_hidden)
    wf = np.pad(wf, ((0, 0), (0, 0), (0, fch_pad - fc_hidden)))

    fb1 = np.pad(np.asarray(p["fc1_b"], np.float32),
                 (0, fch_pad - fc_hidden)).reshape(1, -1)

    # fc_mean / fc_sigma fused into one (fch_pad, 2*fc_out) head matmul
    head_w = np.concatenate([np.asarray(p["fcm_w"], np.float32),
                             np.asarray(p["fcs_w"], np.float32)], axis=0).T
    head_w = np.pad(head_w, ((0, fch_pad - fc_hidden), (0, 0)))
    head_b = np.concatenate([np.asarray(p["fcm_b"], np.float32),
                             np.asarray(p["fcs_b"], np.float32)]).reshape(1, -1)

    return {
        "in_w": conv_w(p["in_w"], pad_to=cin_pad), "in_b": conv_b(p["in_b"]),
        "rb1_w1": conv_w(p["rb1"]["w1"]), "rb1_b1": conv_b(p["rb1"]["b1"]),
        "rb1_w2": conv_w(p["rb1"]["w2"]), "rb1_b2": conv_b(p["rb1"]["b2"]),
        "rb2_w1": conv_w(p["rb2"]["w1"]), "rb2_b1": conv_b(p["rb2"]["b1"]),
        "rb2_w2": conv_w(p["rb2"]["w2"]), "rb2_b2": conv_b(p["rb2"]["b2"]),
        "pool1": jnp.asarray(P1),
        "fc_w": jnp.asarray(wf), "fc_b": jnp.asarray(fb1),
        "head_w": jnp.asarray(head_w), "head_b": jnp.asarray(head_b),
        "m1": interior_mask(Hp, Wp), "m2": interior_mask(Hp2, Wp2),
    }


# ---------------------------------------------------------------------------
# Pure-JAX reference (same assumed InConv / ResBlock semantics)
# ---------------------------------------------------------------------------
def _ref_forward(image, mask, p):
    act = lambda v: jnp.where(v > 0, v, NEG_SLOPE * v)
    hi = jax.lax.Precision.HIGHEST

    def conv(x, w, b):
        y = jax.lax.conv_general_dilated(
            x, w, window_strides=(1, 1), padding=((1, 1), (1, 1)),
            dimension_numbers=("NCHW", "OIHW", "NCHW"), precision=hi)
        return y + b.reshape(1, -1, 1, 1)

    def pool(x):
        b, c, h, w = x.shape
        return x.reshape(b, c, h // 2, 2, w // 2, 2).mean(axis=(3, 5))

    out = jnp.concatenate([image, mask], axis=1)
    out = act(conv(out, p["in_w"], p["in_b"]))
    h = act(conv(out, p["rb1"]["w1"], p["rb1"]["b1"]))
    out = act(conv(h, p["rb1"]["w2"], p["rb1"]["b2"]) + out)
    out = pool(out)
    h = act(conv(out, p["rb2"]["w1"], p["rb2"]["b1"]))
    out = act(conv(h, p["rb2"]["w2"], p["rb2"]["b2"]) + out)
    out = pool(out)
    out = out.reshape(out.shape[0], -1)
    out = act(jnp.dot(out, p["fc1_w"].T, precision=hi) + p["fc1_b"])
    mean = jnp.dot(out, p["fcm_w"].T, precision=hi) + p["fcm_b"]
    logs = jnp.dot(out, p["fcs_w"].T, precision=hi) + p["fcs_b"]
    return mean, logs


# ---------------------------------------------------------------------------
# Deterministic synthetic parameters (PyTorch-shaped)
# ---------------------------------------------------------------------------
def init_params(key, inp_channels=2, n_hidden=16, fc_hidden=50, fc_out=16):
    def conv_w(k, cout, cin):
        s = 1.0 / jnp.sqrt(cin * 9.0)
        return jax.random.uniform(k, (cout, cin, 3, 3), jnp.float32, -s, s)

    def lin_w(k, out, inp):
        s = 1.0 / jnp.sqrt(float(inp))
        return jax.random.uniform(k, (out, inp), jnp.float32, -s, s)

    def vec(k, n, fan_in):
        s = 1.0 / jnp.sqrt(float(fan_in))
        return jax.random.uniform(k, (n,), jnp.float32, -s, s)

    ks = jax.random.split(key, 16)
    return {
        "in_w": conv_w(ks[0], n_hidden, inp_channels),
        "in_b": vec(ks[1], n_hidden, inp_channels * 9),
        "rb1": {
            "w1": conv_w(ks[2], n_hidden, n_hidden), "b1": vec(ks[3], n_hidden, n_hidden * 9),
            "w2": conv_w(ks[4], n_hidden, n_hidden), "b2": vec(ks[5], n_hidden, n_hidden * 9),
        },
        "rb2": {
            "w1": conv_w(ks[6], n_hidden, n_hidden), "b1": vec(ks[7], n_hidden, n_hidden * 9),
            "w2": conv_w(ks[8], n_hidden, n_hidden), "b2": vec(ks[9], n_hidden, n_hidden * 9),
        },
        "fc1_w": lin_w(ks[10], fc_hidden, n_hidden * 7 * 7),
        "fc1_b": vec(ks[11], fc_hidden, n_hidden * 7 * 7),
        "fcm_w": lin_w(ks[12], fc_out, fc_hidden),
        "fcm_b": vec(ks[13], fc_out, fc_hidden),
        "fcs_w": lin_w(ks[14], fc_out, fc_hidden),
        "fcs_b": vec(ks[15], fc_out, fc_hidden),
    }


if __name__ == "__main__":
    key = jax.random.PRNGKey(0)
    k_img, k_mask, k_par = jax.random.split(key, 3)

    B = 2
    # MNIST-sized inputs (28x28 so that two 2x pools give the 7x7 fc1 input).
    image = jax.random.uniform(k_img, (B, 1, 28, 28), jnp.float32)              # NCHW
    mask = (jax.random.uniform(k_mask, (B, 1, 28, 28)) > 0.5).astype(jnp.float32)

    # concatenated input has 1 (image) + 1 (mask) = 2 channels -> inp_channels=2
    params = init_params(k_par, inp_channels=2, n_hidden=16, fc_hidden=50, fc_out=16)
    kparams = prepare_params(params)   # one-time weight re-layout (outside jit)

    fwd = jax.jit(proposal_net_mini)
    mean, logs = fwd(image, mask, kparams)
    jax.block_until_ready((mean, logs))

    # correctness vs. a pure-JAX reference with the same assumed module structure
    ref_mean, ref_logs = _ref_forward(image, mask, params)

    assert mean.shape == (B, 16) and logs.shape == (B, 16)
    assert mean.dtype == jnp.float32 and logs.dtype == jnp.float32
    assert bool(jnp.all(jnp.isfinite(mean))) and bool(jnp.all(jnp.isfinite(logs)))
    assert bool(jnp.allclose(mean, ref_mean, rtol=1e-2, atol=1e-3))
    assert bool(jnp.allclose(logs, ref_logs, rtol=1e-2, atol=1e-3))
    print("KERNEL_OK")
</pallas_src>

<mosaic_0001>
module attributes {stable_mosaic.version = 11 : i64} {
  func.func @kernel(%arg0: i32, %arg1: memref<1x8x1156xf32, #tpu.memory_space<vmem>>, %arg2: memref<1x900xf32, #tpu.memory_space<vmem>>, %arg3: memref<1x256xf32, #tpu.memory_space<vmem>>, %arg4: memref<16x72xf32, #tpu.memory_space<vmem>>, %arg5: memref<16x1xf32, #tpu.memory_space<vmem>>, %arg6: memref<16x144xf32, #tpu.memory_space<vmem>>, %arg7: memref<16x1xf32, #tpu.memory_space<vmem>>, %arg8: memref<16x144xf32, #tpu.memory_space<vmem>>, %arg9: memref<16x1xf32, #tpu.memory_space<vmem>>, %arg10: memref<16x144xf32, #tpu.memory_space<vmem>>, %arg11: memref<16x1xf32, #tpu.memory_space<vmem>>, %arg12: memref<16x144xf32, #tpu.memory_space<vmem>>, %arg13: memref<16x1xf32, #tpu.memory_space<vmem>>, %arg14: memref<900x256xf32, #tpu.memory_space<vmem>>, %arg15: memref<16x256x64xf32, #tpu.memory_space<vmem>>, %arg16: memref<1x64xf32, #tpu.memory_space<vmem>>, %arg17: memref<64x32xf32, #tpu.memory_space<vmem>>, %arg18: memref<1x32xf32, #tpu.memory_space<vmem>>, %arg19: memref<1x1x32xf32, #tpu.memory_space<vmem>>, %arg20: memref<16x1156xf32, #tpu.memory_space<vmem>>, %arg21: memref<16x1156xf32, #tpu.memory_space<vmem>>, %arg22: memref<16x512xf32, #tpu.memory_space<vmem>>, %arg23: memref<16x512xf32, #tpu.memory_space<vmem>>, %arg24: memref<144x900xf32, #tpu.memory_space<vmem>>) attributes {dimension_semantics = [#tpu.dimension_semantics<parallel>], iteration_bounds = array<i64: 2>, scalar_prefetch = 0 : i64, scratch_operands = 5 : i64, tpu.core_type = #tpu.core_type<tc>, window_params = [{transform_indices = @transform_0, window_bounds = array<i64: 1, 8, 1156>}, {pipeline_mode = #tpu.pipeline_mode<synchronous>, transform_indices = @transform_1, window_bounds = array<i64: 1, 900>}, {pipeline_mode = #tpu.pipeline_mode<synchronous>, transform_indices = @transform_2, window_bounds = array<i64: 1, 256>}, {pipeline_mode = #tpu.pipeline_mode<synchronous>, transform_indices = @transform_3, window_bounds = array<i64: 16, 72>}, {pipeline_mode = #tpu.pipeline_mode<synchronous>, transform_indices = @transform_4, window_bounds = array<i64: 16, 1>}, {pipeline_mode = #tpu.pipeline_mode<synchronous>, transform_indices = @transform_5, window_bounds = array<i64: 16, 144>}, {pipeline_mode = #tpu.pipeline_mode<synchronous>, transform_indices = @transform_6, window_bounds = array<i64: 16, 1>}, {pipeline_mode = #tpu.pipeline_mode<synchronous>, transform_indices = @transform_7, window_bounds = array<i64: 16, 144>}, {pipeline_mode = #tpu.pipeline_mode<synchronous>, transform_indices = @transform_8, window_bounds = array<i64: 16, 1>}, {pipeline_mode = #tpu.pipeline_mode<synchronous>, transform_indices = @transform_9, window_bounds = array<i64: 16, 144>}, {pipeline_mode = #tpu.pipeline_mode<synchronous>, transform_indices = @transform_10, window_bounds = array<i64: 16, 1>}, {pipeline_mode = #tpu.pipeline_mode<synchronous>, transform_indices = @transform_11, window_bounds = array<i64: 16, 144>}, {pipeline_mode = #tpu.pipeline_mode<synchronous>, transform_indices = @transform_12, window_bounds = array<i64: 16, 1>}, {pipeline_mode = #tpu.pipeline_mode<synchronous>, transform_indices = @transform_13, window_bounds = array<i64: 900, 256>}, {pipeline_mode = #tpu.pipeline_mode<synchronous>, transform_indices = @transform_14, window_bounds = array<i64: 16, 256, 64>}, {pipeline_mode = #tpu.pipeline_mode<synchronous>, transform_indices = @transform_15, window_bounds = array<i64: 1, 64>}, {pipeline_mode = #tpu.pipeline_mode<synchronous>, transform_indices = @transform_16, window_bounds = array<i64: 64, 32>}, {pipeline_mode = #tpu.pipeline_mode<synchronous>, transform_indices = @transform_17, window_bounds = array<i64: 1, 32>}, {transform_indices = @transform_18, window_bounds = array<i64: 1, 1, 32>}]} {
    %cst = arith.constant 0.000000e+00 : f32
    %0 = vector.broadcast %cst : f32 to vector<16x128xf32>
    %c0 = arith.constant 0 : index
    %c0_0 = arith.constant 0 : index
    %1 = vector.load %arg20[%c0, %c0_0] : memref<16x1156xf32, #tpu.memory_space<vmem>>, vector<16x128xf32>
    tpu.vector_store %arg20[%c0, %c0_0], %0 {strides = array<i32>} : memref<16x1156xf32, #tpu.memory_space<vmem>>, vector<16x128xf32>,
    %c0_1 = arith.constant 0 : index
    %c1028 = arith.constant 1028 : index
    %2 = vector.load %arg20[%c0_1, %c1028] : memref<16x1156xf32, #tpu.memory_space<vmem>>, vector<16x128xf32>
    tpu.vector_store %arg20[%c0_1, %c1028], %0 {strides = array<i32>} : memref<16x1156xf32, #tpu.memory_space<vmem>>, vector<16x128xf32>,
    %c0_2 = arith.constant 0 : index
    %c0_3 = arith.constant 0 : index
    %3 = vector.load %arg21[%c0_2, %c0_3] : memref<16x1156xf32, #tpu.memory_space<vmem>>, vector<16x128xf32>
    tpu.vector_store %arg21[%c0_2, %c0_3], %0 {strides = array<i32>} : memref<16x1156xf32, #tpu.memory_space<vmem>>, vector<16x128xf32>,
    %c0_4 = arith.constant 0 : index
    %c1028_5 = arith.constant 1028 : index
    %4 = vector.load %arg21[%c0_4, %c1028_5] : memref<16x1156xf32, #tpu.memory_space<vmem>>, vector<16x128xf32>
    tpu.vector_store %arg21[%c0_4, %c1028_5], %0 {strides = array<i32>} : memref<16x1156xf32, #tpu.memory_space<vmem>>, vector<16x128xf32>,
    %c0_6 = arith.constant 0 : index
    %c0_7 = arith.constant 0 : index
    %5 = vector.load %arg22[%c0_6, %c0_7] : memref<16x512xf32, #tpu.memory_space<vmem>>, vector<16x128xf32>
    tpu.vector_store %arg22[%c0_6, %c0_7], %0 {strides = array<i32>} : memref<16x512xf32, #tpu.memory_space<vmem>>, vector<16x128xf32>,
    %c0_8 = arith.constant 0 : index
    %c384 = arith.constant 384 : index
    %6 = vector.load %arg22[%c0_8, %c384] : memref<16x512xf32, #tpu.memory_space<vmem>>, vector<16x128xf32>
    tpu.vector_store %arg22[%c0_8, %c384], %0 {strides = array<i32>} : memref<16x512xf32, #tpu.memory_space<vmem>>, vector<16x128xf32>,
    %c0_9 = arith.constant 0 : index
    %c0_10 = arith.constant 0 : index
    %7 = vector.load %arg23[%c0_9, %c0_10] : memref<16x512xf32, #tpu.memory_space<vmem>>, vector<16x128xf32>
    tpu.vector_store %arg23[%c0_9, %c0_10], %0 {strides = array<i32>} : memref<16x512xf32, #tpu.memory_space<vmem>>, vector<16x128xf32>,
    %c0_11 = arith.constant 0 : index
    %c384_12 = arith.constant 384 : index
    %8 = vector.load %arg23[%c0_11, %c384_12] : memref<16x512xf32, #tpu.memory_space<vmem>>, vector<16x128xf32>
    tpu.vector_store %arg23[%c0_11, %c384_12], %0 {strides = array<i32>} : memref<16x512xf32, #tpu.memory_space<vmem>>, vector<16x128xf32>,
    %c0_13 = arith.constant 0 : index
    %c0_14 = arith.constant 0 : index
    %9 = vector.load %arg2[%c0_13, %c0_14] : memref<1x900xf32, #tpu.memory_space<vmem>>, vector<1x900xf32>
    %10 = vector.shape_cast %9 : vector<1x900xf32> to vector<1x900xf32>
    %11 = vector.broadcast %10 : vector<1x900xf32> to vector<16x900xf32>
    %c0_15 = arith.constant 0 : index
    %c0_16 = arith.constant 0 : index
    %12 = vector.load %arg3[%c0_15, %c0_16] : memref<1x256xf32, #tpu.memory_space<vmem>>, vector<1x256xf32>
    %13 = vector.shape_cast %12 : vector<1x256xf32> to vector<1x256xf32>
    %14 = vector.broadcast %13 : vector<1x256xf32> to vector<16x256xf32>
    %c0_17 = arith.constant 0 : index
    %c0_18 = arith.constant 0 : index
    %c97 = arith.constant 97 : index
    %15 = vector.load %arg1[%c0_17, %c0_18, %c97] : memref<1x8x1156xf32, #tpu.memory_space<vmem>>, vector<1x8x900xf32>
    %16 = vector.shape_cast %15 : vector<1x8x900xf32> to vector<8x900xf32>
    %c0_19 = arith.constant 0 : index
    %c0_20 = arith.constant 0 : index
    %17 = vector.load %arg24[%c0_19, %c0_20] : memref<144x900xf32, #tpu.memory_space<vmem>>, vector<8x900xf32>
    tpu.vector_store %arg24[%c0_19, %c0_20], %16 {strides = array<i32>} : memref<144x900xf32, #tpu.memory_space<vmem>>, vector<8x900xf32>,
    %c0_21 = arith.constant 0 : index
    %c0_22 = arith.constant 0 : index
    %c98 = arith.constant 98 : index
    %18 = vector.load %arg1[%c0_21, %c0_22, %c98] : memref<1x8x1156xf32, #tpu.memory_space<vmem>>, vector<1x8x900xf32>
    %19 = vector.shape_cast %18 : vector<1x8x900xf32> to vector<8x900xf32>
    %c8 = arith.constant 8 : index
    %c0_23 = arith.constant 0 : index
    %20 = vector.load %arg24[%c8, %c0_23] : memref<144x900xf32, #tpu.memory_space<vmem>>, vector<8x900xf32>
    tpu.vector_store %arg24[%c8, %c0_23], %19 {strides = array<i32>} : memref<144x900xf32, #tpu.memory_space<vmem>>, vector<8x900xf32>,
    %c0_24 = arith.constant 0 : index
    %c0_25 = arith.constant 0 : index
    %c99 = arith.constant 99 : index
    %21 = vector.load %arg1[%c0_24, %c0_25, %c99] : memref<1x8x1156xf32, #tpu.memory_space<vmem>>, vector<1x8x900xf32>
    %22 = vector.shape_cast %21 : vector<1x8x900xf32> to vector<8x900xf32>
    %c16 = arith.constant 16 : index
    %c0_26 = arith.constant 0 : index
    %23 = vector.load %arg24[%c16, %c0_26] : memref<144x900xf32, #tpu.memory_space<vmem>>, vector<8x900xf32>
    tpu.vector_store %arg24[%c16, %c0_26], %22 {strides = array<i32>} : memref<144x900xf32, #tpu.memory_space<vmem>>, vector<8x900xf32>,
    %c0_27 = arith.constant 0 : index
    %c0_28 = arith.constant 0 : index
    %c127 = arith.constant 127 : index
    %24 = vector.load %arg1[%c0_27, %c0_28, %c127] : memref<1x8x1156xf32, #tpu.memory_space<vmem>>, vector<1x8x900xf32>
    %25 = vector.shape_cast %24 : vector<1x8x900xf32> to vector<8x900xf32>
    %c24 = arith.constant 24 : index
    %c0_29 = arith.constant 0 : index
    %26 = vector.load %arg24[%c24, %c0_29] : memref<144x900xf32, #tpu.memory_space<vmem>>, vector<8x900xf32>
    tpu.vector_store %arg24[%c24, %c0_29], %25 {strides = array<i32>} : memref<144x900xf32, #tpu.memory_space<vmem>>, vector<8x900xf32>,
    %c0_30 = arith.constant 0 : index
    %c0_31 = arith.constant 0 : index
    %c128 = arith.constant 128 : index
    %27 = vector.load %arg1[%c0_30, %c0_31, %c128] : memref<1x8x1156xf32, #tpu.memory_space<vmem>>, vector<1x8x900xf32>
    %28 = vector.shape_cast %27 : vector<1x8x900xf32> to vector<8x900xf32>
    %c32 = arith.constant 32 : index
    %c0_32 = arith.constant 0 : index
    %29 = vector.load %arg24[%c32, %c0_32] : memref<144x900xf32, #tpu.memory_space<vmem>>, vector<8x900xf32>
    tpu.vector_store %arg24[%c32, %c0_32], %28 {strides = array<i32>} : memref<144x900xf32, #tpu.memory_space<vmem>>, vector<8x900xf32>,
    %c0_33 = arith.constant 0 : index
    %c0_34 = arith.constant 0 : index
    %c129 = arith.constant 129 : index
    %30 = vector.load %arg1[%c0_33, %c0_34, %c129] : memref<1x8x1156xf32, #tpu.memory_space<vmem>>, vector<1x8x900xf32>
    %31 = vector.shape_cast %30 : vector<1x8x900xf32> to vector<8x900xf32>
    %c40 = arith.constant 40 : index
    %c0_35 = arith.constant 0 : index
    %32 = vector.load %arg24[%c40, %c0_35] : memref<144x900xf32, #tpu.memory_space<vmem>>, vector<8x900xf32>
    tpu.vector_store %arg24[%c40, %c0_35], %31 {strides = array<i32>} : memref<144x900xf32, #tpu.memory_space<vmem>>, vector<8x900xf32>,
    %c0_36 = arith.constant 0 : index
    %c0_37 = arith.constant 0 : index
    %c157 = arith.constant 157 : index
    %33 = vector.load %arg1[%c0_36, %c0_37, %c157] : memref<1x8x1156xf32, #tpu.memory_space<vmem>>, vector<1x8x900xf32>
    %34 = vector.shape_cast %33 : vector<1x8x900xf32> to vector<8x900xf32>
    %c48 = arith.constant 48 : index
    %c0_38 = arith.constant 0 : index
    %35 = vector.load %arg24[%c48, %c0_38] : memref<144x900xf32, #tpu.memory_space<vmem>>, vector<8x900xf32>
    tpu.vector_store %arg24[%c48, %c0_38], %34 {strides = array<i32>} : memref<144x900xf32, #tpu.memory_space<vmem>>, vector<8x900xf32>,
    %c0_39 = arith.constant 0 : index
    %c0_40 = arith.constant 0 : index
    %c158 = arith.constant 158 : index
    %36 = vector.load %arg1[%c0_39, %c0_40, %c158] : memref<1x8x1156xf32, #tpu.memory_space<vmem>>, vector<1x8x900xf32>
    %37 = vector.shape_cast %36 : vector<1x8x900xf32> to vector<8x900xf32>
    %c56 = arith.constant 56 : index
    %c0_41 = arith.constant 0 : index
    %38 = vector.load %arg24[%c56, %c0_41] : memref<144x900xf32, #tpu.memory_space<vmem>>, vector<8x900xf32>
    tpu.vector_store %arg24[%c56, %c0_41], %37 {strides = array<i32>} : memref<144x900xf32, #tpu.memory_space<vmem>>, vector<8x900xf32>,
    %c0_42 = arith.constant 0 : index
    %c0_43 = arith.constant 0 : index
    %c159 = arith.constant 159 : index
    %39 = vector.load %arg1[%c0_42, %c0_43, %c159] : memref<1x8x1156xf32, #tpu.memory_space<vmem>>, vector<1x8x900xf32>
    %40 = vector.shape_cast %39 : vector<1x8x900xf32> to vector<8x900xf32>
    %c64 = arith.constant 64 : index
    %c0_44 = arith.constant 0 : index
    %41 = vector.load %arg24[%c64, %c0_44] : memref<144x900xf32, #tpu.memory_space<vmem>>, vector<8x900xf32>
    tpu.vector_store %arg24[%c64, %c0_44], %40 {strides = array<i32>} : memref<144x900xf32, #tpu.memory_space<vmem>>, vector<8x900xf32>,
    %c0_45 = arith.constant 0 : index
    %c0_46 = arith.constant 0 : index
    %42 = vector.load %arg4[%c0_45, %c0_46] : memref<16x72xf32, #tpu.memory_space<vmem>>, vector<16x72xf32>
    %c0_47 = arith.constant 0 : index
    %c0_48 = arith.constant 0 : index
    %43 = vector.load %arg24[%c0_47, %c0_48] : memref<144x900xf32, #tpu.memory_space<vmem>>, vector<72x900xf32>
    %cst_49 = arith.constant dense<0.000000e+00> : vector<16x900xf32>
    %44 = tpu.matmul %42, %43, %cst_49 {dimension_numbers = #tpu.dot_dimension_numbers<[1], [0], [0], [1], [0, 0, 1, 1], [], []>} : vector<16x72xf32>, vector<72x900xf32>, vector<16x900xf32> -> vector<16x900xf32>
    %c0_50 = arith.constant 0 : index
    %c0_51 = arith.constant 0 : index
    %45 = vector.load %arg5[%c0_50, %c0_51] : memref<16x1xf32, #tpu.memory_space<vmem>>, vector<16x1xf32>
    %46 = vector.broadcast %45 : vector<16x1xf32> to vector<16x900xf32>
    %47 = arith.addf %44, %46 : vector<16x900xf32>
    %cst_52 = arith.constant 0.000000e+00 : f32
    %48 = vector.broadcast %cst_52 : f32 to vector<16x900xf32>
    %49 = arith.cmpf ogt, %47, %48 : vector<16x900xf32>
    %cst_53 = arith.constant 0.00999999977 : f32
    %50 = vector.broadcast %cst_53 : f32 to vector<16x900xf32>
    %51 = arith.mulf %50, %47 : vector<16x900xf32>
    %52 = arith.select %49, %47, %51 : vector<16x900xi1>, vector<16x900xf32>
    %53 = arith.mulf %52, %11 : vector<16x900xf32>
    %c0_54 = arith.constant 0 : index
    %c128_55 = arith.constant 128 : index
    %54 = vector.load %arg20[%c0_54, %c128_55] : memref<16x1156xf32, #tpu.memory_space<vmem>>, vector<16x900xf32>
    tpu.vector_store %arg20[%c0_54, %c128_55], %53 {strides = array<i32>} : memref<16x1156xf32, #tpu.memory_space<vmem>>, vector<16x900xf32>,
    %c0_56 = arith.constant 0 : index
    %c97_57 = arith.constant 97 : index
    %55 = vector.load %arg20[%c0_56, %c97_57] : memref<16x1156xf32, #tpu.memory_space<vmem>>, vector<16x900xf32>
    %c0_58 = arith.constant 0 : index
    %c0_59 = arith.constant 0 : index
    %56 = vector.load %arg24[%c0_58, %c0_59] : memref<144x900xf32, #tpu.memory_space<vmem>>, vector<16x900xf32>
    tpu.vector_store %arg24[%c0_58, %c0_59], %55 {strides = array<i32>} : memref<144x900xf32, #tpu.memory_space<vmem>>, vector<16x900xf32>,
    %c0_60 = arith.constant 0 : index
    %c98_61 = arith.constant 98 : index
    %57 = vector.load %arg20[%c0_60, %c98_61] : memref<16x1156xf32, #tpu.memory_space<vmem>>, vector<16x900xf32>
    %c16_62 = arith.constant 16 : index
    %c0_63 = arith.constant 0 : index
    %58 = vector.load %arg24[%c16_62, %c0_63] : memref<144x900xf32, #tpu.memory_space<vmem>>, vector<16x900xf32>
    tpu.vector_store %arg24[%c16_62, %c0_63], %57 {strides = array<i32>} : memref<144x900xf32, #tpu.memory_space<vmem>>, vector<16x900xf32>,
    %c0_64 = arith.constant 0 : index
    %c99_65 = arith.constant 99 : index
    %59 = vector.load %arg20[%c0_64, %c99_65] : memref<16x1156xf32, #tpu.memory_space<vmem>>, vector<16x900xf32>
    %c32_66 = arith.constant 32 : index
    %c0_67 = arith.constant 0 : index
    %60 = vector.load %arg24[%c32_66, %c0_67] : memref<144x900xf32, #tpu.memory_space<vmem>>, vector<16x900xf32>
    tpu.vector_store %arg24[%c32_66, %c0_67], %59 {strides = array<i32>} : memref<144x900xf32, #tpu.memory_space<vmem>>, vector<16x900xf32>,
    %c0_68 = arith.constant 0 : index
    %c127_69 = arith.constant 127 : index
    %61 = vector.load %arg20[%c0_68, %c127_69] : memref<16x1156xf32, #tpu.memory_space<vmem>>, vector<16x900xf32>
    %c48_70 = arith.constant 48 : index
    %c0_71 = arith.constant 0 : index
    %62 = vector.load %arg24[%c48_70, %c0_71] : memref<144x900xf32, #tpu.memory_space<vmem>>, vector<16x900xf32>
    tpu.vector_store %arg24[%c48_70, %c0_71], %61 {strides = array<i32>} : memref<144x900xf32, #tpu.memory_space<vmem>>, vector<16x900xf32>,
    %c0_72 = arith.constant 0 : index
    %c128_73 = arith.constant 128 : index
    %63 = vector.load %arg20[%c0_72, %c128_73] : memref<16x1156xf32, #tpu.memory_space<vmem>>, vector<16x900xf32>
    %c64_74 = arith.constant 64 : index
    %c0_75 = arith.constant 0 : index
    %64 = vector.load %arg24[%c64_74, %c0_75] : memref<144x900xf32, #tpu.memory_space<vmem>>, vector<16x900xf32>
    tpu.vector_store %arg24[%c64_74, %c0_75], %63 {strides = array<i32>} : memref<144x900xf32, #tpu.memory_space<vmem>>, vector<16x900xf32>,
    %c0_76 = arith.constant 0 : index
    %c129_77 = arith.constant 129 : index
    %65 = vector.load %arg20[%c0_76, %c129_77] : memref<16x1156xf32, #tpu.memory_space<vmem>>, vector<16x900xf32>
    %c80 = arith.constant 80 : index
    %c0_78 = arith.constant 0 : index
    %66 = vector.load %arg24[%c80, %c0_78] : memref<144x900xf32, #tpu.memory_space<vmem>>, vector<16x900xf32>
    tpu.vector_store %arg24[%c80, %c0_78], %65 {strides = array<i32>} : memref<144x900xf32, #tpu.memory_space<vmem>>, vector<16x900xf32>,
    %c0_79 = arith.constant 0 : index
    %c157_80 = arith.constant 157 : index
    %67 = vector.load %arg20[%c0_79, %c157_80] : memref<16x1156xf32, #tpu.memory_space<vmem>>, vector<16x900xf32>
    %c96 = arith.constant 96 : index
    %c0_81 = arith.constant 0 : index
    %68 = vector.load %arg24[%c96, %c0_81] : memref<144x900xf32, #tpu.memory_space<vmem>>, vector<16x900xf32>
    tpu.vector_store %arg24[%c96, %c0_81], %67 {strides = array<i32>} : memref<144x900xf32, #tpu.memory_space<vmem>>, vector<16x900xf32>,
    %c0_82 = arith.constant 0 : index
    %c158_83 = arith.constant 158 : index
    %69 = vector.load %arg20[%c0_82, %c158_83] : memref<16x1156xf32, #tpu.memory_space<vmem>>, vector<16x900xf32>
    %c112 = arith.constant 112 : index
    %c0_84 = arith.constant 0 : index
    %70 = vector.load %arg24[%c112, %c0_84] : memref<144x900xf32, #tpu.memory_space<vmem>>, vector<16x900xf32>
    tpu.vector_store %arg24[%c112, %c0_84], %69 {strides = array<i32>} : memref<144x900xf32, #tpu.memory_space<vmem>>, vector<16x900xf32>,
    %c0_85 = arith.constant 0 : index
    %c159_86 = arith.constant 159 : index
    %71 = vector.load %arg20[%c0_85, %c159_86] : memref<16x1156xf32, #tpu.memory_space<vmem>>, vector<16x900xf32>
    %c128_87 = arith.constant 128 : index
    %c0_88 = arith.constant 0 : index
    %72 = vector.load %arg24[%c128_87, %c0_88] : memref<144x900xf32, #tpu.memory_space<vmem>>, vector<16x900xf32>
    tpu.vector_store %arg24[%c128_87, %c0_88], %71 {strides = array<i32>} : memref<144x900xf32, #tpu.memory_space<vmem>>, vector<16x900xf32>,
    %c0_89 = arith.constant 0 : index
    %c0_90 = arith.constant 0 : index
    %73 = vector.load %arg6[%c0_89, %c0_90] : memref<16x144xf32, #tpu.memory_space<vmem>>, vector<16x144xf32>
    %c0_91 = arith.constant 0 : index
    %c0_92 = arith.constant 0 : index
    %74 = vector.load %arg24[%c0_91, %c0_92] : memref<144x900xf32, #tpu.memory_space<vmem>>, vector<144x900xf32>
    %cst_93 = arith.constant dense<0.000000e+00> : vector<16x900xf32>
    %75 = tpu.matmul %73, %74, %cst_93 {dimension_numbers = #tpu.dot_dimension_numbers<[1], [0], [0], [1], [0, 0, 1, 1], [], []>} : vector<16x144xf32>, vector<144x900xf32>, vector<16x900xf32> -> vector<16x900xf32>
    %c0_94 = arith.constant 0 : index
    %c0_95 = arith.constant 0 : index
    %76 = vector.load %arg7[%c0_94, %c0_95] : memref<16x1xf32, #tpu.memory_space<vmem>>, vector<16x1xf32>
    %77 = vector.broadcast %76 : vector<16x1xf32> to vector<16x900xf32>
    %78 = arith.addf %75, %77 : vector<16x900xf32>
    %cst_96 = arith.constant 0.000000e+00 : f32
    %79 = vector.broadcast %cst_96 : f32 to vector<16x900xf32>
    %80 = arith.cmpf ogt, %78, %79 : vector<16x900xf32>
    %cst_97 = arith.constant 0.00999999977 : f32
    %81 = vector.broadcast %cst_97 : f32 to vector<16x900xf32>
    %82 = arith.mulf %81, %78 : vector<16x900xf32>
    %83 = arith.select %80, %78, %82 : vector<16x900xi1>, vector<16x900xf32>
    %84 = arith.mulf %83, %11 : vector<16x900xf32>
    %c0_98 = arith.constant 0 : index
    %c128_99 = arith.constant 128 : index
    %85 = vector.load %arg21[%c0_98, %c128_99] : memref<16x1156xf32, #tpu.memory_space<vmem>>, vector<16x900xf32>
    tpu.vector_store %arg21[%c0_98, %c128_99], %84 {strides = array<i32>} : memref<16x1156xf32, #tpu.memory_space<vmem>>, vector<16x900xf32>,
    %c0_100 = arith.constant 0 : index
    %c97_101 = arith.constant 97 : index
    %86 = vector.load %arg21[%c0_100, %c97_101] : memref<16x1156xf32, #tpu.memory_space<vmem>>, vector<16x900xf32>
    %c0_102 = arith.constant 0 : index
    %c0_103 = arith.constant 0 : index
    %87 = vector.load %arg24[%c0_102, %c0_103] : memref<144x900xf32, #tpu.memory_space<vmem>>, vector<16x900xf32>
    tpu.vector_store %arg24[%c0_102, %c0_103], %86 {strides = array<i32>} : memref<144x900xf32, #tpu.memory_space<vmem>>, vector<16x900xf32>,
    %c0_104 = arith.constant 0 : index
    %c98_105 = arith.constant 98 : index
    %88 = vector.load %arg21[%c0_104, %c98_105] : memref<16x1156xf32, #tpu.memory_space<vmem>>, vector<16x900xf32>
    %c16_106 = arith.constant 16 : index
    %c0_107 = arith.constant 0 : index
    %89 = vector.load %arg24[%c16_106, %c0_107] : memref<144x900xf32, #tpu.memory_space<vmem>>, vector<16x900xf32>
    tpu.vector_store %arg24[%c16_106, %c0_107], %88 {strides = array<i32>} : memref<144x900xf32, #tpu.memory_space<vmem>>, vector<16x900xf32>,
    %c0_108 = arith.constant 0 : index
    %c99_109 = arith.constant 99 : index
    %90 = vector.load %arg21[%c0_108, %c99_109] : memref<16x1156xf32, #tpu.memory_space<vmem>>, vector<16x900xf32>
    %c32_110 = arith.constant 32 : index
    %c0_111 = arith.constant 0 : index
    %91 = vector.load %arg24[%c32_110, %c0_111] : memref<144x900xf32, #tpu.memory_space<vmem>>, vector<16x900xf32>
    tpu.vector_store %arg24[%c32_110, %c0_111], %90 {strides = array<i32>} : memref<144x900xf32, #tpu.memory_space<vmem>>, vector<16x900xf32>,
    %c0_112 = arith.constant 0 : index
    %c127_113 = arith.constant 127 : index
    %92 = vector.load %arg21[%c0_112, %c127_113] : memref<16x1156xf32, #tpu.memory_space<vmem>>, vector<16x900xf32>
    %c48_114 = arith.constant 48 : index
    %c0_115 = arith.constant 0 : index
    %93 = vector.load %arg24[%c48_114, %c0_115] : memref<144x900xf32, #tpu.memory_space<vmem>>, vector<16x900xf32>
    tpu.vector_store %arg24[%c48_114, %c0_115], %92 {strides = array<i32>} : memref<144x900xf32, #tpu.memory_space<vmem>>, vector<16x900xf32>,
    %c0_116 = arith.constant 0 : index
    %c128_117 = arith.constant 128 : index
    %94 = vector.load %arg21[%c0_116, %c128_117] : memref<16x1156xf32, #tpu.memory_space<vmem>>, vector<16x900xf32>
    %c64_118 = arith.constant 64 : index
    %c0_119 = arith.constant 0 : index
    %95 = vector.load %arg24[%c64_118, %c0_119] : memref<144x900xf32, #tpu.memory_space<vmem>>, vector<16x900xf32>
    tpu.vector_store %arg24[%c64_118, %c0_119], %94 {strides = array<i32>} : memref<144x900xf32, #tpu.memory_space<vmem>>, vector<16x900xf32>,
    %c0_120 = arith.constant 0 : index
    %c129_121 = arith.constant 129 : index
    %96 = vector.load %arg21[%c0_120, %c129_121] : memref<16x1156xf32, #tpu.memory_space<vmem>>, vector<16x900xf32>
    %c80_122 = arith.constant 80 : index
    %c0_123 = arith.constant 0 : index
    %97 = vector.load %arg24[%c80_122, %c0_123] : memref<144x900xf32, #tpu.memory_space<vmem>>, vector<16x900xf32>
    tpu.vector_store %arg24[%c80_122, %c0_123], %96 {strides = array<i32>} : memref<144x900xf32, #tpu.memory_space<vmem>>, vector<16x900xf32>,
    %c0_124 = arith.constant 0 : index
    %c157_125 = arith.constant 157 : index
    %98 = vector.load %arg21[%c0_124, %c157_125] : memref<16x1156xf32, #tpu.memory_space<vmem>>, vector<16x900xf32>
    %c96_126 = arith.constant 96 : index
    %c0_127 = arith.constant 0 : index
    %99 = vector.load %arg24[%c96_126, %c0_127] : memref<144x900xf32, #tpu.memory_space<vmem>>, vector<16x900xf32>
    tpu.vector_store %arg24[%c96_126, %c0_127], %98 {strides = array<i32>} : memref<144x900xf32, #tpu.memory_space<vmem>>, vector<16x900xf32>,
    %c0_128 = arith.constant 0 : index
    %c158_129 = arith.constant 158 : index
    %100 = vector.load %arg21[%c0_128, %c158_129] : memref<16x1156xf32, #tpu.memory_space<vmem>>, vector<16x900xf32>
    %c112_130 = arith.constant 112 : index
    %c0_131 = arith.constant 0 : index
    %101 = vector.load %arg24[%c112_130, %c0_131] : memref<144x900xf32, #tpu.memory_space<vmem>>, vector<16x900xf32>
    tpu.vector_store %arg24[%c112_130, %c0_131], %100 {strides = array<i32>} : memref<144x900xf32, #tpu.memory_space<vmem>>, vector<16x900xf32>,
    %c0_132 = arith.constant 0 : index
    %c159_133 = arith.constant 159 : index
    %102 = vector.load %arg21[%c0_132, %c159_133] : memref<16x1156xf32, #tpu.memory_space<vmem>>, vector<16x900xf32>
    %c128_134 = arith.constant 128 : index
    %c0_135 = arith.constant 0 : index
    %103 = vector.load %arg24[%c128_134, %c0_135] : memref<144x900xf32, #tpu.memory_space<vmem>>, vector<16x900xf32>
    tpu.vector_store %arg24[%c128_134, %c0_135], %102 {strides = array<i32>} : memref<144x900xf32, #tpu.memory_space<vmem>>, vector<16x900xf32>,
    %c0_136 = arith.constant 0 : index
    %c0_137 = arith.constant 0 : index
    %104 = vector.load %arg8[%c0_136, %c0_137] : memref<16x144xf32, #tpu.memory_space<vmem>>, vector<16x144xf32>
    %c0_138 = arith.constant 0 : index
    %c0_139 = arith.constant 0 : index
    %105 = vector.load %arg24[%c0_138, %c0_139] : memref<144x900xf32, #tpu.memory_space<vmem>>, vector<144x900xf32>
    %cst_140 = arith.constant dense<0.000000e+00> : vector<16x900xf32>
    %106 = tpu.matmul %104, %105, %cst_140 {dimension_numbers = #tpu.dot_dimension_numbers<[1], [0], [0], [1], [0, 0, 1, 1], [], []>} : vector<16x144xf32>, vector<144x900xf32>, vector<16x900xf32> -> vector<16x900xf32>
    %c0_141 = arith.constant 0 : index
    %c0_142 = arith.constant 0 : index
    %107 = vector.load %arg9[%c0_141, %c0_142] : memref<16x1xf32, #tpu.memory_space<vmem>>, vector<16x1xf32>
    %108 = vector.broadcast %107 : vector<16x1xf32> to vector<16x900xf32>
    %109 = arith.addf %106, %108 : vector<16x900xf32>
    %c0_143 = arith.constant 0 : index
    %c128_144 = arith.constant 128 : index
    %110 = vector.load %arg20[%c0_143, %c128_144] : memref<16x1156xf32, #tpu.memory_space<vmem>>, vector<16x900xf32>
    %111 = arith.addf %109, %110 : vector<16x900xf32>
    %cst_145 = arith.constant 0.000000e+00 : f32
    %112 = vector.broadcast %cst_145 : f32 to vector<16x900xf32>
    %113 = arith.cmpf ogt, %111, %112 : vector<16x900xf32>
    %cst_146 = arith.constant 0.00999999977 : f32
    %114 = vector.broadcast %cst_146 : f32 to vector<16x900xf32>
    %115 = arith.mulf %114, %111 : vector<16x900xf32>
    %116 = arith.select %113, %111, %115 : vector<16x900xi1>, vector<16x900xf32>
    %c0_147 = arith.constant 0 : index
    %c0_148 = arith.constant 0 : index
    %117 = vector.load %arg14[%c0_147, %c0_148] : memref<900x256xf32, #tpu.memory_space<vmem>>, vector<900x256xf32>
    %cst_149 = arith.constant dense<0.000000e+00> : vector<16x256xf32>
    %118 = tpu.matmul %116, %117, %cst_149 {dimension_numbers = #tpu.dot_dimension_numbers<[1], [0], [0], [1], [0, 0, 1, 1], [], []>} : vector<16x900xf32>, vector<900x256xf32>, vector<16x256xf32> -> vector<16x256xf32>
    %c0_150 = arith.constant 0 : index
    %c128_151 = arith.constant 128 : index
    %119 = vector.load %arg22[%c0_150, %c128_151] : memref<16x512xf32, #tpu.memory_space<vmem>>, vector<16x256xf32>
    tpu.vector_store %arg22[%c0_150, %c128_151], %118 {strides = array<i32>} : memref<16x512xf32, #tpu.memory_space<vmem>>, vector<16x256xf32>,
    %c0_152 = arith.constant 0 : index
    %c111 = arith.constant 111 : index
    %120 = vector.load %arg22[%c0_152, %c111] : memref<16x512xf32, #tpu.memory_space<vmem>>, vector<16x256xf32>
    %c0_153 = arith.constant 0 : index
    %c0_154 = arith.constant 0 : index
    %121 = vector.load %arg24[%c0_153, %c0_154] : memref<144x900xf32, #tpu.memory_space<vmem>>, vector<16x256xf32>
    tpu.vector_store %arg24[%c0_153, %c0_154], %120 {strides = array<i32>} : memref<144x900xf32, #tpu.memory_space<vmem>>, vector<16x256xf32>,
    %c0_155 = arith.constant 0 : index
    %c112_156 = arith.constant 112 : index
    %122 = vector.load %arg22[%c0_155, %c112_156] : memref<16x512xf32, #tpu.memory_space<vmem>>, vector<16x256xf32>
    %c16_157 = arith.constant 16 : index
    %c0_158 = arith.constant 0 : index
    %123 = vector.load %arg24[%c16_157, %c0_158] : memref<144x900xf32, #tpu.memory_space<vmem>>, vector<16x256xf32>
    tpu.vector_store %arg24[%c16_157, %c0_158], %122 {strides = array<i32>} : memref<144x900xf32, #tpu.memory_space<vmem>>, vector<16x256xf32>,
    %c0_159 = arith.constant 0 : index
    %c113 = arith.constant 113 : index
    %124 = vector.load %arg22[%c0_159, %c113] : memref<16x512xf32, #tpu.memory_space<vmem>>, vector<16x256xf32>
    %c32_160 = arith.constant 32 : index
    %c0_161 = arith.constant 0 : index
    %125 = vector.load %arg24[%c32_160, %c0_161] : memref<144x900xf32, #tpu.memory_space<vmem>>, vector<16x256xf32>
    tpu.vector_store %arg24[%c32_160, %c0_161], %124 {strides = array<i32>} : memref<144x900xf32, #tpu.memory_space<vmem>>, vector<16x256xf32>,
    %c0_162 = arith.constant 0 : index
    %c127_163 = arith.constant 127 : index
    %126 = vector.load %arg22[%c0_162, %c127_163] : memref<16x512xf32, #tpu.memory_space<vmem>>, vector<16x256xf32>
    %c48_164 = arith.constant 48 : index
    %c0_165 = arith.constant 0 : index
    %127 = vector.load %arg24[%c48_164, %c0_165] : memref<144x900xf32, #tpu.memory_space<vmem>>, vector<16x256xf32>
    tpu.vector_store %arg24[%c48_164, %c0_165], %126 {strides = array<i32>} : memref<144x900xf32, #tpu.memory_space<vmem>>, vector<16x256xf32>,
    %c0_166 = arith.constant 0 : index
    %c128_167 = arith.constant 128 : index
    %128 = vector.load %arg22[%c0_166, %c128_167] : memref<16x512xf32, #tpu.memory_space<vmem>>, vector<16x256xf32>
    %c64_168 = arith.constant 64 : index
    %c0_169 = arith.constant 0 : index
    %129 = vector.load %arg24[%c64_168, %c0_169] : memref<144x900xf32, #tpu.memory_space<vmem>>, vector<16x256xf32>
    tpu.vector_store %arg24[%c64_168, %c0_169], %128 {strides = array<i32>} : memref<144x900xf32, #tpu.memory_space<vmem>>, vector<16x256xf32>,
    %c0_170 = arith.constant 0 : index
    %c129_171 = arith.constant 129 : index
    %130 = vector.load %arg22[%c0_170, %c129_171] : memref<16x512xf32, #tpu.memory_space<vmem>>, vector<16x256xf32>
    %c80_172 = arith.constant 80 : index
    %c0_173 = arith.constant 0 : index
    %131 = vector.load %arg24[%c80_172, %c0_173] : memref<144x900xf32, #tpu.memory_space<vmem>>, vector<16x256xf32>
    tpu.vector_store %arg24[%c80_172, %c0_173], %130 {strides = array<i32>} : memref<144x900xf32, #tpu.memory_space<vmem>>, vector<16x256xf32>,
    %c0_174 = arith.constant 0 : index
    %c143 = arith.constant 143 : index
    %132 = vector.load %arg22[%c0_174, %c143] : memref<16x512xf32, #tpu.memory_space<vmem>>, vector<16x256xf32>
    %c96_175 = arith.constant 96 : index
    %c0_176 = arith.constant 0 : index
    %133 = vector.load %arg24[%c96_175, %c0_176] : memref<144x900xf32, #tpu.memory_space<vmem>>, vector<16x256xf32>
    tpu.vector_store %arg24[%c96_175, %c0_176], %132 {strides = array<i32>} : memref<144x900xf32, #tpu.memory_space<vmem>>, vector<16x256xf32>,
    %c0_177 = arith.constant 0 : index
    %c144 = arith.constant 144 : index
    %134 = vector.load %arg22[%c0_177, %c144] : memref<16x512xf32, #tpu.memory_space<vmem>>, vector<16x256xf32>
    %c112_178 = arith.constant 112 : index
    %c0_179 = arith.constant 0 : index
    %135 = vector.load %arg24[%c112_178, %c0_179] : memref<144x900xf32, #tpu.memory_space<vmem>>, vector<16x256xf32>
    tpu.vector_store %arg24[%c112_178, %c0_179], %134 {strides = array<i32>} : memref<144x900xf32, #tpu.memory_space<vmem>>, vector<16x256xf32>,
    %c0_180 = arith.constant 0 : index
    %c145 = arith.constant 145 : index
    %136 = vector.load %arg22[%c0_180, %c145] : memref<16x512xf32, #tpu.memory_space<vmem>>, vector<16x256xf32>
    %c128_181 = arith.constant 128 : index
    %c0_182 = arith.constant 0 : index
    %137 = vector.load %arg24[%c128_181, %c0_182] : memref<144x900xf32, #tpu.memory_space<vmem>>, vector<16x256xf32>
    tpu.vector_store %arg24[%c128_181, %c0_182], %136 {strides = array<i32>} : memref<144x900xf32, #tpu.memory_space<vmem>>, vector<16x256xf32>,
    %c0_183 = arith.constant 0 : index
    %c0_184 = arith.constant 0 : index
    %138 = vector.load %arg10[%c0_183, %c0_184] : memref<16x144xf32, #tpu.memory_space<vmem>>, vector<16x144xf32>
    %c0_185 = arith.constant 0 : index
    %c0_186 = arith.constant 0 : index
    %139 = vector.load %arg24[%c0_185, %c0_186] : memref<144x900xf32, #tpu.memory_space<vmem>>, vector<144x256xf32>
    %cst_187 = arith.constant dense<0.000000e+00> : vector<16x256xf32>
    %140 = tpu.matmul %138, %139, %cst_187 {dimension_numbers = #tpu.dot_dimension_numbers<[1], [0], [0], [1], [0, 0, 1, 1], [], []>} : vector<16x144xf32>, vector<144x256xf32>, vector<16x256xf32> -> vector<16x256xf32>
    %c0_188 = arith.constant 0 : index
    %c0_189 = arith.constant 0 : index
    %141 = vector.load %arg11[%c0_188, %c0_189] : memref<16x1xf32, #tpu.memory_space<vmem>>, vector<16x1xf32>
    %142 = vector.broadcast %141 : vector<16x1xf32> to vector<16x256xf32>
    %143 = arith.addf %140, %142 : vector<16x256xf32>
    %cst_190 = arith.constant 0.000000e+00 : f32
    %144 = vector.broadcast %cst_190 : f32 to vector<16x256xf32>
    %145 = arith.cmpf ogt, %143, %144 : vector<16x256xf32>
    %cst_191 = arith.constant 0.00999999977 : f32
    %146 = vector.broadcast %cst_191 : f32 to vector<16x256xf32>
    %147 = arith.mulf %146, %143 : vector<16x256xf32>
    %148 = arith.select %145, %143, %147 : vector<16x256xi1>, vector<16x256xf32>
    %149 = arith.mulf %148, %14 : vector<16x256xf32>
    %c0_192 = arith.constant 0 : index
    %c128_193 = arith.constant 128 : index
    %150 = vector.load %arg23[%c0_192, %c128_193] : memref<16x512xf32, #tpu.memory_space<vmem>>, vector<16x256xf32>
    tpu.vector_store %arg23[%c0_192, %c128_193], %149 {strides = array<i32>} : memref<16x512xf32, #tpu.memory_space<vmem>>, vector<16x256xf32>,
    %c0_194 = arith.constant 0 : index
    %c111_195 = arith.constant 111 : index
    %151 = vector.load %arg23[%c0_194, %c111_195] : memref<16x512xf32, #tpu.memory_space<vmem>>, vector<16x256xf32>
    %c0_196 = arith.constant 0 : index
    %c0_197 = arith.constant 0 : index
    %152 = vector.load %arg24[%c0_196, %c0_197] : memref<144x900xf32, #tpu.memory_space<vmem>>, vector<16x256xf32>
    tpu.vector_store %arg24[%c0_196, %c0_197], %151 {strides = array<i32>} : memref<144x900xf32, #tpu.memory_space<vmem>>, vector<16x256xf32>,
    %c0_198 = arith.constant 0 : index
    %c112_199 = arith.constant 112 : index
    %153 = vector.load %arg23[%c0_198, %c112_199] : memref<16x512xf32, #tpu.memory_space<vmem>>, vector<16x256xf32>
    %c16_200 = arith.constant 16 : index
    %c0_201 = arith.constant 0 : index
    %154 = vector.load %arg24[%c16_200, %c0_201] : memref<144x900xf32, #tpu.memory_space<vmem>>, vector<16x256xf32>
    tpu.vector_store %arg24[%c16_200, %c0_201], %153 {strides = array<i32>} : memref<144x900xf32, #tpu.memory_space<vmem>>, vector<16x256xf32>,
    %c0_202 = arith.constant 0 : index
    %c113_203 = arith.constant 113 : index
    %155 = vector.load %arg23[%c0_202, %c113_203] : memref<16x512xf32, #tpu.memory_space<vmem>>, vector<16x256xf32>
    %c32_204 = arith.constant 32 : index
    %c0_205 = arith.constant 0 : index
    %156 = vector.load %arg24[%c32_204, %c0_205] : memref<144x900xf32, #tpu.memory_space<vmem>>, vector<16x256xf32>
    tpu.vector_store %arg24[%c32_204, %c0_205], %155 {strides = array<i32>} : memref<144x900xf32, #tpu.memory_space<vmem>>, vector<16x256xf32>,
    %c0_206 = arith.constant 0 : index
    %c127_207 = arith.constant 127 : index
    %157 = vector.load %arg23[%c0_206, %c127_207] : memref<16x512xf32, #tpu.memory_space<vmem>>, vector<16x256xf32>
    %c48_208 = arith.constant 48 : index
    %c0_209 = arith.constant 0 : index
    %158 = vector.load %arg24[%c48_208, %c0_209] : memref<144x900xf32, #tpu.memory_space<vmem>>, vector<16x256xf32>
    tpu.vector_store %arg24[%c48_208, %c0_209], %157 {strides = array<i32>} : memref<144x900xf32, #tpu.memory_space<vmem>>, vector<16x256xf32>,
    %c0_210 = arith.constant 0 : index
    %c128_211 = arith.constant 128 : index
    %159 = vector.load %arg23[%c0_210, %c128_211] : memref<16x512xf32, #tpu.memory_space<vmem>>, vector<16x256xf32>
    %c64_212 = arith.constant 64 : index
    %c0_213 = arith.constant 0 : index
    %160 = vector.load %arg24[%c64_212, %c0_213] : memref<144x900xf32, #tpu.memory_space<vmem>>, vector<16x256xf32>
    tpu.vector_store %arg24[%c64_212, %c0_213], %159 {strides = array<i32>} : memref<144x900xf32, #tpu.memory_space<vmem>>, vector<16x256xf32>,
    %c0_214 = arith.constant 0 : index
    %c129_215 = arith.constant 129 : index
    %161 = vector.load %arg23[%c0_214, %c129_215] : memref<16x512xf32, #tpu.memory_space<vmem>>, vector<16x256xf32>
    %c80_216 = arith.constant 80 : index
    %c0_217 = arith.constant 0 : index
    %162 = vector.load %arg24[%c80_216, %c0_217] : memref<144x900xf32, #tpu.memory_space<vmem>>, vector<16x256xf32>
    tpu.vector_store %arg24[%c80_216, %c0_217], %161 {strides = array<i32>} : memref<144x900xf32, #tpu.memory_space<vmem>>, vector<16x256xf32>,
    %c0_218 = arith.constant 0 : index
    %c143_219 = arith.constant 143 : index
    %163 = vector.load %arg23[%c0_218, %c143_219] : memref<16x512xf32, #tpu.memory_space<vmem>>, vector<16x256xf32>
    %c96_220 = arith.constant 96 : index
    %c0_221 = arith.constant 0 : index
    %164 = vector.load %arg24[%c96_220, %c0_221] : memref<144x900xf32, #tpu.memory_space<vmem>>, vector<16x256xf32>
    tpu.vector_store %arg24[%c96_220, %c0_221], %163 {strides = array<i32>} : memref<144x900xf32, #tpu.memory_space<vmem>>, vector<16x256xf32>,
    %c0_222 = arith.constant 0 : index
    %c144_223 = arith.constant 144 : index
    %165 = vector.load %arg23[%c0_222, %c144_223] : memref<16x512xf32, #tpu.memory_space<vmem>>, vector<16x256xf32>
    %c112_224 = arith.constant 112 : index
    %c0_225 = arith.constant 0 : index
    %166 = vector.load %arg24[%c112_224, %c0_225] : memref<144x900xf32, #tpu.memory_space<vmem>>, vector<16x256xf32>
    tpu.vector_store %arg24[%c112_224, %c0_225], %165 {strides = array<i32>} : memref<144x900xf32, #tpu.memory_space<vmem>>, vector<16x256xf32>,
    %c0_226 = arith.constant 0 : index
    %c145_227 = arith.constant 145 : index
    %167 = vector.load %arg23[%c0_226, %c145_227] : memref<16x512xf32, #tpu.memory_space<vmem>>, vector<16x256xf32>
    %c128_228 = arith.constant 128 : index
    %c0_229 = arith.constant 0 : index
    %168 = vector.load %arg24[%c128_228, %c0_229] : memref<144x900xf32, #tpu.memory_space<vmem>>, vector<16x256xf32>
    tpu.vector_store %arg24[%c128_228, %c0_229], %167 {strides = array<i32>} : memref<144x900xf32, #tpu.memory_space<vmem>>, vector<16x256xf32>,
    %c0_230 = arith.constant 0 : index
    %c0_231 = arith.constant 0 : index
    %169 = vector.load %arg12[%c0_230, %c0_231] : memref<16x144xf32, #tpu.memory_space<vmem>>, vector<16x144xf32>
    %c0_232 = arith.constant 0 : index
    %c0_233 = arith.constant 0 : index
    %170 = vector.load %arg24[%c0_232, %c0_233] : memref<144x900xf32, #tpu.memory_space<vmem>>, vector<144x256xf32>
    %cst_234 = arith.constant dense<0.000000e+00> : vector<16x256xf32>
    %171 = tpu.matmul %169, %170, %cst_234 {dimension_numbers = #tpu.dot_dimension_numbers<[1], [0], [0], [1], [0, 0, 1, 1], [], []>} : vector<16x144xf32>, vector<144x256xf32>, vector<16x256xf32> -> vector<16x256xf32>
    %c0_235 = arith.constant 0 : index
    %c0_236 = arith.constant 0 : index
    %172 = vector.load %arg13[%c0_235, %c0_236] : memref<16x1xf32, #tpu.memory_space<vmem>>, vector<16x1xf32>
    %173 = vector.broadcast %172 : vector<16x1xf32> to vector<16x256xf32>
    %174 = arith.addf %171, %173 : vector<16x256xf32>
    %c0_237 = arith.constant 0 : index
    %c128_238 = arith.constant 128 : index
    %175 = vector.load %arg22[%c0_237, %c128_238] : memref<16x512xf32, #tpu.memory_space<vmem>>, vector<16x256xf32>
    %176 = arith.addf %174, %175 : vector<16x256xf32>
    %cst_239 = arith.constant 0.000000e+00 : f32
    %177 = vector.broadcast %cst_239 : f32 to vector<16x256xf32>
    %178 = arith.cmpf ogt, %176, %177 : vector<16x256xf32>
    %cst_240 = arith.constant 0.00999999977 : f32
    %179 = vector.broadcast %cst_240 : f32 to vector<16x256xf32>
    %180 = arith.mulf %179, %176 : vector<16x256xf32>
    %181 = arith.select %178, %176, %180 : vector<16x256xi1>, vector<16x256xf32>
    %cst_241 = arith.constant 0.000000e+00 : f32
    %182 = vector.broadcast %cst_241 : f32 to vector<1x64xf32>
    %183 = vector.extract_strided_slice %181 {offsets = [0, 0], sizes = [1, 256], strides = [1, 1]} : vector<16x256xf32> to vector<1x256xf32>
    %c0_242 = arith.constant 0 : index
    %c0_243 = arith.constant 0 : index
    %c0_244 = arith.constant 0 : index
    %184 = vector.load %arg15[%c0_242, %c0_243, %c0_244] : memref<16x256x64xf32, #tpu.memory_space<vmem>>, vector<1x256x64xf32>
    %185 = vector.shape_cast %184 : vector<1x256x64xf32> to vector<256x64xf32>
    %cst_245 = arith.constant dense<0.000000e+00> : vector<1x64xf32>
    %186 = tpu.matmul %183, %185, %cst_245 {dimension_numbers = #tpu.dot_dimension_numbers<[1], [0], [0], [1], [0, 0, 1, 1], [], []>} : vector<1x256xf32>, vector<256x64xf32>, vector<1x64xf32> -> vector<1x64xf32>
    %187 = arith.addf %182, %186 : vector<1x64xf32>
    %188 = vector.extract_strided_slice %181 {offsets = [1, 0], sizes = [1, 256], strides = [1, 1]} : vector<16x256xf32> to vector<1x256xf32>
    %c1 = arith.constant 1 : index
    %c0_246 = arith.constant 0 : index
    %c0_247 = arith.constant 0 : index
    %189 = vector.load %arg15[%c1, %c0_246, %c0_247] : memref<16x256x64xf32, #tpu.memory_space<vmem>>, vector<1x256x64xf32>
    %190 = vector.shape_cast %189 : vector<1x256x64xf32> to vector<256x64xf32>
    %cst_248 = arith.constant dense<0.000000e+00> : vector<1x64xf32>
    %191 = tpu.matmul %188, %190, %cst_248 {dimension_numbers = #tpu.dot_dimension_numbers<[1], [0], [0], [1], [0, 0, 1, 1], [], []>} : vector<1x256xf32>, vector<256x64xf32>, vector<1x64xf32> -> vector<1x64xf32>
    %192 = arith.addf %187, %191 : vector<1x64xf32>
    %193 = vector.extract_strided_slice %181 {offsets = [2, 0], sizes = [1, 256], strides = [1, 1]} : vector<16x256xf32> to vector<1x256xf32>
    %c2 = arith.constant 2 : index
    %c0_249 = arith.constant 0 : index
    %c0_250 = arith.constant 0 : index
    %194 = vector.load %arg15[%c2, %c0_249, %c0_250] : memref<16x256x64xf32, #tpu.memory_space<vmem>>, vector<1x256x64xf32>
    %195 = vector.shape_cast %194 : vector<1x256x64xf32> to vector<256x64xf32>
    %cst_251 = arith.constant dense<0.000000e+00> : vector<1x64xf32>
    %196 = tpu.matmul %193, %195, %cst_251 {dimension_numbers = #tpu.dot_dimension_numbers<[1], [0], [0], [1], [0, 0, 1, 1], [], []>} : vector<1x256xf32>, vector<256x64xf32>, vector<1x64xf32> -> vector<1x64xf32>
    %197 = arith.addf %192, %196 : vector<1x64xf32>
    %198 = vector.extract_strided_slice %181 {offsets = [3, 0], sizes = [1, 256], strides = [1, 1]} : vector<16x256xf32> to vector<1x256xf32>
    %c3 = arith.constant 3 : index
    %c0_252 = arith.constant 0 : index
    %c0_253 = arith.constant 0 : index
    %199 = vector.load %arg15[%c3, %c0_252, %c0_253] : memref<16x256x64xf32, #tpu.memory_space<vmem>>, vector<1x256x64xf32>
    %200 = vector.shape_cast %199 : vector<1x256x64xf32> to vector<256x64xf32>
    %cst_254 = arith.constant dense<0.000000e+00> : vector<1x64xf32>
    %201 = tpu.matmul %198, %200, %cst_254 {dimension_numbers = #tpu.dot_dimension_numbers<[1], [0], [0], [1], [0, 0, 1, 1], [], []>} : vector<1x256xf32>, vector<256x64xf32>, vector<1x64xf32> -> vector<1x64xf32>
    %202 = arith.addf %197, %201 : vector<1x64xf32>
    %203 = vector.extract_strided_slice %181 {offsets = [4, 0], sizes = [1, 256], strides = [1, 1]} : vector<16x256xf32> to vector<1x256xf32>
    %c4 = arith.constant 4 : index
    %c0_255 = arith.constant 0 : index
    %c0_256 = arith.constant 0 : index
    %204 = vector.load %arg15[%c4, %c0_255, %c0_256] : memref<16x256x64xf32, #tpu.memory_space<vmem>>, vector<1x256x64xf32>
    %205 = vector.shape_cast %204 : vector<1x256x64xf32> to vector<256x64xf32>
    %cst_257 = arith.constant dense<0.000000e+00> : vector<1x64xf32>
    %206 = tpu.matmul %203, %205, %cst_257 {dimension_numbers = #tpu.dot_dimension_numbers<[1], [0], [0], [1], [0, 0, 1, 1], [], []>} : vector<1x256xf32>, vector<256x64xf32>, vector<1x64xf32> -> vector<1x64xf32>
    %207 = arith.addf %202, %206 : vector<1x64xf32>
    %208 = vector.extract_strided_slice %181 {offsets = [5, 0], sizes = [1, 256], strides = [1, 1]} : vector<16x256xf32> to vector<1x256xf32>
    %c5 = arith.constant 5 : index
    %c0_258 = arith.constant 0 : index
    %c0_259 = arith.constant 0 : index
    %209 = vector.load %arg15[%c5, %c0_258, %c0_259] : memref<16x256x64xf32, #tpu.memory_space<vmem>>, vector<1x256x64xf32>
    %210 = vector.shape_cast %209 : vector<1x256x64xf32> to vector<256x64xf32>
    %cst_260 = arith.constant dense<0.000000e+00> : vector<1x64xf32>
    %211 = tpu.matmul %208, %210, %cst_260 {dimension_numbers = #tpu.dot_dimension_numbers<[1], [0], [0], [1], [0, 0, 1, 1], [], []>} : vector<1x256xf32>, vector<256x64xf32>, vector<1x64xf32> -> vector<1x64xf32>
    %212 = arith.addf %207, %211 : vector<1x64xf32>
    %213 = vector.extract_strided_slice %181 {offsets = [6, 0], sizes = [1, 256], strides = [1, 1]} : vector<16x256xf32> to vector<1x256xf32>
    %c6 = arith.constant 6 : index
    %c0_261 = arith.constant 0 : index
    %c0_262 = arith.constant 0 : index
    %214 = vector.load %arg15[%c6, %c0_261, %c0_262] : memref<16x256x64xf32, #tpu.memory_space<vmem>>, vector<1x256x64xf32>
    %215 = vector.shape_cast %214 : vector<1x256x64xf32> to vector<256x64xf32>
    %cst_263 = arith.constant dense<0.000000e+00> : vector<1x64xf32>
    %216 = tpu.matmul %213, %215, %cst_263 {dimension_numbers = #tpu.dot_dimension_numbers<[1], [0], [0], [1], [0, 0, 1, 1], [], []>} : vector<1x256xf32>, vector<256x64xf32>, vector<1x64xf32> -> vector<1x64xf32>
    %217 = arith.addf %212, %216 : vector<1x64xf32>
    %218 = vector.extract_strided_slice %181 {offsets = [7, 0], sizes = [1, 256], strides = [1, 1]} : vector<16x256xf32> to vector<1x256xf32>
    %c7 = arith.constant 7 : index
    %c0_264 = arith.constant 0 : index
    %c0_265 = arith.constant 0 : index
    %219 = vector.load %arg15[%c7, %c0_264, %c0_265] : memref<16x256x64xf32, #tpu.memory_space<vmem>>, vector<1x256x64xf32>
    %220 = vector.shape_cast %219 : vector<1x256x64xf32> to vector<256x64xf32>
    %cst_266 = arith.constant dense<0.000000e+00> : vector<1x64xf32>
    %221 = tpu.matmul %218, %220, %cst_266 {dimension_numbers = #tpu.dot_dimension_numbers<[1], [0], [0], [1], [0, 0, 1, 1], [], []>} : vector<1x256xf32>, vector<256x64xf32>, vector<1x64xf32> -> vector<1x64xf32>
    %222 = arith.addf %217, %221 : vector<1x64xf32>
    %223 = vector.extract_strided_slice %181 {offsets = [8, 0], sizes = [1, 256], strides = [1, 1]} : vector<16x256xf32> to vector<1x256xf32>
    %c8_267 = arith.constant 8 : index
    %c0_268 = arith.constant 0 : index
    %c0_269 = arith.constant 0 : index
    %224 = vector.load %arg15[%c8_267, %c0_268, %c0_269] : memref<16x256x64xf32, #tpu.memory_space<vmem>>, vector<1x256x64xf32>
    %225 = vector.shape_cast %224 : vector<1x256x64xf32> to vector<256x64xf32>
    %cst_270 = arith.constant dense<0.000000e+00> : vector<1x64xf32>
    %226 = tpu.matmul %223, %225, %cst_270 {dimension_numbers = #tpu.dot_dimension_numbers<[1], [0], [0], [1], [0, 0, 1, 1], [], []>} : vector<1x256xf32>, vector<256x64xf32>, vector<1x64xf32> -> vector<1x64xf32>
    %227 = arith.addf %222, %226 : vector<1x64xf32>
    %228 = vector.extract_strided_slice %181 {offsets = [9, 0], sizes = [1, 256], strides = [1, 1]} : vector<16x256xf32> to vector<1x256xf32>
    %c9 = arith.constant 9 : index
    %c0_271 = arith.constant 0 : index
    %c0_272 = arith.constant 0 : index
    %229 = vector.load %arg15[%c9, %c0_271, %c0_272] : memref<16x256x64xf32, #tpu.memory_space<vmem>>, vector<1x256x64xf32>
    %230 = vector.shape_cast %229 : vector<1x256x64xf32> to vector<256x64xf32>
    %cst_273 = arith.constant dense<0.000000e+00> : vector<1x64xf32>
    %231 = tpu.matmul %228, %230, %cst_273 {dimension_numbers = #tpu.dot_dimension_numbers<[1], [0], [0], [1], [0, 0, 1, 1], [], []>} : vector<1x256xf32>, vector<256x64xf32>, vector<1x64xf32> -> vector<1x64xf32>
    %232 = arith.addf %227, %231 : vector<1x64xf32>
    %233 = vector.extract_strided_slice %181 {offsets = [10, 0], sizes = [1, 256], strides = [1, 1]} : vector<16x256xf32> to vector<1x256xf32>
    %c10 = arith.constant 10 : index
    %c0_274 = arith.constant 0 : index
    %c0_275 = arith.constant 0 : index
    %234 = vector.load %arg15[%c10, %c0_274, %c0_275] : memref<16x256x64xf32, #tpu.memory_space<vmem>>, vector<1x256x64xf32>
    %235 = vector.shape_cast %234 : vector<1x256x64xf32> to vector<256x64xf32>
    %cst_276 = arith.constant dense<0.000000e+00> : vector<1x64xf32>
    %236 = tpu.matmul %233, %235, %cst_276 {dimension_numbers = #tpu.dot_dimension_numbers<[1], [0], [0], [1], [0, 0, 1, 1], [], []>} : vector<1x256xf32>, vector<256x64xf32>, vector<1x64xf32> -> vector<1x64xf32>
    %237 = arith.addf %232, %236 : vector<1x64xf32>
    %238 = vector.extract_strided_slice %181 {offsets = [11, 0], sizes = [1, 256], strides = [1, 1]} : vector<16x256xf32> to vector<1x256xf32>
    %c11 = arith.constant 11 : index
    %c0_277 = arith.constant 0 : index
    %c0_278 = arith.constant 0 : index
    %239 = vector.load %arg15[%c11, %c0_277, %c0_278] : memref<16x256x64xf32, #tpu.memory_space<vmem>>, vector<1x256x64xf32>
    %240 = vector.shape_cast %239 : vector<1x256x64xf32> to vector<256x64xf32>
    %cst_279 = arith.constant dense<0.000000e+00> : vector<1x64xf32>
    %241 = tpu.matmul %238, %240, %cst_279 {dimension_numbers = #tpu.dot_dimension_numbers<[1], [0], [0], [1], [0, 0, 1, 1], [], []>} : vector<1x256xf32>, vector<256x64xf32>, vector<1x64xf32> -> vector<1x64xf32>
    %242 = arith.addf %237, %241 : vector<1x64xf32>
    %243 = vector.extract_strided_slice %181 {offsets = [12, 0], sizes = [1, 256], strides = [1, 1]} : vector<16x256xf32> to vector<1x256xf32>
    %c12 = arith.constant 12 : index
    %c0_280 = arith.constant 0 : index
    %c0_281 = arith.constant 0 : index
    %244 = vector.load %arg15[%c12, %c0_280, %c0_281] : memref<16x256x64xf32, #tpu.memory_space<vmem>>, vector<1x256x64xf32>
    %245 = vector.shape_cast %244 : vector<1x256x64xf32> to vector<256x64xf32>
    %cst_282 = arith.constant dense<0.000000e+00> : vector<1x64xf32>
    %246 = tpu.matmul %243, %245, %cst_282 {dimension_numbers = #tpu.dot_dimension_numbers<[1], [0], [0], [1], [0, 0, 1, 1], [], []>} : vector<1x256xf32>, vector<256x64xf32>, vector<1x64xf32> -> vector<1x64xf32>
    %247 = arith.addf %242, %246 : vector<1x64xf32>
    %248 = vector.extract_strided_slice %181 {offsets = [13, 0], sizes = [1, 256], strides = [1, 1]} : vector<16x256xf32> to vector<1x256xf32>
    %c13 = arith.constant 13 : index
    %c0_283 = arith.constant 0 : index
    %c0_284 = arith.constant 0 : index
    %249 = vector.load %arg15[%c13, %c0_283, %c0_284] : memref<16x256x64xf32, #tpu.memory_space<vmem>>, vector<1x256x64xf32>
    %250 = vector.shape_cast %249 : vector<1x256x64xf32> to vector<256x64xf32>
    %cst_285 = arith.constant dense<0.000000e+00> : vector<1x64xf32>
    %251 = tpu.matmul %248, %250, %cst_285 {dimension_numbers = #tpu.dot_dimension_numbers<[1], [0], [0], [1], [0, 0, 1, 1], [], []>} : vector<1x256xf32>, vector<256x64xf32>, vector<1x64xf32> -> vector<1x64xf32>
    %252 = arith.addf %247, %251 : vector<1x64xf32>
    %253 = vector.extract_strided_slice %181 {offsets = [14, 0], sizes = [1, 256], strides = [1, 1]} : vector<16x256xf32> to vector<1x256xf32>
    %c14 = arith.constant 14 : index
    %c0_286 = arith.constant 0 : index
    %c0_287 = arith.constant 0 : index
    %254 = vector.load %arg15[%c14, %c0_286, %c0_287] : memref<16x256x64xf32, #tpu.memory_space<vmem>>, vector<1x256x64xf32>
    %255 = vector.shape_cast %254 : vector<1x256x64xf32> to vector<256x64xf32>
    %cst_288 = arith.constant dense<0.000000e+00> : vector<1x64xf32>
    %256 = tpu.matmul %253, %255, %cst_288 {dimension_numbers = #tpu.dot_dimension_numbers<[1], [0], [0], [1], [0, 0, 1, 1], [], []>} : vector<1x256xf32>, vector<256x64xf32>, vector<1x64xf32> -> vector<1x64xf32>
    %257 = arith.addf %252, %256 : vector<1x64xf32>
    %258 = vector.extract_strided_slice %181 {offsets = [15, 0], sizes = [1, 256], strides = [1, 1]} : vector<16x256xf32> to vector<1x256xf32>
    %c15 = arith.constant 15 : index
    %c0_289 = arith.constant 0 : index
    %c0_290 = arith.constant 0 : index
    %259 = vector.load %arg15[%c15, %c0_289, %c0_290] : memref<16x256x64xf32, #tpu.memory_space<vmem>>, vector<1x256x64xf32>
    %260 = vector.shape_cast %259 : vector<1x256x64xf32> to vector<256x64xf32>
    %cst_291 = arith.constant dense<0.000000e+00> : vector<1x64xf32>
    %261 = tpu.matmul %258, %260, %cst_291 {dimension_numbers = #tpu.dot_dimension_numbers<[1], [0], [0], [1], [0, 0, 1, 1], [], []>} : vector<1x256xf32>, vector<256x64xf32>, vector<1x64xf32> -> vector<1x64xf32>
    %262 = arith.addf %257, %261 : vector<1x64xf32>
    %c0_292 = arith.constant 0 : index
    %c0_293 = arith.constant 0 : index
    %263 = vector.load %arg16[%c0_292, %c0_293] : memref<1x64xf32, #tpu.memory_space<vmem>>, vector<1x64xf32>
    %264 = arith.addf %262, %263 : vector<1x64xf32>
    %cst_294 = arith.constant 0.000000e+00 : f32
    %265 = vector.broadcast %cst_294 : f32 to vector<1x64xf32>
    %266 = arith.cmpf ogt, %264, %265 : vector<1x64xf32>
    %cst_295 = arith.constant 0.00999999977 : f32
    %267 = vector.broadcast %cst_295 : f32 to vector<1x64xf32>
    %268 = arith.mulf %267, %264 : vector<1x64xf32>
    %269 = arith.select %266, %264, %268 : vector<1x64xi1>, vector<1x64xf32>
    %c0_296 = arith.constant 0 : index
    %c0_297 = arith.constant 0 : index
    %270 = vector.load %arg17[%c0_296, %c0_297] : memref<64x32xf32, #tpu.memory_space<vmem>>, vector<64x32xf32>
    %cst_298 = arith.constant dense<0.000000e+00> : vector<1x32xf32>
    %271 = tpu.matmul %269, %270, %cst_298 {dimension_numbers = #tpu.dot_dimension_numbers<[1], [0], [0], [1], [0, 0, 1, 1], [], []>} : vector<1x64xf32>, vector<64x32xf32>, vector<1x32xf32> -> vector<1x32xf32>
    %c0_299 = arith.constant 0 : index
    %c0_300 = arith.constant 0 : index
    %272 = vector.load %arg18[%c0_299, %c0_300] : memref<1x32xf32, #tpu.memory_space<vmem>>, vector<1x32xf32>
    %273 = arith.addf %271, %272 : vector<1x32xf32>
    %c0_301 = arith.constant 0 : index
    %c0_302 = arith.constant 0 : index
    %c0_303 = arith.constant 0 : index
    %274 = vector.load %arg19[%c0_301, %c0_302, %c0_303] : memref<1x1x32xf32, #tpu.memory_space<vmem>>, vector<1x1x32xf32>
    %275 = vector.shape_cast %274 : vector<1x1x32xf32> to vector<1x32xf32>
    %276 = vector.shape_cast %273 : vector<1x32xf32> to vector<1x1x32xf32>
    tpu.vector_store %arg19[%c0_301, %c0_302, %c0_303], %276 {strides = array<i32>} : memref<1x1x32xf32, #tpu.memory_space<vmem>>, vector<1x1x32xf32>,
    return
  }
  func.func @transform_0(%arg0: i32) -> (i32, i32, i32) {
    %c0_i32 = arith.constant 0 : i32
    %c0_i32_0 = arith.constant 0 : i32
    %c0_i32_1 = arith.constant 0 : i32
    return %arg0, %c0_i32, %c0_i32_0 : i32, i32, i32
  }
  func.func @transform_1(%arg0: i32) -> (i32, i32) {
    %c0_i32 = arith.constant 0 : i32
    %c0_i32_0 = arith.constant 0 : i32
    %c0_i32_1 = arith.constant 0 : i32
    return %c0_i32, %c0_i32_0 : i32, i32
  }
  func.func @transform_2(%arg0: i32) -> (i32, i32) {
    %c0_i32 = arith.constant 0 : i32
    %c0_i32_0 = arith.constant 0 : i32
    %c0_i32_1 = arith.constant 0 : i32
    return %c0_i32, %c0_i32_0 : i32, i32
  }
  func.func @transform_3(%arg0: i32) -> (i32, i32) {
    %c0_i32 = arith.constant 0 : i32
    %c0_i32_0 = arith.constant 0 : i32
    %c0_i32_1 = arith.constant 0 : i32
    return %c0_i32, %c0_i32_0 : i32, i32
  }
  func.func @transform_4(%arg0: i32) -> (i32, i32) {
    %c0_i32 = arith.constant 0 : i32
    %c0_i32_0 = arith.constant 0 : i32
    %c0_i32_1 = arith.constant 0 : i32
    return %c0_i32, %c0_i32_0 : i32, i32
  }
  func.func @transform_5(%arg0: i32) -> (i32, i32) {
    %c0_i32 = arith.constant 0 : i32
    %c0_i32_0 = arith.constant 0 : i32
    %c0_i32_1 = arith.constant 0 : i32
    return %c0_i32, %c0_i32_0 : i32, i32
  }
  func.func @transform_6(%arg0: i32) -> (i32, i32) {
    %c0_i32 = arith.constant 0 : i32
    %c0_i32_0 = arith.constant 0 : i32
    %c0_i32_1 = arith.constant 0 : i32
    return %c0_i32, %c0_i32_0 : i32, i32
  }
  func.func @transform_7(%arg0: i32) -> (i32, i32) {
    %c0_i32 = arith.constant 0 : i32
    %c0_i32_0 = arith.constant 0 : i32
    %c0_i32_1 = arith.constant 0 : i32
    return %c0_i32, %c0_i32_0 : i32, i32
  }
  func.func @transform_8(%arg0: i32) -> (i32, i32) {
    %c0_i32 = arith.constant 0 : i32
    %c0_i32_0 = arith.constant 0 : i32
    %c0_i32_1 = arith.constant 0 : i32
    return %c0_i32, %c0_i32_0 : i32, i32
  }
  func.func @transform_9(%arg0: i32) -> (i32, i32) {
    %c0_i32 = arith.constant 0 : i32
    %c0_i32_0 = arith.constant 0 : i32
    %c0_i32_1 = arith.constant 0 : i32
    return %c0_i32, %c0_i32_0 : i32, i32
  }
  func.func @transform_10(%arg0: i32) -> (i32, i32) {
    %c0_i32 = arith.constant 0 : i32
    %c0_i32_0 = arith.constant 0 : i32
    %c0_i32_1 = arith.constant 0 : i32
    return %c0_i32, %c0_i32_0 : i32, i32
  }
  func.func @transform_11(%arg0: i32) -> (i32, i32) {
    %c0_i32 = arith.constant 0 : i32
    %c0_i32_0 = arith.constant 0 : i32
    %c0_i32_1 = arith.constant 0 : i32
    return %c0_i32, %c0_i32_0 : i32, i32
  }
  func.func @transform_12(%arg0: i32) -> (i32, i32) {
    %c0_i32 = arith.constant 0 : i32
    %c0_i32_0 = arith.constant 0 : i32
    %c0_i32_1 = arith.constant 0 : i32
    return %c0_i32, %c0_i32_0 : i32, i32
  }
  func.func @transform_13(%arg0: i32) -> (i32, i32) {
    %c0_i32 = arith.constant 0 : i32
    %c0_i32_0 = arith.constant 0 : i32
    %c0_i32_1 = arith.constant 0 : i32
    return %c0_i32, %c0_i32_0 : i32, i32
  }
  func.func @transform_14(%arg0: i32) -> (i32, i32, i32) {
    %c0_i32 = arith.constant 0 : i32
    %c0_i32_0 = arith.constant 0 : i32
    %c0_i32_1 = arith.constant 0 : i32
    %c0_i32_2 = arith.constant 0 : i32
    return %c0_i32, %c0_i32_0, %c0_i32_1 : i32, i32, i32
  }
  func.func @transform_15(%arg0: i32) -> (i32, i32) {
    %c0_i32 = arith.constant 0 : i32
    %c0_i32_0 = arith.constant 0 : i32
    %c0_i32_1 = arith.constant 0 : i32
    return %c0_i32, %c0_i32_0 : i32, i32
  }
  func.func @transform_16(%arg0: i32) -> (i32, i32) {
    %c0_i32 = arith.constant 0 : i32
    %c0_i32_0 = arith.constant 0 : i32
    %c0_i32_1 = arith.constant 0 : i32
    return %c0_i32, %c0_i32_0 : i32, i32
  }
  func.func @transform_17(%arg0: i32) -> (i32, i32) {
    %c0_i32 = arith.constant 0 : i32
    %c0_i32_0 = arith.constant 0 : i32
    %c0_i32_1 = arith.constant 0 : i32
    return %c0_i32, %c0_i32_0 : i32, i32
  }
  func.func @transform_18(%arg0: i32) -> (i32, i32, i32) {
    %c0_i32 = arith.constant 0 : i32
    %c0_i32_0 = arith.constant 0 : i32
    %c0_i32_1 = arith.constant 0 : i32
    return %arg0, %c0_i32, %c0_i32_0 : i32, i32, i32
  }
}

</mosaic_0001>

<bundles_post_ra>
// kernel: proposal_net_mini.1
= control target key start
LH: loop header
LB: loop body
LE: loop exit
PB: predicated region body
PF: predicated region fallthrough
CT: control target
= control target key end

     0   :  { %s8215_s27 = smov 0   ;;  %s13172_s0 = inlined_call_operand.vmem [shape: f32[2,8,1156], index: 0, kind: input, shape index: {}]   ;;  %s13173_s1 = inlined_call_operand.vmem [shape: f32[1,900], index: 1, kind: input, shape index: {}]   ;;  %s13174_s2 = inlined_call_operand.vmem [shape: f32[1,256], index: 2, kind: input, shape index: {}]   ;;  %s13175_s3 = inlined_call_operand.vmem [shape: f32[16,72], index: 3, kind: input, shape index: {}]   ;;  %s13176_s4 = inlined_call_operand.vmem [shape: f32[16,1], index: 4, kind: input, shape index: {}]   ;;  %s13177_s5 = inlined_call_operand.vmem [shape: f32[16,144], index: 5, kind: input, shape index: {}]   ;;  %s13178_s6 = inlined_call_operand.vmem [shape: f32[16,1], index: 6, kind: input, shape index: {}]   ;;  %s13179_s7 = inlined_call_operand.vmem [shape: f32[16,144], index: 7, kind: input, shape index: {}]   ;;  %s13180_s8 = inlined_call_operand.vmem [shape: f32[16,1], index: 8, kind: input, shape index: {}]   ;;  %s13181_s9 = inlined_call_operand.vmem [shape: f32[16,144], index: 9, kind: input, shape index: {}]   ;;  %s13182_s10 = inlined_call_operand.vmem [shape: f32[16,1], index: 10, kind: input, shape index: {}]   ;;  %s13183_s11 = inlined_call_operand.vmem [shape: f32[16,144], index: 11, kind: input, shape index: {}]   ;;  %s13184_s12 = inlined_call_operand.vmem [shape: f32[16,1], index: 12, kind: input, shape index: {}]   ;;  %s13185_s13 = inlined_call_operand.vmem [shape: f32[900,256], index: 13, kind: input, shape index: {}]   ;;  %s13186_s14 = inlined_call_operand.vmem [shape: f32[16,256,64], index: 14, kind: input, shape index: {}]   ;;  %s13187_s15 = inlined_call_operand.vmem [shape: f32[1,64], index: 15, kind: input, shape index: {}]   ;;  %s13188_s16 = inlined_call_operand.vmem [shape: f32[64,32], index: 16, kind: input, shape index: {}]   ;;  %s13189_s17 = inlined_call_operand.vmem [shape: f32[1,32], index: 17, kind: input, shape index: {}]   ;;  %s13190_s18 = inlined_call_operand.vmem [shape: f32[2,1,32], index: 18, kind: output, shape index: {}]  }
   0x1   :  { %13195 = sst [smem:[#allocation7_spill]] %s13172_s0 }
   0x2   :  { %13196 = sst [smem:[#allocation8_spill]] %s13173_s1 }
   0x3   :  { %13197 = sst [smem:[#allocation9_spill]] %s13174_s2 }
   0x4 LB: > { %s7393_s28 = sadd.s32 4294967295, %s8102_s27   ;;  %p7397_p0 = scmp.ge.s32.totalorder %s8102_s27, 1  ;;  %s8102_s27 = sphi %s8215_s27, %s28_s27  }
   0x5   : > { %p512_p1 = scmp.lt.s32.totalorder %s8102_s27, 3 }
   0x7   : > { %p513_p2 = pnand %p7397_p0, %p512_p1 }
   0x8   : > { %p564_p3 = scmp.lt.s32.totalorder (!%p513_p2), %s7393_s28, 1  ;;  %s13198_s19 = sld [smem:[#allocation7_spill]] (!%p513_p2) }
   0x9   : > { %516 = sbr.rel (%p513_p2) target bundleno = 2698 (0xa8a), region = 92  ;;  %s8104_s20 = smov (!%p513_p2), 97  }
   0xa   : > { %s8105_s21 = smov (!%p513_p2), 98   ;;  %s8106_s22 = smov (!%p513_p2), 99  }
   0xb   : > { %s8107_s2 = smov (!%p513_p2), 127   ;;  %s8108_s23 = smov (!%p513_p2), 1  }
   0xc   : > { %s8109_s24 = smov (!%p513_p2), 29   ;;  %s8110_s25 = smov (!%p513_p2), 30  }
   0xd   : > { %s8111_s26 = smov (!%p513_p2), 31   ;;  %s8117_s30 = smov (!%p513_p2), 15  }
   0xe   : > { %s13204_s28 = smov (!%p564_p3, %s7393_s28), 1  ;;  %vm1063_vm0 = vcmask 793600   ;;  %vm1007_vm1 = vcmask 801792   ;;  %vm951_vm2 = vcmask 809984   ;;  %vm895_vm3 = vcmask 1039360   ;;  %v8444_v55 = vld [vmem:[%s13175_s3] sm:$0xff] }
   0xf   : > { %s7944_s29 = smul.u32 80, %s13204_s28  ;;  %vm822_vm4 = vcmask 7168   ;;  %vm762_vm5 = vcmask 236544   ;;  %vm706_vm6 = vcmask 244736   ;;  %vm650_vm7 = vcmask 252928   ;;  %v1161_v60 = vld [vmem:[%s13176_s4] sm:$0xff] }
  0x10   : > { %vm1173_vm8 = vcmask 588800   ;;  %v8112_v59 = vmov 0   ;;  %vm576_vm9 = vcmask 31744   ;;  %s13193_s0 = smov 17  }
  0x11   : > { %s8229_s1 = scalar_lea.vmem %s13198_s19, %s7944_s29  ;;  %7970 = vset.pattern.permute.xlu0 %v8112_v59  ;;  %7969 = vset.pattern.permute.xlu2 %v8112_v59  ;;  %s13199_s29 = sld [smem:[#allocation8_spill]] }
  0x12   : > { %v8232_v0 = vld [vmem:[%s8229_s1 + $0x18] sm:$0xff]  ;;  %v8241_v1 = vld [vmem:[%s8229_s1 + $0x20] sm:$0xff]  ;;  %v8250_v2 = vld [vmem:[%s8229_s1 + $0x10] sm:$0xff]  ;;  %8011 = vset.pattern.permute.xlu1 %v8112_v59 }
  0x13   : > { %1051 = vrot.lane.b32.xlu0 %v8232_v0, %s8104_s20  ;;  %995 = vrot.lane.b32.xlu1 %v8232_v0, %s8105_s21  ;;  %v8259_v3 = vld [vmem:[%s8229_s1 + $0x28] sm:$0xff]  ;;  %v786_v5 = vld [vmem:[%s8229_s1] sm:$0xff] }
  0x14   : > { %939 = vrot.lane.b32.xlu2 %v8232_v0, %s8106_s22  ;;  %v8274_v4 = vld [vmem:[%s8229_s1 + $0x8] sm:$0xff]  ;;  %v8327_v8 = vld [vmem:[%s8229_s1 + $0x30] sm:$0xff]  ;;  %v8330_v9 = vld [vmem:[%s8229_s1 + $0x38] sm:$0xff] }
  0x15   : > { %v8360_v20 = vld [vmem:[%s8229_s1 + $0x40] sm:$0xff]  ;;  %s8115_s1 = smov 112  }
  0x16   : > { %862 = vst.msk [vmem:[#allocation6 + $0x138] sm:$0xff] %vm576_vm9, %v8360_v20 }
  0x1b   : > { %1053 = vrot.lane.b32.xlu0 %v8241_v1, %s8104_s20  ;;  %997 = vrot.lane.b32.xlu1 %v8241_v1, %s8105_s21 }
  0x1c   : > { %941 = vrot.lane.b32.xlu2 %v8241_v1, %s8106_s22 }
  0x23   : > { %885 = vrot.lane.b32.xlu1 %v8241_v1, %s8107_s2  ;;  %883 = vrot.lane.b32.xlu0 %v8232_v0, %s8107_s2 }
  0x24   : > { %1049 = vrot.lane.b32.xlu2 %v8250_v2, %s8104_s20 }
  0x2b   : > { %1055 = vrot.lane.b32.xlu1 %v8259_v3, %s8104_s20  ;;  %993 = vrot.lane.b32.xlu0 %v8250_v2, %s8105_s21 }
  0x2c   : > { %808 = vrot.lane.b32.xlu2 %v8250_v2, %s8108_s23 }
  0x33   : > { %937 = vrot.lane.b32.xlu1 %v8250_v2, %s8106_s22  ;;  %810 = vrot.lane.b32.xlu0 %v8232_v0, %s8108_s23 }
  0x34   : > { %999 = vrot.lane.b32.xlu2 %v8259_v3, %s8105_s21 }
  0x3b   : > { %1047 = vrot.lane.b32.xlu0 %v8274_v4, %s8104_s20  ;;  %750 = vrot.lane.b32.xlu1 %v8250_v2, %s8109_s24 }
  0x3c   : > { %752 = vrot.lane.b32.xlu2 %v8232_v0, %s8109_s24 }
  0x43   : > { %881 = vrot.lane.b32.xlu0 %v8250_v2, %s8107_s2  ;;  %943 = vrot.lane.b32.xlu1 %v8259_v3, %s8106_s22 }
  0x44   : > { %991 = vrot.lane.b32.xlu2 %v8274_v4, %s8105_s21 }
  0x4b   : > { %696 = vrot.lane.b32.xlu1 %v8232_v0, %s8110_s25  ;;  %694 = vrot.lane.b32.xlu0 %v8250_v2, %s8110_s25 }
  0x4c   : > { %887 = vrot.lane.b32.xlu2 %v8259_v3, %s8107_s2 }
  0x53   : > { %935 = vrot.lane.b32.xlu0 %v8274_v4, %s8106_s22  ;;  %638 = vrot.lane.b32.xlu1 %v8250_v2, %s8111_s26 }
  0x54   : > { %640 = vrot.lane.b32.xlu2 %v8232_v0, %s8111_s26 }
  0x5b   : > { %806 = vrot.lane.b32.xlu0 %v8274_v4, %s8108_s23  ;;  %879 = vrot.lane.b32.xlu1 %v8274_v4, %s8107_s2 }
  0x5c   : > { %748 = vrot.lane.b32.xlu2 %v8274_v4, %s8109_s24 }
  0x63   : > { %812 = vrot.lane.b32.xlu0 %v8241_v1, %s8108_s23  ;;  %692 = vrot.lane.b32.xlu1 %v8274_v4, %s8110_s25 }
  0x64   : > { %754 = vrot.lane.b32.xlu2 %v8241_v1, %s8109_s24 }
  0x6b   : > { %804 = vrot.lane.b32.xlu0 %v786_v5, %s8108_s23  ;;  %636 = vrot.lane.b32.xlu1 %v8274_v4, %s8111_s26 }
  0x6c   : > { %698 = vrot.lane.b32.xlu2 %v8241_v1, %s8110_s25 }
  0x6e   : > { %v8318_v6 = vpop.permute.xlu2 %939 }
  0x73   : > { %746 = vrot.lane.b32.xlu0 %v786_v5, %s8109_s24  ;;  %642 = vrot.lane.b32.xlu1 %v8241_v1, %s8111_s26 }
  0x74   : > { %690 = vrot.lane.b32.xlu2 %v786_v5, %s8110_s25 }
  0x76   : > { %v8324_v7 = vpop.permute.xlu2 %941 }
  0x77   : > { %v954_v21 = vsel %vm951_vm2, %v8318_v6, %v8324_v7 }
  0x7b   : > { %1057 = vrot.lane.b32.xlu1 %v8327_v8, %s8104_s20  ;;  %634 = vrot.lane.b32.xlu0 %v786_v5, %s8111_s26 }
  0x7c   : > { %1059 = vrot.lane.b32.xlu2 %v8330_v9, %s8104_s20 }
  0x7e   : > { %v8337_v10 = vpop.permute.xlu2 %1049 }
  0x83   : > { %1003 = vrot.lane.b32.xlu1 %v8330_v9, %s8105_s21  ;;  %1001 = vrot.lane.b32.xlu0 %v8327_v8, %s8105_s21 }
  0x84   : > { %945 = vrot.lane.b32.xlu2 %v8327_v8, %s8106_s22 }
  0x85   : > { %v1052_v11 = vpop.permute.xlu0 %1051  ;;  %v996_v12 = vpop.permute.xlu1 %995 }
  0x86   : > { %v1065_v13 = vsel %vm1063_vm0, %v8337_v10, %v1052_v11  ;;  %v8347_v14 = vpop.permute.xlu2 %808 }
  0x87   : > { %1210 = vmatpush.msra.mxu1 %v1065_v13 }
  0x8b   : > { %889 = vrot.lane.b32.xlu1 %v8327_v8, %s8107_s2  ;;  %947 = vrot.lane.b32.xlu0 %v8330_v9, %s8106_s22 }
  0x8c   : > { %891 = vrot.lane.b32.xlu2 %v8330_v9, %s8107_s2 }
  0x8d   : > { %v1054_v15 = vpop.permute.xlu0 %1053  ;;  %v998_v16 = vpop.permute.xlu1 %997 }
  0x8e   : > { %v1066_v17 = vsel %vm1063_vm0, %v1052_v11, %v1054_v15  ;;  %v8356_v18 = vpop.permute.xlu2 %999  ;;  %v1010_v19 = vsel %vm1007_vm1, %v996_v12, %v998_v16 }
  0x8f   : > { %1233 = vmatpush.msra.mxu2 %v1066_v17  ;;  %v1011_v31 = vsel %vm1007_vm1, %v998_v16, %v8356_v18 }
  0x91   : > { %1234 = vmatpush.msra.mxu2 %v1010_v19 }
  0x93   : > { %1005 = vrot.lane.b32.xlu1 %v8360_v20, %s8105_s21  ;;  %1061 = vrot.lane.b32.xlu0 %v8360_v20, %s8104_s20 }
  0x94   : > { %814 = vrot.lane.b32.xlu2 %v8259_v3, %s8108_s23  ;;  %1235 = vmatpush.msra.mxu2 %v954_v21 }
  0x95   : > { %v886_v22 = vpop.permute.xlu1 %885  ;;  %v884_v23 = vpop.permute.xlu0 %883 }
  0x96   : > { %v898_v24 = vsel %vm895_vm3, %v884_v23, %v886_v22  ;;  %v8372_v25 = vpop.permute.xlu2 %752 }
  0x97   : > { %1236 = vmatpush.msra.mxu2 %v898_v24 }
  0x99   : > { %1237 = vmatpush.msra.mxu2 %v8232_v0 }
  0x9b   : > { %949 = vrot.lane.b32.xlu1 %v8360_v20, %s8106_s22  ;;  %816 = vrot.lane.b32.xlu0 %v8327_v8, %s8108_s23 }
  0x9c   : > { %756 = vrot.lane.b32.xlu2 %v8259_v3, %s8109_s24 }
  0x9d   : > { %v8381_v26 = vpop.permute.xlu1 %1055  ;;  %v994_v27 = vpop.permute.xlu0 %993 }
  0x9e   : > { %v1067_v28 = vsel %vm1063_vm0, %v1054_v15, %v8381_v26  ;;  %v1009_v29 = vsel %vm1007_vm1, %v994_v27, %v996_v12  ;;  %v992_v30 = vpop.permute.xlu2 %991 }
  0x9f   : > { %1211 = vmatpush.msra.mxu1 %v1009_v29  ;;  %1256 = vmatpush.msra.mxu3 %v1067_v28  ;;  %v1008_v42 = vsel %vm1007_vm1, %v992_v30, %v994_v27 }
  0xa1   : > { %1257 = vmatpush.msra.mxu3 %v1011_v31 }
  0xa3   : > { %893 = vrot.lane.b32.xlu1 %v8360_v20, %s8107_s2  ;;  %758 = vrot.lane.b32.xlu0 %v8327_v8, %s8109_s24 }
  0xa4   : > { %700 = vrot.lane.b32.xlu2 %v8259_v3, %s8110_s25 }
  0xa5   : > { %v938_v32 = vpop.permute.xlu1 %937  ;;  %v8394_v33 = vpop.permute.xlu0 %810 }
  0xa6   : > { %v953_v34 = vsel %vm951_vm2, %v938_v32, %v8318_v6  ;;  %v825_v35 = vsel %vm822_vm4, %v8347_v14, %v8394_v33  ;;  %v8401_v36 = vpop.permute.xlu2 %887 }
  0xa7   : > { %1212 = vmatpush.msra.mxu1 %v953_v34  ;;  %1238 = vmatpush.msra.mxu2 %v825_v35  ;;  %v899_v48 = vsel %vm895_vm3, %v886_v22, %v8401_v36 }
  0xab   : > { %644 = vrot.lane.b32.xlu1 %v8259_v3, %s8111_s26  ;;  %702 = vrot.lane.b32.xlu0 %v8327_v8, %s8110_s25 }
  0xac   : > { %646 = vrot.lane.b32.xlu2 %v8327_v8, %s8111_s26 }
  0xad   : > { %v1048_v37 = vpop.permute.xlu0 %1047  ;;  %v751_v38 = vpop.permute.xlu1 %750 }
  0xae   : > { %v1064_v39 = vsel %vm1063_vm0, %v1048_v37, %v8337_v10  ;;  %v765_v40 = vsel %vm762_vm5, %v751_v38, %v8372_v25  ;;  %v8413_v41 = vpop.permute.xlu2 %640 }
  0xaf   : > { %1187 = vmatpush.msra.mxu0 %v1064_v39  ;;  %1239 = vmatpush.msra.mxu2 %v765_v40 }
  0xb1   : > { %1188 = vmatpush.msra.mxu0 %v1008_v42 }
  0xb3   : > { %760 = vrot.lane.b32.xlu1 %v8330_v9, %s8109_s24  ;;  %818 = vrot.lane.b32.xlu0 %v8330_v9, %s8108_s23 }
  0xb4   : > { %704 = vrot.lane.b32.xlu2 %v8330_v9, %s8110_s25 }
  0xb5   : > { %v882_v43 = vpop.permute.xlu0 %881  ;;  %v8422_v44 = vpop.permute.xlu1 %943 }
  0xb6   : > { %v897_v45 = vsel %vm895_vm3, %v882_v43, %v884_v23  ;;  %v955_v46 = vsel %vm951_vm2, %v8324_v7, %v8422_v44  ;;  %v8428_v47 = vpop.permute.xlu2 %748 }
  0xb7   : > { %1213 = vmatpush.msra.mxu1 %v897_v45  ;;  %1258 = vmatpush.msra.mxu3 %v955_v46 }
  0xb9   : > { %1259 = vmatpush.msra.mxu3 %v899_v48  ;;  %1214 = vmatpush.msra.mxu1 %v8250_v2  ;;  %v764_v2 = vsel %vm762_vm5, %v8428_v47, %v751_v38 }
  0xbb   : > { %820 = vrot.lane.b32.xlu1 %v8360_v20, %s8108_s23  ;;  %648 = vrot.lane.b32.xlu0 %v8330_v9, %s8111_s26 }
  0xbc   : > { %1260 = vmatpush.msra.mxu3 %v8241_v1 }
  0xbd   : > { %v697_v49 = vpop.permute.xlu1 %696  ;;  %v695_v50 = vpop.permute.xlu0 %694 }
  0xbe   : > { %v709_v51 = vsel %vm706_vm6, %v695_v50, %v697_v49  ;;  %v8439_v52 = vpop.permute.xlu2 %754 }
  0xbf   : > { %1240 = vmatpush.msra.mxu2 %v709_v51  ;;  %v766_v12 = vsel %vm762_vm5, %v8372_v25, %v8439_v52 }
  0xc3   : > { %1165 = vperm.xlu0 %7970, %v1161_v60  }
  0xc5   : > { %v936_v53 = vpop.permute.xlu0 %935  ;;  %v639_v54 = vpop.permute.xlu1 %638 }
  0xc6   : > { %v952_v56 = vsel %vm951_vm2, %v936_v53, %v938_v32  ;;  %v8447_v57 = vpop.permute.xlu2 %698  ;;  %v653_v58 = vsel %vm650_vm7, %v639_v54, %v8413_v41 }
  0xc7   : > { %1189 = vmatpush.msra.mxu0 %v952_v56  ;;  %1241 = vmatpush.msra.mxu2 %v653_v58 }
  0xc8   : > { %7403 = vmatmul.msk.f32.vlgmr.msra.gmra.mxu2 %vm1173_vm8, %v8444_v55 }
  0xcd   : > { %v807_v61 = vpop.permute.xlu0 %806  ;;  %v880_v62 = vpop.permute.xlu1 %879 }
  0xce   : > { %v824_v63 = vsel %vm822_vm4, %v807_v61, %v8347_v14  ;;  %v691_v0 = vpop.permute.xlu2 %690  ;;  %v896_v1 = vsel %vm895_vm3, %v880_v62, %v882_v43  ;;  %v1162_v62 = vld [vmem:[%s13176_s4 + $0x8] sm:$0xff] }
  0xcf   : > { %1190 = vmatpush.msra.mxu0 %v896_v1  ;;  %1215 = vmatpush.msra.mxu1 %v824_v63 }
  0xd0   : > { %1170 = vperm.xlu2 %7969, %v1162_v62  }
  0xd1   : > { %1216 = vmatpush.msra.mxu1 %v764_v2  ;;  %1191 = vmatpush.msra.mxu0 %v8274_v4  ;;  %v710_v4 = vsel %vm706_vm6, %v697_v49, %v8447_v57  ;;  %v1128_v2 = vld [vmem:[#allocation6 + $0x138] sm:$0xff] }
  0xd5   : > { %v8462_v5 = vpop.permute.xlu0 %812  ;;  %v693_v6 = vpop.permute.xlu1 %692 }
  0xd6   : > { %v826_v7 = vsel %vm822_vm4, %v8394_v33, %v8462_v5  ;;  %v8467_v10 = vpop.permute.xlu2 %1059  ;;  %v708_v11 = vsel %vm706_vm6, %v693_v6, %v695_v50  ;;  %v707_v25 = vsel %vm706_vm6, %v691_v0, %v693_v6 }
  0xd7   : > { %1217 = vmatpush.msra.mxu1 %v708_v11  ;;  %1261 = vmatpush.msra.mxu3 %v826_v7 }
  0xd9   : > { %1262 = vmatpush.msra.mxu3 %v766_v12 }
  0xdb   : > { %1263 = vmatpush.msra.mxu3 %v710_v4 }
  0xdd   : > { %v805_v13 = vpop.permute.xlu0 %804  ;;  %v637_v14 = vpop.permute.xlu1 %636 }
  0xde   : > { %v823_v15 = vsel %vm822_vm4, %v805_v13, %v807_v61  ;;  %v946_v16 = vpop.permute.xlu2 %945  ;;  %v652_v17 = vsel %vm650_vm7, %v637_v14, %v639_v54 }
  0xdf   : > { %1192 = vmatpush.msra.mxu0 %v823_v15  ;;  %1218 = vmatpush.msra.mxu1 %v652_v17  ;;  %v956_v38 = vsel %vm951_vm2, %v8422_v44, %v946_v16 }
  0xe0   : > { %7401 = vmatmul.msk.f32.vlgmr.msra.gmra.mxu1 %vm1173_vm8, %v8444_v55 }
  0xe5   : > { %v747_v19 = vpop.permute.xlu0 %746  ;;  %v8481_v21 = vpop.permute.xlu1 %642 }
  0xe6   : > { %v763_v22 = vsel %vm762_vm5, %v747_v19, %v8428_v47  ;;  %v8485_v23 = vpop.permute.xlu2 %891  ;;  %v654_v24 = vsel %vm650_vm7, %v8413_v41, %v8481_v21 }
  0xe7   : > { %1193 = vmatpush.msra.mxu0 %v763_v22  ;;  %1264 = vmatpush.msra.mxu3 %v654_v24 }
  0xe8   : > { %7405 = vmatmul.msk.f32.vlgmr.msra.gmra.mxu3 %vm1173_vm8, %v8444_v55 }
  0xe9   : > { %1194 = vmatpush.msra.mxu0 %v707_v25 }
  0xed   : > { %v1058_v20 = vpop.permute.xlu1 %1057  ;;  %v635_v27 = vpop.permute.xlu0 %634 }
  0xee   : > { %v815_v28 = vpop.permute.xlu2 %814  ;;  %v1068_v29 = vsel %vm1063_vm0, %v8381_v26, %v1058_v20  ;;  %v1069_v30 = vsel %vm1063_vm0, %v1058_v20, %v8467_v10  ;;  %v651_v31 = vsel %vm650_vm7, %v635_v27, %v637_v14  ;;  %v8506_v26 = vld [vmem:[%s13175_s3 + $0x8] sm:$0xff]  ;;  %v8586_v20 = vld [vmem:[%s13199_s29] sm:$0xff]  ;;  %s8116_s29 = smov 16  }
  0xef   : > { %1195 = vmatpush.msra.mxu0 %v651_v31  ;;  %1302 = vmatpush.msrb.mxu1 %v1069_v30  ;;  %v827_v44 = vsel %vm822_vm4, %v8462_v5, %v815_v28  ;;  %v8590_v27 = vperm.slane %v8586_v20, 2 }
  0xf0   : > { %7399 = vmatmul.msk.f32.vlgmr.msra.gmra.mxu0 %vm1173_vm8, %v8444_v55  ;;  %7402 = vmatmul.msk.f32.gmra.mxu1 %vm1173_vm8, %v8506_v26 }
  0xf1   : > { %1279 = vmatpush.msrb.mxu0 %v1068_v29  ;;  %7404 = vmatmul.msk.f32.gmra.mxu2 %vm1173_vm8, %v8506_v26 }
  0xf2   : > { %7406 = vmatmul.msk.f32.gmra.mxu3 %vm1173_vm8, %v8506_v26 }
  0xf5   : > { %v1004_v32 = vpop.permute.xlu1 %1003  ;;  %v1002_v33 = vpop.permute.xlu0 %1001 }
  0xf6   : > { %v757_v34 = vpop.permute.xlu2 %756  ;;  %v1012_v35 = vsel %vm1007_vm1, %v8356_v18, %v1002_v33  ;;  %v1013_v37 = vsel %vm1007_vm1, %v1002_v33, %v1004_v32  ;;  %v8598_v33 = vperm.slane %v8586_v20, 1 }
  0xf7   : > { %1280 = vmatpush.msrb.mxu0 %v1012_v35  ;;  %1303 = vmatpush.msrb.mxu1 %v1013_v37  ;;  %v767_v45 = vsel %vm762_vm5, %v8439_v52, %v757_v34 }
  0xf8   : > { %7400 = vmatmul.msk.f32.gmra.mxu0 %vm1173_vm8, %v8506_v26 }
  0xf9   : > { %1281 = vmatpush.msrb.mxu0 %v956_v38 }
  0xfd   : > { %v890_v18 = vpop.permute.xlu1 %889  ;;  %v948_v39 = vpop.permute.xlu0 %947 }
  0xfe   : > { %v701_v40 = vpop.permute.xlu2 %700  ;;  %v900_v41 = vsel %vm895_vm3, %v8401_v36, %v890_v18  ;;  %v901_v42 = vsel %vm895_vm3, %v890_v18, %v8485_v23  ;;  %v957_v43 = vsel %vm951_vm2, %v946_v16, %v948_v39  ;;  %v8612_v18 = vperm.slane %v8586_v20, 3 }
  0xff   : > { %1282 = vmatpush.msrb.mxu0 %v900_v41  ;;  %1304 = vmatpush.msrb.mxu1 %v957_v43  ;;  %v711_v47 = vsel %vm706_vm6, %v8447_v57, %v701_v40 }
 0x101   : > { %1283 = vmatpush.msrb.mxu0 %v8259_v3  ;;  %1305 = vmatpush.msrb.mxu1 %v901_v42  ;;  %v8618_v42 = vperm.slane %v8586_v20, 0 }
 0x103   : > { %1284 = vmatpush.msrb.mxu0 %v827_v44  ;;  %1306 = vmatpush.msrb.mxu1 %v8327_v8 }
 0x105   : > { %v1006_v36 = vpop.permute.xlu1 %1005  ;;  %v1062_v46 = vpop.permute.xlu0 %1061  ;;  %1285 = vmatpush.msrb.mxu0 %v767_v45 }
 0x106   : > { %v1014_v48 = vsel %vm1007_vm1, %v1004_v32, %v1006_v36  ;;  %1030 = vst.msk [vmem:[#allocation6 + $0x1f8] sm:$0xff] %vm576_vm9, %v1006_v36  ;;  %v1070_v3 = vsel %vm1063_vm0, %v8467_v10, %v1062_v46  ;;  %v647_v49 = vpop.permute.xlu2 %646 }
 0x107   : > { %1086 = vst.msk [vmem:[#allocation6 + $0x238] sm:$0xff] %vm576_vm9, %v1062_v46  ;;  %1286 = vmatpush.msrb.mxu0 %v711_v47  ;;  %1325 = vmatpush.msrb.mxu2 %v1070_v3 }
 0x109   : > { %1326 = vmatpush.msrb.mxu2 %v1014_v48 }
 0x10d   : > { %v950_v8 = vpop.permute.xlu1 %949  ;;  %v817_v50 = vpop.permute.xlu0 %816  ;;  %v1152_v56 = vld [vmem:[#allocation6 + $0x1f8] sm:$0xff] }
 0x10e   : > { %v958_v51 = vsel %vm951_vm2, %v948_v39, %v950_v8  ;;  %974 = vst.msk [vmem:[#allocation6 + $0x1b8] sm:$0xff] %vm576_vm9, %v950_v8  ;;  %v828_v52 = vsel %vm822_vm4, %v815_v28, %v817_v50  ;;  %v705_v53 = vpop.permute.xlu2 %704  ;;  %v1160_v54 = vld [vmem:[#allocation6 + $0x238] sm:$0xff] }
 0x10f   : > { %1307 = vmatpush.msrb.mxu1 %v828_v52  ;;  %729 = vst.msk [vmem:[#allocation6 + $0x78] sm:$0xff] %vm576_vm9, %v705_v53  ;;  %1327 = vmatpush.msrb.mxu2 %v958_v51 }
 0x110   : > { %1348 = vmatpush.msrb.mxu3 %v1160_v54 }
 0x112   : > { %1349 = vmatpush.msrb.mxu3 %v1152_v56 }
 0x115   : > { %v894_v57 = vpop.permute.xlu1 %893  ;;  %v759_v58 = vpop.permute.xlu0 %758  ;;  %v1144_v59 = vld [vmem:[#allocation6 + $0x1b8] sm:$0xff] }
 0x116   : > { %v902_v60 = vsel %vm895_vm3, %v8485_v23, %v894_v57  ;;  %918 = vst.msk [vmem:[#allocation6 + $0x178] sm:$0xff] %vm576_vm9, %v894_v57  ;;  %v768_v61 = vsel %vm762_vm5, %v757_v34, %v759_v58  ;;  %1350 = vmatpush.msrb.mxu3 %v1144_v59  ;;  %v8113_v23 = vmov 0.0  }
 0x117   : > { %1308 = vmatpush.msrb.mxu1 %v768_v61  ;;  %1328 = vmatpush.msrb.mxu2 %v902_v60  ;;  %572 = vst [vmem:[#allocation2] sm:$0xff] %v8113_v23 }
 0x118   : > { %7972 = vrot.lane.b32.xlu2 %v8113_v23, %s8108_s23  ;;  %7977 = vrot.lane.b32.xlu1 %v8113_v23, %s8109_s24 }
 0x119   : > { %1329 = vmatpush.msrb.mxu2 %v8330_v9 }
 0x11d   : > { %v645_v63 = vpop.permute.xlu1 %644  ;;  %v703_v0 = vpop.permute.xlu0 %702  ;;  %v1136_v1 = vld [vmem:[#allocation6 + $0x178] sm:$0xff] }
 0x11e   : > { %v655_v5 = vsel %vm650_vm7, %v8481_v21, %v645_v63  ;;  %v712_v6 = vsel %vm706_vm6, %v701_v40, %v703_v0  ;;  %v656_v7 = vsel %vm650_vm7, %v645_v63, %v647_v49  ;;  %1351 = vmatpush.msrb.mxu3 %v1136_v1  ;;  %v713_v4 = vsel %vm706_vm6, %v703_v0, %v705_v53  ;;  %v1104_v21 = vld [vmem:[#allocation6 + $0x78] sm:$0xff] }
 0x11f   : > { %1287 = vmatpush.msrb.mxu0 %v655_v5  ;;  %1309 = vmatpush.msrb.mxu1 %v712_v6 }
 0x120   : > { %7407 = vmatmul.msk.f32.vlgmr.msrb.gmra.mxu0 %vm1173_vm8, %v8444_v55  ;;  %1352 = vmatpush.msrb.mxu3 %v1128_v2 }
 0x121   : > { %1310 = vmatpush.msrb.mxu1 %v656_v7  ;;  %v8691_v7 = vperm.slane %v8586_v20, 4 }
 0x122   : > { %7409 = vmatmul.msk.f32.vlgmr.msrb.gmra.mxu1 %vm1173_vm8, %v8444_v55 }
 0x125   : > { %v761_v9 = vpop.permute.xlu1 %760  ;;  %v819_v10 = vpop.permute.xlu0 %818 }
 0x126   : > { %v769_v11 = vsel %vm762_vm5, %v759_v58, %v761_v9  ;;  %785 = vst.msk [vmem:[#allocation6 + $0xb8] sm:$0xff] %vm576_vm9, %v761_v9  ;;  %v829_v12 = vsel %vm822_vm4, %v817_v50, %v819_v10 }
 0x127   : > { %1330 = vmatpush.msrb.mxu2 %v829_v12  ;;  %v8696_v12 = vperm.slane %v8586_v20, 5 }
 0x128   : > { %7408 = vmatmul.msk.f32.gmra.mxu0 %vm1173_vm8, %v8506_v26 }
 0x129   : > { %1331 = vmatpush.msrb.mxu2 %v769_v11 }
 0x12a   : > { %7410 = vmatmul.msk.f32.gmra.mxu1 %vm1173_vm8, %v8506_v26  ;;  %v8634_v48 = vpop.permute.xlu2 %1170 }
 0x12b   : > { %1332 = vmatpush.msrb.mxu2 %v713_v4 }
 0x12d   : > { %v821_v13 = vpop.permute.xlu1 %820  ;;  %v649_v14 = vpop.permute.xlu0 %648  ;;  %v1112_v19 = vld [vmem:[#allocation6 + $0xb8] sm:$0xff] }
 0x12e   : > { %v830_v15 = vsel %vm822_vm4, %v819_v10, %v821_v13  ;;  %v657_v16 = vsel %vm650_vm7, %v647_v49, %v649_v14  ;;  %673 = vst.msk [vmem:[#allocation6 + $0x38] sm:$0xff] %vm576_vm9, %v649_v14 }
 0x12f   : > { %846 = vst.msk [vmem:[#allocation6 + $0xf8] sm:$0xff] %vm576_vm9, %v830_v15  ;;  %1333 = vmatpush.msrb.mxu2 %v657_v16 }
 0x130   : > { %7411 = vmatmul.msk.f32.vlgmr.msrb.gmra.mxu2 %vm1173_vm8, %v8444_v55 }
 0x135   : > { %v1096_v22 = vld [vmem:[#allocation6 + $0x38] sm:$0xff]  ;;  %v8581_v24 = vpop.permute.xlu0 %1165 }
 0x136   : > { %v1120_v17 = vld [vmem:[#allocation6 + $0xf8] sm:$0xff] }
 0x137   : > { %1353 = vmatpush.msrb.mxu3 %v1120_v17 }
 0x138   : > { %7412 = vmatmul.msk.f32.gmra.mxu2 %vm1173_vm8, %v8506_v26 }
 0x139   : > { %1354 = vmatpush.msrb.mxu3 %v1112_v19 }
 0x13b   : > { %1355 = vmatpush.msrb.mxu3 %v1104_v21 }
 0x13d   : > { %1356 = vmatpush.msrb.mxu3 %v1096_v22 }
 0x13e   : > { %7413 = vmatmul.msk.f32.vlgmr.msrb.gmra.mxu3 %vm1173_vm8, %v8444_v55 }
 0x146   : > { %7414 = vmatmul.msk.f32.gmra.mxu3 %vm1173_vm8, %v8506_v26 }
 0x14b   : > { %v1243_v25 = vpop.f32.mrf.mxu2 }
 0x14c   : > { %v1244_v55 = vadd.f32 %v1243_v25, %v8581_v24 }
 0x14e   : > { %vm1366_vm10 = vcmp.gt.f32.partialorder %v1244_v55, 0.0  ;;  %v1382_v28 = vmul.f32 0.01, %v1244_v55 }
 0x150   : > { %v1398_v29 = vsel %vm1366_vm10, %v1244_v55, %v1382_v28 }
 0x151   : > { %v8593_v30 = vmul.f32 %v1398_v29, %v8590_v27 }
 0x153   : > { %1430 = vst [vmem:[#allocation2 + $0x18] sm:$0xff] %v8593_v30 }
 0x15d   : > { %v1220_v31 = vpop.f32.mrf.mxu1 }
 0x15e   : > { %v1221_v32 = vadd.f32 %v1220_v31, %v8581_v24 }
 0x160   : > { %vm1365_vm11 = vcmp.gt.f32.partialorder %v1221_v32, 0.0  ;;  %v1381_v34 = vmul.f32 0.01, %v1221_v32 }
 0x162   : > { %v1397_v35 = vsel %vm1365_vm11, %v1221_v32, %v1381_v34  ;;  %vm574_vm11 = vcmask 1047584  }
 0x163   : > { %v8601_v37 = vmul.f32 %v1397_v35, %v8598_v33  ;;  %575 = vst.msk [vmem:[#allocation2 + $0x40] sm:$0xff] %vm574_vm11, %v8113_v23 }
 0x164   : > { %578 = vst.msk [vmem:[#allocation2 + $0x90] sm:$0xff] %vm574_vm11, %v8113_v23 }
 0x165   : > { %1429 = vst [vmem:[#allocation2 + $0x10] sm:$0xff] %v8601_v37  ;;  %1960 = vrot.lane.b32.xlu0 %v8601_v37, %s8107_s2  ;;  %2180 = vrot.lane.b32.xlu1 %v8601_v37, %s8105_s21 }
 0x166   : > { %2070 = vrot.lane.b32.xlu2 %v8601_v37, %s8106_s22  ;;  %582 = vst.msk [vmem:[#allocation3 + $0x40] sm:$0xff] %vm574_vm11, %v8113_v23 }
 0x167   : > { %584 = vst.msk [vmem:[#allocation3 + $0x90] sm:$0xff] %vm574_vm11, %v8113_v23 }
 0x16b   : > { %v1266_v26 = vpop.f32.mrf.mxu3 }
 0x16c   : > { %v1267_v38 = vadd.f32 %v1266_v26, %v8581_v24  ;;  %v8730_v26 = vperm.slane %v8586_v20, 6 }
 0x16d   : > { %v1197_v39 = vpop.f32.mrf.mxu0  ;;  %1814 = vrot.lane.b32.xlu0 %v8601_v37, %s8108_s23  ;;  %v1223_v47 = vpop.f32.mrf.mxu1 }
 0x16e   : > { %vm1367_vm12 = vcmp.gt.f32.partialorder %v1267_v38, 0.0  ;;  %v1383_v40 = vmul.f32 0.01, %v1267_v38  ;;  %v1198_v41 = vadd.f32 %v1197_v39, %v8581_v24  ;;  %v1224_v8 = vadd.f32 %v1223_v47, %v8634_v48 }
 0x170   : > { %v1399_v43 = vsel %vm1367_vm12, %v1267_v38, %v1383_v40  ;;  %vm1364_vm13 = vcmp.gt.f32.partialorder %v1198_v41, 0.0  ;;  %v1380_v44 = vmul.f32 0.01, %v1198_v41  ;;  %vm1373_vm15 = vcmp.gt.f32.partialorder %v1224_v8, 0.0 }
 0x171   : > { %v8621_v45 = vmul.f32 %v1399_v43, %v8612_v18  ;;  %v1389_v51 = vmul.f32 0.01, %v1224_v8 }
 0x172   : > { %v1396_v36 = vsel %vm1364_vm13, %v1198_v41, %v1380_v44  ;;  %v8743_v44 = vpop.permute.xlu2 %7972 }
 0x173   : > { %1431 = vst [vmem:[#allocation2 + $0x20] sm:$0xff] %v8621_v45  ;;  %v8625_v46 = vmul.f32 %v1396_v36, %v8618_v42  ;;  %v1405_v53 = vsel %vm1373_vm15, %v1224_v8, %v1389_v51 }
 0x174   : > { %v1246_v56 = vpop.f32.mrf.mxu2  ;;  %v8646_v57 = vmul.f32 %v1405_v53, %v8598_v33 }
 0x175   : > { %1428 = vst [vmem:[#allocation2 + $0x8] sm:$0xff] %v8625_v46  ;;  %2178 = vrot.lane.b32.xlu1 %v8625_v46, %s8105_s21  ;;  %1812 = vrot.lane.b32.xlu2 %v8625_v46, %s8108_s23  ;;  %v1200_v3 = vpop.f32.mrf.mxu0  ;;  %v1247_v58 = vadd.f32 %v1246_v56, %v8634_v48  ;;  %v1269_v59 = vpop.f32.mrf.mxu3 }
 0x176   : > { %1698 = vrot.lane.b32.xlu0 %v8625_v46, %s8109_s24  ;;  %v1201_v49 = vadd.f32 %v1200_v3, %v8634_v48  ;;  %v1270_v60 = vadd.f32 %v1269_v59, %v8634_v48  ;;  %1437 = vst [vmem:[#allocation2 + $0x60] sm:$0xff] %v8646_v57 }
 0x177   : > { %vm1374_vm8 = vcmp.gt.f32.partialorder %v1247_v58, 0.0  ;;  %v1390_v61 = vmul.f32 0.01, %v1247_v58 }
 0x178   : > { %vm1372_vm14 = vcmp.gt.f32.partialorder %v1201_v49, 0.0  ;;  %v1388_v50 = vmul.f32 0.01, %v1201_v49  ;;  %vm1375_vm10 = vcmp.gt.f32.partialorder %v1270_v60, 0.0  ;;  %v1391_v62 = vmul.f32 0.01, %v1270_v60 }
 0x179   : > { %v1406_v63 = vsel %vm1374_vm8, %v1247_v58, %v1390_v61 }
 0x17a   : > { %v1404_v52 = vsel %vm1372_vm14, %v1201_v49, %v1388_v50  ;;  %v8655_v0 = vmul.f32 %v1406_v63, %v8590_v27  ;;  %v1407_v1 = vsel %vm1375_vm10, %v1270_v60, %v1391_v62  ;;  %v8756_v50 = vperm.slane %v8586_v20, 7 }
 0x17b   : > { %v8639_v54 = vmul.f32 %v1404_v52, %v8618_v42  ;;  %v8658_v2 = vmul.f32 %v1407_v1, %v8612_v18 }
 0x17c   : > { %1438 = vst [vmem:[#allocation2 + $0x68] sm:$0xff] %v8655_v0 }
 0x17d   : > { %2068 = vrot.lane.b32.xlu1 %v8625_v46, %s8106_s22  ;;  %2290 = vrot.lane.b32.xlu2 %v8601_v37, %s8104_s20  ;;  %1436 = vst [vmem:[#allocation2 + $0x58] sm:$0xff] %v8639_v54 }
 0x17e   : > { %1590 = vrot.lane.b32.xlu0 %v8601_v37, %s8110_s25  ;;  %1439 = vst [vmem:[#allocation2 + $0x70] sm:$0xff] %v8658_v2 }
 0x185   : > { %1958 = vrot.lane.b32.xlu1 %v8625_v46, %s8107_s2  ;;  %2288 = vrot.lane.b32.xlu2 %v8625_v46, %s8104_s20 }
 0x186   : > { %2072 = vrot.lane.b32.xlu0 %v8593_v30, %s8106_s22 }
 0x18d   : > { %1700 = vrot.lane.b32.xlu1 %v8601_v37, %s8109_s24  ;;  %1588 = vrot.lane.b32.xlu2 %v8625_v46, %s8110_s25 }
 0x18e   : > { %2184 = vrot.lane.b32.xlu0 %v8621_v45, %s8105_s21 }
 0x195   : > { %1962 = vrot.lane.b32.xlu1 %v8593_v30, %s8107_s2  ;;  %2182 = vrot.lane.b32.xlu2 %v8593_v30, %s8105_s21 }
 0x196   : > { %2292 = vrot.lane.b32.xlu0 %v8593_v30, %s8104_s20 }
 0x19d   : > { %v1289_v5 = vpop.f32.mrf.mxu0  ;;  %2074 = vrot.lane.b32.xlu1 %v8621_v45, %s8106_s22  ;;  %1976 = vrot.lane.b32.xlu2 %v8646_v57, %s8107_s2 }
 0x19e   : > { %v1290_v6 = vadd.f32 %v1289_v5, %v8581_v24  ;;  %2086 = vrot.lane.b32.xlu0 %v8646_v57, %s8106_s22 }
 0x19f   : > { %v1312_v9 = vpop.f32.mrf.mxu1 }
 0x1a0   : > { %vm1368_vm12 = vcmp.gt.f32.partialorder %v1290_v6, 0.0  ;;  %v1384_v10 = vmul.f32 0.01, %v1290_v6  ;;  %v1313_v11 = vadd.f32 %v1312_v9, %v8581_v24 }
 0x1a2   : > { %v1400_v4 = vsel %vm1368_vm12, %v1290_v6, %v1384_v10  ;;  %vm1369_vm13 = vcmp.gt.f32.partialorder %v1313_v11, 0.0  ;;  %v1385_v13 = vmul.f32 0.01, %v1313_v11 }
 0x1a3   : > { %v8699_v14 = vmul.f32 %v1400_v4, %v8691_v7 }
 0x1a4   : > { %v1401_v15 = vsel %vm1369_vm13, %v1313_v11, %v1385_v13  ;;  %vm2526_vm13 = vcmask 130048  }
 0x1a5   : > { %1432 = vst [vmem:[#allocation2 + $0x28] sm:$0xff] %v8699_v14  ;;  %v8703_v16 = vmul.f32 %v1401_v15, %v8696_v12  ;;  %v1292_v17 = vpop.f32.mrf.mxu0  ;;  %1964 = vrot.lane.b32.xlu1 %v8621_v45, %s8107_s2  ;;  %2084 = vrot.lane.b32.xlu2 %v8639_v54, %s8106_s22 }
 0x1a6   : > { %v1293_v19 = vadd.f32 %v1292_v17, %v8634_v48  ;;  %1974 = vrot.lane.b32.xlu0 %v8639_v54, %s8107_s2 }
 0x1a7   : > { %1433 = vst [vmem:[#allocation2 + $0x30] sm:$0xff] %v8703_v16  ;;  %v1315_v21 = vpop.f32.mrf.mxu1 }
 0x1a8   : > { %vm1376_vm14 = vcmp.gt.f32.partialorder %v1293_v19, 0.0  ;;  %v1392_v22 = vmul.f32 0.01, %v1293_v19  ;;  %v1316_v25 = vadd.f32 %v1315_v21, %v8634_v48 }
 0x1aa   : > { %v1408_v55 = vsel %vm1376_vm14, %v1293_v19, %v1392_v22  ;;  %vm1377_vm15 = vcmp.gt.f32.partialorder %v1316_v25, 0.0  ;;  %v1393_v28 = vmul.f32 0.01, %v1316_v25 }
 0x1ab   : > { %v8715_v29 = vmul.f32 %v1408_v55, %v8691_v7 }
 0x1ac   : > { %v1409_v31 = vsel %vm1377_vm15, %v1316_v25, %v1393_v28 }
 0x1ad   : > { %1440 = vst [vmem:[#allocation2 + $0x78] sm:$0xff] %v8715_v29  ;;  %v8719_v32 = vmul.f32 %v1409_v31, %v8696_v12  ;;  %2196 = vrot.lane.b32.xlu1 %v8646_v57, %s8105_s21  ;;  %1830 = vrot.lane.b32.xlu2 %v8639_v54, %s8108_s23 }
 0x1ae   : > { %1832 = vrot.lane.b32.xlu0 %v8646_v57, %s8108_s23 }
 0x1af   : > { %1441 = vst [vmem:[#allocation2 + $0x80] sm:$0xff] %v8719_v32 }
 0x1b3   : > { %v1335_v34 = vpop.f32.mrf.mxu2 }
 0x1b4   : > { %v1336_v35 = vadd.f32 %v1335_v34, %v8581_v24 }
 0x1b5   : > { %2194 = vrot.lane.b32.xlu1 %v8639_v54, %s8105_s21  ;;  %1716 = vrot.lane.b32.xlu2 %v8646_v57, %s8109_s24 }
 0x1b6   : > { %vm1370_vm8 = vcmp.gt.f32.partialorder %v1336_v35, 0.0  ;;  %v1386_v38 = vmul.f32 0.01, %v1336_v35  ;;  %2306 = vrot.lane.b32.xlu0 %v8646_v57, %s8104_s20 }
 0x1b8   : > { %v1402_v39 = vsel %vm1370_vm8, %v1336_v35, %v1386_v38 }
 0x1b9   : > { %v8739_v40 = vmul.f32 %v1402_v39, %v8730_v26 }
 0x1bb   : > { %1434 = vst [vmem:[#allocation2 + $0x38] sm:$0xff] %v8739_v40  ;;  %v1338_v41 = vpop.f32.mrf.mxu2 }
 0x1bc   : > { %v1339_v43 = vadd.f32 %v1338_v41, %v8634_v48 }
 0x1bd   : > { %1714 = vrot.lane.b32.xlu1 %v8639_v54, %s8109_s24  ;;  %2304 = vrot.lane.b32.xlu2 %v8639_v54, %s8104_s20 }
 0x1be   : > { %vm1378_vm10 = vcmp.gt.f32.partialorder %v1339_v43, 0.0  ;;  %v1394_v36 = vmul.f32 0.01, %v1339_v43  ;;  %1604 = vrot.lane.b32.xlu0 %v8639_v54, %s8110_s25 }
 0x1c0   : > { %v1410_v47 = vsel %vm1378_vm10, %v1339_v43, %v1394_v36 }
 0x1c1   : > { %v1358_v3 = vpop.f32.mrf.mxu3  ;;  %v8752_v49 = vmul.f32 %v1410_v47, %v8730_v26 }
 0x1c2   : > { %v1359_v8 = vadd.f32 %v1358_v3, %v8581_v24  ;;  %v8766_v24 = vpop.permute.xlu2 %2070 }
 0x1c3   : > { %1442 = vst [vmem:[#allocation2 + $0x88] sm:$0xff] %v8752_v49 }
 0x1c4   : > { %vm1371_vm11 = vcmp.gt.f32.partialorder %v1359_v8, 0.0  ;;  %v1387_v51 = vmul.f32 0.01, %v1359_v8 }
 0x1c5   : > { %1606 = vrot.lane.b32.xlu1 %v8646_v57, %s8110_s25  ;;  %2198 = vrot.lane.b32.xlu2 %v8655_v0, %s8105_s21 }
 0x1c6   : > { %v1403_v52 = vsel %vm1371_vm11, %v1359_v8, %v1387_v51  ;;  %1978 = vrot.lane.b32.xlu0 %v8655_v0, %s8107_s2 }
 0x1c7   : > { %v1419_v53 = vmul.f32 %v1403_v52, %v8756_v50 }
 0x1c9   : > { %1435 = vst.msk [vmem:[#allocation2 + $0x40] sm:$0xff] %vm576_vm9, %v1419_v53  ;;  %v1361_v20 = vpop.f32.mrf.mxu3 }
 0x1ca   : > { %v1362_v56 = vadd.f32 %v1361_v20, %v8634_v48  ;;  %v8781_v48 = vpop.permute.xlu1 %7977 }
 0x1cc   : > { %vm1379_vm12 = vcmp.gt.f32.partialorder %v1362_v56, 0.0  ;;  %v1395_v58 = vmul.f32 0.01, %v1362_v56 }
 0x1cd   : > { %2088 = vrot.lane.b32.xlu1 %v8655_v0, %s8106_s22  ;;  %2200 = vrot.lane.b32.xlu2 %v8658_v2, %s8105_s21 }
 0x1ce   : > { %v1411_v59 = vsel %vm1379_vm12, %v1362_v56, %v1395_v58  ;;  %2186 = vrot.lane.b32.xlu0 %v8699_v14, %s8105_s21 }
 0x1cf   : > { %v1427_v60 = vmul.f32 %v1411_v59, %v8756_v50  ;;  %v8777_v61 = vpop.permute.xlu2 %1812 }
 0x1d0   : > { %v1901_v62 = vld [vmem:[#allocation2 + $0x40] sm:$0xff] }
 0x1d1   : > { %1443 = vst.msk [vmem:[#allocation2 + $0x90] sm:$0xff] %vm576_vm9, %v1427_v60 }
 0x1d2   : > { %1917 = vst.msk [vmem:[#allocation6 + $0x238] sm:$0xff] %vm576_vm9, %v1901_v62 }
 0x1d5   : > { %2308 = vrot.lane.b32.xlu1 %v8655_v0, %s8104_s20  ;;  %2090 = vrot.lane.b32.xlu2 %v8658_v2, %s8106_s22 }
 0x1d6   : > { %2202 = vrot.lane.b32.xlu0 %v8715_v29, %s8105_s21 }
 0x1d7   : > { %v8789_v63 = vpop.permute.xlu0 %1960  ;;  %v8791_v1 = vpop.permute.xlu2 %2290 }
 0x1d8   : > { %v1909_v5 = vld [vmem:[#allocation2 + $0x90] sm:$0xff]  ;;  %v8798_v6 = vpop.permute.xlu1 %2180 }
 0x1d9   : > { %1925 = vst.msk [vmem:[#allocation6 + $0x278] sm:$0xff] %vm576_vm9, %v1909_v5 }
 0x1dd   : > { %2188 = vrot.lane.b32.xlu1 %v8703_v16, %s8105_s21  ;;  %1980 = vrot.lane.b32.xlu2 %v8658_v2, %s8107_s2 }
 0x1de   : > { %2092 = vrot.lane.b32.xlu0 %v8715_v29, %s8106_s22 }
 0x1df   : > { %v8802_v9 = vpop.permute.xlu0 %1814  ;;  %v8804_v10 = vpop.permute.xlu2 %2288 }
 0x1e0   : > { %v2320_v62 = vsel %vm1063_vm0, %v8804_v10, %v8791_v1 }
 0x1e5   : > { %2204 = vrot.lane.b32.xlu1 %v8719_v32, %s8105_s21  ;;  %1834 = vrot.lane.b32.xlu2 %v8655_v0, %s8108_s23 }
 0x1e6   : > { %2076 = vrot.lane.b32.xlu0 %v8699_v14, %s8106_s22 }
 0x1e7   : > { %v2179_v11 = vpop.permute.xlu1 %2178  ;;  %v8812_v4 = vpop.permute.xlu2 %1588 }
 0x1e8   : > { %v8814_v13 = vpop.permute.xlu0 %1698  ;;  %v2210_v60 = vsel %vm1007_vm1, %v2179_v11, %v8798_v6 }
 0x1ed   : > { %2094 = vrot.lane.b32.xlu1 %v8719_v32, %s8106_s22  ;;  %1816 = vrot.lane.b32.xlu2 %v8593_v30, %s8108_s23 }
 0x1ee   : > { %1496 = vrot.lane.b32.xlu0 %v8646_v57, %s8111_s26 }
 0x1ef   : > { %v8822_v15 = vpop.permute.xlu1 %2068  ;;  %v8824_v17 = vpop.permute.xlu2 %2182 }
 0x1f0   : > { %v8826_v19 = vpop.permute.xlu0 %1590  ;;  %v2211_v53 = vsel %vm1007_vm1, %v8798_v6, %v8824_v17 }
 0x1f5   : > { %2078 = vrot.lane.b32.xlu1 %v8703_v16, %s8106_s22  ;;  %1494 = vrot.lane.b32.xlu2 %v8639_v54, %s8111_s26 }
 0x1f6   : > { %1984 = vrot.lane.b32.xlu0 %v8719_v32, %s8107_s2 }
 0x1f7   : > { %v8834_v21 = vpop.permute.xlu1 %1958  ;;  %v8836_v22 = vpop.permute.xlu2 %1976 }
 0x1f8   : > { %v8838_v25 = vpop.permute.xlu0 %2072 }
 0x1fd   : > { %1718 = vrot.lane.b32.xlu1 %v8655_v0, %s8109_s24  ;;  %1982 = vrot.lane.b32.xlu2 %v8715_v29, %s8107_s2 }
 0x1fe   : > { %7982 = vrot.lane.b32.xlu0 %v8113_v23, %s8110_s25 }
 0x1ff   : > { %v8846_v55 = vpop.permute.xlu1 %1700  ;;  %v2085_v28 = vpop.permute.xlu2 %2084 }
 0x200   : > { %v8848_v31 = vpop.permute.xlu0 %2184 }
 0x201   : > { %v2212_v6 = vsel %vm1007_vm1, %v8824_v17, %v8848_v31  ;;  %v1990_v17 = vsel %vm895_vm3, %v8834_v21, %v8789_v63  ;;  %v7974_v21 = vunpack.i.l.bf16 %v8743_v44 }
 0x205   : > { %1480 = vrot.lane.b32.xlu2 %v8601_v37, %s8111_s26  ;;  %1478 = vrot.lane.b32.xlu1 %v8625_v46, %s8111_s26 }
 0x206   : > { %1968 = vrot.lane.b32.xlu0 %v8703_v16, %s8107_s2 }
 0x207   : > { %v8856_v34 = vpop.permute.xlu1 %1962  ;;  %v8858_v35 = vpop.permute.xlu2 %1830 }
 0x208   : > { %v8860_v38 = vpop.permute.xlu0 %2292 }
 0x20d   : > { %1966 = vrot.lane.b32.xlu2 %v8699_v14, %s8107_s2  ;;  %1702 = vrot.lane.b32.xlu1 %v8593_v30, %s8109_s24 }
 0x20e   : > { %2310 = vrot.lane.b32.xlu0 %v8658_v2, %s8104_s20 }
 0x20f   : > { %v8868_v37 = vpop.permute.xlu1 %2074  ;;  %v8870_v39 = vpop.permute.xlu2 %1716 }
 0x210   : > { %v8872_v41 = vpop.permute.xlu0 %2086 }
 0x215   : > { %2206 = vrot.lane.b32.xlu2 %v8752_v49, %s8105_s21  ;;  %1608 = vrot.lane.b32.xlu1 %v8655_v0, %s8110_s25 }
 0x216   : > { %2190 = vrot.lane.b32.xlu0 %v8739_v40, %s8105_s21 }
 0x217   : > { %v8880_v43 = vpop.permute.xlu1 %1964  ;;  %v2305_v36 = vpop.permute.xlu2 %2304 }
 0x218   : > { %v1975_v47 = vpop.permute.xlu0 %1974 }
 0x21d   : > { %1592 = vrot.lane.b32.xlu2 %v8593_v30, %s8110_s25  ;;  %7987 = vrot.lane.b32.xlu1 %v8113_v23, %s8111_s26 }
 0x21e   : > { %1836 = vrot.lane.b32.xlu0 %v8658_v2, %s8108_s23 }
 0x21f   : > { %v2197_v3 = vpop.permute.xlu1 %2196  ;;  %v2199_v8 = vpop.permute.xlu2 %2198 }
 0x220   : > { %v8888_v51 = vpop.permute.xlu0 %1832  ;;  %v2218_v52 = vsel %vm1007_vm1, %v2197_v3, %v2199_v8 }
 0x221   : > { %2579 = vmatpush.msra.mxu2 %v2218_v52 }
 0x223   : > { %2580 = vmatpush.msra.mxu2 %v2211_v53  ;;  %v7975_v53 = vunpack.i.h.bf16 %v8743_v44 }
 0x225   : > { %1498 = vrot.lane.b32.xlu2 %v8655_v0, %s8111_s26  ;;  %2294 = vrot.lane.b32.xlu1 %v8621_v45, %s8104_s20 }
 0x226   : > { %1482 = vrot.lane.b32.xlu0 %v8593_v30, %s8111_s26 }
 0x227   : > { %v2195_v23 = vpop.permute.xlu1 %2194  ;;  %v8900_v20 = vpop.permute.xlu2 %2200 }
 0x228   : > { %v2217_v56 = vsel %vm1007_vm1, %v2195_v23, %v2197_v3  ;;  %v8903_v58 = vpop.permute.xlu0 %2306  ;;  %v2219_v5 = vsel %vm1007_vm1, %v2199_v8, %v8900_v20  ;;  %v2100_v3 = vsel %vm951_vm2, %v8822_v15, %v8766_v24  ;;  %v1854_v23 = vsel %vm822_vm4, %v7974_v21, %v8858_v35  ;;  %v1895_v21 = vld [vmem:[#allocation2 + $0x10] sm:$0xff] }
 0x229   : > { %v2327_v59 = vsel %vm1063_vm0, %v2305_v36, %v8903_v58  ;;  %2533 = vmatpush.msra.mxu0 %v2217_v56  ;;  %v2107_v36 = vsel %vm951_vm2, %v2085_v28, %v8872_v41  ;;  %v1997_v28 = vsel %vm895_vm3, %v1975_v47, %v8836_v22  ;;  %v1846_v56 = vsel %vm822_vm4, %v7975_v53, %v8777_v61 }
 0x22a   : > { %2570 = vmatpush.msra.mxu1 %v2327_v59  ;;  %v7979_v59 = vunpack.i.l.bf16 %v8781_v48 }
 0x22b   : > { %2534 = vmatpush.msra.mxu0 %v2210_v60 }
 0x22c   : > { %2571 = vmatpush.msra.mxu1 %v2320_v62 }
 0x22d   : > { %2096 = vrot.lane.b32.xlu2 %v8752_v49, %s8106_s22  ;;  %1838 = vrot.lane.b32.xlu1 %v8715_v29, %s8108_s23 }
 0x22e   : > { %2080 = vrot.lane.b32.xlu0 %v8739_v40, %s8106_s22  ;;  %2625 = vmatpush.msrb.mxu1 %v2219_v5 }
 0x22f   : > { %v8925_v10 = vpop.permute.xlu1 %1714  ;;  %v8927_v11 = vpop.permute.xlu2 %2090  ;;  %2535 = vmatpush.msra.mxu0 %v2107_v36 }
 0x230   : > { %v8932_v8 = vpop.permute.xlu0 %1604  ;;  %2626 = vmatpush.msrb.mxu1 %v2212_v6 }
 0x231   : > { %2536 = vmatpush.msra.mxu0 %v2100_v3  ;;  %v2102_v3 = vsel %vm951_vm2, %v8838_v25, %v8868_v37 }
 0x233   : > { %2537 = vmatpush.msra.mxu0 %v1997_v28 }
 0x235   : > { %1820 = vrot.lane.b32.xlu2 %v8699_v14, %s8108_s23  ;;  %1818 = vrot.lane.b32.xlu1 %v8621_v45, %s8108_s23 }
 0x236   : > { %1986 = vrot.lane.b32.xlu0 %v8752_v49, %s8107_s2  ;;  %2538 = vmatpush.msra.mxu0 %v1990_v17 }
 0x237   : > { %v8945_v15 = vpop.permute.xlu1 %1606  ;;  %v8947_v52 = vpop.permute.xlu2 %1980 }
 0x238   : > { %v1979_v47 = vpop.permute.xlu0 %1978  ;;  %2539 = vmatpush.msra.mxu0 %v8639_v54  ;;  %v1735_v54 = vsel %vm762_vm5, %v7979_v59, %v8925_v10 }
 0x239   : > { %v1998_v28 = vsel %vm895_vm3, %v8836_v22, %v1979_v47 }
 0x23a   : > { %2540 = vmatpush.msra.mxu0 %v8625_v46  ;;  %v7980_v46 = vunpack.i.h.bf16 %v8781_v48  ;;  %v2101_v48 = vsel %vm951_vm2, %v8766_v24, %v8838_v25  ;;  %v1999_v24 = vsel %vm895_vm3, %v1979_v47, %v8947_v52  ;;  %v1991_v25 = vsel %vm895_vm3, %v8789_v63, %v8856_v34 }
 0x23b   : > { %v2321_v63 = vsel %vm1063_vm0, %v8791_v1, %v8860_v38 }
 0x23c   : > { %2541 = vmatpush.msra.mxu0 %v1854_v23  ;;  %v1728_v6 = vsel %vm762_vm5, %v7980_v46, %v8814_v13  ;;  %v1847_v23 = vsel %vm822_vm4, %v8777_v61, %v8802_v9  ;;  %v1626_v61 = vsel %vm706_vm6, %v8932_v8, %v8945_v15  ;;  %v9066_v46 = vld [vmem:[#allocation2 + $0x20] sm:$0xff] }
 0x23d   : > { %1722 = vrot.lane.b32.xlu2 %v8715_v29, %s8109_s24  ;;  %1720 = vrot.lane.b32.xlu1 %v8658_v2, %s8109_s24 }
 0x23e   : > { %1706 = vrot.lane.b32.xlu0 %v8699_v14, %s8109_s24  ;;  %2542 = vmatpush.msra.mxu0 %v1846_v56 }
 0x23f   : > { %v2089_v44 = vpop.permute.xlu1 %2088  ;;  %v8967_v60 = vpop.permute.xlu2 %1834 }
 0x240   : > { %v2108_v62 = vsel %vm951_vm2, %v8872_v41, %v2089_v44  ;;  %v2109_v5 = vsel %vm951_vm2, %v2089_v44, %v8927_v11  ;;  %v8973_v36 = vpop.permute.xlu0 %2186  ;;  %2543 = vmatpush.msra.mxu0 %v1735_v54  ;;  %v8983_v41 = vld [vmem:[#allocation2 + $0x90] sm:$0xff] }
 0x241   : > { %2581 = vmatpush.msra.mxu2 %v2108_v62  ;;  %2627 = vmatpush.msrb.mxu1 %v2109_v5 }
 0x242   : > { %2544 = vmatpush.msra.mxu0 %v1728_v6 }
 0x243   : > { %2582 = vmatpush.msra.mxu2 %v2101_v48  ;;  %2628 = vmatpush.msrb.mxu1 %v2102_v3  ;;  %v9113_v3 = vld [vmem:[%s13177_s5 + $0x18] sm:$0xff] }
 0x245   : > { %1704 = vrot.lane.b32.xlu2 %v8621_v45, %s8109_s24  ;;  %2208 = vrot.lane.b32.xlu1 %v8983_v41, %s8105_s21  ;;  %v1992_v45 = vsel %vm895_vm3, %v8856_v34, %v8880_v43  ;;  %v9015_v34 = vld [vmem:[#allocation2 + $0x40] sm:$0xff] }
 0x246   : > { %1610 = vrot.lane.b32.xlu0 %v8658_v2, %s8110_s25  ;;  %2583 = vmatpush.msra.mxu2 %v1998_v28 }
 0x247   : > { %v8998_v17 = vpop.permute.xlu1 %2308  ;;  %v9000_v22 = vpop.permute.xlu2 %1816  ;;  %2629 = vmatpush.msrb.mxu1 %v1999_v24 }
 0x248   : > { %v2328_v47 = vsel %vm1063_vm0, %v8903_v58, %v8998_v17  ;;  %v9008_v53 = vpop.permute.xlu0 %2202  ;;  %2584 = vmatpush.msra.mxu2 %v1991_v25  ;;  %v1855_v58 = vsel %vm822_vm4, %v8858_v35, %v8888_v51  ;;  %v1736_v35 = vsel %vm762_vm5, %v8925_v10, %v8870_v39 }
 0x249   : > { %2630 = vmatpush.msrb.mxu1 %v1992_v45  ;;  %2616 = vmatpush.msra.mxu3 %v2328_v47 }
 0x24a   : > { %2585 = vmatpush.msra.mxu2 %v8646_v57  ;;  %v1856_v57 = vsel %vm822_vm4, %v8888_v51, %v8967_v60  ;;  %v1729_v51 = vsel %vm762_vm5, %v8814_v13, %v8846_v55  ;;  %v1619_v13 = vsel %vm706_vm6, %v8812_v4, %v8826_v19 }
 0x24b   : > { %2631 = vmatpush.msrb.mxu1 %v8655_v0  ;;  %2617 = vmatpush.msra.mxu3 %v2321_v63 }
 0x24c   : > { %2586 = vmatpush.msra.mxu2 %v1895_v21 }
 0x24d   : > { %2192 = vrot.lane.b32.xlu2 %v9015_v34, %s8105_s21  ;;  %1970 = vrot.lane.b32.xlu1 %v8739_v40, %s8107_s2 }
 0x24e   : > { %2312 = vrot.lane.b32.xlu0 %v8715_v29, %s8104_s20  ;;  %2632 = vmatpush.msrb.mxu1 %v8593_v30  ;;  %v1848_v30 = vsel %vm822_vm4, %v8802_v9, %v9000_v22 }
 0x24f   : > { %v9030_v0 = vpop.permute.xlu1 %2188  ;;  %v9032_v1 = vpop.permute.xlu2 %1494  ;;  %2587 = vmatpush.msra.mxu2 %v1855_v58 }
 0x250   : > { %v9037_v56 = vpop.permute.xlu0 %2092  ;;  %2633 = vmatpush.msrb.mxu1 %v1856_v57 }
 0x251   : > { %2588 = vmatpush.msra.mxu2 %v1847_v23 }
 0x252   : > { %2634 = vmatpush.msrb.mxu1 %v1848_v30  ;;  %v9161_v30 = vld [vmem:[%s13177_s5 + $0x10] sm:$0xff] }
 0x253   : > { %2589 = vmatpush.msra.mxu2 %v1736_v35 }
 0x255   : > { %2098 = vrot.lane.b32.xlu2 %v8983_v41, %s8106_s22  ;;  %1612 = vrot.lane.b32.xlu1 %v8715_v29, %s8110_s25 }
 0x256   : > { %2082 = vrot.lane.b32.xlu0 %v9015_v34, %s8106_s22  ;;  %2590 = vmatpush.msra.mxu2 %v1729_v51 }
 0x257   : > { %v9057_v9 = vpop.permute.xlu1 %2204  ;;  %v9059_v10 = vpop.permute.xlu2 %1982 }
 0x258   : > { %v9061_v59 = vpop.permute.xlu0 %2076  ;;  %2591 = vmatpush.msra.mxu2 %v1626_v61 }
 0x25a   : > { %2592 = vmatpush.msra.mxu2 %v1619_v13  ;;  %v9172_v13 = vld [vmem:[#allocation2 + $0x30] sm:$0xff] }
 0x25d   : > { %1596 = vrot.lane.b32.xlu2 %v8699_v14, %s8110_s25  ;;  %1594 = vrot.lane.b32.xlu1 %v9066_v46, %s8110_s25 }
 0x25e   : > { %1502 = vrot.lane.b32.xlu0 %v8715_v29, %s8111_s26  ;;  %v9092_v29 = vld [vmem:[%s13177_s5 + $0x8] sm:$0xff] }
 0x25f   : > { %v9074_v54 = vpop.permute.xlu1 %2094  ;;  %v9076_v44 = vpop.permute.xlu2 %1480  ;;  %7417 = vmatmul.msk.f32.vlgmr.msra.gmra.mxu3 %vm2526_vm13, %v9092_v29  ;;  %7415 = vmatmul.msk.f32.vlgmr.msra.gmra.mxu1 %vm2526_vm13, %v9092_v29 }
 0x260   : > { %v9078_v62 = vpop.permute.xlu0 %1496 }
 0x261   : > { %v1516_v5 = vsel %vm650_vm7, %v9032_v1, %v9078_v62 }
 0x262   : > { %2593 = vmatpush.msra.mxu2 %v1516_v5 }
 0x265   : > { %1500 = vrot.lane.b32.xlu2 %v8658_v2, %s8111_s26  ;;  %2296 = vrot.lane.b32.xlu1 %v8699_v14, %s8104_s20 }
 0x266   : > { %1484 = vrot.lane.b32.xlu0 %v9066_v46, %s8111_s26 }
 0x267   : > { %v9094_v6 = vpop.permute.xlu1 %2078  ;;  %v9096_v48 = vpop.permute.xlu2 %1966  ;;  %7418 = vmatmul.msk.f32.gmra.mxu3 %vm2526_vm13, %v9113_v3  ;;  %7416 = vmatmul.msk.f32.gmra.mxu1 %vm2526_vm13, %v9113_v3 }
 0x268   : > { %v9102_v2 = vpop.permute.xlu0 %1984 }
 0x26d   : > { %1988 = vrot.lane.b32.xlu2 %v8983_v41, %s8107_s2  ;;  %1840 = vrot.lane.b32.xlu1 %v8719_v32, %s8108_s23 }
 0x26e   : > { %1972 = vrot.lane.b32.xlu0 %v9015_v34, %s8107_s2 }
 0x26f   : > { %v9115_v28 = vpop.permute.xlu1 %1718  ;;  %v9117_v24 = vpop.permute.xlu2 %2206 }
 0x270   : > { %v1737_v25 = vsel %vm762_vm5, %v8870_v39, %v9115_v28  ;;  %v7983_v45 = vpop.permute.xlu0 %7982 }
 0x271   : > { %v7985_v47 = vunpack.i.h.bf16 %v7983_v45  ;;  %v7984_v63 = vunpack.i.l.bf16 %v7983_v45  ;;  %2635 = vmatpush.msrb.mxu1 %v1737_v25 }
 0x273   : > { %v1625_v21 = vsel %vm706_vm6, %v7984_v63, %v8932_v8  ;;  %v1618_v58 = vsel %vm706_vm6, %v7985_v47, %v8812_v4  ;;  %v9141_v8 = vld [vmem:[%s13177_s5] sm:$0xff] }
 0x274   : > { %2545 = vmatpush.msra.mxu0 %v1625_v21 }
 0x275   : > { %1822 = vrot.lane.b32.xlu2 %v8703_v16, %s8108_s23  ;;  %1486 = vrot.lane.b32.xlu1 %v8699_v14, %s8111_s26 }
 0x276   : > { %1708 = vrot.lane.b32.xlu0 %v8703_v16, %s8109_s24  ;;  %2546 = vmatpush.msra.mxu0 %v1618_v58 }
 0x277   : > { %v9136_v39 = vpop.permute.xlu2 %1592  ;;  %v1479_v57 = vpop.permute.xlu1 %1478 }
 0x278   : > { %v9143_v23 = vpop.permute.xlu0 %1968  ;;  %v1509_v4 = vsel %vm650_vm7, %v1479_v57, %v9076_v44  ;;  %v1620_v45 = vsel %vm706_vm6, %v8826_v19, %v9136_v39 }
 0x279   : > { %2594 = vmatpush.msra.mxu2 %v1509_v4 }
 0x27a   : > { %2595 = vmatmul.f32.vlgmr.msra.gmra.mxu2 %v9141_v8 }
 0x27d   : > { %2314 = vrot.lane.b32.xlu2 %v8719_v32, %s8104_s20  ;;  %1724 = vrot.lane.b32.xlu1 %v8719_v32, %s8109_s24 }
 0x27e   : > { %1842 = vrot.lane.b32.xlu0 %v8752_v49, %s8108_s23 }
 0x27f   : > { %v9154_v14 = vpop.permute.xlu2 %1498  ;;  %v9156_v16 = vpop.permute.xlu1 %1702 }
 0x280   : > { %v9163_v35 = vpop.permute.xlu0 %2310  ;;  %v1730_v51 = vsel %vm762_vm5, %v8846_v55, %v9156_v16 }
 0x281   : > { %v2329_v61 = vsel %vm1063_vm0, %v8998_v17, %v9163_v35  ;;  %2636 = vmatpush.msrb.mxu1 %v1730_v51  ;;  %v2213_v51 = vsel %vm1007_vm1, %v8848_v31, %v8973_v36  ;;  %v9242_v31 = vld [vmem:[#allocation2 + $0x88] sm:$0xff] }
 0x282   : > { %2662 = vmatpush.msrb.mxu3 %v2329_v61  ;;  %2598 = vmatmul.f32.gmra.mxu2 %v9161_v30  ;;  %v2110_v61 = vsel %vm951_vm2, %v8927_v11, %v9037_v56  ;;  %v2214_v11 = vsel %vm1007_vm1, %v8973_v36, %v9030_v0  ;;  %v1993_v36 = vsel %vm895_vm3, %v8880_v43, %v9096_v48 }
 0x283   : > { %v2001_v43 = vsel %vm895_vm3, %v9059_v10, %v9102_v2 }
 0x285   : > { %1614 = vrot.lane.b32.xlu2 %v8719_v32, %s8110_s25  ;;  %2298 = vrot.lane.b32.xlu1 %v9172_v13, %s8104_s20 }
 0x286   : > { %1504 = vrot.lane.b32.xlu0 %v8719_v32, %s8111_s26  ;;  %v1517_v32 = vsel %vm650_vm7, %v9078_v62, %v9154_v14 }
 0x287   : > { %v9180_v55 = vpop.permute.xlu2 %2096  ;;  %v9182_v5 = vpop.permute.xlu1 %1608 }
 0x288   : > { %v9184_v17 = vpop.permute.xlu0 %2190  ;;  %v1627_v25 = vsel %vm706_vm6, %v8945_v15, %v9182_v5 }
 0x289   : > { %2637 = vmatpush.msrb.mxu1 %v1627_v25 }
 0x28b   : > { %2638 = vmatpush.msrb.mxu1 %v1620_v45  ;;  %v2111_v45 = vsel %vm951_vm2, %v9037_v56, %v9074_v54  ;;  %v1994_v56 = vsel %vm895_vm3, %v9096_v48, %v9143_v23  ;;  %v1906_v48 = vld [vmem:[#allocation2 + $0x78] sm:$0xff] }
 0x28d   : > { %1824 = vrot.lane.b32.xlu2 %v8739_v40, %s8108_s23  ;;  %1598 = vrot.lane.b32.xlu1 %v9172_v13, %s8110_s25 }
 0x28e   : > { %1710 = vrot.lane.b32.xlu0 %v8739_v40, %s8109_s24  ;;  %2639 = vmatpush.msrb.mxu1 %v1517_v32  ;;  %v2220_v40 = vsel %vm1007_vm1, %v8900_v20, %v9008_v53 }
 0x28f   : > { %v9201_v15 = vpop.permute.xlu2 %1820  ;;  %v7988_v47 = vpop.permute.xlu1 %7987 }
 0x290   : > { %v9203_v63 = vpop.permute.xlu0 %1836  ;;  %v7989_v19 = vunpack.i.l.bf16 %v7988_v47  ;;  %v7990_v21 = vunpack.i.h.bf16 %v7988_v47  ;;  %v1905_v47 = vld [vmem:[#allocation2 + $0x70] sm:$0xff] }
 0x292   : > { %v1515_v62 = vsel %vm650_vm7, %v7989_v19, %v9032_v1  ;;  %v1508_v58 = vsel %vm650_vm7, %v7990_v21, %v1479_v57  ;;  %v9274_v19 = vld [vmem:[#allocation2 + $0x38] sm:$0xff] }
 0x293   : > { %2547 = vmatpush.msra.mxu0 %v1515_v62 }
 0x295   : > { %1488 = vrot.lane.b32.xlu2 %v9172_v13, %s8111_s26  ;;  %1726 = vrot.lane.b32.xlu1 %v8752_v49, %s8109_s24 }
 0x296   : > { %2318 = vrot.lane.b32.xlu0 %v8983_v41, %s8104_s20  ;;  %2548 = vmatpush.msra.mxu0 %v1508_v58  ;;  %v1898_v58 = vld [vmem:[#allocation2 + $0x28] sm:$0xff] }
 0x297   : > { %v9217_v4 = vpop.permute.xlu2 %1722  ;;  %v9219_v1 = vpop.permute.xlu1 %2294  ;;  %2549 = vmatmul.f32.vlgmr.msra.gmra.mxu0 %v9141_v8 }
 0x298   : > { %v9222_v57 = vpop.permute.xlu0 %1482  ;;  %v2322_v49 = vsel %vm1063_vm0, %v8860_v38, %v9219_v1  ;;  %2671 = vmatpush.msrb.mxu0 %v2220_v40  ;;  %v2221_v38 = vsel %vm1007_vm1, %v9008_v53, %v9057_v9  ;;  %v2000_v53 = vsel %vm895_vm3, %v8947_v52, %v9059_v10  ;;  %v2104_v52 = vsel %vm951_vm2, %v9061_v59, %v9094_v6 }
 0x299   : > { %v1510_v20 = vsel %vm650_vm7, %v9076_v44, %v9222_v57  ;;  %2663 = vmatpush.msrb.mxu3 %v2322_v49  ;;  %v2103_v44 = vsel %vm951_vm2, %v8868_v37, %v9061_v59  ;;  %v1857_v10 = vsel %vm822_vm4, %v8967_v60, %v9203_v63 }
 0x29a   : > { %2672 = vmatpush.msrb.mxu0 %v2213_v51  ;;  %2640 = vmatpush.msrb.mxu1 %v1510_v20 }
 0x29b   : > { %2641 = vmatmul.f32.vlgmr.msrb.gmra.mxu1 %v9141_v8  ;;  %7419 = vmatmul.msk.f32.vlgmr.msrb.gmra.mxu3 %vm2526_vm13, %v9092_v29 }
 0x29c   : > { %2673 = vmatpush.msrb.mxu0 %v2110_v61  ;;  %2717 = vmatpush.msra.mxu3 %v2221_v38  ;;  %v2515_v38 = vld [vmem:[%s13178_s6 + $0x8] sm:$0xff] }
 0x29d   : > { %2316 = vrot.lane.b32.xlu2 %v9242_v31, %s8104_s20  ;;  %1616 = vrot.lane.b32.xlu1 %v9242_v31, %s8110_s25 }
 0x29e   : > { %2302 = vrot.lane.b32.xlu0 %v9015_v34, %s8104_s20  ;;  %2674 = vmatpush.msrb.mxu0 %v2103_v44 }
 0x29f   : > { %v1705_v25 = vpop.permute.xlu2 %1704  ;;  %v9259_v37 = vpop.permute.xlu1 %1838  ;;  %2718 = vmatpush.msra.mxu3 %v2214_v11  ;;  %2552 = vmatmul.f32.gmra.mxu0 %v9161_v30 }
 0x2a0   : > { %v9265_v32 = vpop.permute.xlu0 %2080  ;;  %2675 = vmatpush.msrb.mxu0 %v2000_v53  ;;  %v1858_v60 = vsel %vm822_vm4, %v9203_v63, %v9259_v37  ;;  %v1731_v61 = vsel %vm762_vm5, %v9156_v16, %v1705_v25 }
 0x2a1   : > { %2719 = vmatpush.msra.mxu3 %v2111_v45 }
 0x2a2   : > { %2676 = vmatpush.msrb.mxu0 %v1993_v36 }
 0x2a3   : > { %2720 = vmatpush.msra.mxu3 %v2104_v52  ;;  %2644 = vmatmul.f32.gmra.mxu1 %v9161_v30 }
 0x2a4   : > { %7420 = vmatmul.msk.f32.gmra.mxu3 %vm2526_vm13, %v9113_v3  ;;  %2677 = vmatpush.msrb.mxu0 %v1905_v47 }
 0x2a5   : > { %2300 = vrot.lane.b32.xlu2 %v9274_v19, %s8104_s20  ;;  %1600 = vrot.lane.b32.xlu1 %v9274_v19, %s8110_s25 }
 0x2a6   : > { %1844 = vrot.lane.b32.xlu0 %v8983_v41, %s8108_s23  ;;  %2721 = vmatpush.msra.mxu3 %v2001_v43 }
 0x2a7   : > { %v9290_v59 = vpop.permute.xlu2 %2192  ;;  %v1819_v21 = vpop.permute.xlu1 %1818  ;;  %2678 = vmatpush.msrb.mxu0 %v9066_v46  ;;  %v2514_v46 = vld [vmem:[%s13178_s6] sm:$0xff] }
 0x2a8   : > { %v9296_v62 = vpop.permute.xlu0 %1986  ;;  %2247 = vst.msk [vmem:[#allocation6 + $0x3b8] sm:$0xff] %vm576_vm9, %v9290_v59  ;;  %v1849_v41 = vsel %vm822_vm4, %v9000_v22, %v1819_v21  ;;  %2722 = vmatpush.msra.mxu3 %v1994_v56  ;;  %v1850_v22 = vsel %vm822_vm4, %v1819_v21, %v9201_v15 }
 0x2a9   : > { %2679 = vmatpush.msrb.mxu0 %v1857_v10 }
 0x2aa   : > { %2723 = vmatpush.msra.mxu3 %v1906_v48 }
 0x2ab   : > { %2680 = vmatpush.msrb.mxu0 %v1849_v41 }
 0x2ac   : > { %2724 = vmatpush.msra.mxu3 %v1898_v58 }
 0x2ad   : > { %1490 = vrot.lane.b32.xlu2 %v9274_v19, %s8111_s26  ;;  %1506 = vrot.lane.b32.xlu1 %v9242_v31, %s8111_s26 }
 0x2ae   : > { %2518 = vperm.xlu0 %7970, %v2514_v46   ;;  %2725 = vmatpush.msra.mxu3 %v1858_v60 }
 0x2af   : > { %v9314_v40 = vpop.permute.xlu2 %2098  ;;  %v1721_v49 = vpop.permute.xlu1 %1720 }
 0x2b0   : > { %v9316_v51 = vpop.permute.xlu0 %1706  ;;  %2145 = vst.msk [vmem:[#allocation6 + $0x378] sm:$0xff] %vm576_vm9, %v9314_v40  ;;  %v1738_v63 = vsel %vm762_vm5, %v9115_v28, %v1721_v49  ;;  %v1739_v20 = vsel %vm762_vm5, %v1721_v49, %v9217_v4  ;;  %2726 = vmatpush.msra.mxu3 %v1850_v22 }
 0x2b1   : > { %2681 = vmatpush.msrb.mxu0 %v1738_v63  ;;  %v1732_v44 = vsel %vm762_vm5, %v1705_v25, %v9316_v51 }
 0x2b2   : > { %2727 = vmatpush.msra.mxu3 %v1739_v20 }
 0x2b3   : > { %2682 = vmatpush.msrb.mxu0 %v1731_v61 }
 0x2b4   : > { %2728 = vmatpush.msra.mxu3 %v1732_v44 }
 0x2b5   : > { %2523 = vperm.xlu2 %7969, %v2515_v38   ;;  %1826 = vrot.lane.b32.xlu1 %v9015_v34, %s8108_s23 }
 0x2b7   : > { %v9333_v28 = vpop.permute.xlu2 %1596  ;;  %v9335_v11 = vpop.permute.xlu1 %2208 }
 0x2b8   : > { %v1611_v53 = vpop.permute.xlu0 %1610  ;;  %2255 = vst.msk [vmem:[#allocation6 + $0x3f8] sm:$0xff] %vm576_vm9, %v9335_v11 }
 0x2b9   : > { %v1628_v16 = vsel %vm706_vm6, %v9182_v5, %v1611_v53 }
 0x2ba   : > { %2683 = vmatpush.msrb.mxu0 %v1628_v16 }
 0x2bf   : > { %v1501_v45 = vpop.permute.xlu2 %1500  ;;  %v9341_v25 = vpop.permute.xlu1 %1970 }
 0x2c0   : > { %v2313_v36 = vpop.permute.xlu0 %2312  ;;  %v1518_v48 = vsel %vm650_vm7, %v9154_v14, %v1501_v45  ;;  %v2222_v14 = vsel %vm1007_vm1, %v9057_v9, %v9117_v24  ;;  %v2105_v9 = vsel %vm951_vm2, %v9094_v6, %v9265_v32  ;;  %v1907_v6 = vld [vmem:[#allocation2 + $0x80] sm:$0xff] }
 0x2c1   : > { %v2330_v52 = vsel %vm1063_vm0, %v9163_v35, %v2313_v36 }
 0x2c2   : > { %2708 = vmatpush.msrb.mxu2 %v2330_v52 }
 0x2c7   : > { %v9345_v34 = vpop.permute.xlu2 %1988  ;;  %v9347_v47 = vpop.permute.xlu1 %1612 }
 0x2c8   : > { %v9349_v43 = vpop.permute.xlu0 %2082  ;;  %2035 = vst.msk [vmem:[#allocation6 + $0x2f8] sm:$0xff] %vm576_vm9, %v9345_v34  ;;  %v1629_v5 = vsel %vm706_vm6, %v1611_v53, %v9347_v47 }
 0x2c9   : > { %2137 = vst.msk [vmem:[#allocation6 + $0x338] sm:$0xff] %vm576_vm9, %v9349_v43  ;;  %2729 = vmatpush.msra.mxu3 %v1629_v5  ;;  %v8092_v5 = vld [vmem:[#allocation2] sm:$0xff] }
 0x2cf   : > { %v9357_v56 = vpop.permute.xlu2 %1822  ;;  %v1595_v35 = vpop.permute.xlu1 %1594 }
 0x2d0   : > { %v9359_v21 = vpop.permute.xlu0 %1502  ;;  %v1621_v10 = vsel %vm706_vm6, %v9136_v39, %v1595_v35  ;;  %v1622_v41 = vsel %vm706_vm6, %v1595_v35, %v9333_v28  ;;  %v7991_v35 = vpack.i.bf16 %v8092_v5, %v8092_v5 }
 0x2d1   : > { %2684 = vmatpush.msrb.mxu0 %v1621_v10  ;;  %2730 = vmatpush.msra.mxu3 %v1622_v41  ;;  %v1519_v46 = vsel %vm650_vm7, %v1501_v45, %v9359_v21 }
 0x2d2   : > { %7992 = vrot.lane.b32.xlu1 %v7991_v35, %s8108_s23  ;;  %7997 = vrot.lane.b32.xlu2 %v7991_v35, %s8109_s24 }
 0x2d3   : > { %2685 = vmatpush.msrb.mxu0 %v1518_v48  ;;  %2731 = vmatpush.msra.mxu3 %v1519_v46 }
 0x2d7   : > { %v2315_v58 = vpop.permute.xlu2 %2314  ;;  %v2297_v60 = vpop.permute.xlu1 %2296 }
 0x2d8   : > { %v1485_v22 = vpop.permute.xlu0 %1484  ;;  %v2331_v49 = vsel %vm1063_vm0, %v2313_v36, %v2315_v58  ;;  %v2323_v39 = vsel %vm1063_vm0, %v9219_v1, %v2297_v60  ;;  %v2215_v1 = vsel %vm1007_vm1, %v9030_v0, %v9184_v17  ;;  %v2002_v0 = vsel %vm895_vm3, %v9102_v2, %v9296_v62 }
 0x2d9   : > { %v1511_v63 = vsel %vm650_vm7, %v9222_v57, %v1485_v22  ;;  %2709 = vmatpush.msrb.mxu2 %v2323_v39  ;;  %2754 = vmatpush.msra.mxu1 %v2331_v49  ;;  %v2112_v57 = vsel %vm951_vm2, %v9074_v54, %v9180_v55  ;;  %v1995_v54 = vsel %vm895_vm3, %v9143_v23, %v9341_v25 }
 0x2da   : > { %2686 = vmatpush.msrb.mxu0 %v1511_v63  ;;  %7421 = vmatmul.msk.f32.vlgmr.msrb.gmra.mxu2 %vm2526_vm13, %v9092_v29  ;;  %v1851_v23 = vsel %vm822_vm4, %v9201_v15, %v9357_v56 }
 0x2db   : > { %2687 = vmatmul.f32.vlgmr.msrb.gmra.mxu0 %v9141_v8  ;;  %2763 = vmatpush.msra.mxu2 %v2222_v14  ;;  %v2481_v14 = vld [vmem:[#allocation6 + $0x378] sm:$0xff] }
 0x2dc   : > { %8002 = vrot.lane.b32.xlu1 %v7991_v35, %s8110_s25 }
 0x2dd   : > { %2764 = vmatpush.msra.mxu2 %v2215_v1 }
 0x2df   : > { %v9386_v20 = vpop.permute.xlu2 %1614  ;;  %v9388_v61 = vpop.permute.xlu1 %1840  ;;  %2765 = vmatpush.msra.mxu2 %v2112_v57 }
 0x2e0   : > { %v9393_v38 = vpop.permute.xlu0 %1972  ;;  %v1859_v45 = vsel %vm822_vm4, %v9259_v37, %v9388_v61  ;;  %v1630_v10 = vsel %vm706_vm6, %v9347_v47, %v9386_v20  ;;  %v2216_v47 = vsel %vm1007_vm1, %v9184_v17, %v9290_v59 }
 0x2e1   : > { %2027 = vst.msk [vmem:[#allocation6 + $0x2b8] sm:$0xff] %vm576_vm9, %v9393_v38  ;;  %2766 = vmatpush.msra.mxu2 %v2105_v9  ;;  %v2473_v9 = vld [vmem:[#allocation6 + $0x338] sm:$0xff] }
 0x2e2   : > { %7422 = vmatmul.msk.f32.gmra.mxu2 %vm2526_vm13, %v9113_v3 }
 0x2e3   : > { %2690 = vmatmul.f32.gmra.mxu0 %v9161_v30  ;;  %2767 = vmatpush.msra.mxu2 %v2002_v0 }
 0x2e4   : > { %8007 = vrot.lane.b32.xlu1 %v7991_v35, %s8111_s26 }
 0x2e5   : > { %2768 = vmatpush.msra.mxu2 %v1995_v54 }
 0x2e7   : > { %v9406_v44 = vpop.permute.xlu2 %1824  ;;  %v9408_v53 = vpop.permute.xlu1 %1486  ;;  %2769 = vmatpush.msra.mxu2 %v1907_v6 }
 0x2e8   : > { %v9410_v16 = vpop.permute.xlu0 %1708  ;;  %v1512_v2 = vsel %vm650_vm7, %v1485_v22, %v9408_v53  ;;  %v1852_v0 = vsel %vm822_vm4, %v9357_v56, %v9406_v44  ;;  %v2457_v6 = vld [vmem:[#allocation6 + $0x2b8] sm:$0xff] }
 0x2e9   : > { %2770 = vmatpush.msra.mxu2 %v9172_v13  ;;  %2732 = vmatpush.msra.mxu3 %v1512_v2  ;;  %v1733_v15 = vsel %vm762_vm5, %v9316_v51, %v9410_v16  ;;  %v2223_v51 = vsel %vm1007_vm1, %v9117_v24, %v9335_v11  ;;  %v2106_v24 = vsel %vm951_vm2, %v9265_v32, %v9349_v43  ;;  %v2497_v32 = vld [vmem:[#allocation6 + $0x3f8] sm:$0xff]  ;;  %v9482_v43 = vpop.f32.mrf.mxu3 }
 0x2ea   : > { %2733 = vmatmul.f32.vlgmr.msra.gmra.mxu3 %v9141_v8 }
 0x2eb   : > { %2771 = vmatpush.msra.mxu2 %v1859_v45  ;;  %v2449_v45 = vld [vmem:[#allocation6 + $0x278] sm:$0xff] }
 0x2ed   : > { %2772 = vmatpush.msra.mxu2 %v1851_v23 }
 0x2ef   : > { %v9422_v36 = vpop.permute.xlu2 %1488  ;;  %v9424_v52 = vpop.permute.xlu1 %1724 }
 0x2f0   : > { %v9426_v13 = vpop.permute.xlu0 %1842  ;;  %v1740_v37 = vsel %vm762_vm5, %v9217_v4, %v9424_v52 }
 0x2f1   : > { %2773 = vmatpush.msra.mxu2 %v1740_v37 }
 0x2f2   : > { %2736 = vmatmul.f32.gmra.mxu3 %v9161_v30 }
 0x2f3   : > { %2774 = vmatpush.msra.mxu2 %v1733_v15 }
 0x2f5   : > { %2775 = vmatpush.msra.mxu2 %v1630_v10  ;;  %v2441_v10 = vld [vmem:[#allocation6 + $0x238] sm:$0xff] }
 0x2f7   : > { %v2317_v41 = vpop.permute.xlu2 %2316  ;;  %v2299_v48 = vpop.permute.xlu1 %2298 }
 0x2f8   : > { %v9440_v4 = vpop.permute.xlu0 %1504  ;;  %v2332_v46 = vsel %vm1063_vm0, %v2315_v58, %v2317_v41  ;;  %v2324_v22 = vsel %vm1063_vm0, %v2297_v60, %v2299_v48  ;;  %v2113_v58 = vsel %vm951_vm2, %v9180_v55, %v9314_v40  ;;  %v2003_v55 = vsel %vm895_vm3, %v9296_v62, %v9345_v34  ;;  %v2489_v62 = vld [vmem:[#allocation6 + $0x3b8] sm:$0xff] }
 0x2f9   : > { %2755 = vmatpush.msra.mxu1 %v2324_v22  ;;  %2800 = vmatpush.msra.mxu0 %v2332_v46  ;;  %v1520_v59 = vsel %vm650_vm7, %v9359_v21, %v9440_v4  ;;  %v1513_v34 = vsel %vm650_vm7, %v9408_v53, %v9422_v36  ;;  %v9489_v21 = vpop.f32.mrf.mxu1 }
 0x2fa   : > { %7423 = vmatmul.msk.f32.vlgmr.msra.gmra.mxu1 %vm2526_vm13, %v9092_v29 }
 0x2fb   : > { %2809 = vmatpush.msrb.mxu1 %v2223_v51 }
 0x2fd   : > { %2810 = vmatpush.msrb.mxu1 %v2216_v47  ;;  %v9477_v40 = vpop.f32.mrf.mxu2 }
 0x2ff   : > { %v9456_v60 = vpop.permute.xlu2 %2300  ;;  %v9458_v49 = vpop.permute.xlu1 %1598  ;;  %2811 = vmatpush.msrb.mxu1 %v2113_v58 }
 0x300   : > { %v1711_v11 = vpop.permute.xlu0 %1710  ;;  %v2325_v39 = vsel %vm1063_vm0, %v2299_v48, %v9456_v60  ;;  %v1623_v17 = vsel %vm706_vm6, %v9333_v28, %v9458_v49  ;;  %v1996_v28 = vsel %vm895_vm3, %v9341_v25, %v9393_v38  ;;  %v1860_v38 = vsel %vm822_vm4, %v9388_v61, %v9426_v13  ;;  %v2622_v61 = vpop.f32.mrf.mxu3 }
 0x301   : > { %1765 = vst.msk [vmem:[#allocation6 + $0x138] sm:$0xff] %vm576_vm9, %v1711_v11  ;;  %2812 = vmatpush.msrb.mxu1 %v2106_v24  ;;  %2776 = vmatpush.msra.mxu2 %v1623_v17  ;;  %v1734_v56 = vsel %vm762_vm5, %v9410_v16, %v1711_v11  ;;  %v2576_v37 = vpop.f32.mrf.mxu1 }
 0x302   : > { %2801 = vmatpush.msra.mxu0 %v2325_v39  ;;  %7424 = vmatmul.msk.f32.gmra.mxu1 %vm2526_vm13, %v9113_v3 }
 0x303   : > { %2813 = vmatpush.msrb.mxu1 %v2003_v55  ;;  %2777 = vmatpush.msra.mxu2 %v1520_v59 }
 0x304   : > { %2855 = vmatpush.msrb.mxu0 %v2497_v32 }
 0x305   : > { %7425 = vmatmul.msk.f32.vlgmr.msra.gmra.mxu0 %vm2526_vm13, %v9092_v29  ;;  %2814 = vmatpush.msrb.mxu1 %v1996_v28  ;;  %v2599_v54 = vpop.f32.mrf.mxu2 }
 0x306   : > { %2856 = vmatpush.msrb.mxu0 %v2489_v62  ;;  %2778 = vmatpush.msra.mxu2 %v1513_v34 }
 0x307   : > { %v9492_v63 = vpop.permute.xlu2 %1490  ;;  %v1727_v25 = vpop.permute.xlu1 %1726  ;;  %2779 = vmatmul.f32.vlgmr.msra.gmra.mxu2 %v9141_v8  ;;  %2815 = vmatpush.msrb.mxu1 %v9242_v31  ;;  %v2465_v31 = vld [vmem:[#allocation6 + $0x2f8] sm:$0xff] }
 0x308   : > { %v2319_v1 = vpop.permute.xlu0 %2318  ;;  %1545 = vst.msk [vmem:[#allocation6 + $0x38] sm:$0xff] %vm576_vm9, %v9492_v63  ;;  %2857 = vmatpush.msrb.mxu0 %v2481_v14  ;;  %v1514_v34 = vsel %vm650_vm7, %v9422_v36, %v9492_v63 }
 0x309   : > { %v2333_v57 = vsel %vm1063_vm0, %v2317_v41, %v2319_v1  ;;  %2365 = vst.msk [vmem:[#allocation6 + $0x478] sm:$0xff] %vm576_vm9, %v2319_v1  ;;  %2816 = vmatpush.msrb.mxu1 %v9274_v19  ;;  %v1741_v19 = vsel %vm762_vm5, %v9424_v52, %v1727_v25 }
 0x30a   : > { %1773 = vst.msk [vmem:[#allocation6 + $0x178] sm:$0xff] %vm576_vm9, %v1727_v25  ;;  %2858 = vmatpush.msrb.mxu0 %v2473_v9  ;;  %2846 = vmatpush.msrb.mxu3 %v2333_v57 }
 0x30b   : > { %2817 = vmatpush.msrb.mxu1 %v1860_v38 }
 0x30c   : > { %2859 = vmatpush.msrb.mxu0 %v2465_v31 }
 0x30d   : > { %2818 = vmatpush.msrb.mxu1 %v1852_v0  ;;  %7426 = vmatmul.msk.f32.gmra.mxu0 %vm2526_vm13, %v9113_v3 }
 0x30e   : > { %2860 = vmatpush.msrb.mxu0 %v2457_v6 }
 0x30f   : > { %v9512_v53 = vpop.permute.xlu2 %2523  ;;  %v1617_v2 = vpop.permute.xlu1 %1616  ;;  %2782 = vmatmul.f32.gmra.mxu2 %v9161_v30  ;;  %2819 = vmatpush.msrb.mxu1 %v1741_v19 }
 0x310   : > { %v2303_v23 = vpop.permute.xlu0 %2302  ;;  %v2600_v5 = vadd.f32 %v2599_v54, %v9512_v53  ;;  %v1631_v35 = vsel %vm706_vm6, %v9386_v20, %v1617_v2  ;;  %1663 = vst.msk [vmem:[#allocation6 + $0xf8] sm:$0xff] %vm576_vm9, %v1617_v2  ;;  %v2513_v52 = vld [vmem:[#allocation6 + $0x478] sm:$0xff]  ;;  %2861 = vmatpush.msrb.mxu0 %v2449_v45 }
 0x311   : > { %v2326_v15 = vsel %vm1063_vm0, %v9456_v60, %v2303_v23  ;;  %2357 = vst.msk [vmem:[#allocation6 + $0x438] sm:$0xff] %vm576_vm9, %v2303_v23  ;;  %2892 = vmatpush.msrb.mxu2 %v2513_v52  ;;  %2820 = vmatpush.msrb.mxu1 %v1734_v56  ;;  %v2417_v23 = vld [vmem:[#allocation6 + $0x178] sm:$0xff] }
 0x312   : > { %v2623_v16 = vadd.f32 %v2622_v61, %v2600_v5  ;;  %2862 = vmatpush.msrb.mxu0 %v2441_v10  ;;  %2847 = vmatpush.msrb.mxu3 %v2326_v15  ;;  %v2377_v10 = vld [vmem:[#allocation6 + $0x38] sm:$0xff] }
 0x313   : > { %2821 = vmatpush.msrb.mxu1 %v1631_v35  ;;  %7427 = vmatmul.msk.f32.vlgmr.msrb.gmra.mxu3 %vm2526_vm13, %v9092_v29  ;;  %v2409_v35 = vld [vmem:[#allocation6 + $0x138] sm:$0xff] }
 0x314   : > { %vm2910_vm14 = vcmp.gt.f32.partialorder %v2623_v16, 0.0  ;;  %v2926_v20 = vmul.f32 0.01, %v2623_v16  ;;  %v2550_v41 = vpop.f32.mrf.mxu0 }
 0x316   : > { %v2942_v48 = vsel %vm2910_vm14, %v2623_v16, %v2926_v20 }
 0x317   : > { %v9527_v46 = vmul.f32 %v2942_v48, %v8598_v33  ;;  %v1601_v22 = vpop.permute.xlu1 %1600 }
 0x318   : > { %v1845_v51 = vpop.permute.xlu0 %1844  ;;  %v1624_v47 = vsel %vm706_vm6, %v9458_v49, %v1601_v22  ;;  %1655 = vst.msk [vmem:[#allocation6 + $0xb8] sm:$0xff] %vm576_vm9, %v1601_v22  ;;  %v2505_v58 = vld [vmem:[#allocation6 + $0x438] sm:$0xff]  ;;  %v2642_v24 = vpop.f32.mrf.mxu1 }
 0x319   : > { %v1861_v60 = vsel %vm822_vm4, %v9426_v13, %v1845_v51  ;;  %2893 = vmatpush.msrb.mxu2 %v2505_v58  ;;  %2822 = vmatpush.msrb.mxu1 %v1624_v47 }
 0x31a   : > { %1893 = vst.msk [vmem:[#allocation6 + $0x1f8] sm:$0xff] %vm576_vm9, %v1861_v60  ;;  %7429 = vmatmul.msk.f32.vlgmr.msrb.gmra.mxu2 %vm2526_vm13, %v9092_v29 }
 0x31b   : > { %7428 = vmatmul.msk.f32.gmra.mxu3 %vm2526_vm13, %v9113_v3 }
 0x31c   : > { %v2553_v11 = vpop.f32.mrf.mxu0 }
 0x31d   : > { %v2554_v49 = vadd.f32 %v2553_v11, %v9512_v53 }
 0x31e   : > { %v2665_v39 = vpop.f32.mrf.mxu3 }
 0x31f   : > { %v1507_v17 = vpop.permute.xlu1 %1506  ;;  %v2577_v55 = vadd.f32 %v2576_v37, %v2554_v49  ;;  %v2393_v37 = vld [vmem:[#allocation6 + $0xb8] sm:$0xff] }
 0x320   : > { %v9540_v32 = vpop.permute.xlu0 %2518  ;;  %v1521_v13 = vsel %vm650_vm7, %v9440_v4, %v1507_v17  ;;  %1553 = vst.msk [vmem:[#allocation6 + $0x78] sm:$0xff] %vm576_vm9, %v1507_v17  ;;  %v2645_v57 = vpop.f32.mrf.mxu1 }
 0x321   : > { %v2551_v59 = vadd.f32 %v2550_v41, %v9540_v32  ;;  %v2597_v29 = vadd.f32 %v9477_v40, %v9540_v32  ;;  %v2643_v28 = vadd.f32 %v2642_v24, %v9540_v32  ;;  %v2433_v62 = vld [vmem:[#allocation6 + $0x1f8] sm:$0xff]  ;;  %vm2909_vm15 = vcmp.gt.f32.partialorder %v2577_v55, 0.0  ;;  %2823 = vmatpush.msrb.mxu1 %v1521_v13 }
 0x322   : > { %2863 = vmatpush.msrb.mxu0 %v2433_v62  ;;  %v2925_v25 = vmul.f32 0.01, %v2577_v55  ;;  %7430 = vmatmul.msk.f32.gmra.mxu2 %vm2526_vm13, %v9113_v3 }
 0x323   : > { %v2574_v4 = vadd.f32 %v9489_v21, %v2551_v59  ;;  %v2620_v14 = vadd.f32 %v9482_v43, %v2597_v29  ;;  %v2666_v1 = vadd.f32 %v2665_v39, %v2643_v28  ;;  %2824 = vmatpush.msrb.mxu1 %v1514_v34  ;;  %v2646_v21 = vadd.f32 %v2645_v57, %v9512_v53 }
 0x324   : > { %v2941_v40 = vsel %vm2909_vm15, %v2577_v55, %v2925_v25  ;;  %2825 = vmatmul.f32.vlgmr.msrb.gmra.mxu1 %v9141_v8 }
 0x325   : > { %vm2901_vm8 = vcmp.gt.f32.partialorder %v2574_v4, 0.0  ;;  %vm2902_vm10 = vcmp.gt.f32.partialorder %v2620_v14, 0.0  ;;  %v2917_v9 = vmul.f32 0.01, %v2574_v4  ;;  %v2918_v38 = vmul.f32 0.01, %v2620_v14 }
 0x326   : > { %v9558_v36 = vmul.f32 %v2941_v40, %v8618_v42  ;;  %vm2903_vm11 = vcmp.gt.f32.partialorder %v2666_v1, 0.0  ;;  %v2919_v63 = vmul.f32 0.01, %v2666_v1 }
 0x327   : > { %v2933_v3 = vsel %vm2901_vm8, %v2574_v4, %v2917_v9  ;;  %v2934_v31 = vsel %vm2902_vm10, %v2620_v14, %v2918_v38  ;;  %v1827_v43 = vpop.permute.xlu1 %1826  ;;  %v2668_v0 = vpop.f32.mrf.mxu3  ;;  %v2385_v15 = vld [vmem:[#allocation6 + $0x78] sm:$0xff] }
 0x328   : > { %v9562_v54 = vmul.f32 %v2933_v3, %v8618_v42  ;;  %v9565_v6 = vmul.f32 %v2934_v31, %v8598_v33  ;;  %v2935_v19 = vsel %vm2903_vm11, %v2666_v1, %v2919_v63  ;;  %v1853_v61 = vsel %vm822_vm4, %v9406_v44, %v1827_v43  ;;  %3731 = vrot.lane.b32.xlu1 %v9558_v36, %s8105_s21 }
 0x329   : > { %v9570_v2 = vmul.f32 %v2935_v19, %v8590_v27  ;;  %1885 = vst.msk [vmem:[#allocation6 + $0x1b8] sm:$0xff] %vm576_vm9, %v1853_v61  ;;  %v2669_v45 = vadd.f32 %v2668_v0, %v2646_v21 }
 0x32a   : > { %3715 = vrot.lane.b32.xlu0 %v9562_v54, %s8105_s21 }
 0x32b   : > { %vm2911_vm12 = vcmp.gt.f32.partialorder %v2669_v45, 0.0  ;;  %v2927_v42 = vmul.f32 0.01, %v2669_v45  ;;  %3719 = vrot.lane.b32.xlu2 %v9570_v2, %s8105_s21  ;;  %2967 = vst [vmem:[#allocation3 + $0x18] sm:$0xff] %v9570_v2 }
 0x32c   : > { %2828 = vmatmul.f32.gmra.mxu1 %v9161_v30  ;;  %v9662_v62 = vpop.permute.xlu2 %7997 }
 0x32d   : > { %v2943_v33 = vsel %vm2911_vm12, %v2669_v45, %v2927_v42 }
 0x32e   : > { %v9582_v44 = vmul.f32 %v2943_v33, %v8590_v27  ;;  %v2401_v27 = vld [vmem:[#allocation6 + $0xf8] sm:$0xff] }
 0x330   : > { %2975 = vst [vmem:[#allocation3 + $0x68] sm:$0xff] %v9582_v44  ;;  %v2425_v56 = vld [vmem:[#allocation6 + $0x1b8] sm:$0xff]  ;;  %3717 = vrot.lane.b32.xlu1 %v9565_v6, %s8105_s21 }
 0x331   : > { %2864 = vmatpush.msrb.mxu0 %v2425_v56 }
 0x332   : > { %3605 = vrot.lane.b32.xlu0 %v9562_v54, %s8106_s22  ;;  %v9591_v5 = vld [vmem:[#allocation3 + $0x18] sm:$0xff] }
 0x333   : > { %2865 = vmatpush.msrb.mxu0 %v2417_v23  ;;  %3609 = vrot.lane.b32.xlu2 %v9570_v2, %s8106_s22 }
 0x335   : > { %2866 = vmatpush.msrb.mxu0 %v2409_v35 }
 0x337   : > { %2867 = vmatpush.msrb.mxu0 %v2401_v27  ;;  %v9593_v52 = vld [vmem:[#allocation3 + $0x68] sm:$0xff] }
 0x338   : > { %3607 = vrot.lane.b32.xlu1 %v9565_v6, %s8106_s22 }
 0x339   : > { %2868 = vmatpush.msrb.mxu0 %v2393_v37 }
 0x33a   : > { %3495 = vrot.lane.b32.xlu0 %v9562_v54, %s8107_s2 }
 0x33b   : > { %2869 = vmatpush.msrb.mxu0 %v2385_v15  ;;  %3367 = vrot.lane.b32.xlu2 %v9558_v36, %s8108_s23 }
 0x33d   : > { %2870 = vmatpush.msrb.mxu0 %v2377_v10 }
 0x33e   : > { %2871 = vmatmul.f32.vlgmr.msrb.gmra.mxu0 %v9141_v8 }
 0x340   : > { %3497 = vrot.lane.b32.xlu1 %v9565_v6, %s8107_s2 }
 0x342   : > { %3349 = vrot.lane.b32.xlu0 %v9562_v54, %s8108_s23 }
 0x343   : > { %3141 = vrot.lane.b32.xlu2 %v9558_v36, %s8110_s25 }
 0x344   : > { %v9667_v4 = vpop.permute.xlu1 %7992 }
 0x346   : > { %2874 = vmatmul.f32.gmra.mxu0 %v9161_v30 }
 0x348   : > { %3351 = vrot.lane.b32.xlu1 %v9565_v6, %s8108_s23 }
 0x34a   : > { %3235 = vrot.lane.b32.xlu0 %v9562_v54, %s8109_s24 }
 0x34b   : > { %3031 = vrot.lane.b32.xlu2 %v9558_v36, %s8111_s26 }
 0x34e   : > { %v9683_v31 = vpop.permute.xlu1 %8002 }
 0x350   : > { %3623 = vrot.lane.b32.xlu1 %v9527_v46, %s8106_s22 }
 0x352   : > { %3125 = vrot.lane.b32.xlu0 %v9562_v54, %s8110_s25 }
 0x353   : > { %3735 = vrot.lane.b32.xlu2 %v9582_v44, %s8105_s21 }
 0x356   : > { %v9702_v33 = vpop.permute.xlu1 %8007 }
 0x358   : > { %v2688_v8 = vpop.f32.mrf.mxu0  ;;  %3513 = vrot.lane.b32.xlu1 %v9527_v46, %s8107_s2 }
 0x359   : > { %v2689_v30 = vadd.f32 %v2688_v8, %v9540_v32 }
 0x35a   : > { %3499 = vrot.lane.b32.xlu0 %v9570_v2, %s8107_s2 }
 0x35b   : > { %3625 = vrot.lane.b32.xlu2 %v9582_v44, %s8106_s22 }
 0x35d   : > { %v2711_v16 = vpop.f32.mrf.mxu2 }
 0x35e   : > { %v2712_v20 = vadd.f32 %v2711_v16, %v2689_v30 }
 0x360   : > { %vm2904_vm14 = vcmp.gt.f32.partialorder %v2712_v20, 0.0  ;;  %v2920_v41 = vmul.f32 0.01, %v2712_v20  ;;  %v2691_v48 = vpop.f32.mrf.mxu0  ;;  %3369 = vrot.lane.b32.xlu1 %v9527_v46, %s8108_s23 }
 0x361   : > { %v2692_v47 = vadd.f32 %v2691_v48, %v9512_v53 }
 0x362   : > { %v2936_v22 = vsel %vm2904_vm14, %v2712_v20, %v2920_v41  ;;  %3621 = vrot.lane.b32.xlu0 %v9558_v36, %s8106_s22 }
 0x363   : > { %v9633_v51 = vmul.f32 %v2936_v22, %v8612_v18  ;;  %3515 = vrot.lane.b32.xlu2 %v9582_v44, %s8107_s2 }
 0x365   : > { %2968 = vst [vmem:[#allocation3 + $0x20] sm:$0xff] %v9633_v51  ;;  %v2714_v58 = vpop.f32.mrf.mxu2 }
 0x366   : > { %v2715_v60 = vadd.f32 %v2714_v58, %v2692_v47 }
 0x368   : > { %vm2912_vm15 = vcmp.gt.f32.partialorder %v2715_v60, 0.0  ;;  %v2928_v24 = vmul.f32 0.01, %v2715_v60  ;;  %3253 = vrot.lane.b32.xlu1 %v9527_v46, %s8109_s24 }
 0x36a   : > { %v2944_v11 = vsel %vm2912_vm15, %v2715_v60, %v2928_v24  ;;  %3511 = vrot.lane.b32.xlu0 %v9558_v36, %s8107_s2 }
 0x36b   : > { %v9644_v49 = vmul.f32 %v2944_v11, %v8612_v18  ;;  %3733 = vrot.lane.b32.xlu2 %v9527_v46, %s8105_s21 }
 0x36c   : > { %v9648_v39 = vld [vmem:[#allocation3 + $0x20] sm:$0xff] }
 0x36d   : > { %2976 = vst [vmem:[#allocation3 + $0x70] sm:$0xff] %v9644_v49  ;;  %v2734_v17 = vpop.f32.mrf.mxu3 }
 0x36e   : > { %v2735_v13 = vadd.f32 %v2734_v17, %v9540_v32 }
 0x370   : > { %3143 = vrot.lane.b32.xlu1 %v9527_v46, %s8110_s25 }
 0x372   : > { %3251 = vrot.lane.b32.xlu0 %v9558_v36, %s8109_s24 }
 0x374   : > { %v9655_v55 = vld [vmem:[#allocation3 + $0x70] sm:$0xff] }
 0x375   : > { %v2737_v28 = vpop.f32.mrf.mxu3 }
 0x376   : > { %v2738_v14 = vadd.f32 %v2737_v28, %v9512_v53 }
 0x377   : > { %v2757_v18 = vpop.f32.mrf.mxu1 }
 0x378   : > { %v2758_v59 = vadd.f32 %v2757_v18, %v2735_v13  ;;  %3627 = vrot.lane.b32.xlu1 %v9644_v49, %s8106_s22 }
 0x37a   : > { %vm2905_vm8 = vcmp.gt.f32.partialorder %v2758_v59, 0.0  ;;  %v2921_v29 = vmul.f32 0.01, %v2758_v59  ;;  %3237 = vrot.lane.b32.xlu0 %v9565_v6, %s8109_s24 }
 0x37c   : > { %v2937_v34 = vsel %vm2905_vm8, %v2758_v59, %v2921_v29 }
 0x37d   : > { %v9665_v25 = vmul.f32 %v2937_v34, %v8691_v7 }
 0x37f   : > { %2969 = vst [vmem:[#allocation3 + $0x28] sm:$0xff] %v9665_v25  ;;  %v2760_v1 = vpop.f32.mrf.mxu1  ;;  %3723 = vrot.lane.b32.xlu2 %v9665_v25, %s8105_s21 }
 0x380   : > { %v2761_v40 = vadd.f32 %v2760_v1, %v2738_v14  ;;  %3517 = vrot.lane.b32.xlu1 %v9644_v49, %s8107_s2 }
 0x382   : > { %vm2913_vm10 = vcmp.gt.f32.partialorder %v2761_v40, 0.0  ;;  %v2929_v57 = vmul.f32 0.01, %v2761_v40  ;;  %v2803_v21 = vpop.f32.mrf.mxu0 }
 0x384   : > { %v2945_v9 = vsel %vm2913_vm10, %v2761_v40, %v2929_v57 }
 0x385   : > { %v9676_v38 = vmul.f32 %v2945_v9, %v8691_v7  ;;  %v9678_v63 = vpop.permute.xlu2 %3719 }
 0x386   : > { %v9680_v3 = vld [vmem:[#allocation3 + $0x28] sm:$0xff] }
 0x387   : > { %2977 = vst [vmem:[#allocation3 + $0x78] sm:$0xff] %v9676_v38  ;;  %3721 = vrot.lane.b32.xlu2 %v9633_v51, %s8105_s21  ;;  %3739 = vrot.lane.b32.xlu0 %v9676_v38, %s8105_s21 }
 0x388   : > { %3033 = vrot.lane.b32.xlu1 %v9527_v46, %s8111_s26 }
 0x38a   : > { %v2780_v7 = vpop.f32.mrf.mxu2  ;;  %v2806_v35 = vpop.f32.mrf.mxu0 }
 0x38b   : > { %v2781_v43 = vadd.f32 %v2780_v7, %v9540_v32 }
 0x38d   : > { %v2804_v0 = vadd.f32 %v2803_v21, %v2781_v43  ;;  %v9692_v19 = vpop.permute.xlu2 %3609 }
 0x38e   : > { %v9694_v61 = vld [vmem:[#allocation3 + $0x78] sm:$0xff] }
 0x38f   : > { %vm2906_vm11 = vcmp.gt.f32.partialorder %v2804_v0, 0.0  ;;  %v2922_v45 = vmul.f32 0.01, %v2804_v0  ;;  %3611 = vrot.lane.b32.xlu2 %v9633_v51, %s8106_s22  ;;  %3629 = vrot.lane.b32.xlu0 %v9676_v38, %s8106_s22 }
 0x390   : > { %3017 = vrot.lane.b32.xlu1 %v9565_v6, %s8111_s26 }
 0x391   : > { %v2938_v42 = vsel %vm2906_vm11, %v2804_v0, %v2922_v45 }
 0x392   : > { %v9705_v56 = vmul.f32 %v2938_v42, %v8696_v12  ;;  %v2783_v23 = vpop.f32.mrf.mxu2 }
 0x393   : > { %v2784_v27 = vadd.f32 %v2783_v23, %v9512_v53 }
 0x394   : > { %2970 = vst [vmem:[#allocation3 + $0x30] sm:$0xff] %v9705_v56 }
 0x395   : > { %v2807_v37 = vadd.f32 %v2806_v35, %v2784_v27  ;;  %v9709_v15 = vpop.permute.xlu2 %3367 }
 0x396   : > { %v2849_v22 = vpop.f32.mrf.mxu3 }
 0x397   : > { %vm2914_vm12 = vcmp.gt.f32.partialorder %v2807_v37, 0.0  ;;  %v2930_v10 = vmul.f32 0.01, %v2807_v37  ;;  %3737 = vrot.lane.b32.xlu2 %v9644_v49, %s8105_s21  ;;  %3127 = vrot.lane.b32.xlu0 %v9565_v6, %s8110_s25 }
 0x398   : > { %3841 = vrot.lane.b32.xlu1 %v9558_v36, %s8104_s20 }
 0x399   : > { %v2946_v8 = vsel %vm2914_vm12, %v2807_v37, %v2930_v10 }
 0x39a   : > { %v9718_v30 = vmul.f32 %v2946_v8, %v8696_v12  ;;  %v9720_v16 = vpop.permute.xlu1 %3731 }
 0x39b   : > { %v9722_v20 = vld [vmem:[#allocation3 + $0x30] sm:$0xff] }
 0x39c   : > { %2978 = vst [vmem:[#allocation3 + $0x80] sm:$0xff] %v9718_v30  ;;  %v9725_v41 = vpop.permute.xlu0 %3715 }
 0x39d   : > { %v9727_v48 = vpop.permute.xlu2 %3141 }
 0x39e   : > { %v2852_v28 = vpop.f32.mrf.mxu3 }
 0x39f   : > { %3613 = vrot.lane.b32.xlu2 %v9665_v25, %s8106_s22  ;;  %3015 = vrot.lane.b32.xlu0 %v9562_v54, %s8111_s26 }
 0x3a1   : > { %v2826_v47 = vpop.f32.mrf.mxu1 }
 0x3a2   : > { %v2827_v12 = vadd.f32 %v2826_v47, %v9540_v32  ;;  %v9734_v58 = vpop.permute.xlu1 %3717 }
 0x3a3   : > { %v9736_v60 = vld [vmem:[#allocation3 + $0x80] sm:$0xff] }
 0x3a4   : > { %v2850_v24 = vadd.f32 %v2849_v22, %v2827_v12  ;;  %v9738_v11 = vpop.permute.xlu0 %3605 }
 0x3a5   : > { %v9740_v17 = vpop.permute.xlu2 %3031 }
 0x3a6   : > { %vm2907_vm14 = vcmp.gt.f32.partialorder %v2850_v24, 0.0  ;;  %v2923_v13 = vmul.f32 0.01, %v2850_v24 }
 0x3a7   : > { %3501 = vrot.lane.b32.xlu2 %v9633_v51, %s8107_s2  ;;  %3519 = vrot.lane.b32.xlu0 %v9676_v38, %s8107_s2 }
 0x3a8   : > { %v2939_v18 = vsel %vm2907_vm14, %v2850_v24, %v2923_v13  ;;  %vm4749_vm14 = vcmask 1043456  }
 0x3a9   : > { %v9747_v59 = vmul.f32 %v2939_v18, %v8730_v26  ;;  %v2829_v29 = vpop.f32.mrf.mxu1 }
 0x3aa   : > { %v2830_v34 = vadd.f32 %v2829_v29, %v9512_v53  ;;  %v9751_v14 = vpop.permute.xlu1 %3607 }
 0x3ab   : > { %2971 = vst [vmem:[#allocation3 + $0x38] sm:$0xff] %v9747_v59 }
 0x3ac   : > { %v2853_v1 = vadd.f32 %v2852_v28, %v2830_v34  ;;  %v9753_v40 = vpop.permute.xlu0 %3495 }
 0x3ad   : > { %v9755_v57 = vpop.permute.xlu2 %3735 }
 0x3ae   : > { %vm2915_vm15 = vcmp.gt.f32.partialorder %v2853_v1, 0.0  ;;  %v2931_v9 = vmul.f32 0.01, %v2853_v1 }
 0x3af   : > { %3503 = vrot.lane.b32.xlu2 %v9665_v25, %s8107_s2  ;;  %3741 = vrot.lane.b32.xlu0 %v9718_v30, %s8105_s21 }
 0x3b0   : > { %v2947_v21 = vsel %vm2915_vm15, %v2853_v1, %v2931_v9 }
 0x3b1   : > { %v9762_v7 = vmul.f32 %v2947_v21, %v8730_v26  ;;  %v2895_v26 = vpop.f32.mrf.mxu2 }
 0x3b2   : > { %v9764_v43 = vld [vmem:[#allocation3 + $0x38] sm:$0xff]  ;;  %v9767_v0 = vpop.permute.xlu1 %3497 }
 0x3b3   : > { %2979 = vst [vmem:[#allocation3 + $0x88] sm:$0xff] %v9762_v7  ;;  %3743 = vrot.lane.b32.xlu1 %v9762_v7, %s8105_s21 }
 0x3b4   : > { %v9771_v45 = vpop.permute.xlu0 %3349  ;;  %3453 = vst [vmem:[#allocation6 + $0x230] sm:$0xff] %v9764_v43 }
 0x3b5   : > { %v9774_v42 = vpop.permute.xlu2 %3625 }
 0x3b7   : > { %3843 = vrot.lane.b32.xlu2 %v9527_v46, %s8104_s20  ;;  %3725 = vrot.lane.b32.xlu0 %v9705_v56, %s8105_s21 }
 0x3b9   : > { %v2898_v24 = vpop.f32.mrf.mxu2 }
 0x3ba   : > { %v9780_v23 = vld [vmem:[#allocation3 + $0x88] sm:$0xff]  ;;  %v9782_v27 = vpop.permute.xlu1 %3351 }
 0x3bb   : > { %v2872_v35 = vpop.f32.mrf.mxu0  ;;  %3845 = vrot.lane.b32.xlu1 %v9582_v44, %s8104_s20  ;;  %3461 = vst [vmem:[#allocation6 + $0x270] sm:$0xff] %v9780_v23 }
 0x3bc   : > { %v2873_v37 = vadd.f32 %v2872_v35, %v9540_v32  ;;  %v9788_v10 = vpop.permute.xlu0 %3235 }
 0x3bd   : > { %v9790_v8 = vpop.permute.xlu2 %3515 }
 0x3be   : > { %v2896_v22 = vadd.f32 %v2895_v26, %v2873_v37  ;;  %v3747_v26 = vsel %vm1007_vm1, %v9725_v41, %v9734_v58 }
 0x3bf   : > { %3825 = vrot.lane.b32.xlu2 %v9562_v54, %s8104_s20  ;;  %3827 = vrot.lane.b32.xlu0 %v9565_v6, %s8104_s20 }
 0x3c0   : > { %vm2908_vm8 = vcmp.gt.f32.partialorder %v2896_v22, 0.0  ;;  %v2924_v47 = vmul.f32 0.01, %v2896_v22 }
 0x3c2   : > { %v2940_v12 = vsel %vm2908_vm8, %v2896_v22, %v2924_v47  ;;  %v3624_v29 = vpop.permute.xlu1 %3623 }
 0x3c3   : > { %v2956_v13 = vmul.f32 %v2940_v12, %v8756_v50  ;;  %v2875_v18 = vpop.f32.mrf.mxu0  ;;  %3727 = vrot.lane.b32.xlu1 %v9747_v59, %s8105_s21  ;;  %v3645_v22 = vsel %vm951_vm2, %v3624_v29, %v9774_v42 }
 0x3c4   : > { %v2876_v32 = vadd.f32 %v2875_v18, %v9512_v53  ;;  %v9800_v28 = vpop.permute.xlu0 %3125 }
 0x3c5   : > { %2972 = vst.msk [vmem:[#allocation3 + $0x40] sm:$0xff] %vm576_vm9, %v2956_v13  ;;  %v3734_v34 = vpop.permute.xlu2 %3733 }
 0x3c6   : > { %v2899_v1 = vadd.f32 %v2898_v24, %v2876_v32  ;;  %v3754_v9 = vsel %vm1007_vm1, %v9720_v16, %v3734_v34  ;;  %v3755_v21 = vsel %vm1007_vm1, %v3734_v34, %v9755_v57  ;;  %v3748_v16 = vsel %vm1007_vm1, %v9734_v58, %v9678_v63 }
 0x3c7   : > { %3371 = vrot.lane.b32.xlu2 %v9582_v44, %s8108_s23  ;;  %3631 = vrot.lane.b32.xlu0 %v9718_v30, %s8106_s22  ;;  %v3638_v58 = vsel %vm951_vm2, %v9751_v14, %v9692_v19 }
 0x3c8   : > { %vm2916_vm10 = vcmp.gt.f32.partialorder %v2899_v1, 0.0  ;;  %v2932_v53 = vmul.f32 0.01, %v2899_v1  ;;  %4069 = vmatpush.msra.mxu3 %v3754_v9  ;;  %4115 = vmatpush.msra.mxu2 %v3755_v21  ;;  %v3527_v21 = vsel %vm895_vm3, %v9753_v40, %v9767_v0 }
 0x3ca   : > { %v2948_v35 = vsel %vm2916_vm10, %v2899_v1, %v2932_v53  ;;  %4070 = vmatpush.msra.mxu3 %v3747_v26  ;;  %4116 = vmatpush.msra.mxu2 %v3748_v16  ;;  %v3514_v47 = vpop.permute.xlu1 %3513  ;;  %v3637_v1 = vsel %vm951_vm2, %v9738_v11, %v9751_v14  ;;  %v7994_v53 = vunpack.i.l.bf16 %v9667_v4 }
 0x3cb   : > { %v2964_v37 = vmul.f32 %v2948_v35, %v8756_v50  ;;  %3373 = vrot.lane.b32.xlu1 %v9644_v49, %s8108_s23  ;;  %v3535_v50 = vsel %vm895_vm3, %v3514_v47, %v9790_v8 }
 0x3cc   : > { %v9822_v12 = vpop.permute.xlu0 %3499  ;;  %4117 = vmatpush.msra.mxu2 %v3645_v22  ;;  %v3438_v41 = vld [vmem:[#allocation3 + $0x40] sm:$0xff] }
 0x3cd   : > { %2980 = vst.msk [vmem:[#allocation3 + $0x90] sm:$0xff] %vm576_vm9, %v2964_v37  ;;  %v3528_v24 = vsel %vm895_vm3, %v9767_v0, %v9822_v12  ;;  %v7995_v37 = vunpack.i.h.bf16 %v9667_v4  ;;  %v8004_v4 = vunpack.i.l.bf16 %v9683_v31 }
 0x3ce   : > { %4118 = vmatpush.msra.mxu2 %v3638_v58  ;;  %3454 = vst.msk [vmem:[#allocation6 + $0x238] sm:$0xff] %vm576_vm9, %v3438_v41 }
 0x3cf   : > { %3829 = vrot.lane.b32.xlu2 %v9570_v2, %s8104_s20  ;;  %3353 = vrot.lane.b32.xlu0 %v9570_v2, %s8108_s23 }
 0x3d0   : > { %4119 = vmatpush.msra.mxu2 %v3535_v50 }
 0x3d2   : > { %4120 = vmatpush.msra.mxu2 %v3528_v24  ;;  %v9838_v13 = vpop.permute.xlu1 %3369 }
 0x3d3   : > { %3255 = vrot.lane.b32.xlu1 %v9582_v44, %s8109_s24  ;;  %v3392_v9 = vsel %vm822_vm4, %v9709_v15, %v9838_v13 }
 0x3d4   : > { %v3622_v18 = vpop.permute.xlu0 %3621  ;;  %4121 = vmatpush.msra.mxu2 %v9527_v46  ;;  %v3446_v32 = vld [vmem:[#allocation3 + $0x90] sm:$0xff]  ;;  %v3384_v46 = vsel %vm822_vm4, %v9771_v45, %v9782_v27 }
 0x3d5   : > { %v3644_v34 = vsel %vm951_vm2, %v3622_v18, %v3624_v29  ;;  %3462 = vst.msk [vmem:[#allocation6 + $0x278] sm:$0xff] %vm576_vm9, %v3446_v32  ;;  %v8005_v18 = vunpack.i.h.bf16 %v9683_v31  ;;  %v3162_v32 = vsel %vm706_vm6, %v8004_v4, %v9727_v48 }
 0x3d6   : > { %4071 = vmatpush.msra.mxu3 %v3644_v34  ;;  %4122 = vmatpush.msra.mxu2 %v9565_v6 }
 0x3d7   : > { %3615 = vrot.lane.b32.xlu2 %v9705_v56, %s8106_s22  ;;  %3633 = vrot.lane.b32.xlu0 %v9762_v7, %s8106_s22 }
 0x3d8   : > { %4072 = vmatpush.msra.mxu3 %v3637_v1  ;;  %4123 = vmatpush.msra.mxu2 %v3392_v9  ;;  %v3155_v1 = vsel %vm706_vm6, %v8005_v18, %v9800_v28 }
 0x3d9   : > { %v9859_v6 = vpop.permute.xlu2 %3723 }
 0x3da   : > { %4124 = vmatpush.msra.mxu2 %v3384_v46  ;;  %v9861_v11 = vpop.permute.xlu1 %3253 }
 0x3db   : > { %3617 = vrot.lane.b32.xlu1 %v9747_v59, %s8106_s22 }
 0x3dc   : > { %v3512_v14 = vpop.permute.xlu0 %3511 }
 0x3dd   : > { %v3534_v29 = vsel %vm895_vm3, %v3512_v14, %v3514_v47  ;;  %v3383_v47 = vsel %vm822_vm4, %v7995_v37, %v9771_v45 }
 0x3de   : > { %4073 = vmatpush.msra.mxu3 %v3534_v29 }
 0x3df   : > { %3355 = vrot.lane.b32.xlu2 %v9633_v51, %s8108_s23  ;;  %3521 = vrot.lane.b32.xlu0 %v9718_v30, %s8107_s2 }
 0x3e0   : > { %4074 = vmatpush.msra.mxu3 %v3527_v21 }
 0x3e1   : > { %v3722_v26 = vpop.permute.xlu2 %3721 }
 0x3e2   : > { %v9876_v16 = vsel %vm1007_vm1, %v9678_v63, %v3722_v26  ;;  %v9880_v35 = vsel %vm1007_vm1, %v3722_v26, %v9859_v6  ;;  %4075 = vmatpush.msra.mxu3 %v9558_v36  ;;  %v9883_v40 = vpop.permute.xlu1 %3143  ;;  %v3391_v63 = vsel %vm822_vm4, %v7994_v53, %v9709_v15  ;;  %v7999_v36 = vunpack.i.l.bf16 %v9662_v62 }
 0x3e3   : > { %3505 = vrot.lane.b32.xlu1 %v9705_v56, %s8107_s2 }
 0x3e4   : > { %v3252_v0 = vpop.permute.xlu0 %3251  ;;  %4076 = vmatpush.msra.mxu3 %v9562_v54  ;;  %v8000_v54 = vunpack.i.h.bf16 %v9662_v62 }
 0x3e5   : > { %v3273_v22 = vsel %vm762_vm5, %v3252_v0, %v9861_v11  ;;  %v3272_v15 = vsel %vm762_vm5, %v7999_v36, %v3252_v0 }
 0x3e6   : > { %4077 = vmatpush.msra.mxu3 %v3391_v63  ;;  %4125 = vmatpush.msra.mxu2 %v3273_v22  ;;  %v3265_v45 = vsel %vm762_vm5, %v8000_v54, %v9788_v10  ;;  %v8010_v54 = vunpack.i.h.bf16 %v9702_v33 }
 0x3e7   : > { %3239 = vrot.lane.b32.xlu2 %v9570_v2, %s8109_s24  ;;  %3257 = vrot.lane.b32.xlu0 %v9644_v49, %s8109_s24 }
 0x3e8   : > { %4078 = vmatpush.msra.mxu3 %v3383_v47 }
 0x3e9   : > { %v3612_v41 = vpop.permute.xlu2 %3611 }
 0x3ea   : > { %v9905_v58 = vsel %vm951_vm2, %v9692_v19, %v3612_v41  ;;  %4079 = vmatpush.msra.mxu3 %v3272_v15  ;;  %v3628_v50 = vpop.permute.xlu1 %3627  ;;  %v8009_v19 = vunpack.i.l.bf16 %v9702_v33 }
 0x3eb   : > { %3241 = vrot.lane.b32.xlu1 %v9633_v51, %s8109_s24  ;;  %v9915_v62 = vsel %vm951_vm2, %v9774_v42, %v3628_v50  ;;  %v3163_v42 = vsel %vm706_vm6, %v9727_v48, %v9883_v40 }
 0x3ec   : > { %v9911_v24 = vpop.permute.xlu0 %3237  ;;  %4080 = vmatpush.msra.mxu3 %v3265_v45  ;;  %v3052_v31 = vsel %vm650_vm7, %v8009_v19, %v9740_v17 }
 0x3ed   : > { %v3266_v34 = vsel %vm762_vm5, %v9788_v10, %v9911_v24 }
 0x3ee   : > { %4081 = vmatpush.msra.mxu3 %v3162_v32  ;;  %4126 = vmatpush.msra.mxu2 %v3266_v34  ;;  %v10034_v34 = vld [vmem:[#allocation3 + $0x40] sm:$0xff] }
 0x3ef   : > { %3523 = vrot.lane.b32.xlu2 %v9762_v7, %s8107_s2  ;;  %3145 = vrot.lane.b32.xlu0 %v9582_v44, %s8110_s25 }
 0x3f0   : > { %4082 = vmatpush.msra.mxu3 %v3155_v1  ;;  %4127 = vmatpush.msra.mxu2 %v3163_v42 }
 0x3f1   : > { %v3738_v10 = vpop.permute.xlu2 %3737 }
 0x3f2   : > { %v9937_v9 = vsel %vm1007_vm1, %v9755_v57, %v3738_v10  ;;  %4083 = vmatpush.msra.mxu3 %v3052_v31  ;;  %v3518_v46 = vpop.permute.xlu1 %3517 }
 0x3f3   : > { %3129 = vrot.lane.b32.xlu1 %v9570_v2, %s8110_s25  ;;  %v9943_v48 = vsel %vm895_vm3, %v9790_v8, %v3518_v46 }
 0x3f7   : > { %3507 = vrot.lane.b32.xlu2 %v9747_v59, %s8107_s2  ;;  %3847 = vrot.lane.b32.xlu0 %v9644_v49, %s8104_s20 }
 0x3f9   : > { %v9949_v14 = vpop.permute.xlu2 %3613  ;;  %v3740_v29 = vpop.permute.xlu0 %3739 }
 0x3fa   : > { %v9953_v57 = vsel %vm951_vm2, %v3612_v41, %v9949_v14  ;;  %v9956_v21 = vsel %vm1007_vm1, %v3738_v10, %v3740_v29  ;;  %v9960_v8 = vpop.permute.xlu1 %3033 }
 0x3fb   : > { %3849 = vrot.lane.b32.xlu1 %v9676_v38, %s8104_s20 }
 0x3ff   : > { %3147 = vrot.lane.b32.xlu2 %v9644_v49, %s8110_s25  ;;  %3831 = vrot.lane.b32.xlu0 %v9633_v51, %s8104_s20 }
 0x401   : > { %v3502_v53 = vpop.permute.xlu2 %3501  ;;  %v9966_v26 = vpop.permute.xlu0 %3629 }
 0x402   : > { %v9970_v0 = vsel %vm895_vm3, %v9822_v12, %v3502_v53  ;;  %v9974_v37 = vsel %vm951_vm2, %v3628_v50, %v9966_v26  ;;  %v9978_v63 = vpop.permute.xlu1 %3017  ;;  %v10019_v50 = vld [vmem:[#allocation3 + $0x90] sm:$0xff] }
 0x403   : > { %3375 = vrot.lane.b32.xlu1 %v9676_v38, %s8108_s23 }
 0x407   : > { %3035 = vrot.lane.b32.xlu2 %v9582_v44, %s8111_s26  ;;  %3131 = vrot.lane.b32.xlu0 %v9633_v51, %s8110_s25  ;;  %v3053_v44 = vsel %vm650_vm7, %v9740_v17, %v9960_v8 }
 0x409   : > { %v9984_v22 = vpop.permute.xlu2 %3503  ;;  %v9986_v36 = vpop.permute.xlu0 %3127 }
 0x40a   : > { %v9990_v12 = vsel %vm895_vm3, %v3502_v53, %v9984_v22  ;;  %v3156_v47 = vsel %vm706_vm6, %v9800_v28, %v9986_v36  ;;  %v3842_v4 = vpop.permute.xlu1 %3841  ;;  %v10067_v53 = vld [vmem:[%s13179_s7] sm:$0xff] }
 0x40b   : > { %3037 = vrot.lane.b32.xlu1 %v9644_v49, %s8111_s26  ;;  %4128 = vmatpush.msra.mxu2 %v3156_v47 }
 0x40d   : > { %4129 = vmatpush.msra.mxu2 %v3053_v44 }
 0x40f   : > { %3833 = vrot.lane.b32.xlu2 %v9665_v25, %s8104_s20  ;;  %3019 = vrot.lane.b32.xlu0 %v9570_v2, %s8111_s26 }
 0x411   : > { %v3844_v15 = vpop.permute.xlu2 %3843  ;;  %v3016_v28 = vpop.permute.xlu0 %3015 }
 0x412   : > { %v3864_v41 = vsel %vm1063_vm0, %v3842_v4, %v3844_v15  ;;  %v3045_v49 = vsel %vm650_vm7, %v8010_v54, %v3016_v28  ;;  %v3046_v45 = vsel %vm650_vm7, %v3016_v28, %v9978_v63 }
 0x413   : > { %3021 = vrot.lane.b32.xlu1 %v9633_v51, %s8111_s26  ;;  %4084 = vmatpush.msra.mxu3 %v3045_v49 }
 0x414   : > { %4106 = vmatpush.msra.mxu1 %v3864_v41  ;;  %4130 = vmatpush.msra.mxu2 %v3046_v45 }
 0x415   : > { %4085 = vmatmul.f32.vlgmr.msra.gmra.mxu3 %v10067_v53  ;;  %4131 = vmatmul.f32.vlgmr.msra.gmra.mxu2 %v10067_v53 }
 0x417   : > { %3357 = vrot.lane.b32.xlu2 %v9665_v25, %s8108_s23  ;;  %3377 = vrot.lane.b32.xlu0 %v9718_v30, %s8108_s23 }
 0x419   : > { %v3826_v2 = vpop.permute.xlu2 %3825  ;;  %v10015_v33 = vpop.permute.xlu0 %3519 }
 0x41a   : > { %v3537_v17 = vsel %vm895_vm3, %v3518_v46, %v10015_v33 }
 0x41b   : > { %3745 = vrot.lane.b32.xlu1 %v10019_v50, %s8105_s21 }
 0x41f   : > { %3259 = vrot.lane.b32.xlu2 %v9676_v38, %s8109_s24  ;;  %3359 = vrot.lane.b32.xlu0 %v9705_v56, %s8108_s23 }
 0x421   : > { %v3372_v51 = vpop.permute.xlu2 %3371  ;;  %v3742_v18 = vpop.permute.xlu0 %3741 }
 0x422   : > { %v10029_v19 = vsel %vm822_vm4, %v9838_v13, %v3372_v51  ;;  %v10032_v32 = vsel %vm1007_vm1, %v3740_v29, %v3742_v18 }
 0x423   : > { %3729 = vrot.lane.b32.xlu1 %v10034_v34, %s8105_s21  ;;  %s13191_s21 = smov 111  }
 0x425   : > { %v10038_v1 = vpop.permute.xlu1 %3743 }
 0x426   : > { %v10042_v42 = vsel %vm1007_vm1, %v3742_v18, %v10038_v1 }
 0x427   : > { %3243 = vrot.lane.b32.xlu2 %v9665_v25, %s8109_s24  ;;  %3261 = vrot.lane.b32.xlu0 %v9718_v30, %s8109_s24 }
 0x429   : > { %v10048_v13 = vpop.permute.xlu2 %3829  ;;  %v3726_v31 = vpop.permute.xlu0 %3725 }
 0x42a   : > { %v10052_v10 = vsel %vm1007_vm1, %v9859_v6, %v3726_v31 }
 0x42b   : > { %3635 = vrot.lane.b32.xlu1 %v10019_v50, %s8106_s22 }
 0x42d   : > { %v10056_v46 = vpop.permute.xlu1 %3845 }
 0x42e   : > { %v3865_v29 = vsel %vm1063_vm0, %v3844_v15, %v10056_v46 }
 0x42f   : > { %3149 = vrot.lane.b32.xlu2 %v9676_v38, %s8110_s25  ;;  %3245 = vrot.lane.b32.xlu0 %v9705_v56, %s8109_s24 }
 0x430   : > { %4152 = vmatpush.msra.mxu0 %v3865_v29 }
 0x431   : > { %v10070_v6 = vpop.permute.xlu2 %3615  ;;  %v3828_v47 = vpop.permute.xlu0 %3827 }
 0x432   : > { %v10076_v44 = vsel %vm951_vm2, %v9949_v14, %v10070_v6  ;;  %v3857_v54 = vsel %vm1063_vm0, %v3826_v2, %v3828_v47  ;;  %v3858_v4 = vsel %vm1063_vm0, %v3828_v47, %v10048_v13 }
 0x433   : > { %3619 = vrot.lane.b32.xlu1 %v10034_v34, %s8106_s22  ;;  %4107 = vmatpush.msra.mxu1 %v3857_v54  ;;  %s8114_s22 = smov 113  }
 0x434   : > { %4153 = vmatpush.msra.mxu0 %v3858_v4 }
 0x435   : > { %4161 = vmatpush.msrb.mxu1 %v9937_v9  ;;  %v10084_v15 = vpop.permute.xlu1 %3727  ;;  %v10101_v9 = vld [vmem:[%s13179_s7 + $0x10] sm:$0xff] }
 0x436   : > { %4207 = vmatpush.msrb.mxu0 %v9956_v21  ;;  %v10089_v14 = vsel %vm1007_vm1, %v3726_v31, %v10084_v15  ;;  %v10106_v21 = vld [vmem:[%s13179_s7 + $0x8] sm:$0xff]  ;;  %4088 = vmatmul.f32.gmra.mxu3 %v10101_v9 }
 0x437   : > { %4162 = vmatpush.msrb.mxu1 %v9876_v16  ;;  %3133 = vrot.lane.b32.xlu2 %v9665_v25, %s8110_s25 }
 0x438   : > { %3151 = vrot.lane.b32.xlu0 %v9718_v30, %s8110_s25  ;;  %4208 = vmatpush.msrb.mxu0 %v9880_v35 }
 0x439   : > { %4163 = vmatpush.msrb.mxu1 %v9915_v62  ;;  %v10108_v16 = vpop.permute.xlu2 %3355  ;;  %v3632_v28 = vpop.permute.xlu0 %3631  ;;  %4134 = vmatmul.f32.gmra.mxu2 %v10101_v9 }
 0x43a   : > { %7431 = vmatmul.msk.f32.vlgmr.msra.gmra.mxu1 %vm2526_vm13, %v10106_v21  ;;  %v10115_v35 = vsel %vm951_vm2, %v9966_v26, %v3632_v28  ;;  %4209 = vmatpush.msrb.mxu0 %v9974_v37 }
 0x43b   : > { %4164 = vmatpush.msrb.mxu1 %v9905_v58  ;;  %3525 = vrot.lane.b32.xlu1 %v10019_v50, %s8107_s2  ;;  %v10138_v58 = vld [vmem:[%s13179_s7 + $0x18] sm:$0xff] }
 0x43c   : > { %4210 = vmatpush.msrb.mxu0 %v9953_v57 }
 0x43d   : > { %4165 = vmatpush.msrb.mxu1 %v9943_v48  ;;  %v10124_v62 = vpop.permute.xlu1 %3373  ;;  %7433 = vmatmul.msk.f32.vlgmr.msra.gmra.mxu0 %vm2526_vm13, %v10106_v21 }
 0x43e   : > { %v3394_v26 = vsel %vm822_vm4, %v3372_v51, %v10124_v62  ;;  %4211 = vmatpush.msrb.mxu0 %v3537_v17 }
 0x43f   : > { %4166 = vmatpush.msrb.mxu1 %v9970_v0  ;;  %3039 = vrot.lane.b32.xlu2 %v9676_v38, %s8111_s26 }
 0x440   : > { %3135 = vrot.lane.b32.xlu0 %v9705_v56, %s8110_s25  ;;  %4212 = vmatpush.msrb.mxu0 %v9990_v12 }
 0x441   : > { %4167 = vmatpush.msrb.mxu1 %v9593_v52  ;;  %v3240_v48 = vpop.permute.xlu2 %3239  ;;  %v3354_v57 = vpop.permute.xlu0 %3353 }
 0x442   : > { %7432 = vmatmul.msk.f32.gmra.mxu1 %vm2526_vm13, %v10138_v58  ;;  %v3267_v38 = vsel %vm762_vm5, %v9911_v24, %v3240_v48  ;;  %v3385_v0 = vsel %vm822_vm4, %v9782_v27, %v3354_v57  ;;  %v3386_v37 = vsel %vm822_vm4, %v3354_v57, %v10108_v16  ;;  %4213 = vmatpush.msrb.mxu0 %v9655_v55 }
 0x443   : > { %4168 = vmatpush.msrb.mxu1 %v9591_v5  ;;  %3509 = vrot.lane.b32.xlu1 %v10034_v34, %s8107_s2 }
 0x444   : > { %4214 = vmatpush.msrb.mxu0 %v9648_v39 }
 0x445   : > { %4169 = vmatpush.msrb.mxu1 %v10029_v19  ;;  %v3256_v52 = vpop.permute.xlu1 %3255  ;;  %7434 = vmatmul.msk.f32.gmra.mxu0 %vm2526_vm13, %v10138_v58 }
 0x446   : > { %v3274_v27 = vsel %vm762_vm5, %v9861_v11, %v3256_v52  ;;  %4215 = vmatpush.msrb.mxu0 %v3394_v26 }
 0x447   : > { %4170 = vmatpush.msrb.mxu1 %v3385_v0  ;;  %3023 = vrot.lane.b32.xlu2 %v9665_v25, %s8111_s26 }
 0x448   : > { %3041 = vrot.lane.b32.xlu0 %v9718_v30, %s8111_s26  ;;  %4216 = vmatpush.msrb.mxu0 %v3386_v37 }
 0x449   : > { %4171 = vmatpush.msrb.mxu1 %v3274_v27  ;;  %v10164_v5 = vpop.permute.xlu2 %3523  ;;  %v10166_v39 = vpop.permute.xlu0 %3633 }
 0x44a   : > { %v10170_v55 = vsel %vm951_vm2, %v3632_v28, %v10166_v39 }
 0x44b   : > { %4172 = vmatpush.msrb.mxu1 %v3267_v38  ;;  %3835 = vrot.lane.b32.xlu1 %v9705_v56, %s8104_s20 }
 0x44d   : > { %v10174_v11 = vpop.permute.xlu1 %3617 }
 0x44e   : > { %v10179_v25 = vsel %vm951_vm2, %v10070_v6, %v10174_v11 }
 0x44f   : > { %3025 = vrot.lane.b32.xlu2 %v9705_v56, %s8111_s26 }
 0x450   : > { %3851 = vrot.lane.b32.xlu0 %v9718_v30, %s8104_s20 }
 0x451   : > { %v10185_v24 = vpop.permute.xlu2 %3507  ;;  %v3522_v12 = vpop.permute.xlu0 %3521 }
 0x452   : > { %v10189_v41 = vsel %vm895_vm3, %v10015_v33, %v3522_v12  ;;  %v10193_v49 = vsel %vm895_vm3, %v3522_v12, %v10164_v5 }
 0x453   : > { %3837 = vrot.lane.b32.xlu1 %v9747_v59, %s8104_s20 }
 0x455   : > { %v3506_v45 = vpop.permute.xlu1 %3505 }
 0x456   : > { %v10199_v56 = vsel %vm895_vm3, %v9984_v22, %v3506_v45  ;;  %v10203_v30 = vsel %vm895_vm3, %v3506_v45, %v10185_v24 }
 0x457   : > { %3853 = vrot.lane.b32.xlu2 %v9762_v7, %s8104_s20 }
 0x458   : > { %3379 = vrot.lane.b32.xlu0 %v9762_v7, %s8108_s23 }
 0x459   : > { %v10209_v2 = vpop.permute.xlu2 %3147  ;;  %v3258_v33 = vpop.permute.xlu0 %3257 }
 0x45a   : > { %v3275_v17 = vsel %vm762_vm5, %v3256_v52, %v3258_v33 }
 0x45b   : > { %3263 = vrot.lane.b32.xlu1 %v9762_v7, %s8109_s24  ;;  %4217 = vmatpush.msrb.mxu0 %v3275_v17 }
 0x45d   : > { %v10214_v22 = vpop.permute.xlu1 %3241 }
 0x45e   : > { %v3268_v51 = vsel %vm762_vm5, %v3240_v48, %v10214_v22 }
 0x45f   : > { %3361 = vrot.lane.b32.xlu2 %v9747_v59, %s8108_s23  ;;  %4218 = vmatpush.msrb.mxu0 %v3268_v51 }
 0x460   : > { %3381 = vrot.lane.b32.xlu0 %v10019_v50, %s8108_s23 }
 0x461   : > { %v3036_v18 = vpop.permute.xlu2 %3035  ;;  %v3146_v19 = vpop.permute.xlu0 %3145 }
 0x462   : > { %v3054_v31 = vsel %vm650_vm7, %v9960_v8, %v3036_v18  ;;  %v3164_v29 = vsel %vm706_vm6, %v9883_v40, %v3146_v19  ;;  %v3165_v6 = vsel %vm706_vm6, %v3146_v19, %v10209_v2 }
 0x463   : > { %3153 = vrot.lane.b32.xlu1 %v9762_v7, %s8110_s25  ;;  %4173 = vmatpush.msrb.mxu1 %v3164_v29 }
 0x464   : > { %4219 = vmatpush.msrb.mxu0 %v3165_v6 }
 0x465   : > { %v3130_v59 = vpop.permute.xlu1 %3129 }
 0x466   : > { %v3157_v47 = vsel %vm706_vm6, %v9986_v36, %v3130_v59 }
 0x467   : > { %3363 = vrot.lane.b32.xlu2 %v10034_v34, %s8108_s23  ;;  %4174 = vmatpush.msrb.mxu1 %v3157_v47 }
 0x468   : > { %3247 = vrot.lane.b32.xlu0 %v9764_v43, %s8109_s24 }
 0x469   : > { %v10236_v40 = vpop.permute.xlu2 %3833  ;;  %v3848_v8 = vpop.permute.xlu0 %3847  ;;  %4175 = vmatpush.msrb.mxu1 %v3054_v31 }
 0x46a   : > { %v3866_v54 = vsel %vm1063_vm0, %v10056_v46, %v3848_v8  ;;  %v4051_v46 = vld [vmem:[%s13180_s8] sm:$0xff] }
 0x46b   : > { %3839 = vrot.lane.b32.xlu1 %v10034_v34, %s8104_s20  ;;  %4198 = vmatpush.msrb.mxu3 %v3866_v54 }
 0x46d   : > { %v10242_v7 = vpop.permute.xlu1 %3849 }
 0x46e   : > { %v3867_v36 = vsel %vm1063_vm0, %v3848_v8, %v10242_v7 }
 0x46f   : > { %3855 = vrot.lane.b32.xlu2 %v10019_v50, %s8104_s20  ;;  %4244 = vmatpush.msrb.mxu2 %v3867_v36 }
 0x470   : > { %3137 = vrot.lane.b32.xlu0 %v9764_v43, %s8110_s25 }
 0x471   : > { %v10253_v4 = vpop.permute.xlu2 %3357  ;;  %v3832_v34 = vpop.permute.xlu0 %3831 }
 0x472   : > { %v3387_v28 = vsel %vm822_vm4, %v10108_v16, %v10253_v4  ;;  %v3859_v26 = vsel %vm1063_vm0, %v10048_v13, %v3832_v34  ;;  %v3860_v50 = vsel %vm1063_vm0, %v3832_v34, %v10236_v40 }
 0x473   : > { %4055 = vperm.xlu1 %8011, %v4051_v46   ;;  %4199 = vmatpush.msrb.mxu3 %v3859_v26 }
 0x474   : > { %4245 = vmatpush.msrb.mxu2 %v3860_v50  ;;  %7435 = vmatmul.msk.f32.vlgmr.msrb.gmra.mxu3 %vm2526_vm13, %v10106_v21 }
 0x475   : > { %4253 = vmatpush.msra.mxu3 %v10032_v32  ;;  %v3376_v48 = vpop.permute.xlu1 %3375  ;;  %7437 = vmatmul.msk.f32.vlgmr.msrb.gmra.mxu2 %vm2526_vm13, %v10106_v21 }
 0x476   : > { %4299 = vmatpush.msra.mxu2 %v10042_v42  ;;  %v3395_v16 = vsel %vm822_vm4, %v10124_v62, %v3376_v48 }
 0x477   : > { %4254 = vmatpush.msra.mxu3 %v10052_v10  ;;  %3043 = vrot.lane.b32.xlu2 %v9780_v23, %s8111_s26  ;;  %v4052_v23 = vld [vmem:[%s13180_s8 + $0x8] sm:$0xff] }
 0x478   : > { %3027 = vrot.lane.b32.xlu0 %v9764_v43, %s8111_s26  ;;  %4300 = vmatpush.msra.mxu2 %v10089_v14 }
 0x479   : > { %4255 = vmatpush.msra.mxu3 %v10115_v35  ;;  %v3260_v32 = vpop.permute.xlu2 %3259  ;;  %v3132_v42 = vpop.permute.xlu0 %3131 }
 0x47a   : > { %v3276_v13 = vsel %vm762_vm5, %v3258_v33, %v3260_v32  ;;  %v3158_v62 = vsel %vm706_vm6, %v3130_v59, %v3132_v42  ;;  %4301 = vmatpush.msra.mxu2 %v10170_v55 }
 0x47b   : > { %4256 = vmatpush.msra.mxu3 %v10076_v44  ;;  %4220 = vmatpush.msrb.mxu0 %v3158_v62 }
 0x47c   : > { %4302 = vmatpush.msra.mxu2 %v10179_v25  ;;  %7436 = vmatmul.msk.f32.gmra.mxu3 %vm2526_vm13, %v10138_v58 }
 0x47d   : > { %4257 = vmatpush.msra.mxu3 %v10189_v41  ;;  %v3038_v43 = vpop.permute.xlu1 %3037  ;;  %7438 = vmatmul.msk.f32.gmra.mxu2 %vm2526_vm13, %v10138_v58 }
 0x47e   : > { %v3055_v10 = vsel %vm650_vm7, %v3036_v18, %v3038_v43  ;;  %4303 = vmatpush.msra.mxu2 %v10193_v49 }
 0x47f   : > { %4258 = vmatpush.msra.mxu3 %v10199_v56  ;;  %4060 = vperm.xlu2 %7969, %v4052_v23  }
 0x480   : > { %4221 = vmatpush.msrb.mxu0 %v3055_v10  ;;  %4304 = vmatpush.msra.mxu2 %v10203_v30 }
 0x481   : > { %4259 = vmatpush.msra.mxu3 %v9694_v61  ;;  %v3244_v44 = vpop.permute.xlu2 %3243  ;;  %v3020_v14 = vpop.permute.xlu0 %3019 }
 0x482   : > { %v3269_v35 = vsel %vm762_vm5, %v10214_v22, %v3244_v44  ;;  %v3047_v57 = vsel %vm650_vm7, %v9978_v63, %v3020_v14  ;;  %4305 = vmatpush.msra.mxu2 %v9736_v60 }
 0x483   : > { %4260 = vmatpush.msra.mxu3 %v9680_v3  ;;  %4176 = vmatpush.msrb.mxu1 %v3047_v57 }
 0x484   : > { %4306 = vmatpush.msra.mxu2 %v9722_v20  ;;  %4177 = vmatmul.f32.vlgmr.msrb.gmra.mxu1 %v10067_v53 }
 0x485   : > { %v3022_v61 = vpop.permute.xlu1 %3021  ;;  %4261 = vmatpush.msra.mxu3 %v3395_v16 }
 0x486   : > { %v3048_v38 = vsel %vm650_vm7, %v3020_v14, %v3022_v61 }
 0x487   : > { %4262 = vmatpush.msra.mxu3 %v3387_v28  ;;  %4222 = vmatpush.msrb.mxu0 %v3048_v38 }
 0x488   : > { %4223 = vmatmul.f32.vlgmr.msrb.gmra.mxu0 %v10067_v53 }
 0x489   : > { %v3150_v0 = vpop.permute.xlu2 %3149  ;;  %v10305_v37 = vpop.permute.xlu0 %3377  ;;  %4263 = vmatpush.msra.mxu3 %v3276_v13 }
 0x48a   : > { %v3166_v3 = vsel %vm706_vm6, %v10209_v2, %v3150_v0  ;;  %v3396_v20 = vsel %vm822_vm4, %v3376_v48, %v10305_v37 }
 0x48b   : > { %4264 = vmatpush.msra.mxu3 %v3269_v35  ;;  %4307 = vmatpush.msra.mxu2 %v3396_v20 }
 0x48c   : > { %4180 = vmatmul.f32.gmra.mxu1 %v10101_v9 }
 0x48d   : > { %v3746_v60 = vpop.permute.xlu1 %3745  ;;  %4265 = vmatpush.msra.mxu3 %v3166_v3 }
 0x48e   : > { %v10314_v63 = vsel %vm1007_vm1, %v10038_v1, %v3746_v60  ;;  %3792 = vst.msk [vmem:[#allocation6 + $0x3f8] sm:$0xff] %vm576_vm9, %v3746_v60 }
 0x490   : > { %4226 = vmatmul.f32.gmra.mxu0 %v10101_v9 }
 0x491   : > { %v3134_v52 = vpop.permute.xlu2 %3133  ;;  %v3360_v27 = vpop.permute.xlu0 %3359 }
 0x492   : > { %v3159_v55 = vsel %vm706_vm6, %v3132_v42, %v3134_v52  ;;  %v3388_v25 = vsel %vm822_vm4, %v10253_v4, %v3360_v27 }
 0x493   : > { %4266 = vmatpush.msra.mxu3 %v3159_v55  ;;  %4308 = vmatpush.msra.mxu2 %v3388_v25  ;;  %v8094_v55 = vld [vmem:[#allocation6 + $0x230] sm:$0xff] }
 0x495   : > { %v3730_v12 = vpop.permute.xlu1 %3729 }
 0x496   : > { %v10323_v41 = vsel %vm1007_vm1, %v10084_v15, %v3730_v12  ;;  %3784 = vst.msk [vmem:[#allocation6 + $0x3b8] sm:$0xff] %vm576_vm9, %v3730_v12  ;;  %v3978_v12 = vld [vmem:[#allocation6 + $0x238] sm:$0xff] }
 0x499   : > { %v3040_v1 = vpop.permute.xlu2 %3039  ;;  %v10326_v49 = vpop.permute.xlu0 %3261 }
 0x49a   : > { %v3056_v45 = vsel %vm650_vm7, %v3038_v43, %v3040_v1  ;;  %v3277_v56 = vsel %vm762_vm5, %v3260_v32, %v10326_v49 }
 0x49b   : > { %4267 = vmatpush.msra.mxu3 %v3056_v45  ;;  %4309 = vmatpush.msra.mxu2 %v3277_v56 }
 0x49d   : > { %v3636_v30 = vpop.permute.xlu1 %3635  ;;  %v4026_v10 = vld [vmem:[#allocation6 + $0x3b8] sm:$0xff] }
 0x49e   : > { %v3650_v2 = vsel %vm951_vm2, %v10166_v39, %v3636_v30  ;;  %3682 = vst.msk [vmem:[#allocation6 + $0x378] sm:$0xff] %vm576_vm9, %v3636_v30  ;;  %v4547_v30 = vld [vmem:[%s13185_s13 + $0xf0] sm:$0xff] }
 0x4a1   : > { %v3024_v15 = vpop.permute.xlu2 %3023  ;;  %v10334_v33 = vpop.permute.xlu0 %3245 }
 0x4a2   : > { %v3049_v17 = vsel %vm650_vm7, %v3022_v61, %v3024_v15  ;;  %v3270_v22 = vsel %vm762_vm5, %v3244_v44, %v10334_v33 }
 0x4a3   : > { %4268 = vmatpush.msra.mxu3 %v3049_v17  ;;  %4310 = vmatpush.msra.mxu2 %v3270_v22 }
 0x4a4   : > { %4269 = vmatmul.f32.vlgmr.msra.gmra.mxu3 %v10067_v53 }
 0x4a5   : > { %v3620_v51 = vpop.permute.xlu1 %3619  ;;  %v4018_v44 = vld [vmem:[#allocation6 + $0x378] sm:$0xff] }
 0x4a6   : > { %v3643_v18 = vsel %vm951_vm2, %v10174_v11, %v3620_v51  ;;  %3674 = vst.msk [vmem:[#allocation6 + $0x338] sm:$0xff] %vm576_vm9, %v3620_v51  ;;  %v4543_v51 = vld [vmem:[%s13185_s13 + $0xd0] sm:$0xff] }
 0x4a9   : > { %v10343_v39 = vpop.permute.xlu2 %3025 }
 0x4aa   : > { %v10345_v19 = vpop.permute.xlu0 %3151  ;;  %v3050_v31 = vsel %vm650_vm7, %v3024_v15, %v10343_v39 }
 0x4ab   : > { %v3167_v29 = vsel %vm706_vm6, %v3150_v0, %v10345_v19 }
 0x4ac   : > { %4311 = vmatpush.msra.mxu2 %v3167_v29  ;;  %4272 = vmatmul.f32.gmra.mxu3 %v10101_v9 }
 0x4ad   : > { %v3526_v6 = vpop.permute.xlu1 %3525  ;;  %v4010_v57 = vld [vmem:[#allocation6 + $0x338] sm:$0xff] }
 0x4ae   : > { %v3540_v59 = vsel %vm895_vm3, %v10164_v5, %v3526_v6  ;;  %3572 = vst.msk [vmem:[#allocation6 + $0x2f8] sm:$0xff] %vm576_vm9, %v3526_v6  ;;  %v4539_v6 = vld [vmem:[%s13185_s13 + $0xb0] sm:$0xff] }
 0x4b1   : > { %v3854_v11 = vpop.permute.xlu2 %3853 }
 0x4b2   : > { %v10355_v47 = vpop.permute.xlu0 %3135 }
 0x4b3   : > { %v3160_v8 = vsel %vm706_vm6, %v3134_v52, %v10355_v47  ;;  %v3986_v52 = vld [vmem:[#allocation6 + $0x278] sm:$0xff] }
 0x4b4   : > { %4312 = vmatpush.msra.mxu2 %v3160_v8 }
 0x4b5   : > { %v3510_v54 = vpop.permute.xlu1 %3509  ;;  %v4002_v61 = vld [vmem:[#allocation6 + $0x2f8] sm:$0xff] }
 0x4b6   : > { %v3533_v36 = vsel %vm895_vm3, %v10185_v24, %v3510_v54  ;;  %3564 = vst.msk [vmem:[#allocation6 + $0x2b8] sm:$0xff] %vm576_vm9, %v3510_v54 }
 0x4b9   : > { %v3362_v46 = vpop.permute.xlu2 %3361 }
 0x4ba   : > { %v3042_v4 = vpop.permute.xlu0 %3041  ;;  %v10363_v34 = vsel %vm822_vm4, %v3360_v27, %v3362_v46 }
 0x4bb   : > { %v3057_v5 = vsel %vm650_vm7, %v3040_v1, %v3042_v4 }
 0x4bc   : > { %4313 = vmatpush.msra.mxu2 %v3057_v5  ;;  %v4533_v5 = vld [vmem:[%s13185_s13 + $0x80] sm:$0xff] }
 0x4bd   : > { %v3836_v28 = vpop.permute.xlu1 %3835  ;;  %v3994_v60 = vld [vmem:[#allocation6 + $0x2b8] sm:$0xff] }
 0x4be   : > { %4314 = vmatpush.msra.mxu2 %v3050_v31  ;;  %v3861_v26 = vsel %vm1063_vm0, %v10236_v40, %v3836_v28  ;;  %v4541_v31 = vld [vmem:[%s13185_s13 + $0xc0] sm:$0xff] }
 0x4bf   : > { %4315 = vmatmul.f32.vlgmr.msra.gmra.mxu2 %v10067_v53 }
 0x4c1   : > { %v3364_v50 = vpop.permute.xlu2 %3363 }
 0x4c2   : > { %v3852_v48 = vpop.permute.xlu0 %3851  ;;  %v3390_v24 = vsel %vm822_vm4, %v3362_v46, %v3364_v50  ;;  %v4579_v46 = vld [vmem:[%s13185_s13 + $0x1f0] sm:$0xff] }
 0x4c3   : > { %v3868_v16 = vsel %vm1063_vm0, %v10242_v7, %v3852_v48  ;;  %v3869_v32 = vsel %vm1063_vm0, %v3852_v48, %v3854_v11  ;;  %3422 = vst.msk [vmem:[#allocation6 + $0x1b8] sm:$0xff] %vm576_vm9, %v3390_v24  ;;  %v4034_v7 = vld [vmem:[#allocation6 + $0x3f8] sm:$0xff]  ;;  %v4531_v50 = vld [vmem:[%s13185_s13 + $0x70] sm:$0xff]  ;;  %v4109_v24 = vpop.f32.mrf.mxu1 }
 0x4c4   : > { %4290 = vmatpush.msra.mxu1 %v3868_v16  ;;  %4336 = vmatpush.msra.mxu0 %v3869_v32  ;;  %v4575_v48 = vld [vmem:[%s13185_s13 + $0x1d0] sm:$0xff]  ;;  %v4605_v16 = vld [vmem:[%s13185_s13 + $0x2c0] sm:$0xff] }
 0x4c5   : > { %v10374_v42 = vpop.permute.xlu1 %3837  ;;  %v4529_v32 = vld [vmem:[%s13185_s13 + $0x60] sm:$0xff] }
 0x4c6   : > { %4291 = vmatpush.msra.mxu1 %v3861_v26  ;;  %v3862_v40 = vsel %vm1063_vm0, %v3836_v28, %v10374_v42  ;;  %v4577_v28 = vld [vmem:[%s13185_s13 + $0x1e0] sm:$0xff] }
 0x4c7   : > { %7439 = vmatmul.msk.f32.vlgmr.msra.gmra.mxu1 %vm2526_vm13, %v10106_v21  ;;  %4318 = vmatmul.f32.gmra.mxu2 %v10101_v9 }
 0x4c8   : > { %4345 = vmatpush.msrb.mxu1 %v10314_v63  ;;  %4337 = vmatpush.msra.mxu0 %v3862_v40  ;;  %v8093_v63 = vld [vmem:[#allocation6 + $0x270] sm:$0xff] }
 0x4c9   : > { %7441 = vmatmul.msk.f32.vlgmr.msra.gmra.mxu0 %vm2526_vm13, %v10106_v21  ;;  %v3856_v13 = vpop.permute.xlu2 %3855 }
 0x4ca   : > { %v3380_v62 = vpop.permute.xlu0 %3379  ;;  %4346 = vmatpush.msrb.mxu1 %v10323_v41  ;;  %4391 = vmatpush.msrb.mxu0 %v4034_v7  ;;  %v3870_v23 = vsel %vm1063_vm0, %v3854_v11, %v3856_v13  ;;  %3902 = vst.msk [vmem:[#allocation6 + $0x478] sm:$0xff] %vm576_vm9, %v3856_v13  ;;  %v3962_v56 = vld [vmem:[#allocation6 + $0x1b8] sm:$0xff]  ;;  %v4537_v11 = vld [vmem:[%s13185_s13 + $0xa0] sm:$0xff]  ;;  %v4643_v7 = vld [vmem:[%s13185_s13 + $0x3f0] sm:$0xff] }
 0x4cb   : > { %v3397_v43 = vsel %vm822_vm4, %v10305_v37, %v3380_v62  ;;  %4382 = vmatpush.msrb.mxu3 %v3870_v23  ;;  %v4573_v13 = vld [vmem:[%s13185_s13 + $0x1c0] sm:$0xff]  ;;  %v10490_v23 = vpop.f32.mrf.mxu0 }
 0x4cc   : > { %4347 = vmatpush.msrb.mxu1 %v3650_v2  ;;  %4392 = vmatpush.msrb.mxu0 %v4026_v10  ;;  %v4571_v10 = vld [vmem:[%s13185_s13 + $0x1b0] sm:$0xff] }
 0x4cd   : > { %v3264_v14 = vpop.permute.xlu1 %3263 }
 0x4ce   : > { %4348 = vmatpush.msrb.mxu1 %v3643_v18  ;;  %4393 = vmatpush.msrb.mxu0 %v4018_v44  ;;  %v3278_v35 = vsel %vm762_vm5, %v10326_v49, %v3264_v14  ;;  %3310 = vst.msk [vmem:[#allocation6 + $0x178] sm:$0xff] %vm576_vm9, %v3264_v14  ;;  %v4603_v44 = vld [vmem:[%s13185_s13 + $0x2b0] sm:$0xff]  ;;  %v4525_v14 = vld [vmem:[%s13185_s13 + $0x40] sm:$0xff] }
 0x4cf   : > { %7440 = vmatmul.msk.f32.gmra.mxu1 %vm2526_vm13, %v10138_v58 }
 0x4d0   : > { %4349 = vmatpush.msrb.mxu1 %v3540_v59  ;;  %4394 = vmatpush.msrb.mxu0 %v4010_v57  ;;  %v4611_v59 = vld [vmem:[%s13185_s13 + $0x2f0] sm:$0xff] }
 0x4d1   : > { %7442 = vmatmul.msk.f32.gmra.mxu0 %vm2526_vm13, %v10138_v58  ;;  %v3044_v38 = vpop.permute.xlu2 %3043  ;;  %v4050_v37 = vld [vmem:[#allocation6 + $0x478] sm:$0xff] }
 0x4d2   : > { %v3382_v0 = vpop.permute.xlu0 %3381  ;;  %4350 = vmatpush.msrb.mxu1 %v3533_v36  ;;  %4395 = vmatpush.msrb.mxu0 %v4002_v61  ;;  %v3058_v3 = vsel %vm650_vm7, %v3042_v4, %v3044_v38  ;;  %3090 = vst.msk [vmem:[#allocation6 + $0x78] sm:$0xff] %vm576_vm9, %v3044_v38 }
 0x4d3   : > { %v3398_v20 = vsel %vm822_vm4, %v3380_v62, %v3382_v0  ;;  %4428 = vmatpush.msrb.mxu2 %v4050_v37  ;;  %v4601_v0 = vld [vmem:[%s13185_s13 + $0x2a0] sm:$0xff]  ;;  %v4523_v37 = vld [vmem:[%s13185_s13 + $0x30] sm:$0xff] }
 0x4d4   : > { %4351 = vmatpush.msrb.mxu1 %v8093_v63  ;;  %4396 = vmatpush.msrb.mxu0 %v3994_v60  ;;  %3430 = vst.msk [vmem:[#allocation6 + $0x1f8] sm:$0xff] %vm576_vm9, %v3398_v20  ;;  %v4567_v20 = vld [vmem:[%s13185_s13 + $0x190] sm:$0xff]  ;;  %v4437_v63 = vld [vmem:[#allocation2 + $0x8] sm:$0xff] }
 0x4d5   : > { %v3154_v27 = vpop.permute.xlu1 %3153  ;;  %v3954_v15 = vld [vmem:[#allocation6 + $0x178] sm:$0xff]  ;;  %v4599_v60 = vld [vmem:[%s13185_s13 + $0x290] sm:$0xff] }
 0x4d6   : > { %4352 = vmatpush.msrb.mxu1 %v8094_v55  ;;  %4397 = vmatpush.msrb.mxu0 %v3986_v52  ;;  %v3168_v25 = vsel %vm706_vm6, %v10345_v19, %v3154_v27  ;;  %3200 = vst.msk [vmem:[#allocation6 + $0xf8] sm:$0xff] %vm576_vm9, %v3154_v27  ;;  %v4112_v27 = vpop.f32.mrf.mxu1  ;;  %v4635_v55 = vld [vmem:[%s13185_s13 + $0x3b0] sm:$0xff] }
 0x4d8   : > { %4353 = vmatpush.msrb.mxu1 %v3397_v43  ;;  %4398 = vmatpush.msrb.mxu0 %v3978_v12  ;;  %v4641_v43 = vld [vmem:[%s13185_s13 + $0x3e0] sm:$0xff] }
 0x4d9   : > { %v3922_v4 = vld [vmem:[#allocation6 + $0x78] sm:$0xff]  ;;  %v10512_v61 = vpop.permute.xlu2 %4060 }
 0x4da   : > { %v3248_v41 = vpop.permute.xlu0 %3247  ;;  %4354 = vmatpush.msrb.mxu1 %v10363_v34  ;;  %v4607_v34 = vld [vmem:[%s13185_s13 + $0x2d0] sm:$0xff] }
 0x4db   : > { %v3271_v1 = vsel %vm762_vm5, %v10334_v33, %v3248_v41  ;;  %3302 = vst.msk [vmem:[#allocation6 + $0x138] sm:$0xff] %vm576_vm9, %v3248_v41  ;;  %v3970_v49 = vld [vmem:[#allocation6 + $0x1f8] sm:$0xff]  ;;  %v4545_v33 = vld [vmem:[%s13185_s13 + $0xe0] sm:$0xff] }
 0x4dc   : > { %4355 = vmatpush.msrb.mxu1 %v3278_v35  ;;  %4399 = vmatpush.msrb.mxu0 %v3970_v49  ;;  %v4569_v35 = vld [vmem:[%s13185_s13 + $0x1a0] sm:$0xff] }
 0x4dd   : > { %v3840_v45 = vpop.permute.xlu1 %3839  ;;  %v3938_v19 = vld [vmem:[#allocation6 + $0xf8] sm:$0xff]  ;;  %v4565_v41 = vld [vmem:[%s13185_s13 + $0x180] sm:$0xff] }
 0x4de   : > { %4356 = vmatpush.msrb.mxu1 %v3271_v1  ;;  %v3863_v2 = vsel %vm1063_vm0, %v10374_v42, %v3840_v45  ;;  %3894 = vst.msk [vmem:[#allocation6 + $0x438] sm:$0xff] %vm576_vm9, %v3840_v45  ;;  %4400 = vmatpush.msrb.mxu0 %v3962_v56  ;;  %v10478_v42 = vpop.f32.mrf.mxu2  ;;  %v4597_v1 = vld [vmem:[%s13185_s13 + $0x280] sm:$0xff]  ;;  %v4519_v56 = vld [vmem:[%s13185_s13 + $0x10] sm:$0xff] }
 0x4df   : > { %4383 = vmatpush.msrb.mxu3 %v3863_v2  ;;  %v4633_v45 = vld [vmem:[%s13185_s13 + $0x3a0] sm:$0xff]  ;;  %v4595_v2 = vld [vmem:[%s13185_s13 + $0x270] sm:$0xff] }
 0x4e0   : > { %4357 = vmatpush.msrb.mxu1 %v3168_v25  ;;  %4401 = vmatpush.msrb.mxu0 %v3954_v15  ;;  %v4521_v25 = vld [vmem:[%s13185_s13 + $0x20] sm:$0xff]  ;;  %v10555_v15 = vpop.f32.mrf.mxu0 }
 0x4e1   : > { %4756 = vmatpush.msra.mxu3 %v4547_v30  ;;  %v4563_v30 = vld [vmem:[%s13185_s13 + $0x170] sm:$0xff] }
 0x4e2   : > { %v3138_v17 = vpop.permute.xlu0 %3137  ;;  %v3946_v22 = vld [vmem:[#allocation6 + $0x138] sm:$0xff]  ;;  %7443 = vmatmul.msk.f32.vlgmr.msrb.gmra.mxu3 %vm2526_vm13, %v10106_v21 }
 0x4e3   : > { %v3161_v18 = vsel %vm706_vm6, %v10355_v47, %v3138_v17  ;;  %3192 = vst.msk [vmem:[#allocation6 + $0xb8] sm:$0xff] %vm576_vm9, %v3138_v17  ;;  %4402 = vmatpush.msrb.mxu0 %v3946_v22  ;;  %4757 = vmatpush.msra.mxu3 %v4545_v33  ;;  %v4609_v47 = vld [vmem:[%s13185_s13 + $0x2e0] sm:$0xff]  ;;  %v4631_v33 = vld [vmem:[%s13185_s13 + $0x390] sm:$0xff] }
 0x4e4   : > { %4358 = vmatpush.msrb.mxu1 %v3161_v18  ;;  %v4517_v17 = vld [vmem:[%s13185_s13] sm:$0xff] }
 0x4e5   : > { %4403 = vmatpush.msrb.mxu0 %v3938_v19  ;;  %4758 = vmatpush.msra.mxu3 %v4543_v51  ;;  %v4042_v29 = vld [vmem:[#allocation6 + $0x438] sm:$0xff]  ;;  %v10462_v26 = vpop.permute.xlu1 %4055  ;;  %v4561_v18 = vld [vmem:[%s13185_s13 + $0x160] sm:$0xff] }
 0x4e6   : > { %4359 = vmatpush.msrb.mxu1 %v3058_v3  ;;  %4429 = vmatpush.msrb.mxu2 %v4042_v29  ;;  %v4637_v3 = vld [vmem:[%s13185_s13 + $0x3c0] sm:$0xff]  ;;  %v4135_v49 = vpop.f32.mrf.mxu2  ;;  %v4133_v51 = vadd.f32 %v10478_v42, %v10462_v26 }
 0x4e7   : > { %4759 = vmatpush.msra.mxu3 %v4541_v31  ;;  %7445 = vmatmul.msk.f32.vlgmr.msrb.gmra.mxu2 %vm2526_vm13, %v10106_v21  ;;  %v4535_v21 = vld [vmem:[%s13185_s13 + $0x90] sm:$0xff]  ;;  %v4593_v19 = vld [vmem:[%s13185_s13 + $0x260] sm:$0xff]  ;;  %v4136_v42 = vadd.f32 %v4135_v49, %v10512_v61 }
 0x4e8   : > { %4802 = vmatpush.msra.mxu2 %v4611_v59  ;;  %v4629_v31 = vld [vmem:[%s13185_s13 + $0x380] sm:$0xff]  ;;  %v4559_v59 = vld [vmem:[%s13185_s13 + $0x150] sm:$0xff] }
 0x4e9   : > { %4760 = vmatpush.msra.mxu3 %v4539_v6  ;;  %v4445_v6 = vld [vmem:[#allocation2 + $0x58] sm:$0xff]  ;;  %v4617_v49 = vld [vmem:[%s13185_s13 + $0x320] sm:$0xff] }
 0x4ea   : > { %v3028_v8 = vpop.permute.xlu0 %3027  ;;  %v3930_v54 = vld [vmem:[#allocation6 + $0xb8] sm:$0xff]  ;;  %7444 = vmatmul.msk.f32.gmra.mxu3 %vm2526_vm13, %v10138_v58  ;;  %4803 = vmatpush.msra.mxu2 %v4609_v47 }
 0x4eb   : > { %v3051_v36 = vsel %vm650_vm7, %v10343_v39, %v3028_v8  ;;  %3082 = vst.msk [vmem:[#allocation6 + $0x38] sm:$0xff] %vm576_vm9, %v3028_v8  ;;  %4404 = vmatpush.msrb.mxu0 %v3930_v54  ;;  %4761 = vmatpush.msra.mxu3 %v4537_v11  ;;  %v4086_v39 = vpop.f32.mrf.mxu3  ;;  %v4591_v11 = vld [vmem:[%s13185_s13 + $0x250] sm:$0xff] }
 0x4ec   : > { %4360 = vmatpush.msrb.mxu1 %v3051_v36  ;;  %4804 = vmatpush.msra.mxu2 %v4607_v34  ;;  %v4087_v62 = vadd.f32 %v4086_v39, %v10462_v26  ;;  %v4627_v54 = vld [vmem:[%s13185_s13 + $0x370] sm:$0xff]  ;;  %v4557_v34 = vld [vmem:[%s13185_s13 + $0x140] sm:$0xff] }
 0x4ed   : > { %4405 = vmatpush.msrb.mxu0 %v3922_v4  ;;  %4361 = vmatmul.f32.vlgmr.msrb.gmra.mxu1 %v10067_v53  ;;  %v4589_v39 = vld [vmem:[%s13185_s13 + $0x240] sm:$0xff] }
 0x4ee   : > { %4762 = vmatpush.msra.mxu3 %v4535_v21  ;;  %4779 = vmatpush.msra.mxu1 %v4579_v46  ;;  %v4110_v57 = vadd.f32 %v4109_v24, %v4087_v62  ;;  %v4156_v21 = vadd.f32 %v10490_v23, %v4133_v51  ;;  %v4675_v46 = vld [vmem:[%s13185_s13 + $0x4f0] sm:$0xff] }
 0x4ef   : > { %7446 = vmatmul.msk.f32.gmra.mxu2 %vm2526_vm13, %v10138_v58  ;;  %v4527_v58 = vld [vmem:[%s13185_s13 + $0x50] sm:$0xff] }
 0x4f0   : > { %4763 = vmatpush.msra.mxu3 %v4533_v5  ;;  %4780 = vmatpush.msra.mxu1 %v4577_v28  ;;  %v4453_v12 = vadd.f32 %v4437_v63, %v4110_v57  ;;  %v4625_v5 = vld [vmem:[%s13185_s13 + $0x360] sm:$0xff]  ;;  %v4555_v24 = vld [vmem:[%s13185_s13 + $0x130] sm:$0xff] }
 0x4f1   : > { %4805 = vmatpush.msra.mxu2 %v4605_v16  ;;  %v4587_v16 = vld [vmem:[%s13185_s13 + $0x230] sm:$0xff] }
 0x4f2   : > { %v3914_v40 = vld [vmem:[#allocation6 + $0x38] sm:$0xff]  ;;  %4764 = vmatpush.msra.mxu3 %v4531_v50  ;;  %4781 = vmatpush.msra.mxu1 %v4575_v48  ;;  %v4485_v22 = vmul.f32 0.01, %v4453_v12  ;;  %vm4469_vm0 = vcmp.gt.f32.partialorder %v4453_v12, 0.0  ;;  %v4673_v50 = vld [vmem:[%s13185_s13 + $0x4e0] sm:$0xff]  ;;  %v4671_v23 = vld [vmem:[%s13185_s13 + $0x4d0] sm:$0xff] }
 0x4f3   : > { %4406 = vmatpush.msrb.mxu0 %v3914_v40  ;;  %v4089_v38 = vpop.f32.mrf.mxu3  ;;  %4806 = vmatpush.msra.mxu2 %v4603_v44  ;;  %v4439_v40 = vld [vmem:[#allocation2 + $0x18] sm:$0xff]  ;;  %v4553_v44 = vld [vmem:[%s13185_s13 + $0x120] sm:$0xff]  ;;  %v4551_v57 = vld [vmem:[%s13185_s13 + $0x110] sm:$0xff] }
 0x4f4   : > { %4407 = vmatmul.f32.vlgmr.msrb.gmra.mxu0 %v10067_v53  ;;  %4765 = vmatpush.msra.mxu3 %v4529_v32  ;;  %v4639_v53 = vld [vmem:[%s13185_s13 + $0x3d0] sm:$0xff]  ;;  %v4090_v52 = vadd.f32 %v4089_v38, %v10512_v61  ;;  %v10580_v8 = vsel %vm4469_vm0, %v4453_v12, %v4485_v22 }
 0x4f5   : > { %4825 = vmatpush.msra.mxu0 %v4643_v7  ;;  %4782 = vmatpush.msra.mxu1 %v4573_v13  ;;  %v4438_v32 = vld [vmem:[#allocation2 + $0x10] sm:$0xff] }
 0x4f6   : > { %4364 = vmatmul.f32.gmra.mxu1 %v10101_v9  ;;  %4766 = vmatpush.msra.mxu3 %v4527_v58  ;;  %v4623_v7 = vld [vmem:[%s13185_s13 + $0x350] sm:$0xff]  ;;  %v4454_v58 = vadd.f32 %v4438_v32, %v4156_v21 }
 0x4f7   : > { %4826 = vmatpush.msra.mxu0 %v4641_v43  ;;  %4783 = vmatpush.msra.mxu1 %v4571_v10  ;;  %v4583_v38 = vld [vmem:[%s13185_s13 + $0x210] sm:$0xff] }
 0x4f8   : > { %4767 = vmatpush.msra.mxu3 %v4525_v14  ;;  %4807 = vmatpush.msra.mxu2 %v4601_v0  ;;  %v4247_v28 = vpop.f32.mrf.mxu2  ;;  %v4585_v14 = vld [vmem:[%s13185_s13 + $0x220] sm:$0xff]  ;;  %vm4470_vm5 = vcmp.gt.f32.partialorder %v4454_v58, 0.0  ;;  %v4448_v21 = vld [vmem:[#allocation2 + $0x70] sm:$0xff] }
 0x4f9   : > { %4827 = vmatpush.msra.mxu0 %v4639_v53  ;;  %4784 = vmatpush.msra.mxu1 %v4569_v35  ;;  %v4621_v53 = vld [vmem:[%s13185_s13 + $0x340] sm:$0xff]  ;;  %v4699_v32 = vld [vmem:[%s13185_s13 + $0x5b0] sm:$0xff] }
 0x4fa   : > { %4768 = vmatpush.msra.mxu3 %v4523_v37  ;;  %4808 = vmatpush.msra.mxu2 %v4599_v60  ;;  %v4159_v37 = vadd.f32 %v10555_v15, %v4136_v42  ;;  %v4619_v60 = vld [vmem:[%s13185_s13 + $0x330] sm:$0xff]  ;;  %v4447_v15 = vld [vmem:[#allocation2 + $0x68] sm:$0xff]  ;;  %v4657_v42 = vld [vmem:[%s13185_s13 + $0x460] sm:$0xff] }
 0x4fb   : > { %4828 = vmatpush.msra.mxu0 %v4637_v3  ;;  %4785 = vmatpush.msra.mxu1 %v4567_v20  ;;  %v4201_v29 = vpop.f32.mrf.mxu3  ;;  %v4440_v3 = vld [vmem:[#allocation2 + $0x20] sm:$0xff] }
 0x4fc   : > { %4410 = vmatmul.f32.gmra.mxu0 %v10101_v9  ;;  %4769 = vmatpush.msra.mxu3 %v4521_v25  ;;  %v4113_v9 = vadd.f32 %v4112_v27, %v4090_v52  ;;  %v4486_v27 = vmul.f32 0.01, %v4454_v58 }
 0x4fd   : > { %4829 = vmatpush.msra.mxu0 %v4635_v55  ;;  %4786 = vmatpush.msra.mxu1 %v4565_v41  ;;  %v4669_v55 = vld [vmem:[%s13185_s13 + $0x4c0] sm:$0xff] }
 0x4fe   : > { %4809 = vmatpush.msra.mxu2 %v4597_v1  ;;  %4770 = vmatpush.msra.mxu3 %v4519_v56  ;;  %v4461_v47 = vadd.f32 %v4445_v6, %v4113_v9  ;;  %v4549_v41 = vld [vmem:[%s13185_s13 + $0x100] sm:$0xff] }
 0x4ff   : > { %4830 = vmatpush.msra.mxu0 %v4633_v45  ;;  %4787 = vmatpush.msra.mxu1 %v4563_v30  ;;  %v4581_v1 = vld [vmem:[%s13185_s13 + $0x200] sm:$0xff] }
 0x500   : > { %4810 = vmatpush.msra.mxu2 %v4595_v2  ;;  %4771 = vmatpush.msra.mxu3 %v4517_v17  ;;  %v4493_v62 = vmul.f32 0.01, %v4461_v47  ;;  %vm4477_vm1 = vcmp.gt.f32.partialorder %v4461_v47, 0.0  ;;  %v4446_v45 = vld [vmem:[#allocation2 + $0x60] sm:$0xff]  ;;  %v4667_v2 = vld [vmem:[%s13185_s13 + $0x4b0] sm:$0xff]  ;;  %v4250_v51 = vpop.f32.mrf.mxu2 }
 0x501   : > { %4831 = vmatpush.msra.mxu0 %v4631_v33  ;;  %4788 = vmatpush.msra.mxu1 %v4561_v18  ;;  %v4178_v36 = vpop.f32.mrf.mxu1  ;;  %v4462_v9 = vadd.f32 %v4446_v45, %v4159_v37  ;;  %v10657_v33 = vsel %vm4470_vm5, %v4454_v58, %v4486_v27  ;;  %v4615_v17 = vld [vmem:[%s13185_s13 + $0x310] sm:$0xff]  ;;  %v4665_v6 = vld [vmem:[%s13185_s13 + $0x4a0] sm:$0xff]  ;;  %v4538_v45 = vld [vmem:[%s13185_s13 + $0xa8] sm:$0xff] }
 0x502   : > { %4811 = vmatpush.msra.mxu2 %v4593_v19  ;;  %4772 = vmatmul.f32.vlgmr.msra.gmra.mxu3 %v10580_v8  ;;  %v4179_v4 = vadd.f32 %v4178_v36, %v10462_v26  ;;  %v10633_v20 = vsel %vm4477_vm1, %v4461_v47, %v4493_v62  ;;  %v4707_v18 = vld [vmem:[%s13185_s13 + $0x5f0] sm:$0xff]  ;;  %v4653_v58 = vld [vmem:[%s13185_s13 + $0x440] sm:$0xff] }
 0x503   : > { %4832 = vmatpush.msra.mxu0 %v4629_v31  ;;  %4789 = vmatpush.msra.mxu1 %v4559_v59  ;;  %v4204_v52 = vpop.f32.mrf.mxu3  ;;  %v4613_v59 = vld [vmem:[%s13185_s13 + $0x300] sm:$0xff]  ;;  %v4663_v36 = vld [vmem:[%s13185_s13 + $0x490] sm:$0xff]  ;;  %vm4478_vm11 = vcmp.gt.f32.partialorder %v4462_v9, 0.0 }
 0x504   : > { %4812 = vmatpush.msra.mxu2 %v4591_v11  ;;  %v4202_v48 = vadd.f32 %v4201_v29, %v4179_v4  ;;  %4848 = vmatpush.msrb.mxu3 %v4675_v46  ;;  %v4705_v11 = vld [vmem:[%s13185_s13 + $0x5e0] sm:$0xff]  ;;  %v4494_v46 = vmul.f32 0.01, %v4462_v9  ;;  %v4703_v4 = vld [vmem:[%s13185_s13 + $0x5d0] sm:$0xff] }
 0x505   : > { %4833 = vmatpush.msra.mxu0 %v4627_v54  ;;  %4790 = vmatpush.msra.mxu1 %v4557_v34  ;;  %v4224_v13 = vpop.f32.mrf.mxu0  ;;  %v4695_v62 = vld [vmem:[%s13185_s13 + $0x590] sm:$0xff] }
 0x506   : > { %4813 = vmatpush.msra.mxu2 %v4589_v39  ;;  %v4455_v43 = vadd.f32 %v4439_v40, %v4202_v48  ;;  %v4225_v10 = vadd.f32 %v4224_v13, %v10462_v26  ;;  %4849 = vmatpush.msrb.mxu3 %v4673_v50  ;;  %v4701_v50 = vld [vmem:[%s13185_s13 + $0x5c0] sm:$0xff]  ;;  %v10694_v48 = vsel %vm4478_vm11, %v4462_v9, %v4494_v46  ;;  %v4683_v37 = vld [vmem:[%s13185_s13 + $0x530] sm:$0xff]  ;;  %v4536_v9 = vld [vmem:[%s13185_s13 + $0x98] sm:$0xff]  ;;  %vm5225_vm11 = vcmask 121856  }
 0x507   : > { %4834 = vmatpush.msra.mxu0 %v4625_v5  ;;  %4791 = vmatpush.msra.mxu1 %v4555_v24  ;;  %v4661_v5 = vld [vmem:[%s13185_s13 + $0x480] sm:$0xff]  ;;  %v4659_v24 = vld [vmem:[%s13185_s13 + $0x470] sm:$0xff]  ;;  %v4528_v46 = vld [vmem:[%s13185_s13 + $0x58] sm:$0xff] }
 0x508   : > { %4814 = vmatpush.msra.mxu2 %v4587_v16  ;;  %v4248_v35 = vadd.f32 %v4247_v28, %v4225_v10  ;;  %v4487_v0 = vmul.f32 0.01, %v4455_v43  ;;  %4850 = vmatpush.msrb.mxu3 %v4671_v23  ;;  %vm4471_vm2 = vcmp.gt.f32.partialorder %v4455_v43, 0.0  ;;  %v4697_v40 = vld [vmem:[%s13185_s13 + $0x5a0] sm:$0xff]  ;;  %v4691_v10 = vld [vmem:[%s13185_s13 + $0x570] sm:$0xff] }
 0x509   : > { %4835 = vmatpush.msra.mxu0 %v4623_v7  ;;  %4792 = vmatpush.msra.mxu1 %v4553_v44  ;;  %v4181_v63 = vpop.f32.mrf.mxu1  ;;  %v4655_v7 = vld [vmem:[%s13185_s13 + $0x450] sm:$0xff]  ;;  %v4693_v23 = vld [vmem:[%s13185_s13 + $0x580] sm:$0xff] }
 0x50a   : > { %4815 = vmatpush.msra.mxu2 %v4585_v14  ;;  %v4456_v25 = vadd.f32 %v4440_v3, %v4248_v35  ;;  %4775 = vmatmul.f32.gmra.mxu3 %v10633_v20  ;;  %v4182_v12 = vadd.f32 %v4181_v63, %v10512_v61  ;;  %v10652_v30 = vsel %vm4471_vm2, %v4455_v43, %v4487_v0  ;;  %v4651_v43 = vld [vmem:[%s13185_s13 + $0x430] sm:$0xff]  ;;  %v4649_v44 = vld [vmem:[%s13185_s13 + $0x420] sm:$0xff]  ;;  %v4548_v0 = vld [vmem:[%s13185_s13 + $0xf8] sm:$0xff] }
 0x50b   : > { %4836 = vmatpush.msra.mxu0 %v4621_v53  ;;  %4793 = vmatpush.msra.mxu1 %v4551_v57  ;;  %v4689_v14 = vld [vmem:[%s13185_s13 + $0x560] sm:$0xff]  ;;  %v4647_v53 = vld [vmem:[%s13185_s13 + $0x410] sm:$0xff]  ;;  %v4546_v3 = vld [vmem:[%s13185_s13 + $0xe8] sm:$0xff] }
 0x50c   : > { %4816 = vmatpush.msra.mxu2 %v4583_v38  ;;  %v4205_v56 = vadd.f32 %v4204_v52, %v4182_v12  ;;  %4851 = vmatpush.msrb.mxu3 %v4669_v55  ;;  %v4488_v29 = vmul.f32 0.01, %v4456_v25  ;;  %vm4472_vm6 = vcmp.gt.f32.partialorder %v4456_v25, 0.0  ;;  %v4687_v35 = vld [vmem:[%s13185_s13 + $0x550] sm:$0xff]  ;;  %v4645_v57 = vld [vmem:[%s13185_s13 + $0x400] sm:$0xff]  ;;  %v4544_v63 = vld [vmem:[%s13185_s13 + $0xd8] sm:$0xff] }
 0x50d   : > { %4837 = vmatpush.msra.mxu0 %v4619_v60  ;;  %4794 = vmatpush.msra.mxu1 %v4549_v41  ;;  %v4227_v22 = vpop.f32.mrf.mxu0  ;;  %v4685_v38 = vld [vmem:[%s13185_s13 + $0x540] sm:$0xff]  ;;  %v4739_v52 = vld [vmem:[%s13185_s13 + $0x6f0] sm:$0xff]  ;;  %v4542_v55 = vld [vmem:[%s13185_s13 + $0xc8] sm:$0xff] }
 0x50e   : > { %4817 = vmatpush.msra.mxu2 %v4581_v1  ;;  %v4463_v19 = vadd.f32 %v4447_v15, %v4205_v56  ;;  %4795 = vmatmul.f32.vlgmr.msra.gmra.mxu1 %v10657_v33  ;;  %v4228_v31 = vadd.f32 %v4227_v22, %v10512_v61  ;;  %v10683_v39 = vsel %vm4472_vm6, %v4456_v25, %v4488_v29  ;;  %v4681_v60 = vld [vmem:[%s13185_s13 + $0x520] sm:$0xff]  ;;  %v4679_v27 = vld [vmem:[%s13185_s13 + $0x510] sm:$0xff]  ;;  %v4540_v1 = vld [vmem:[%s13185_s13 + $0xb8] sm:$0xff] }
 0x50f   : > { %4838 = vmatpush.msra.mxu0 %v4617_v49  ;;  %4818 = vmatmul.f32.vlgmr.msra.gmra.mxu2 %v10652_v30  ;;  %v4737_v25 = vld [vmem:[%s13185_s13 + $0x6e0] sm:$0xff]  ;;  %v4735_v12 = vld [vmem:[%s13185_s13 + $0x6d0] sm:$0xff]  ;;  %v4612_v49 = vld [vmem:[%s13185_s13 + $0x2f8] sm:$0xff] }
 0x510   : > { %4852 = vmatpush.msrb.mxu3 %v4667_v2  ;;  %v4251_v47 = vadd.f32 %v4250_v51, %v4228_v31  ;;  %v4495_v54 = vmul.f32 0.01, %v4463_v19  ;;  %4871 = vmatpush.msrb.mxu1 %v4707_v18  ;;  %vm4479_vm7 = vcmp.gt.f32.partialorder %v4463_v19, 0.0  ;;  %v4677_v41 = vld [vmem:[%s13185_s13 + $0x500] sm:$0xff]  ;;  %v4610_v2 = vld [vmem:[%s13185_s13 + $0x2e8] sm:$0xff]  ;;  %v4731_v15 = vld [vmem:[%s13185_s13 + $0x6b0] sm:$0xff] }
 0x511   : > { %4839 = vmatpush.msra.mxu0 %v4615_v17  ;;  %4894 = vmatpush.msrb.mxu2 %v4739_v52  ;;  %v4733_v56 = vld [vmem:[%s13185_s13 + $0x6c0] sm:$0xff]  ;;  %v4608_v17 = vld [vmem:[%s13185_s13 + $0x2d8] sm:$0xff]  ;;  %v4534_v51 = vld [vmem:[%s13185_s13 + $0x88] sm:$0xff] }
 0x512   : > { %4853 = vmatpush.msrb.mxu3 %v4665_v6  ;;  %v4464_v34 = vadd.f32 %v4448_v21, %v4251_v47  ;;  %4872 = vmatpush.msrb.mxu1 %v4705_v11  ;;  %v10689_v28 = vsel %vm4479_vm7, %v4463_v19, %v4495_v54  ;;  %v4729_v22 = vld [vmem:[%s13185_s13 + $0x6a0] sm:$0xff]  ;;  %v4606_v18 = vld [vmem:[%s13185_s13 + $0x2c8] sm:$0xff]  ;;  %v4727_v19 = vld [vmem:[%s13185_s13 + $0x690] sm:$0xff]  ;;  %vm5342_vm7 = vcmask 924672  }
 0x513   : > { %4840 = vmatpush.msra.mxu0 %v4613_v59  ;;  %4895 = vmatpush.msrb.mxu2 %v4737_v25  ;;  %v4741_v31 = vld [vmem:[%s13185_s13 + $0x700] sm:$0xf]  ;;  %v4532_v29 = vld [vmem:[%s13185_s13 + $0x78] sm:$0xff]  ;;  %v4530_v47 = vld [vmem:[%s13185_s13 + $0x68] sm:$0xff] }
 0x514   : > { %4841 = vmatmul.f32.vlgmr.msra.gmra.mxu0 %v10683_v39  ;;  %4854 = vmatpush.msrb.mxu3 %v4663_v36  ;;  %v4496_v16 = vmul.f32 0.01, %v4464_v34  ;;  %vm4480_vm12 = vcmp.gt.f32.partialorder %v4464_v34, 0.0  ;;  %v4580_v6 = vld [vmem:[%s13185_s13 + $0x1f8] sm:$0xff]  ;;  %v4725_v11 = vld [vmem:[%s13185_s13 + $0x680] sm:$0xff]  ;;  %v4578_v54 = vld [vmem:[%s13185_s13 + $0x1e8] sm:$0xff] }
 0x515   : > { %4873 = vmatpush.msrb.mxu1 %v4703_v4  ;;  %4896 = vmatpush.msrb.mxu2 %v4735_v12  ;;  %v4604_v59 = vld [vmem:[%s13185_s13 + $0x2b8] sm:$0xff]  ;;  %v4602_v36 = vld [vmem:[%s13185_s13 + $0x2a8] sm:$0xff]  ;;  %v4723_v21 = vld [vmem:[%s13185_s13 + $0x670] sm:$0xff] }
 0x516   : > { %4855 = vmatpush.msrb.mxu3 %v4661_v5  ;;  %4798 = vmatmul.f32.gmra.mxu1 %v10694_v48  ;;  %v10713_v13 = vsel %vm4480_vm12, %v4464_v34, %v4496_v16  ;;  %v4576_v4 = vld [vmem:[%s13185_s13 + $0x1d8] sm:$0xff]  ;;  %v4721_v5 = vld [vmem:[%s13185_s13 + $0x660] sm:$0xff]  ;;  %v4598_v16 = vld [vmem:[%s13185_s13 + $0x288] sm:$0xff]  ;;  %vm5416_vm12 = vcmask 908288  }
 0x517   : > { %4821 = vmatmul.f32.gmra.mxu2 %v10689_v28  ;;  %4874 = vmatpush.msrb.mxu1 %v4701_v50  ;;  %v4600_v34 = vld [vmem:[%s13185_s13 + $0x298] sm:$0xff]  ;;  %v4526_v50 = vld [vmem:[%s13185_s13 + $0x48] sm:$0xff] }
 0x518   : > { %4856 = vmatpush.msrb.mxu3 %v4659_v24  ;;  %4897 = vmatpush.msrb.mxu2 %v4733_v56  ;;  %v4574_v24 = vld [vmem:[%s13185_s13 + $0x1c8] sm:$0xff]  ;;  %v4564_v25 = vld [vmem:[%s13185_s13 + $0x178] sm:$0xff] }
 0x519   : > { %4875 = vmatpush.msrb.mxu1 %v4699_v32  ;;  %7447 = vmatpush.msk.msrb.mxu0 %vm4749_vm14, %v4741_v31  ;;  %v4719_v32 = vld [vmem:[%s13185_s13 + $0x650] sm:$0xff]  ;;  %v4590_v52 = vld [vmem:[%s13185_s13 + $0x248] sm:$0xff] }
 0x51a   : > { %4857 = vmatpush.msrb.mxu3 %v4657_v42  ;;  %4898 = vmatpush.msrb.mxu2 %v4731_v15  ;;  %v4524_v42 = vld [vmem:[%s13185_s13 + $0x38] sm:$0xff]  ;;  %v4441_v12 = vld [vmem:[#allocation2 + $0x28] sm:$0xff] }
 0x51b   : > { %4876 = vmatpush.msrb.mxu1 %v4697_v40  ;;  %4963 = vmatpush.msra.mxu0 %v4580_v6  ;;  %v4572_v40 = vld [vmem:[%s13185_s13 + $0x1b8] sm:$0xff] }
 0x51c   : > { %4844 = vmatmul.f32.gmra.mxu0 %v10713_v13  ;;  %4858 = vmatpush.msrb.mxu3 %v4655_v7  ;;  %v4584_v6 = vld [vmem:[%s13185_s13 + $0x218] sm:$0xff] }
 0x51d   : > { %4877 = vmatpush.msrb.mxu1 %v4695_v62  ;;  %4899 = vmatpush.msrb.mxu2 %v4729_v22  ;;  %v4596_v62 = vld [vmem:[%s13185_s13 + $0x278] sm:$0xff]  ;;  %v4586_v22 = vld [vmem:[%s13185_s13 + $0x228] sm:$0xff] }
 0x51e   : > { %4859 = vmatpush.msrb.mxu3 %v4653_v58  ;;  %4964 = vmatpush.msra.mxu0 %v4578_v54  ;;  %v4717_v58 = vld [vmem:[%s13185_s13 + $0x640] sm:$0xff] }
 0x51f   : > { %4878 = vmatpush.msrb.mxu1 %v4693_v23  ;;  %4900 = vmatpush.msrb.mxu2 %v4727_v19  ;;  %v4522_v23 = vld [vmem:[%s13185_s13 + $0x28] sm:$0xff] }
 0x520   : > { %4860 = vmatpush.msrb.mxu3 %v4651_v43  ;;  %4965 = vmatpush.msra.mxu0 %v4576_v4  ;;  %v4570_v43 = vld [vmem:[%s13185_s13 + $0x1a8] sm:$0xff] }
 0x521   : > { %4879 = vmatpush.msrb.mxu1 %v4691_v10  ;;  %4901 = vmatpush.msrb.mxu2 %v4725_v11  ;;  %v4594_v10 = vld [vmem:[%s13185_s13 + $0x268] sm:$0xff] }
 0x522   : > { %4861 = vmatpush.msrb.mxu3 %v4649_v44  ;;  %4966 = vmatpush.msra.mxu0 %v4574_v24  ;;  %v4715_v44 = vld [vmem:[%s13185_s13 + $0x630] sm:$0xff]  ;;  %v4642_v19 = vld [vmem:[%s13185_s13 + $0x3e8] sm:$0xff]  ;;  %v4449_v24 = vld [vmem:[#allocation2 + $0x78] sm:$0xff] }
 0x523   : > { %4880 = vmatpush.msrb.mxu1 %v4689_v14  ;;  %4902 = vmatpush.msrb.mxu2 %v4723_v21  ;;  %v4582_v21 = vld [vmem:[%s13185_s13 + $0x208] sm:$0xff] }
 0x524   : > { %4862 = vmatpush.msrb.mxu3 %v4647_v53  ;;  %4967 = vmatpush.msra.mxu0 %v4572_v40  ;;  %v4520_v53 = vld [vmem:[%s13185_s13 + $0x18] sm:$0xff] }
 0x525   : > { %4881 = vmatpush.msrb.mxu1 %v4687_v35  ;;  %4903 = vmatpush.msrb.mxu2 %v4721_v5  ;;  %v4568_v35 = vld [vmem:[%s13185_s13 + $0x198] sm:$0xff] }
 0x526   : > { %4863 = vmatpush.msrb.mxu3 %v4645_v57  ;;  %4968 = vmatpush.msra.mxu0 %v4570_v43  ;;  %v4636_v43 = vld [vmem:[%s13185_s13 + $0x3b8] sm:$0xff] }
 0x527   : > { %4882 = vmatpush.msrb.mxu1 %v4685_v38  ;;  %v4270_v7 = vpop.f32.mrf.mxu3  ;;  %4904 = vmatpush.msrb.mxu2 %v4719_v32  ;;  %v4592_v38 = vld [vmem:[%s13185_s13 + $0x258] sm:$0xff] }
 0x528   : > { %4940 = vmatpush.msra.mxu3 %v4548_v0  ;;  %v4271_v14 = vadd.f32 %v4270_v7, %v10462_v26  ;;  %v4713_v0 = vld [vmem:[%s13185_s13 + $0x620] sm:$0xff]  ;;  %4969 = vmatpush.msra.mxu0 %v4568_v35  ;;  %v4672_v32 = vld [vmem:[%s13185_s13 + $0x4d8] sm:$0xff] }
 0x529   : > { %4883 = vmatpush.msrb.mxu1 %v4683_v37  ;;  %4905 = vmatpush.msrb.mxu2 %v4717_v58  ;;  %v4450_v58 = vld [vmem:[#allocation2 + $0x80] sm:$0xff]  ;;  %v4560_v35 = vld [vmem:[%s13185_s13 + $0x158] sm:$0xff] }
 0x52a   : > { %4941 = vmatpush.msra.mxu3 %v4546_v3  ;;  %v4518_v3 = vld [vmem:[%s13185_s13 + $0x8] sm:$0xff] }
 0x52b   : > { %4884 = vmatpush.msrb.mxu1 %v4681_v60  ;;  %4906 = vmatpush.msrb.mxu2 %v4715_v44  ;;  %v4566_v60 = vld [vmem:[%s13185_s13 + $0x188] sm:$0xff] }
 0x52c   : > { %4942 = vmatpush.msra.mxu3 %v4544_v63  ;;  %4970 = vmatpush.msra.mxu0 %v4566_v60 }
 0x52d   : > { %4885 = vmatpush.msrb.mxu1 %v4679_v27  ;;  %v4711_v27 = vld [vmem:[%s13185_s13 + $0x610] sm:$0xff]  ;;  %4907 = vmatpush.msrb.mxu2 %v4713_v0 }
 0x52e   : > { %4943 = vmatpush.msra.mxu3 %v4542_v55  ;;  %4971 = vmatpush.msra.mxu0 %v4564_v25  ;;  %v4630_v25 = vld [vmem:[%s13185_s13 + $0x388] sm:$0xff] }
 0x52f   : > { %4886 = vmatpush.msrb.mxu1 %v4677_v41  ;;  %4908 = vmatpush.msrb.mxu2 %v4711_v27  ;;  %v4273_v15 = vpop.f32.mrf.mxu3  ;;  %v4732_v27 = vld [vmem:[%s13185_s13 + $0x6b8] sm:$0xff] }
 0x530   : > { %4944 = vmatpush.msra.mxu3 %v4540_v1  ;;  %v4588_v1 = vld [vmem:[%s13185_s13 + $0x238] sm:$0xff] }
 0x531   : > { %4986 = vmatpush.msra.mxu1 %v4612_v49  ;;  %v4709_v49 = vld [vmem:[%s13185_s13 + $0x600] sm:$0xff] }
 0x532   : > { %4945 = vmatpush.msra.mxu3 %v4538_v45  ;;  %4909 = vmatpush.msrb.mxu2 %v4709_v49  ;;  %v4554_v49 = vld [vmem:[%s13185_s13 + $0x128] sm:$0xff] }
 0x533   : > { %4987 = vmatpush.msra.mxu1 %v4610_v2  ;;  %v4644_v2 = vld [vmem:[%s13185_s13 + $0x3f8] sm:$0xff] }
 0x534   : > { %4946 = vmatpush.msra.mxu3 %v4536_v9  ;;  %v4562_v9 = vld [vmem:[%s13185_s13 + $0x168] sm:$0xff]  ;;  %5009 = vmatpush.msra.mxu2 %v4644_v2  ;;  %v4552_v2 = vld [vmem:[%s13185_s13 + $0x118] sm:$0xff] }
 0x535   : > { %4988 = vmatpush.msra.mxu1 %v4608_v17  ;;  %v4442_v17 = vld [vmem:[#allocation2 + $0x30] sm:$0xff]  ;;  %4972 = vmatpush.msra.mxu0 %v4562_v9  ;;  %v4658_v9 = vld [vmem:[%s13185_s13 + $0x468] sm:$0xff] }
 0x536   : > { %4947 = vmatpush.msra.mxu3 %v4534_v51  ;;  %5010 = vmatpush.msra.mxu2 %v4642_v19  ;;  %v4722_v19 = vld [vmem:[%s13185_s13 + $0x668] sm:$0xff] }
 0x537   : > { %4989 = vmatpush.msra.mxu1 %v4606_v18  ;;  %4973 = vmatpush.msra.mxu0 %v4560_v35 }
 0x538   : > { %4948 = vmatpush.msra.mxu3 %v4532_v29  ;;  %v4676_v29 = vld [vmem:[%s13185_s13 + $0x4f8] sm:$0xff] }
 0x539   : > { %4990 = vmatpush.msra.mxu1 %v4604_v59  ;;  %v4274_v59 = vadd.f32 %v4273_v15, %v10512_v61  ;;  %v4726_v15 = vld [vmem:[%s13185_s13 + $0x688] sm:$0xff] }
 0x53a   : > { %4949 = vmatpush.msra.mxu3 %v4530_v47 }
 0x53b   : > { %4991 = vmatpush.msra.mxu1 %v4602_v36  ;;  %v4674_v36 = vld [vmem:[%s13185_s13 + $0x4e8] sm:$0xff] }
 0x53c   : > { %4950 = vmatpush.msra.mxu3 %v4528_v46  ;;  %v4640_v46 = vld [vmem:[%s13185_s13 + $0x3d8] sm:$0xff] }
 0x53d   : > { %4992 = vmatpush.msra.mxu1 %v4600_v34  ;;  %5011 = vmatpush.msra.mxu2 %v4640_v46  ;;  %v4618_v46 = vld [vmem:[%s13185_s13 + $0x328] sm:$0xff] }
 0x53e   : > { %4951 = vmatpush.msra.mxu3 %v4526_v50  ;;  %v4740_v50 = vld [vmem:[%s13185_s13 + $0x6f8] sm:$0xff] }
 0x53f   : > { %4993 = vmatpush.msra.mxu1 %v4598_v16 }
 0x540   : > { %4952 = vmatpush.msra.mxu3 %v4524_v42  ;;  %v4638_v42 = vld [vmem:[%s13185_s13 + $0x3c8] sm:$0xff] }
 0x541   : > { %4994 = vmatpush.msra.mxu1 %v4596_v62  ;;  %v4738_v62 = vld [vmem:[%s13185_s13 + $0x6e8] sm:$0xff]  ;;  %5012 = vmatpush.msra.mxu2 %v4638_v42 }
 0x542   : > { %v4316_v57 = vpop.f32.mrf.mxu2  ;;  %4953 = vmatpush.msra.mxu3 %v4522_v23  ;;  %v4670_v23 = vld [vmem:[%s13185_s13 + $0x4c8] sm:$0xff] }
 0x543   : > { %v4317_v37 = vadd.f32 %v4316_v57, %v10462_v26  ;;  %4995 = vmatpush.msra.mxu1 %v4594_v10  ;;  %5013 = vmatpush.msra.mxu2 %v4636_v43  ;;  %v4634_v57 = vld [vmem:[%s13185_s13 + $0x3a8] sm:$0xff] }
 0x544   : > { %v4293_v63 = vpop.f32.mrf.mxu1  ;;  %4954 = vmatpush.msra.mxu3 %v4520_v53  ;;  %v4668_v53 = vld [vmem:[%s13185_s13 + $0x4b8] sm:$0xff]  ;;  %v4614_v42 = vld [vmem:[%s13185_s13 + $0x308] sm:$0xff] }
 0x545   : > { %v4294_v55 = vadd.f32 %v4293_v63, %v4271_v14  ;;  %4996 = vmatpush.msra.mxu1 %v4592_v38  ;;  %v4736_v14 = vld [vmem:[%s13185_s13 + $0x6d8] sm:$0xff]  ;;  %5014 = vmatpush.msra.mxu2 %v4634_v57 }
 0x546   : > { %v4339_v41 = vpop.f32.mrf.mxu0  ;;  %4955 = vmatpush.msra.mxu3 %v4518_v3  ;;  %v4734_v3 = vld [vmem:[%s13185_s13 + $0x6c8] sm:$0xff]  ;;  %v4632_v63 = vld [vmem:[%s13185_s13 + $0x398] sm:$0xff] }
 0x547   : > { %v4457_v45 = vadd.f32 %v4441_v12, %v4294_v55  ;;  %v4340_v56 = vadd.f32 %v4339_v41, %v4317_v37  ;;  %4997 = vmatpush.msra.mxu1 %v4590_v52  ;;  %v4666_v37 = vld [vmem:[%s13185_s13 + $0x4a8] sm:$0xff]  ;;  %v4664_v52 = vld [vmem:[%s13185_s13 + $0x498] sm:$0xff]  ;;  %5015 = vmatpush.msra.mxu2 %v4632_v63 }
 0x548   : > { %v4558_v55 = vld [vmem:[%s13185_s13 + $0x148] sm:$0xff] }
 0x549   : > { %v4458_v51 = vadd.f32 %v4442_v17, %v4340_v56  ;;  %vm4473_vm15 = vcmp.gt.f32.partialorder %v4457_v45, 0.0  ;;  %v4489_v18 = vmul.f32 0.01, %v4457_v45  ;;  %4998 = vmatpush.msra.mxu1 %v4588_v1  ;;  %v4662_v12 = vld [vmem:[%s13185_s13 + $0x488] sm:$0xff]  ;;  %4974 = vmatpush.msra.mxu0 %v4558_v55  ;;  %v4556_v1 = vld [vmem:[%s13185_s13 + $0x138] sm:$0xff] }
 0x54a   : > { %v4319_v31 = vpop.f32.mrf.mxu2  ;;  %v4730_v41 = vld [vmem:[%s13185_s13 + $0x6a8] sm:$0xff]  ;;  %v4728_v56 = vld [vmem:[%s13185_s13 + $0x698] sm:$0xff]  ;;  %5016 = vmatpush.msra.mxu2 %v4630_v25 }
 0x54b   : > { %v4490_v11 = vmul.f32 0.01, %v4458_v51  ;;  %v10948_v47 = vsel %vm4473_vm15, %v4457_v45, %v4489_v18  ;;  %vm4474_vm8 = vcmp.gt.f32.partialorder %v4458_v51, 0.0  ;;  %4999 = vmatpush.msra.mxu1 %v4586_v22  ;;  %v4320_v4 = vadd.f32 %v4319_v31, %v10512_v61  ;;  %v4660_v45 = vld [vmem:[%s13185_s13 + $0x478] sm:$0xff]  ;;  %4975 = vmatpush.msra.mxu0 %v4556_v1  ;;  %v4626_v18 = vld [vmem:[%s13185_s13 + $0x368] sm:$0xff] }
 0x54c   : > { %v4296_v54 = vpop.f32.mrf.mxu1  ;;  %4864 = vmatmul.f32.vlgmr.msrb.gmra.mxu3 %v10948_v47  ;;  %v4628_v17 = vld [vmem:[%s13185_s13 + $0x378] sm:$0xff]  ;;  %v4742_v63 = vld [vmem:[%s13185_s13 + $0x708] sm:$0xf] }
 0x54d   : > { %v4297_v34 = vadd.f32 %v4296_v54, %v4274_v59  ;;  %5032 = vmatpush.msrb.mxu3 %v4676_v29  ;;  %v10961_v5 = vsel %vm4474_vm8, %v4458_v51, %v4490_v11  ;;  %5000 = vmatpush.msra.mxu1 %v4584_v6  ;;  %v4724_v22 = vld [vmem:[%s13185_s13 + $0x678] sm:$0xff]  ;;  %v4550_v51 = vld [vmem:[%s13185_s13 + $0x108] sm:$0xff] }
 0x54e   : > { %v4342_v16 = vpop.f32.mrf.mxu0  ;;  %4887 = vmatmul.f32.vlgmr.msrb.gmra.mxu1 %v10961_v5  ;;  %4976 = vmatpush.msra.mxu0 %v4554_v49  ;;  %v4624_v31 = vld [vmem:[%s13185_s13 + $0x358] sm:$0xff]  ;;  %v4622_v59 = vld [vmem:[%s13185_s13 + $0x348] sm:$0xff] }
 0x54f   : > { %v4465_v40 = vadd.f32 %v4449_v24, %v4297_v34  ;;  %v4343_v7 = vadd.f32 %v4342_v16, %v4320_v4  ;;  %5033 = vmatpush.msrb.mxu3 %v4674_v36  ;;  %5001 = vmatpush.msra.mxu1 %v4582_v21  ;;  %v4652_v29 = vld [vmem:[%s13185_s13 + $0x438] sm:$0xff]  ;;  %v4650_v11 = vld [vmem:[%s13185_s13 + $0x428] sm:$0xff] }
 0x550   : > { %4977 = vmatpush.msra.mxu0 %v4552_v2  ;;  %5017 = vmatpush.msra.mxu2 %v4628_v17  ;;  %v4720_v6 = vld [vmem:[%s13185_s13 + $0x658] sm:$0xff]  ;;  %v4718_v54 = vld [vmem:[%s13185_s13 + $0x648] sm:$0xff]  ;;  %v4452_v2 = vld [vmem:[#allocation2 + $0x90] sm:$0xff] }
 0x551   : > { %5078 = vmatpush.msrb.mxu1 %v4740_v50  ;;  %v4466_v10 = vadd.f32 %v4450_v58, %v4343_v7  ;;  %5034 = vmatpush.msrb.mxu3 %v4672_v32  ;;  %vm4481_vm10 = vcmp.gt.f32.partialorder %v4465_v40, 0.0  ;;  %v4497_v44 = vmul.f32 0.01, %v4465_v40  ;;  %v4620_v36 = vld [vmem:[%s13185_s13 + $0x338] sm:$0xff]  ;;  %v4646_v4 = vld [vmem:[%s13185_s13 + $0x408] sm:$0xff] }
 0x552   : > { %4978 = vmatpush.msra.mxu0 %v4550_v51  ;;  %5018 = vmatpush.msra.mxu2 %v4626_v18  ;;  %v4716_v21 = vld [vmem:[%s13185_s13 + $0x638] sm:$0xff]  ;;  %v4706_v49 = vld [vmem:[%s13185_s13 + $0x5e8] sm:$0xff] }
 0x553   : > { %5079 = vmatpush.msrb.mxu1 %v4738_v62  ;;  %5035 = vmatpush.msrb.mxu3 %v4670_v23  ;;  %v10994_v38 = vsel %vm4481_vm10, %v4465_v40, %v4497_v44  ;;  %vm4482_vm0 = vcmp.gt.f32.partialorder %v4466_v10, 0.0  ;;  %v4498_v0 = vmul.f32 0.01, %v4466_v10  ;;  %v4616_v50 = vld [vmem:[%s13185_s13 + $0x318] sm:$0xff]  ;;  %v4710_v40 = vld [vmem:[%s13185_s13 + $0x608] sm:$0xff] }
 0x554   : > { %4867 = vmatmul.f32.gmra.mxu3 %v10994_v38  ;;  %5019 = vmatpush.msra.mxu2 %v4624_v31  ;;  %v4712_v16 = vld [vmem:[%s13185_s13 + $0x618] sm:$0xff]  ;;  %v4698_v51 = vld [vmem:[%s13185_s13 + $0x5a8] sm:$0xff] }
 0x555   : > { %5080 = vmatpush.msrb.mxu1 %v4736_v14  ;;  %5036 = vmatpush.msrb.mxu3 %v4668_v53  ;;  %v11003_v60 = vsel %vm4482_vm0, %v4466_v10, %v4498_v0  ;;  %v4443_v62 = vld [vmem:[#allocation2 + $0x38] sm:$0xff]  ;;  %v4444_v0 = vld [vmem:[#allocation2 + $0x40] sm:$0xff]  ;;  %v4690_v31 = vld [vmem:[%s13185_s13 + $0x568] sm:$0xff] }
 0x556   : > { %4890 = vmatmul.f32.gmra.mxu1 %v11003_v60  ;;  %5020 = vmatpush.msra.mxu2 %v4622_v59  ;;  %v4696_v18 = vld [vmem:[%s13185_s13 + $0x598] sm:$0xff]  ;;  %v4678_v59 = vld [vmem:[%s13185_s13 + $0x508] sm:$0xff] }
 0x557   : > { %5037 = vmatpush.msrb.mxu3 %v4666_v37  ;;  %5081 = vmatpush.msrb.mxu1 %v4734_v3 }
 0x558   : > { %5021 = vmatpush.msra.mxu2 %v4620_v36 }
 0x559   : > { %5038 = vmatpush.msrb.mxu3 %v4664_v52  ;;  %5082 = vmatpush.msrb.mxu1 %v4732_v27  ;;  %v4451_v52 = vld [vmem:[#allocation2 + $0x88] sm:$0xff] }
 0x55a   : > { %5022 = vmatpush.msra.mxu2 %v4618_v46 }
 0x55b   : > { %5039 = vmatpush.msrb.mxu3 %v4662_v12  ;;  %5083 = vmatpush.msrb.mxu1 %v4730_v41 }
 0x55c   : > { %4956 = vmatmul.f32.vlgmr.msra.gmra.mxu3 %v10580_v8  ;;  %v4656_v8 = vld [vmem:[%s13185_s13 + $0x458] sm:$0xff]  ;;  %5023 = vmatpush.msra.mxu2 %v4616_v50 }
 0x55d   : > { %5040 = vmatpush.msrb.mxu3 %v4660_v45  ;;  %5084 = vmatpush.msrb.mxu1 %v4728_v56 }
 0x55e   : > { %5002 = vmatmul.f32.vlgmr.msra.gmra.mxu1 %v10652_v30  ;;  %v4654_v30 = vld [vmem:[%s13185_s13 + $0x448] sm:$0xff]  ;;  %5024 = vmatpush.msra.mxu2 %v4614_v42 }
 0x55f   : > { %5041 = vmatpush.msrb.mxu3 %v4658_v9  ;;  %5085 = vmatpush.msrb.mxu1 %v4726_v15  ;;  %v4704_v9 = vld [vmem:[%s13185_s13 + $0x5d8] sm:$0xff]  ;;  %v4702_v15 = vld [vmem:[%s13185_s13 + $0x5c8] sm:$0xff] }
 0x561   : > { %5042 = vmatpush.msrb.mxu3 %v4656_v8  ;;  %5086 = vmatpush.msrb.mxu1 %v4724_v22  ;;  %v4700_v8 = vld [vmem:[%s13185_s13 + $0x5b8] sm:$0xff] }
 0x563   : > { %5043 = vmatpush.msrb.mxu3 %v4654_v30  ;;  %5087 = vmatpush.msrb.mxu1 %v4722_v19  ;;  %v4694_v30 = vld [vmem:[%s13185_s13 + $0x588] sm:$0xff]  ;;  %v4692_v19 = vld [vmem:[%s13185_s13 + $0x578] sm:$0xff] }
 0x564   : > { %4959 = vmatmul.f32.gmra.mxu3 %v10633_v20  ;;  %v4648_v20 = vld [vmem:[%s13185_s13 + $0x418] sm:$0xff] }
 0x565   : > { %5044 = vmatpush.msrb.mxu3 %v4652_v29  ;;  %5088 = vmatpush.msrb.mxu1 %v4720_v6  ;;  %v4385_v34 = vpop.f32.mrf.mxu3  ;;  %v4686_v29 = vld [vmem:[%s13185_s13 + $0x548] sm:$0xff] }
 0x566   : > { %5005 = vmatmul.f32.gmra.mxu1 %v10689_v28  ;;  %v4714_v28 = vld [vmem:[%s13185_s13 + $0x628] sm:$0xff] }
 0x567   : > { %5045 = vmatpush.msrb.mxu3 %v4650_v11  ;;  %5089 = vmatpush.msrb.mxu1 %v4718_v54  ;;  %v4682_v6 = vld [vmem:[%s13185_s13 + $0x528] sm:$0xff] }
 0x569   : > { %5046 = vmatpush.msrb.mxu3 %v4648_v20  ;;  %5090 = vmatpush.msrb.mxu1 %v4716_v21 }
 0x56a   : > { %v4362_v24 = vpop.f32.mrf.mxu1  ;;  %v4431_v58 = vpop.f32.mrf.mxu2 }
 0x56b   : > { %v4363_v32 = vadd.f32 %v4362_v24, %v10462_v26  ;;  %5047 = vmatpush.msrb.mxu3 %v4646_v4  ;;  %5091 = vmatpush.msrb.mxu1 %v4714_v28 }
 0x56c   : > { %5048 = vmatmul.f32.vlgmr.msrb.gmra.mxu3 %v10948_v47 }
 0x56d   : > { %v4386_v7 = vadd.f32 %v4385_v34, %v4363_v32  ;;  %5092 = vmatpush.msrb.mxu1 %v4712_v16  ;;  %v4388_v53 = vpop.f32.mrf.mxu3 }
 0x56f   : > { %v4459_v23 = vadd.f32 %v4443_v62, %v4386_v7  ;;  %5093 = vmatpush.msrb.mxu1 %v4710_v40 }
 0x571   : > { %v4408_v43 = vpop.f32.mrf.mxu0  ;;  %v4491_v10 = vmul.f32 0.01, %v4459_v23  ;;  %vm4475_vm1 = vcmp.gt.f32.partialorder %v4459_v23, 0.0 }
 0x572   : > { %v4409_v44 = vadd.f32 %v4408_v43, %v10462_v26  ;;  %v4434_v25 = vpop.f32.mrf.mxu2 }
 0x573   : > { %v4365_v14 = vpop.f32.mrf.mxu1  ;;  %v4507_v47 = vsel %vm4475_vm1, %v4459_v23, %v4491_v10 }
 0x574   : > { %v4432_v35 = vadd.f32 %v4431_v58, %v4409_v44  ;;  %v4366_v57 = vadd.f32 %v4365_v14, %v10512_v61  ;;  %4910 = vmatmul.f32.vlgmr.msrb.gmra.mxu2 %v4507_v47  ;;  %5051 = vmatmul.f32.gmra.mxu3 %v10994_v38  ;;  %v4708_v38 = vld [vmem:[%s13185_s13 + $0x5f8] sm:$0xff] }
 0x575   : > { %5094 = vmatmul.f32.vlgmr.msrb.gmra.mxu1 %v4507_v47  ;;  %7450 = vmatpush.msk.msrb.mxu2 %vm4749_vm14, %v4742_v63  ;;  %vm5152_vm14 = vcmask 138240  }
 0x576   : > { %v4460_v37 = vadd.f32 %v4444_v0, %v4432_v35  ;;  %v4389_v3 = vadd.f32 %v4388_v53, %v4366_v57 }
 0x578   : > { %vm4476_vm2 = vcmp.gt.f32.partialorder %v4460_v37, 0.0  ;;  %v4492_v26 = vmul.f32 0.01, %v4460_v37  ;;  %v4467_v27 = vadd.f32 %v4451_v52, %v4389_v3 }
 0x579   : > { %v4411_v55 = vpop.f32.mrf.mxu0 }
 0x57a   : > { %v4412_v12 = vadd.f32 %v4411_v55, %v10512_v61  ;;  %v4508_v41 = vsel %vm4476_vm2, %v4460_v37, %v4492_v26  ;;  %vm4483_vm5 = vcmp.gt.f32.partialorder %v4467_v27, 0.0  ;;  %v4499_v1 = vmul.f32 0.01, %v4467_v27 }
 0x57b   : > { %7448 = vmatmul.msk.f32.vlgmr.msrb.gmra.mxu0 %vm576_vm9, %v4508_v41 }
 0x57c   : > { %v4435_v45 = vadd.f32 %v4434_v25, %v4412_v12  ;;  %5055 = vmatpush.msrb.mxu0 %v4708_v38  ;;  %v4515_v56 = vsel %vm4483_vm5, %v4467_v27, %v4499_v1  ;;  %vm7320_vm5 = vcmask 523264  }
 0x57d   : > { %4913 = vmatmul.f32.gmra.mxu2 %v4515_v56  ;;  %5097 = vmatmul.f32.gmra.mxu1 %v4515_v56 }
 0x57e   : > { %v4468_v61 = vadd.f32 %v4452_v2, %v4435_v45  ;;  %5056 = vmatpush.msrb.mxu0 %v4706_v49 }
 0x580   : > { %5057 = vmatpush.msrb.mxu0 %v4704_v9  ;;  %vm4484_vm6 = vcmp.gt.f32.partialorder %v4468_v61, 0.0  ;;  %v4500_v17 = vmul.f32 0.01, %v4468_v61 }
 0x582   : > { %5058 = vmatpush.msrb.mxu0 %v4702_v15  ;;  %v4516_v22 = vsel %vm4484_vm6, %v4468_v61, %v4500_v17  ;;  %vm7344_vm6 = vcmask 253952  }
 0x583   : > { %7449 = vmatmul.msk.f32.gmra.mxu0 %vm576_vm9, %v4516_v22 }
 0x584   : > { %5059 = vmatpush.msrb.mxu0 %v4700_v8 }
 0x585   : > { %5025 = vmatmul.f32.vlgmr.msra.gmra.mxu2 %v10683_v39  ;;  %v4688_v39 = vld [vmem:[%s13185_s13 + $0x558] sm:$0xff] }
 0x586   : > { %5060 = vmatpush.msrb.mxu0 %v4698_v51 }
 0x588   : > { %5061 = vmatpush.msrb.mxu0 %v4696_v18 }
 0x58a   : > { %5062 = vmatpush.msrb.mxu0 %v4694_v30 }
 0x58b   : > { %4979 = vmatmul.f32.vlgmr.msra.gmra.mxu0 %v10657_v33  ;;  %v4684_v33 = vld [vmem:[%s13185_s13 + $0x538] sm:$0xff] }
 0x58c   : > { %5063 = vmatpush.msrb.mxu0 %v4692_v19 }
 0x58d   : > { %5028 = vmatmul.f32.gmra.mxu2 %v10713_v13  ;;  %v4680_v13 = vld [vmem:[%s13185_s13 + $0x518] sm:$0xff] }
 0x58e   : > { %5064 = vmatpush.msrb.mxu0 %v4690_v31 }
 0x590   : > { %5065 = vmatpush.msrb.mxu0 %v4688_v39 }
 0x591   : > { %v4842_v20 = vpop.f32.mrf.mxu0 }
 0x592   : > { %5066 = vmatpush.msrb.mxu0 %v4686_v29  ;;  %v4819_v54 = vpop.f32.mrf.mxu2 }
 0x593   : > { %4982 = vmatmul.f32.gmra.mxu0 %v10694_v48  ;;  %v8095_v48 = vld [vmem:[#allocation2] sm:$0xff] }
 0x594   : > { %5067 = vmatpush.msrb.mxu0 %v4684_v33  ;;  %v11189_v11 = vpack.i.bf16 %v8095_v48, %v8095_v48  ;;  %v5470_v48 = vld [vmem:[%s13182_s10 + $0x8] sm:$0xff] }
 0x595   : > { %7451 = vmatmul.msk.f32.vlgmr.msrb.gmra.mxu2 %vm576_vm9, %v4508_v41 }
 0x596   : > { %5068 = vmatpush.msrb.mxu0 %v4682_v6  ;;  %8023 = vrot.lane.b32.xlu0 %v11189_v11, %s8107_s2 }
 0x597   : > { %8018 = vrot.lane.b32.xlu1 %v11189_v11, %s8114_s22  ;;  %8013 = vrot.lane.b32.xlu2 %v11189_v11, %s8115_s1 }
 0x598   : > { %5069 = vmatpush.msrb.mxu0 %v4680_v13 }
 0x599   : > { %v4845_v50 = vpop.f32.mrf.mxu0 }
 0x59a   : > { %5070 = vmatpush.msrb.mxu0 %v4678_v59  ;;  %v4822_v34 = vpop.f32.mrf.mxu2 }
 0x59b   : > { %5071 = vmatmul.f32.vlgmr.msrb.gmra.mxu0 %v10961_v5  ;;  %v4773_v5 = vpop.f32.mrf.mxu3 }
 0x59d   : > { %7452 = vmatmul.msk.f32.gmra.mxu2 %vm576_vm9, %v4516_v22  ;;  %vm5379_vm9 = vcmask 916480  }
 0x59e   : > { %8028 = vrot.lane.b32.xlu0 %v11189_v11, %s8108_s23 }
 0x59f   : > { %8038 = vrot.lane.b32.xlu1 %v11189_v11, %s8116_s29  ;;  %8033 = vrot.lane.b32.xlu2 %v11189_v11, %s8117_s30 }
 0x5a3   : > { %5074 = vmatmul.f32.gmra.mxu0 %v11003_v60  ;;  %v4796_v60 = vpop.f32.mrf.mxu1  ;;  %v4776_v36 = vpop.f32.mrf.mxu3 }
 0x5a4   : > { %v4797_v21 = vadd.f32 %v4796_v60, %v4773_v5  ;;  %v5469_v5 = vld [vmem:[%s13182_s10] sm:$0xff] }
 0x5a6   : > { %8043 = vrot.lane.b32.xlu0 %v11189_v11, %s13193_s0  ;;  %v4820_v4 = vadd.f32 %v4819_v54, %v4797_v21 }
 0x5a8   : > { %v4843_v24 = vadd.f32 %v4842_v20, %v4820_v4 }
 0x5ab   : > { %v4799_v46 = vpop.f32.mrf.mxu1 }
 0x5ac   : > { %v4800_v7 = vadd.f32 %v4799_v46, %v4776_v36 }
 0x5ae   : > { %v4823_v43 = vadd.f32 %v4822_v34, %v4800_v7 }
 0x5b0   : > { %v4846_v14 = vadd.f32 %v4845_v50, %v4823_v43 }
 0x5cb   : > { %v4888_v32 = vpop.f32.mrf.mxu1 }
 0x5cf   : > { %v4865_v28 = vpop.f32.mrf.mxu3 }
 0x5d0   : > { %v4866_v16 = vadd.f32 %v4865_v28, %v4843_v24 }
 0x5d2   : > { %v4889_v42 = vadd.f32 %v4888_v32, %v4866_v16 }
 0x5d3   : > { %v4891_v44 = vpop.f32.mrf.mxu1 }
 0x5d7   : > { %v4868_v62 = vpop.f32.mrf.mxu3 }
 0x5d8   : > { %v4869_v53 = vadd.f32 %v4868_v62, %v4846_v14 }
 0x5da   : > { %v4892_v0 = vadd.f32 %v4891_v44, %v4869_v53 }
 0x5db   : > { %v5003_v3 = vpop.f32.mrf.mxu1 }
 0x5df   : > { %v4957_v57 = vpop.f32.mrf.mxu3 }
 0x5e3   : > { %v5006_v12 = vpop.f32.mrf.mxu1 }
 0x5e7   : > { %v4960_v55 = vpop.f32.mrf.mxu3 }
 0x5ef   : > { %v5049_v49 = vpop.f32.mrf.mxu3 }
 0x5f1   : > { %v8014_v13 = vpop.permute.xlu2 %8013 }
 0x5f2   : > { %v5095_v61 = vpop.f32.mrf.mxu1 }
 0x5f7   : > { %v4911_v40 = vpop.f32.mrf.mxu2  ;;  %v5052_v18 = vpop.f32.mrf.mxu3 }
 0x5f8   : > { %v4934_v58 = vpop.f32.mrf.mxu0  ;;  %v4912_v23 = vadd.f32 %v4911_v40, %v4889_v42 }
 0x5f9   : > { %v11287_v60 = vpop.permute.xlu2 %8033 }
 0x5fa   : > { %v11205_v10 = vadd.f32 %v4934_v58, %v4912_v23  ;;  %v5098_v39 = vpop.f32.mrf.mxu1 }
 0x5fc   : > { %5294 = vrot.lane.b32.xlu1 %v11205_v10, %s8107_s2  ;;  %5330 = vrot.lane.b32.xlu2 %v11205_v10, %s8114_s22 }
 0x5fd   : > { %5367 = vrot.lane.b32.xlu0 %v11205_v10, %s8115_s1 }
 0x600   : > { %v4937_v47 = vpop.f32.mrf.mxu0  ;;  %v4914_v35 = vpop.f32.mrf.mxu2 }
 0x601   : > { %v4915_v37 = vadd.f32 %v4914_v35, %v4892_v0  ;;  %v8015_v0 = vunpack.i.l.bf16 %v8014_v13 }
 0x603   : > { %v11219_v26 = vadd.f32 %v4937_v47, %v4915_v37 }
 0x604   : > { %5179 = vrot.lane.b32.xlu1 %v11205_v10, %s8116_s29  ;;  %5215 = vrot.lane.b32.xlu2 %v11205_v10, %s8117_s30 }
 0x605   : > { %5252 = vrot.lane.b32.xlu0 %v11205_v10, %s8108_s23 }
 0x608   : > { %v4980_v63 = vpop.f32.mrf.mxu0  ;;  %v5026_v52 = vpop.f32.mrf.mxu2 }
 0x609   : > { %v4981_v27 = vadd.f32 %v4980_v63, %v4957_v57  ;;  %v11279_v59 = vpop.permute.xlu0 %8023  ;;  %v8019_v54 = vpop.permute.xlu1 %8018 }
 0x60b   : > { %v5004_v25 = vadd.f32 %v5003_v3, %v4981_v27  ;;  %v8016_v3 = vunpack.i.h.bf16 %v8014_v13 }
 0x60c   : > { %5300 = vrot.lane.b32.xlu1 %v11219_v26, %s8107_s2  ;;  %5336 = vrot.lane.b32.xlu2 %v11219_v26, %s8114_s22 }
 0x60d   : > { %5373 = vrot.lane.b32.xlu0 %v11219_v26, %s8115_s1  ;;  %v5027_v1 = vadd.f32 %v5026_v52, %v5004_v25 }
 0x60f   : > { %v5050_v56 = vadd.f32 %v5049_v49, %v5027_v1 }
 0x610   : > { %v4983_v38 = vpop.f32.mrf.mxu0  ;;  %v5029_v41 = vpop.f32.mrf.mxu2 }
 0x611   : > { %v4984_v45 = vadd.f32 %v4983_v38, %v4960_v55  ;;  %v11289_v36 = vpop.permute.xlu0 %8028  ;;  %v11295_v21 = vpop.permute.xlu1 %8038  ;;  %v8020_v55 = vunpack.i.l.bf16 %v8019_v54 }
 0x612   : > { %v8041_v24 = vunpack.i.h.bf16 %v11295_v21 }
 0x613   : > { %v5007_v15 = vadd.f32 %v5006_v12, %v4984_v45  ;;  %v8025_v45 = vunpack.i.l.bf16 %v11279_v59 }
 0x614   : > { %5258 = vrot.lane.b32.xlu1 %v11219_v26, %s8108_s23  ;;  %5185 = vrot.lane.b32.xlu2 %v11219_v26, %s8116_s29 }
 0x615   : > { %5221 = vrot.lane.b32.xlu0 %v11219_v26, %s8117_s30  ;;  %v5030_v51 = vadd.f32 %v5029_v41, %v5007_v15  ;;  %v8021_v41 = vunpack.i.h.bf16 %v8019_v54 }
 0x617   : > { %v5053_v19 = vadd.f32 %v5052_v18, %v5030_v51 }
 0x618   : > { %v5072_v2 = vpop.f32.mrf.mxu0  ;;  %v5118_v8 = vpop.f32.mrf.mxu2 }
 0x619   : > { %v5073_v9 = vadd.f32 %v5072_v2, %v5050_v56  ;;  %v11297_v46 = vpop.permute.xlu0 %8043 }
 0x61b   : > { %v5096_v17 = vadd.f32 %v5095_v61, %v5073_v9  ;;  %v8026_v61 = vunpack.i.h.bf16 %v11279_v59  ;;  %v8036_v59 = vunpack.i.h.bf16 %v11287_v60 }
 0x61d   : > { %v11233_v22 = vadd.f32 %v5118_v8, %v5096_v17 }
 0x61f   : > { %5369 = vrot.lane.b32.xlu1 %v11233_v22, %s8115_s1  ;;  %5296 = vrot.lane.b32.xlu2 %v11233_v22, %s8107_s2 }
 0x620   : > { %5332 = vrot.lane.b32.xlu0 %v11233_v22, %s8114_s22  ;;  %v5075_v30 = vpop.f32.mrf.mxu0  ;;  %v5121_v33 = vpop.f32.mrf.mxu2 }
 0x621   : > { %v5076_v31 = vadd.f32 %v5075_v30, %v5053_v19  ;;  %v8030_v19 = vunpack.i.l.bf16 %v11289_v36 }
 0x623   : > { %v5099_v29 = vadd.f32 %v5098_v39, %v5076_v31  ;;  %v8031_v39 = vunpack.i.h.bf16 %v11289_v36 }
 0x625   : > { %v11247_v6 = vadd.f32 %v5121_v33, %v5099_v29 }
 0x627   : > { %5254 = vrot.lane.b32.xlu1 %v11233_v22, %s8108_s23  ;;  %5181 = vrot.lane.b32.xlu2 %v11233_v22, %s8116_s29 }
 0x628   : > { %5217 = vrot.lane.b32.xlu0 %v11233_v22, %s8117_s30 }
 0x62f   : > { %5375 = vrot.lane.b32.xlu1 %v11247_v6, %s8115_s1  ;;  %5302 = vrot.lane.b32.xlu2 %v11247_v6, %s8107_s2 }
 0x630   : > { %5338 = vrot.lane.b32.xlu0 %v11247_v6, %s8114_s22 }
 0x637   : > { %5148 = vrot.lane.b32.xlu1 %v11219_v26, %s13193_s0  ;;  %5260 = vrot.lane.b32.xlu2 %v11247_v6, %s8108_s23 }
 0x638   : > { %5142 = vrot.lane.b32.xlu0 %v11205_v10, %s13193_s0 }
 0x63f   : > { %5223 = vrot.lane.b32.xlu1 %v11247_v6, %s8117_s30  ;;  %5410 = vrot.lane.b32.xlu2 %v11219_v26, %s13191_s21 }
 0x640   : > { %5187 = vrot.lane.b32.xlu0 %v11247_v6, %s8116_s29 }
 0x647   : > { %5144 = vrot.lane.b32.xlu1 %v11233_v22, %s13193_s0  ;;  %5150 = vrot.lane.b32.xlu2 %v11247_v6, %s13193_s0  ;;  %s13200_s0 = sld [smem:[#allocation9_spill]] }
 0x648   : > { %5412 = vrot.lane.b32.xlu0 %v11247_v6, %s13191_s21 }
 0x64f   : > { %8048 = vrot.lane.b32.xlu1 %v11189_v11, %s13191_s21  ;;  %5404 = vrot.lane.b32.xlu2 %v11205_v10, %s13191_s21 }
 0x650   : > { %5406 = vrot.lane.b32.xlu0 %v11233_v22, %s13191_s21  ;;  %s571_s21 = scalar_lea.vmem %s13190_s18, %s13204_s28 }
 0x656   : > { %v5331_v20 = vpop.permute.xlu2 %5330 }
 0x657   : > { %5478 = vperm.xlu1 %8011, %v5470_v48   ;;  %5473 = vperm.xlu2 %7969, %v5469_v5   ;;  %v8035_v48 = vunpack.i.l.bf16 %v11287_v60 }
 0x65e   : > { %v11303_v4 = vpop.permute.xlu2 %5215 }
 0x65f   : > { %8053 = vrot.lane.b32.xlu1 %v11189_v11, %s8115_s1  ;;  %8063 = vrot.lane.b32.xlu2 %v11189_v11, %s8107_s2  ;;  %v5226_v60 = vsel %vm5225_vm11, %v8036_v59, %v11303_v4 }
 0x666   : > { %v5337_v50 = vpop.permute.xlu2 %5336 }
 0x667   : > { %8058 = vrot.lane.b32.xlu1 %v11189_v11, %s8114_s22  ;;  %8068 = vrot.lane.b32.xlu2 %v11189_v11, %s8108_s23 }
 0x66e   : > { %v5295_v28 = vpop.permute.xlu1 %5294  ;;  %v11316_v40 = vpop.permute.xlu2 %5185 }
 0x66f   : > { %v5368_v34 = vpop.permute.xlu0 %5367  ;;  %8073 = vrot.lane.b32.xlu1 %v11189_v11, %s8117_s30 }
 0x676   : > { %v11308_v16 = vpop.permute.xlu1 %5179 }
 0x677   : > { %v11312_v32 = vsel %vm2526_vm13, %v8041_v24, %v11308_v16  ;;  %v11314_v42 = vpop.permute.xlu0 %5252 }
 0x678   : > { %v5262_v5 = vsel %vm822_vm4, %v8031_v39, %v11314_v42 }
 0x679   : > { %v5297_v58 = vpop.permute.xlu2 %5296 }
 0x67a   : > { %v5306_v51 = vsel %vm895_vm3, %v5295_v28, %v5297_v58  ;;  %v5307_v18 = vsel %vm895_vm3, %v5297_v58, %v8026_v61  ;;  %v8040_v28 = vunpack.i.l.bf16 %v11295_v21  ;;  %v8045_v21 = vunpack.i.l.bf16 %v11297_v46 }
 0x67e   : > { %v5301_v7 = vpop.permute.xlu1 %5300 }
 0x67f   : > { %v5374_v62 = vpop.permute.xlu0 %5373 }
 0x681   : > { %v11320_v44 = vpop.permute.xlu2 %5181 }
 0x686   : > { %v5259_v23 = vpop.permute.xlu1 %5258 }
 0x687   : > { %v11318_v43 = vpop.permute.xlu0 %5221  ;;  %v5264_v29 = vsel %vm822_vm4, %v8030_v19, %v5259_v23 }
 0x688   : > { %v5228_v36 = vsel %vm5225_vm11, %v8035_v48, %v11318_v43 }
 0x689   : > { %v5303_v35 = vpop.permute.xlu2 %5302 }
 0x68a   : > { %v5308_v15 = vsel %vm895_vm3, %v5301_v7, %v5303_v35  ;;  %v5309_v17 = vsel %vm895_vm3, %v5303_v35, %v8025_v45 }
 0x691   : > { %v5370_v14 = vpop.permute.xlu1 %5369  ;;  %v5261_v12 = vpop.permute.xlu2 %5260 }
 0x692   : > { %v5333_v53 = vpop.permute.xlu0 %5332  ;;  %v5380_v25 = vsel %vm5379_vm9, %v5368_v34, %v5370_v14  ;;  %v5381_v38 = vsel %vm5379_vm9, %v5370_v14, %v8016_v3  ;;  %v5265_v33 = vsel %vm822_vm4, %v5259_v23, %v5261_v12  ;;  %v8046_v23 = vunpack.i.h.bf16 %v11297_v46  ;;  %v5429_v14 = vld [vmem:[%s13181_s9] sm:$0xff] }
 0x693   : > { %v5343_v56 = vsel %vm5342_vm7, %v5331_v20, %v5333_v53  ;;  %v5344_v2 = vsel %vm5342_vm7, %v5333_v53, %v8021_v41 }
 0x699   : > { %v5255_v47 = vpop.permute.xlu1 %5254  ;;  %v5411_v30 = vpop.permute.xlu2 %5410 }
 0x69a   : > { %v11322_v57 = vpop.permute.xlu0 %5217  ;;  %v5263_v54 = vsel %vm822_vm4, %v11314_v42, %v5255_v47  ;;  %v5191_v42 = vsel %vm2526_vm13, %v8040_v28, %v11316_v40 }
 0x69b   : > { %v5227_v34 = vsel %vm5225_vm11, %v11303_v4, %v11322_v57  ;;  %v5190_v4 = vsel %vm2526_vm13, %v11308_v16, %v11320_v44  ;;  %v5430_v57 = vld [vmem:[%s13181_s9 + $0x8] sm:$0xff] }
 0x6a1   : > { %v5376_v37 = vpop.permute.xlu1 %5375 }
 0x6a2   : > { %v5382_v63 = vsel %vm5379_vm9, %v5374_v62, %v5376_v37  ;;  %v5383_v52 = vsel %vm5379_vm9, %v5376_v37, %v8015_v0  ;;  %v5339_v27 = vpop.permute.xlu0 %5338 }
 0x6a3   : > { %5487 = vmatpush.msra.mxu2 %v5382_v63  ;;  %5533 = vmatpush.msra.mxu0 %v5383_v52  ;;  %v5345_v1 = vsel %vm5342_vm7, %v5337_v50, %v5339_v27  ;;  %v5346_v49 = vsel %vm5342_vm7, %v5339_v27, %v8020_v55  ;;  %v5151_v50 = vpop.permute.xlu2 %5150  ;;  %v5431_v63 = vld [vmem:[%s13181_s9 + $0x10] sm:$0xff]  ;;  %v5432_v52 = vld [vmem:[%s13181_s9 + $0x18] sm:$0xff] }
 0x6a5   : > { %5488 = vmatpush.msra.mxu2 %v5380_v25  ;;  %5534 = vmatpush.msra.mxu0 %v5381_v38  ;;  %v612_v38 = vld [vmem:[%s13200_s0] sm:$0x3]  ;;  %s13201_s0 = smov 17  }
 0x6a6   : > { %v615_v45 = vperm.slane %v612_v38, 1 }
 0x6a7   : > { %5489 = vmatpush.msra.mxu2 %v5345_v1  ;;  %5535 = vmatpush.msra.mxu0 %v5346_v49 }
 0x6a9   : > { %v5149_v9 = vpop.permute.xlu1 %5148  ;;  %5490 = vmatpush.msra.mxu2 %v5343_v56  ;;  %5536 = vmatpush.msra.mxu0 %v5344_v2 }
 0x6aa   : > { %v5143_v8 = vpop.permute.xlu0 %5142 }
 0x6ab   : > { %5491 = vmatpush.msra.mxu2 %v5308_v15  ;;  %5537 = vmatpush.msra.mxu0 %v5309_v17  ;;  %v5153_v53 = vsel %vm5152_vm14, %v8046_v23, %v5143_v8  ;;  %v614_v17 = vperm.slane %v612_v38, 0 }
 0x6ad   : > { %5492 = vmatpush.msra.mxu2 %v5306_v51  ;;  %5538 = vmatpush.msra.mxu0 %v5307_v18 }
 0x6af   : > { %5493 = vmatpush.msra.mxu2 %v11219_v26  ;;  %5539 = vmatpush.msra.mxu0 %v11247_v6 }
 0x6b1   : > { %v5224_v31 = vpop.permute.xlu1 %5223  ;;  %5494 = vmatpush.msra.mxu2 %v11205_v10  ;;  %5540 = vmatpush.msra.mxu0 %v11233_v22 }
 0x6b2   : > { %v5188_v13 = vpop.permute.xlu0 %5187  ;;  %v5229_v20 = vsel %vm5225_vm11, %v11318_v43, %v5224_v31  ;;  %v5156_v43 = vsel %vm5152_vm14, %v5149_v9, %v5151_v50  ;;  %v5935_v50 = vld [vmem:[%s13184_s12] sm:$0xff] }
 0x6b3   : > { %5495 = vmatpush.msra.mxu2 %v5264_v29  ;;  %5541 = vmatpush.msra.mxu0 %v5265_v33  ;;  %v5192_v7 = vsel %vm2526_vm13, %v11316_v40, %v5188_v13  ;;  %v5155_v40 = vsel %vm5152_vm14, %v8045_v21, %v5149_v9 }
 0x6b5   : > { %5496 = vmatpush.msra.mxu2 %v5262_v5  ;;  %5542 = vmatpush.msra.mxu0 %v5263_v54 }
 0x6b7   : > { %5497 = vmatpush.msra.mxu2 %v5228_v36  ;;  %5543 = vmatpush.msra.mxu0 %v5229_v20 }
 0x6b9   : > { %v5145_v24 = vpop.permute.xlu1 %5144  ;;  %5498 = vmatpush.msra.mxu2 %v5226_v60  ;;  %5544 = vmatpush.msra.mxu0 %v5227_v34 }
 0x6ba   : > { %v5413_v62 = vpop.permute.xlu0 %5412  ;;  %v5154_v16 = vsel %vm5152_vm14, %v5143_v8, %v5145_v24 }
 0x6bb   : > { %v5419_v58 = vsel %vm5416_vm12, %v5411_v30, %v5413_v62  ;;  %5499 = vmatpush.msra.mxu2 %v5191_v42  ;;  %5545 = vmatpush.msra.mxu0 %v5192_v7  ;;  %v5936_v7 = vld [vmem:[%s13184_s12 + $0x8] sm:$0xff] }
 0x6bc   : > { %5524 = vmatpush.msra.mxu3 %v5419_v58 }
 0x6bd   : > { %5500 = vmatpush.msra.mxu2 %v11312_v32  ;;  %5546 = vmatpush.msra.mxu0 %v5190_v4  ;;  %v5405_v32 = vpop.permute.xlu2 %5404 }
 0x6bf   : > { %5501 = vmatpush.msra.mxu2 %v5155_v40  ;;  %5547 = vmatpush.msra.mxu0 %v5156_v43 }
 0x6c1   : > { %v8049_v44 = vpop.permute.xlu1 %8048  ;;  %5502 = vmatpush.msra.mxu2 %v5153_v53  ;;  %5548 = vmatpush.msra.mxu0 %v5154_v16 }
 0x6c2   : > { %v8051_v47 = vunpack.i.h.bf16 %v8049_v44  ;;  %v8050_v46 = vunpack.i.l.bf16 %v8049_v44  ;;  %v5407_v35 = vpop.permute.xlu0 %5406  ;;  %5503 = vmatmul.f32.vlgmr.msra.gmra.mxu2 %v5429_v14  ;;  %5549 = vmatmul.f32.vlgmr.msra.gmra.mxu0 %v5429_v14 }
 0x6c3   : > { %v5417_v0 = vsel %vm5416_vm12, %v5405_v32, %v5407_v35 }
 0x6c4   : > { %v5420_v37 = vsel %vm5416_vm12, %v5413_v62, %v8050_v46  ;;  %5525 = vmatpush.msra.mxu3 %v5417_v0  ;;  %v5418_v3 = vsel %vm5416_vm12, %v5407_v35, %v8051_v47 }
 0x6c5   : > { %7453 = vmatmul.msk.f32.vlgmr.msra.gmra.mxu3 %vm2526_vm13, %v5430_v57  ;;  %5570 = vmatpush.msra.mxu1 %v5420_v37  ;;  %v5474_v55 = vpop.permute.xlu2 %5473 }
 0x6c7   : > { %5571 = vmatpush.msra.mxu1 %v5418_v3 }
 0x6c8   : > { %7455 = vmatmul.msk.f32.vlgmr.msra.gmra.mxu1 %vm2526_vm13, %v5430_v57 }
 0x6c9   : > { %v5479_v8 = vpop.permute.xlu1 %5478 }
 0x6ca   : > { %5506 = vmatmul.f32.gmra.mxu2 %v5431_v63  ;;  %5552 = vmatmul.f32.gmra.mxu0 %v5431_v63 }
 0x6cd   : > { %7454 = vmatmul.msk.f32.gmra.mxu3 %vm2526_vm13, %v5432_v52  ;;  %v8064_v34 = vpop.permute.xlu2 %8063 }
 0x6ce   : > { %v8066_v32 = vunpack.i.h.bf16 %v8064_v34 }
 0x6d0   : > { %7456 = vmatmul.msk.f32.gmra.mxu1 %vm2526_vm13, %v5432_v52 }
 0x6d1   : > { %v8054_v42 = vpop.permute.xlu1 %8053 }
 0x6d2   : > { %v8056_v62 = vunpack.i.h.bf16 %v8054_v42 }
 0x6d5   : > { %v8069_v24 = vpop.permute.xlu2 %8068 }
 0x6d6   : > { %v8071_v14 = vunpack.i.h.bf16 %v8069_v24 }
 0x6d9   : > { %v8059_v4 = vpop.permute.xlu1 %8058 }
 0x6da   : > { %v8061_v23 = vunpack.i.h.bf16 %v8059_v4 }
 0x6e1   : > { %v8074_v53 = vpop.permute.xlu1 %8073 }
 0x73f   : > { %v5550_v27 = vpop.f32.mrf.mxu0 }
 0x740   : > { %v5551_v25 = vadd.f32 %v5550_v27, %v5474_v55 }
 0x745   : > { %v5504_v12 = vpop.f32.mrf.mxu2  ;;  %v5573_v41 = vpop.f32.mrf.mxu1 }
 0x746   : > { %v5505_v1 = vadd.f32 %v5504_v12, %v5474_v55  ;;  %v5574_v49 = vadd.f32 %v5573_v41, %v5551_v25  ;;  %v8065_v12 = vunpack.i.l.bf16 %v8064_v34  ;;  %v8070_v41 = vunpack.i.l.bf16 %v8069_v24 }
 0x747   : > { %v5553_v61 = vpop.f32.mrf.mxu0 }
 0x748   : > { %vm5580_vm15 = vcmp.gt.f32.partialorder %v5574_v49, 0.0  ;;  %v5584_v56 = vmul.f32 0.01, %v5574_v49  ;;  %v5527_v2 = vpop.f32.mrf.mxu3  ;;  %v5554_v30 = vadd.f32 %v5553_v61, %v5479_v8  ;;  %v8076_v61 = vunpack.i.h.bf16 %v8074_v53 }
 0x749   : > { %v5528_v9 = vadd.f32 %v5527_v2, %v5505_v1 }
 0x74a   : > { %v5588_v15 = vsel %vm5580_vm15, %v5574_v49, %v5584_v56 }
 0x74b   : > { %v11399_v51 = vmul.f32 %v5588_v15, %v615_v45  ;;  %vm5579_vm8 = vcmp.gt.f32.partialorder %v5528_v9, 0.0  ;;  %v5583_v18 = vmul.f32 0.01, %v5528_v9 }
 0x74d   : > { %v5587_v19 = vsel %vm5579_vm8, %v5528_v9, %v5583_v18  ;;  %v5507_v31 = vpop.f32.mrf.mxu2  ;;  %v5576_v39 = vpop.f32.mrf.mxu1  ;;  %5723 = vrot.lane.b32.xlu0 %v11399_v51, %s8108_s23  ;;  %5765 = vrot.lane.b32.xlu1 %v11399_v51, %s8107_s2 }
 0x74e   : > { %v11405_v29 = vmul.f32 %v5587_v19, %v614_v17  ;;  %v5508_v33 = vadd.f32 %v5507_v31, %v5479_v8  ;;  %v5577_v13 = vadd.f32 %v5576_v39, %v5554_v30  ;;  %5837 = vrot.lane.b32.xlu2 %v11399_v51, %s8115_s1  ;;  %v8055_v19 = vunpack.i.l.bf16 %v8054_v42 }
 0x750   : > { %vm5582_vm10 = vcmp.gt.f32.partialorder %v5577_v13, 0.0  ;;  %v5586_v59 = vmul.f32 0.01, %v5577_v13  ;;  %v5530_v48 = vpop.f32.mrf.mxu3 }
 0x751   : > { %v5531_v5 = vadd.f32 %v5530_v48, %v5508_v33  ;;  %v8060_v48 = vunpack.i.l.bf16 %v8059_v4 }
 0x752   : > { %v5590_v54 = vsel %vm5582_vm10, %v5577_v13, %v5586_v59 }
 0x753   : > { %v11409_v36 = vmul.f32 %v5590_v54, %v615_v45  ;;  %vm5581_vm0 = vcmp.gt.f32.partialorder %v5531_v5, 0.0  ;;  %v5585_v20 = vmul.f32 0.01, %v5531_v5 }
 0x755   : > { %v5589_v60 = vsel %vm5581_vm0, %v5531_v5, %v5585_v20  ;;  %5651 = vrot.lane.b32.xlu0 %v11399_v51, %s8116_s29  ;;  %5687 = vrot.lane.b32.xlu1 %v11399_v51, %s8117_s30  ;;  %v8075_v5 = vunpack.i.l.bf16 %v8074_v53 }
 0x756   : > { %v11415_v28 = vmul.f32 %v5589_v60, %v614_v17  ;;  %5801 = vrot.lane.b32.xlu2 %v11399_v51, %s8114_s22 }
 0x75d   : > { %5835 = vrot.lane.b32.xlu0 %v11405_v29, %s8115_s1  ;;  %5763 = vrot.lane.b32.xlu1 %v11405_v29, %s8107_s2 }
 0x75e   : > { %5721 = vrot.lane.b32.xlu2 %v11405_v29, %s8108_s23 }
 0x765   : > { %5799 = vrot.lane.b32.xlu0 %v11405_v29, %s8114_s22  ;;  %5771 = vrot.lane.b32.xlu1 %v11409_v36, %s8107_s2 }
 0x766   : > { %5649 = vrot.lane.b32.xlu2 %v11405_v29, %s8116_s29 }
 0x76d   : > { %5685 = vrot.lane.b32.xlu0 %v11405_v29, %s8117_s30  ;;  %5657 = vrot.lane.b32.xlu1 %v11409_v36, %s8116_s29 }
 0x76e   : > { %5693 = vrot.lane.b32.xlu2 %v11409_v36, %s8117_s30 }
 0x775   : > { %5843 = vrot.lane.b32.xlu0 %v11409_v36, %s8115_s1  ;;  %5769 = vrot.lane.b32.xlu1 %v11415_v28, %s8107_s2  ;;  %s13202_s2 = smov 111  }
 0x776   : > { %5805 = vrot.lane.b32.xlu2 %v11415_v28, %s8114_s22 }
 0x77d   : > { %5807 = vrot.lane.b32.xlu0 %v11409_v36, %s8114_s22  ;;  %5691 = vrot.lane.b32.xlu1 %v11415_v28, %s8117_s30 }
 0x77e   : > { %5727 = vrot.lane.b32.xlu2 %v11415_v28, %s8108_s23 }
 0x785   : > { %5729 = vrot.lane.b32.xlu0 %v11409_v36, %s8108_s23  ;;  %5613 = vrot.lane.b32.xlu1 %v11405_v29, %s13201_s0 }
 0x786   : > { %5615 = vrot.lane.b32.xlu2 %v11399_v51, %s13201_s0 }
 0x78d   : > { %5841 = vrot.lane.b32.xlu0 %v11415_v28, %s8115_s1  ;;  %8083 = vrot.lane.b32.xlu1 %v11189_v11, %s13201_s0 }
 0x78e   : > { %5619 = vrot.lane.b32.xlu2 %v11415_v28, %s13201_s0 }
 0x795   : > { %5621 = vrot.lane.b32.xlu0 %v11409_v36, %s13201_s0  ;;  %5873 = vrot.lane.b32.xlu1 %v11399_v51, %s13202_s2 }
 0x796   : > { %5879 = vrot.lane.b32.xlu2 %v11409_v36, %s13202_s2 }
 0x79d   : > { %5655 = vrot.lane.b32.xlu0 %v11415_v28, %s8116_s29  ;;  %5939 = vperm.xlu1 %8011, %v5935_v50  }
 0x79e   : > { %5877 = vrot.lane.b32.xlu2 %v11415_v28, %s13202_s2 }
 0x7a5   : > { %8078 = vrot.lane.b32.xlu0 %v11189_v11, %s8116_s29 }
 0x7a6   : > { %5944 = vperm.xlu2 %7969, %v5936_v7  }
 0x7a8   : > { %v5838_v58 = vpop.permute.xlu2 %5837 }
 0x7a9   : > { %v5848_v21 = vsel %vm5379_vm9, %v5838_v58, %v8056_v62 }
 0x7ad   : > { %8088 = vrot.lane.b32.xlu0 %v11189_v11, %s13202_s2 }
 0x7b0   : > { %v5802_v40 = vpop.permute.xlu2 %5801 }
 0x7b1   : > { %v5812_v43 = vsel %vm5342_vm7, %v5802_v40, %v8061_v23 }
 0x7b5   : > { %5871 = vrot.lane.b32.xlu0 %v11405_v29, %s13202_s2 }
 0x7b8   : > { %v5722_v16 = vpop.permute.xlu2 %5721 }
 0x7b9   : > { %v11486_v44 = vsel %vm822_vm4, %v8071_v14, %v5722_v16 }
 0x7bf   : > { %v5724_v47 = vpop.permute.xlu0 %5723  ;;  %v5766_v46 = vpop.permute.xlu1 %5765 }
 0x7c0   : > { %v5732_v35 = vsel %vm822_vm4, %v5722_v16, %v5724_v47  ;;  %v5776_v57 = vsel %vm895_vm3, %v5766_v46, %v8066_v32  ;;  %v11490_v11 = vpop.permute.xlu2 %5649 }
 0x7c7   : > { %v5652_v0 = vpop.permute.xlu0 %5651  ;;  %v5688_v37 = vpop.permute.xlu1 %5687 }
 0x7c8   : > { %v11494_v3 = vsel %vm2526_vm13, %v11490_v11, %v5652_v0  ;;  %v5694_v63 = vpop.permute.xlu2 %5693 }
 0x7cf   : > { %v5836_v52 = vpop.permute.xlu0 %5835  ;;  %v5764_v27 = vpop.permute.xlu1 %5763 }
 0x7d0   : > { %v5847_v55 = vsel %vm5379_vm9, %v5836_v52, %v5838_v58  ;;  %v11498_v25 = vsel %vm895_vm3, %v5764_v27, %v5766_v46  ;;  %v5806_v38 = vpop.permute.xlu2 %5805  ;;  %v6094_v52 = vld [vmem:[%s13186_s14 + $0xe8] sm:$0xff]  ;;  %v6093_v27 = vld [vmem:[%s13186_s14 + $0xe0] sm:$0xff] }
 0x7d7   : > { %v5800_v1 = vpop.permute.xlu0 %5799  ;;  %v5772_v49 = vpop.permute.xlu1 %5771 }
 0x7d8   : > { %v5811_v45 = vsel %vm5342_vm7, %v5800_v1, %v5802_v40  ;;  %v5778_v56 = vsel %vm895_vm3, %v5772_v49, %v8065_v12  ;;  %v5728_v2 = vpop.permute.xlu2 %5727 }
 0x7d9   : > { %v5733_v9 = vsel %vm822_vm4, %v8070_v41, %v5728_v2  ;;  %v7492_v41 = vld [vmem:[%s13186_s14 + $0x1f8] sm:$0xff] }
 0x7df   : > { %v5686_v15 = vpop.permute.xlu0 %5685  ;;  %v5658_v17 = vpop.permute.xlu1 %5657 }
 0x7e0   : > { %v11504_v8 = vsel %vm5225_vm11, %v8076_v61, %v5686_v15  ;;  %v5696_v18 = vsel %vm5225_vm11, %v5686_v15, %v5688_v37  ;;  %v5616_v30 = vpop.permute.xlu2 %5615  ;;  %v6090_v61 = vld [vmem:[%s13186_s14 + $0xc8] sm:$0xff]  ;;  %v6080_v15 = vld [vmem:[%s13186_s14 + $0x78] sm:$0xff] }
 0x7e7   : > { %v5844_v31 = vpop.permute.xlu0 %5843  ;;  %v5770_v39 = vpop.permute.xlu1 %5769 }
 0x7e8   : > { %v5850_v33 = vsel %vm5379_vm9, %v5844_v31, %v8055_v19  ;;  %v5777_v13 = vsel %vm895_vm3, %v5770_v39, %v5772_v49  ;;  %v5620_v59 = vpop.permute.xlu2 %5619  ;;  %v6091_v49 = vld [vmem:[%s13186_s14 + $0xd0] sm:$0xff]  ;;  %v7489_v39 = vld [vmem:[%s13186_s14 + $0x1e0] sm:$0xff] }
 0x7e9   : > { %5999 = vmatpush.msrb.mxu2 %v5850_v33  ;;  %v6078_v33 = vld [vmem:[%s13186_s14 + $0x68] sm:$0xff] }
 0x7eb   : > { %6000 = vmatpush.msrb.mxu2 %v5848_v21 }
 0x7ef   : > { %v5808_v54 = vpop.permute.xlu0 %5807  ;;  %v5692_v20 = vpop.permute.xlu1 %5691 }
 0x7f0   : > { %v5813_v60 = vsel %vm5342_vm7, %v5806_v38, %v5808_v54  ;;  %v5814_v34 = vsel %vm5342_vm7, %v5808_v54, %v8060_v48  ;;  %v5697_v50 = vsel %vm5225_vm11, %v8075_v5, %v5692_v20  ;;  %v11512_v24 = vpop.permute.xlu2 %5879  ;;  %v5698_v42 = vsel %vm5225_vm11, %v5692_v20, %v5694_v63  ;;  %v7488_v48 = vld [vmem:[%s13186_s14 + $0x1d8] sm:$0xff]  ;;  %v6087_v54 = vld [vmem:[%s13186_s14 + $0xb0] sm:$0xff]  ;;  %v7474_v20 = vld [vmem:[%s13186_s14 + $0x168] sm:$0xff] }
 0x7f1   : > { %6001 = vmatpush.msrb.mxu2 %v5814_v34  ;;  %v5898_v5 = vld [vmem:[%s13183_s11 + $0x18] sm:$0xff]  ;;  %v7487_v34 = vld [vmem:[%s13186_s14 + $0x1d0] sm:$0xff] }
 0x7f3   : > { %6002 = vmatpush.msrb.mxu2 %v5812_v43 }
 0x7f5   : > { %6003 = vmatpush.msrb.mxu2 %v5778_v56 }
 0x7f7   : > { %v5730_v7 = vpop.permute.xlu0 %5729  ;;  %v5614_v62 = vpop.permute.xlu1 %5613  ;;  %6004 = vmatpush.msrb.mxu2 %v5776_v57  ;;  %v5895_v57 = vld [vmem:[%s13183_s11] sm:$0xff] }
 0x7f8   : > { %v5734_v58 = vsel %vm822_vm4, %v5728_v2, %v5730_v7  ;;  %v5624_v21 = vsel %vm5152_vm14, %v5614_v62, %v5616_v30  ;;  %v5878_v4 = vpop.permute.xlu2 %5877  ;;  %v7491_v2 = vld [vmem:[%s13186_s14 + $0x1f0] sm:$0xff]  ;;  %v7486_v7 = vld [vmem:[%s13186_s14 + $0x1c8] sm:$0xff] }
 0x7f9   : > { %v5885_v23 = vsel %vm5416_vm12, %v5878_v4, %v11512_v24  ;;  %6005 = vmatpush.msrb.mxu2 %v11409_v36  ;;  %v6085_v4 = vld [vmem:[%s13186_s14 + $0xa0] sm:$0xff] }
 0x7fa   : > { %5990 = vmatpush.msrb.mxu1 %v5885_v23  ;;  %v7471_v23 = vld [vmem:[%s13186_s14 + $0x150] sm:$0xff] }
 0x7fb   : > { %6006 = vmatpush.msrb.mxu2 %v11399_v51 }
 0x7fd   : > { %6007 = vmatpush.msrb.mxu2 %v5734_v58  ;;  %v6075_v58 = vld [vmem:[%s13186_s14 + $0x50] sm:$0xff] }
 0x7ff   : > { %v5842_v40 = vpop.permute.xlu0 %5841  ;;  %v8084_v43 = vpop.permute.xlu1 %8083  ;;  %6008 = vmatpush.msrb.mxu2 %v5732_v35 }
 0x800   : > { %v5849_v14 = vsel %vm5379_vm9, %v5842_v40, %v5844_v31  ;;  %v8086_v53 = vunpack.i.h.bf16 %v8084_v43  ;;  %v8085_v16 = vunpack.i.l.bf16 %v8084_v43  ;;  %v7476_v31 = vld [vmem:[%s13186_s14 + $0x178] sm:$0xff]  ;;  %v6074_v40 = vld [vmem:[%s13186_s14 + $0x48] sm:$0xff] }
 0x801   : > { %5953 = vmatpush.msrb.mxu3 %v5849_v14  ;;  %6009 = vmatpush.msrb.mxu2 %v5698_v42  ;;  %v6076_v42 = vld [vmem:[%s13186_s14 + $0x58] sm:$0xff] }
 0x802   : > { %v5623_v32 = vsel %vm5152_vm14, %v8086_v53, %v5614_v62  ;;  %v5625_v47 = vsel %vm5152_vm14, %v8085_v16, %v5620_v59  ;;  %v7472_v62 = vld [vmem:[%s13186_s14 + $0x158] sm:$0xff]  ;;  %v7470_v53 = vld [vmem:[%s13186_s14 + $0x148] sm:$0xff]  ;;  %v6073_v16 = vld [vmem:[%s13186_s14 + $0x40] sm:$0xff] }
 0x803   : > { %5954 = vmatpush.msrb.mxu3 %v5847_v55  ;;  %6010 = vmatpush.msrb.mxu2 %v5696_v18  ;;  %v5897_v55 = vld [vmem:[%s13183_s11 + $0x10] sm:$0xff]  ;;  %v7484_v43 = vld [vmem:[%s13186_s14 + $0x1b8] sm:$0xff] }
 0x804   : > { %v6079_v18 = vld [vmem:[%s13186_s14 + $0x70] sm:$0xff]  ;;  %v6084_v14 = vld [vmem:[%s13186_s14 + $0x98] sm:$0xff] }
 0x805   : > { %5955 = vmatpush.msrb.mxu3 %v5813_v60  ;;  %v6077_v60 = vld [vmem:[%s13186_s14 + $0x60] sm:$0xff] }
 0x807   : > { %v5622_v36 = vpop.permute.xlu0 %5621  ;;  %5956 = vmatpush.msrb.mxu3 %v5811_v45  ;;  %v5874_v1 = vpop.permute.xlu1 %5873 }
 0x808   : > { %v5626_v51 = vsel %vm5152_vm14, %v5620_v59, %v5622_v36  ;;  %v7475_v59 = vld [vmem:[%s13186_s14 + $0x170] sm:$0xff]  ;;  %v7469_v36 = vld [vmem:[%s13186_s14 + $0x140] sm:$0xff] }
 0x809   : > { %5957 = vmatpush.msrb.mxu3 %v5777_v13  ;;  %v6088_v13 = vld [vmem:[%s13186_s14 + $0xb8] sm:$0xff] }
 0x80b   : > { %5958 = vmatpush.msrb.mxu3 %v11498_v25 }
 0x80d   : > { %5959 = vmatpush.msrb.mxu3 %v11415_v28  ;;  %v6096_v28 = vld [vmem:[%s13186_s14 + $0xf8] sm:$0xff] }
 0x80f   : > { %v5656_v46 = vpop.permute.xlu0 %5655  ;;  %5960 = vmatpush.msrb.mxu3 %v11405_v29 }
 0x810   : > { %v5662_v35 = vsel %vm2526_vm13, %v5656_v46, %v5658_v17  ;;  %v7490_v17 = vld [vmem:[%s13186_s14 + $0x1e8] sm:$0xff] }
 0x811   : > { %5961 = vmatpush.msrb.mxu3 %v5733_v9  ;;  %6011 = vmatpush.msrb.mxu2 %v5662_v35  ;;  %v5896_v9 = vld [vmem:[%s13183_s11 + $0x8] sm:$0xff] }
 0x812   : > { %v6082_v35 = vld [vmem:[%s13186_s14 + $0x88] sm:$0xff] }
 0x813   : > { %5962 = vmatpush.msrb.mxu3 %v11486_v44  ;;  %6012 = vmatpush.msrb.mxu2 %v11494_v3  ;;  %v6095_v44 = vld [vmem:[%s13186_s14 + $0xf0] sm:$0xff] }
 0x815   : > { %5963 = vmatpush.msrb.mxu3 %v5697_v50  ;;  %6013 = vmatpush.msrb.mxu2 %v5626_v51  ;;  %v6086_v50 = vld [vmem:[%s13186_s14 + $0xa8] sm:$0xff]  ;;  %v6072_v51 = vld [vmem:[%s13186_s14 + $0x38] sm:$0xff] }
 0x817   : > { %v8079_v0 = vpop.permute.xlu0 %8078  ;;  %5964 = vmatpush.msrb.mxu3 %v11504_v8  ;;  %6014 = vmatpush.msrb.mxu2 %v5624_v21  ;;  %v6089_v8 = vld [vmem:[%s13186_s14 + $0xc0] sm:$0xff] }
 0x818   : > { %v8081_v29 = vunpack.i.h.bf16 %v8079_v0  ;;  %v8080_v37 = vunpack.i.l.bf16 %v8079_v0  ;;  %6015 = vmatmul.f32.vlgmr.msrb.gmra.mxu2 %v5895_v57  ;;  %v7485_v21 = vld [vmem:[%s13186_s14 + $0x1c0] sm:$0xff] }
 0x819   : > { %6196 = vmatpush.msra.mxu2 %v6096_v28  ;;  %v6071_v28 = vld [vmem:[%s13186_s14 + $0x30] sm:$0xff]  ;;  %v7481_v0 = vld [vmem:[%s13186_s14 + $0x1a0] sm:$0xff] }
 0x81a   : > { %v5659_v3 = vsel %vm2526_vm13, %v8081_v29, %v11490_v11  ;;  %v5661_v63 = vsel %vm2526_vm13, %v8080_v37, %v5656_v46  ;;  %v6092_v11 = vld [vmem:[%s13186_s14 + $0xd8] sm:$0xff]  ;;  %v7482_v46 = vld [vmem:[%s13186_s14 + $0x1a8] sm:$0xff]  ;;  %v6081_v29 = vld [vmem:[%s13186_s14 + $0x80] sm:$0xff] }
 0x81b   : > { %5965 = vmatpush.msrb.mxu3 %v5661_v63  ;;  %6197 = vmatpush.msra.mxu2 %v6095_v44  ;;  %v7467_v37 = vld [vmem:[%s13186_s14 + $0x130] sm:$0xff]  ;;  %v6070_v44 = vld [vmem:[%s13186_s14 + $0x28] sm:$0xff]  ;;  %v7556_v63 = vld [vmem:[%s13186_s14 + $0x3f8] sm:$0xff] }
 0x81d   : > { %5966 = vmatpush.msrb.mxu3 %v5659_v3  ;;  %6198 = vmatpush.msra.mxu2 %v6094_v52  ;;  %v7480_v3 = vld [vmem:[%s13186_s14 + $0x198] sm:$0xff]  ;;  %v7466_v52 = vld [vmem:[%s13186_s14 + $0x128] sm:$0xff] }
 0x81f   : > { %v8089_v25 = vpop.permute.xlu0 %8088  ;;  %5967 = vmatpush.msrb.mxu3 %v5625_v47  ;;  %6199 = vmatpush.msra.mxu2 %v6093_v27  ;;  %v6083_v47 = vld [vmem:[%s13186_s14 + $0x90] sm:$0xff]  ;;  %v6069_v27 = vld [vmem:[%s13186_s14 + $0x20] sm:$0xff] }
 0x820   : > { %v8091_v38 = vunpack.i.h.bf16 %v8089_v25  ;;  %v8090_v12 = vunpack.i.l.bf16 %v8089_v25  ;;  %6018 = vmatmul.f32.gmra.mxu2 %v5897_v55  ;;  %v7465_v25 = vld [vmem:[%s13186_s14 + $0x120] sm:$0xff] }
 0x821   : > { %5968 = vmatpush.msrb.mxu3 %v5623_v32  ;;  %6200 = vmatpush.msra.mxu2 %v6092_v11  ;;  %v7483_v32 = vld [vmem:[%s13186_s14 + $0x1b0] sm:$0xff] }
 0x822   : > { %v5884_v45 = vsel %vm5416_vm12, %v5874_v1, %v8091_v38  ;;  %v5886_v56 = vsel %vm5416_vm12, %v11512_v24, %v8090_v12  ;;  %5969 = vmatmul.f32.vlgmr.msrb.gmra.mxu3 %v5895_v57  ;;  %v7473_v24 = vld [vmem:[%s13186_s14 + $0x160] sm:$0xff]  ;;  %v7468_v57 = vld [vmem:[%s13186_s14 + $0x138] sm:$0xff]  ;;  %v7555_v11 = vld [vmem:[%s13186_s14 + $0x3f0] sm:$0xff] }
 0x823   : > { %6036 = vmatpush.msrb.mxu0 %v5886_v56  ;;  %6156 = vmatpush.msra.mxu3 %v7492_v41  ;;  %v6068_v38 = vld [vmem:[%s13186_s14 + $0x18] sm:$0xff]  ;;  %v7478_v12 = vld [vmem:[%s13186_s14 + $0x188] sm:$0xff]  ;;  %v7553_v56 = vld [vmem:[%s13186_s14 + $0x3e0] sm:$0xff] }
 0x824   : > { %6201 = vmatpush.msra.mxu2 %v6091_v49  ;;  %v7554_v41 = vld [vmem:[%s13186_s14 + $0x3e8] sm:$0xff]  ;;  %v6067_v49 = vld [vmem:[%s13186_s14 + $0x10] sm:$0xff] }
 0x825   : > { %6037 = vmatpush.msrb.mxu0 %v5884_v45  ;;  %6157 = vmatpush.msra.mxu3 %v7491_v2  ;;  %v7477_v45 = vld [vmem:[%s13186_s14 + $0x180] sm:$0xff]  ;;  %v7463_v2 = vld [vmem:[%s13186_s14 + $0x110] sm:$0xff] }
 0x826   : > { %7459 = vmatmul.msk.f32.vlgmr.msrb.gmra.mxu0 %vm2526_vm13, %v5896_v9  ;;  %6202 = vmatpush.msra.mxu2 %v6090_v61  ;;  %v7524_v61 = vld [vmem:[%s13186_s14 + $0x2f8] sm:$0xff] }
 0x827   : > { %v5872_v30 = vpop.permute.xlu0 %5871  ;;  %6176 = vmatpush.msra.mxu0 %v6080_v15  ;;  %6158 = vmatpush.msra.mxu3 %v7490_v17  ;;  %v7552_v15 = vld [vmem:[%s13186_s14 + $0x3d8] sm:$0xff]  ;;  %v7462_v17 = vld [vmem:[%s13186_s14 + $0x108] sm:$0xff] }
 0x828   : > { %v5883_v19 = vsel %vm5416_vm12, %v5872_v30, %v5874_v1  ;;  %6203 = vmatpush.msra.mxu2 %v6089_v8  ;;  %v7464_v1 = vld [vmem:[%s13186_s14 + $0x118] sm:$0xff]  ;;  %v6065_v8 = vld [vmem:[%s13186_s14] sm:$0xff] }
 0x829   : > { %5991 = vmatpush.msrb.mxu1 %v5883_v19  ;;  %6177 = vmatpush.msra.mxu0 %v6079_v18  ;;  %v7523_v18 = vld [vmem:[%s13186_s14 + $0x2f0] sm:$0xff]  ;;  %v7540_v30 = vld [vmem:[%s13186_s14 + $0x378] sm:$0xff]  ;;  %v7461_v19 = vld [vmem:[%s13186_s14 + $0x100] sm:$0xff] }
 0x82a   : > { %5972 = vmatmul.f32.gmra.mxu3 %v5897_v55  ;;  %7457 = vmatmul.msk.f32.vlgmr.msrb.gmra.mxu1 %vm2526_vm13, %v5896_v9  ;;  %v7479_v55 = vld [vmem:[%s13186_s14 + $0x190] sm:$0xff]  ;;  %v6066_v9 = vld [vmem:[%s13186_s14 + $0x8] sm:$0xff] }
 0x82b   : > { %6136 = vmatpush.msra.mxu1 %v7476_v31  ;;  %6159 = vmatpush.msra.mxu3 %v7489_v39  ;;  %v7551_v31 = vld [vmem:[%s13186_s14 + $0x3d0] sm:$0xff]  ;;  %v7508_v39 = vld [vmem:[%s13186_s14 + $0x278] sm:$0xff] }
 0x82c   : > { %6178 = vmatpush.msra.mxu0 %v6078_v33  ;;  %6204 = vmatpush.msra.mxu2 %v6088_v13  ;;  %v7522_v33 = vld [vmem:[%s13186_s14 + $0x2e8] sm:$0xff]  ;;  %v7539_v13 = vld [vmem:[%s13186_s14 + $0x370] sm:$0xff] }
 0x82d   : > { %6137 = vmatpush.msra.mxu1 %v7475_v59  ;;  %6160 = vmatpush.msra.mxu3 %v7488_v48  ;;  %v7550_v59 = vld [vmem:[%s13186_s14 + $0x3c8] sm:$0xff]  ;;  %v7507_v48 = vld [vmem:[%s13186_s14 + $0x270] sm:$0xff] }
 0x82e   : > { %7460 = vmatmul.msk.f32.gmra.mxu0 %vm2526_vm13, %v5898_v5  ;;  %6205 = vmatpush.msra.mxu2 %v6087_v54  ;;  %v7538_v54 = vld [vmem:[%s13186_s14 + $0x368] sm:$0xff] }
 0x82f   : > { %6138 = vmatpush.msra.mxu1 %v7474_v20  ;;  %6179 = vmatpush.msra.mxu0 %v6077_v60  ;;  %v7549_v20 = vld [vmem:[%s13186_s14 + $0x3c0] sm:$0xff]  ;;  %v7506_v60 = vld [vmem:[%s13186_s14 + $0x268] sm:$0xff] }
 0x830   : > { %6161 = vmatpush.msra.mxu3 %v7487_v34  ;;  %6206 = vmatpush.msra.mxu2 %v6086_v50  ;;  %v7520_v34 = vld [vmem:[%s13186_s14 + $0x2d8] sm:$0xff]  ;;  %v7537_v50 = vld [vmem:[%s13186_s14 + $0x360] sm:$0xff] }
 0x831   : > { %6139 = vmatpush.msra.mxu1 %v7473_v24  ;;  %6180 = vmatpush.msra.mxu0 %v6076_v42  ;;  %v7505_v24 = vld [vmem:[%s13186_s14 + $0x260] sm:$0xff]  ;;  %v7519_v42 = vld [vmem:[%s13186_s14 + $0x2d0] sm:$0xff] }
 0x832   : > { %7458 = vmatmul.msk.f32.gmra.mxu1 %vm2526_vm13, %v5898_v5  ;;  %6162 = vmatpush.msra.mxu3 %v7486_v7  ;;  %v7521_v5 = vld [vmem:[%s13186_s14 + $0x2e0] sm:$0xff]  ;;  %v7536_v7 = vld [vmem:[%s13186_s14 + $0x358] sm:$0xff] }
 0x833   : > { %6140 = vmatpush.msra.mxu1 %v7472_v62  ;;  %6181 = vmatpush.msra.mxu0 %v6075_v58  ;;  %v7504_v62 = vld [vmem:[%s13186_s14 + $0x258] sm:$0xff]  ;;  %v7518_v58 = vld [vmem:[%s13186_s14 + $0x2c8] sm:$0xff] }
 0x834   : > { %6163 = vmatpush.msra.mxu3 %v7485_v21  ;;  %6207 = vmatpush.msra.mxu2 %v6085_v4  ;;  %v7535_v21 = vld [vmem:[%s13186_s14 + $0x350] sm:$0xff] }
 0x835   : > { %6141 = vmatpush.msra.mxu1 %v7471_v23  ;;  %6182 = vmatpush.msra.mxu0 %v6074_v40  ;;  %v7503_v4 = vld [vmem:[%s13186_s14 + $0x250] sm:$0xff]  ;;  %v7517_v23 = vld [vmem:[%s13186_s14 + $0x2c0] sm:$0xff]  ;;  %v7534_v40 = vld [vmem:[%s13186_s14 + $0x348] sm:$0xff] }
 0x836   : > { %6164 = vmatpush.msra.mxu3 %v7484_v43  ;;  %6208 = vmatpush.msra.mxu2 %v6084_v14  ;;  %v7548_v43 = vld [vmem:[%s13186_s14 + $0x3b8] sm:$0xff]  ;;  %v7502_v14 = vld [vmem:[%s13186_s14 + $0x248] sm:$0xff] }
 0x837   : > { %6142 = vmatpush.msra.mxu1 %v7470_v53  ;;  %6183 = vmatpush.msra.mxu0 %v6073_v16  ;;  %v7516_v53 = vld [vmem:[%s13186_s14 + $0x2b8] sm:$0xff]  ;;  %v7533_v16 = vld [vmem:[%s13186_s14 + $0x340] sm:$0xff] }
 0x838   : > { %6165 = vmatpush.msra.mxu3 %v7483_v32  ;;  %6209 = vmatpush.msra.mxu2 %v6083_v47  ;;  %v7547_v32 = vld [vmem:[%s13186_s14 + $0x3b0] sm:$0xff]  ;;  %v7501_v47 = vld [vmem:[%s13186_s14 + $0x240] sm:$0xff] }
 0x839   : > { %6143 = vmatpush.msra.mxu1 %v7469_v36  ;;  %6184 = vmatpush.msra.mxu0 %v6072_v51  ;;  %v7515_v36 = vld [vmem:[%s13186_s14 + $0x2b0] sm:$0xff]  ;;  %v7532_v51 = vld [vmem:[%s13186_s14 + $0x338] sm:$0xff] }
 0x83a   : > { %6166 = vmatpush.msra.mxu3 %v7482_v46  ;;  %6210 = vmatpush.msra.mxu2 %v6082_v35  ;;  %v7546_v46 = vld [vmem:[%s13186_s14 + $0x3a8] sm:$0xff]  ;;  %v7500_v35 = vld [vmem:[%s13186_s14 + $0x238] sm:$0xff] }
 0x83b   : > { %6144 = vmatpush.msra.mxu1 %v7468_v57  ;;  %6185 = vmatpush.msra.mxu0 %v6071_v28  ;;  %v7514_v57 = vld [vmem:[%s13186_s14 + $0x2a8] sm:$0xff]  ;;  %v7531_v28 = vld [vmem:[%s13186_s14 + $0x330] sm:$0xff] }
 0x83c   : > { %6167 = vmatpush.msra.mxu3 %v7481_v0  ;;  %6211 = vmatpush.msra.mxu2 %v6081_v29  ;;  %v7545_v0 = vld [vmem:[%s13186_s14 + $0x3a0] sm:$0xff]  ;;  %v7499_v29 = vld [vmem:[%s13186_s14 + $0x230] sm:$0xff] }
 0x83d   : > { %6145 = vmatpush.msra.mxu1 %v7467_v37  ;;  %6186 = vmatpush.msra.mxu0 %v6070_v44  ;;  %v7513_v37 = vld [vmem:[%s13186_s14 + $0x2a0] sm:$0xff]  ;;  %v7530_v44 = vld [vmem:[%s13186_s14 + $0x328] sm:$0xff] }
 0x83e   : > { %6168 = vmatpush.msra.mxu3 %v7480_v3  ;;  %6351 = vmatpush.msrb.mxu2 %v7556_v63  ;;  %v7544_v3 = vld [vmem:[%s13186_s14 + $0x398] sm:$0xff]  ;;  %v7498_v63 = vld [vmem:[%s13186_s14 + $0x228] sm:$0xff] }
 0x83f   : > { %6146 = vmatpush.msra.mxu1 %v7466_v52  ;;  %6187 = vmatpush.msra.mxu0 %v6069_v27  ;;  %v7512_v52 = vld [vmem:[%s13186_s14 + $0x298] sm:$0xff]  ;;  %v7529_v27 = vld [vmem:[%s13186_s14 + $0x320] sm:$0xff] }
 0x840   : > { %6169 = vmatpush.msra.mxu3 %v7479_v55  ;;  %6352 = vmatpush.msrb.mxu2 %v7555_v11  ;;  %v7543_v55 = vld [vmem:[%s13186_s14 + $0x390] sm:$0xff]  ;;  %v7497_v11 = vld [vmem:[%s13186_s14 + $0x220] sm:$0xff] }
 0x841   : > { %6147 = vmatpush.msra.mxu1 %v7465_v25  ;;  %6188 = vmatpush.msra.mxu0 %v6068_v38  ;;  %v7511_v25 = vld [vmem:[%s13186_s14 + $0x290] sm:$0xff]  ;;  %v7528_v38 = vld [vmem:[%s13186_s14 + $0x318] sm:$0xff] }
 0x842   : > { %6170 = vmatpush.msra.mxu3 %v7478_v12  ;;  %6353 = vmatpush.msrb.mxu2 %v7554_v41  ;;  %v7542_v12 = vld [vmem:[%s13186_s14 + $0x388] sm:$0xff]  ;;  %v7496_v41 = vld [vmem:[%s13186_s14 + $0x218] sm:$0xff] }
 0x843   : > { %6148 = vmatpush.msra.mxu1 %v7464_v1  ;;  %6189 = vmatpush.msra.mxu0 %v6067_v49  ;;  %v7510_v1 = vld [vmem:[%s13186_s14 + $0x288] sm:$0xff]  ;;  %v7527_v49 = vld [vmem:[%s13186_s14 + $0x310] sm:$0xff] }
 0x844   : > { %6171 = vmatpush.msra.mxu3 %v7477_v45  ;;  %6354 = vmatpush.msrb.mxu2 %v7553_v56  ;;  %v7541_v45 = vld [vmem:[%s13186_s14 + $0x380] sm:$0xff]  ;;  %v7495_v56 = vld [vmem:[%s13186_s14 + $0x210] sm:$0xff] }
 0x845   : > { %6149 = vmatpush.msra.mxu1 %v7463_v2  ;;  %6190 = vmatpush.msra.mxu0 %v6066_v9  ;;  %v7509_v2 = vld [vmem:[%s13186_s14 + $0x280] sm:$0xff]  ;;  %v7526_v9 = vld [vmem:[%s13186_s14 + $0x308] sm:$0xff] }
 0x846   : > { %6273 = vmatpush.msrb.mxu3 %v7524_v61  ;;  %6355 = vmatpush.msrb.mxu2 %v7552_v15  ;;  %v7494_v61 = vld [vmem:[%s13186_s14 + $0x208] sm:$0xff]  ;;  %v7525_v15 = vld [vmem:[%s13186_s14 + $0x300] sm:$0xff] }
 0x847   : > { %6150 = vmatpush.msra.mxu1 %v7462_v17  ;;  %6191 = vmatpush.msra.mxu0 %v6065_v8  ;;  %v7493_v17 = vld [vmem:[%s13186_s14 + $0x200] sm:$0xff] }
 0x848   : > { %6274 = vmatpush.msrb.mxu3 %v7523_v18  ;;  %6356 = vmatpush.msrb.mxu2 %v7551_v31  ;;  %v5940_v18 = vpop.permute.xlu1 %5939 }
 0x849   : > { %6331 = vmatpush.msrb.mxu0 %v7540_v30  ;;  %6151 = vmatpush.msra.mxu1 %v7461_v19 }
 0x84a   : > { %6275 = vmatpush.msrb.mxu3 %v7522_v33  ;;  %6357 = vmatpush.msrb.mxu2 %v7550_v59 }
 0x84b   : > { %6253 = vmatpush.msrb.mxu1 %v7508_v39  ;;  %6332 = vmatpush.msrb.mxu0 %v7539_v13 }
 0x84c   : > { %6276 = vmatpush.msrb.mxu3 %v7521_v5  ;;  %6358 = vmatpush.msrb.mxu2 %v7549_v20 }
 0x84d   : > { %6254 = vmatpush.msrb.mxu1 %v7507_v48  ;;  %6333 = vmatpush.msrb.mxu0 %v7538_v54  ;;  %v7620_v54 = vld [vmem:[%s13186_s14 + $0x5f8] sm:$0xff] }
 0x84e   : > { %6277 = vmatpush.msrb.mxu3 %v7520_v34  ;;  %6359 = vmatpush.msrb.mxu2 %v7548_v43  ;;  %v7571_v43 = vld [vmem:[%s13186_s14 + $0x470] sm:$0xff] }
 0x84f   : > { %6255 = vmatpush.msrb.mxu1 %v7506_v60  ;;  %6334 = vmatpush.msrb.mxu0 %v7537_v50  ;;  %v7619_v50 = vld [vmem:[%s13186_s14 + $0x5f0] sm:$0xff] }
 0x850   : > { %6278 = vmatpush.msrb.mxu3 %v7519_v42  ;;  %6360 = vmatpush.msrb.mxu2 %v7547_v32  ;;  %v7604_v42 = vld [vmem:[%s13186_s14 + $0x578] sm:$0xff] }
 0x851   : > { %6256 = vmatpush.msrb.mxu1 %v7505_v24  ;;  %6335 = vmatpush.msrb.mxu0 %v7536_v7  ;;  %v7616_v32 = vld [vmem:[%s13186_s14 + $0x5d8] sm:$0xff] }
 0x852   : > { %6279 = vmatpush.msrb.mxu3 %v7518_v58  ;;  %6361 = vmatpush.msrb.mxu2 %v7546_v46  ;;  %v7601_v46 = vld [vmem:[%s13186_s14 + $0x560] sm:$0xff] }
 0x853   : > { %6257 = vmatpush.msrb.mxu1 %v7504_v62  ;;  %6336 = vmatpush.msrb.mxu0 %v7535_v21  ;;  %v7618_v62 = vld [vmem:[%s13186_s14 + $0x5e8] sm:$0xff]  ;;  %v7572_v21 = vld [vmem:[%s13186_s14 + $0x478] sm:$0xff] }
 0x854   : > { %6280 = vmatpush.msrb.mxu3 %v7517_v23  ;;  %6362 = vmatpush.msrb.mxu2 %v7545_v0  ;;  %v7603_v23 = vld [vmem:[%s13186_s14 + $0x570] sm:$0xff] }
 0x855   : > { %6258 = vmatpush.msrb.mxu1 %v7503_v4  ;;  %6337 = vmatpush.msrb.mxu0 %v7534_v40  ;;  %v7586_v4 = vld [vmem:[%s13186_s14 + $0x4e8] sm:$0xff]  ;;  %v7617_v40 = vld [vmem:[%s13186_s14 + $0x5e0] sm:$0xff]  ;;  %v7583_v0 = vld [vmem:[%s13186_s14 + $0x4d0] sm:$0xff] }
 0x856   : > { %6281 = vmatpush.msrb.mxu3 %v7516_v53  ;;  %6363 = vmatpush.msrb.mxu2 %v7544_v3  ;;  %v7585_v53 = vld [vmem:[%s13186_s14 + $0x4e0] sm:$0xff]  ;;  %v7568_v3 = vld [vmem:[%s13186_s14 + $0x458] sm:$0xff] }
 0x857   : > { %6259 = vmatpush.msrb.mxu1 %v7502_v14  ;;  %6338 = vmatpush.msrb.mxu0 %v7533_v16  ;;  %v7602_v16 = vld [vmem:[%s13186_s14 + $0x568] sm:$0xff] }
 0x858   : > { %6282 = vmatpush.msrb.mxu3 %v7515_v36  ;;  %6364 = vmatpush.msrb.mxu2 %v7543_v55  ;;  %v7570_v36 = vld [vmem:[%s13186_s14 + $0x468] sm:$0xff]  ;;  %v7567_v55 = vld [vmem:[%s13186_s14 + $0x450] sm:$0xff] }
 0x859   : > { %6260 = vmatpush.msrb.mxu1 %v7501_v47  ;;  %6339 = vmatpush.msrb.mxu0 %v7532_v51  ;;  %v7584_v51 = vld [vmem:[%s13186_s14 + $0x4d8] sm:$0xff] }
 0x85a   : > { %6283 = vmatpush.msrb.mxu3 %v7514_v57  ;;  %6365 = vmatpush.msrb.mxu2 %v7542_v12  ;;  %v7569_v57 = vld [vmem:[%s13186_s14 + $0x460] sm:$0xff]  ;;  %v7566_v12 = vld [vmem:[%s13186_s14 + $0x448] sm:$0xff] }
 0x85b   : > { %6261 = vmatpush.msrb.mxu1 %v7500_v35  ;;  %6340 = vmatpush.msrb.mxu0 %v7531_v28  ;;  %v7615_v35 = vld [vmem:[%s13186_s14 + $0x5d0] sm:$0xff] }
 0x85c   : > { %6284 = vmatpush.msrb.mxu3 %v7513_v37  ;;  %6366 = vmatpush.msrb.mxu2 %v7541_v45  ;;  %v7614_v37 = vld [vmem:[%s13186_s14 + $0x5c8] sm:$0xff]  ;;  %v7565_v45 = vld [vmem:[%s13186_s14 + $0x440] sm:$0xff] }
 0x85d   : > { %6262 = vmatpush.msrb.mxu1 %v7499_v29  ;;  %6341 = vmatpush.msrb.mxu0 %v7530_v44  ;;  %v7600_v29 = vld [vmem:[%s13186_s14 + $0x558] sm:$0xff] }
 0x85e   : > { %6285 = vmatpush.msrb.mxu3 %v7512_v52  ;;  %v7599_v52 = vld [vmem:[%s13186_s14 + $0x550] sm:$0xff] }
 0x85f   : > { %6263 = vmatpush.msrb.mxu1 %v7498_v63  ;;  %6342 = vmatpush.msrb.mxu0 %v7529_v27  ;;  %v7582_v63 = vld [vmem:[%s13186_s14 + $0x4c8] sm:$0xff]  ;;  %v7613_v27 = vld [vmem:[%s13186_s14 + $0x5c0] sm:$0xff] }
 0x860   : > { %6286 = vmatpush.msrb.mxu3 %v7511_v25  ;;  %v7598_v25 = vld [vmem:[%s13186_s14 + $0x548] sm:$0xff] }
 0x861   : > { %6264 = vmatpush.msrb.mxu1 %v7497_v11  ;;  %6343 = vmatpush.msrb.mxu0 %v7528_v38  ;;  %v7581_v11 = vld [vmem:[%s13186_s14 + $0x4c0] sm:$0xff]  ;;  %v7612_v38 = vld [vmem:[%s13186_s14 + $0x5b8] sm:$0xff] }
 0x862   : > { %6287 = vmatpush.msrb.mxu3 %v7510_v1  ;;  %v7597_v1 = vld [vmem:[%s13186_s14 + $0x540] sm:$0xff] }
 0x863   : > { %6265 = vmatpush.msrb.mxu1 %v7496_v41  ;;  %6344 = vmatpush.msrb.mxu0 %v7527_v49  ;;  %v7580_v41 = vld [vmem:[%s13186_s14 + $0x4b8] sm:$0xff]  ;;  %v7611_v49 = vld [vmem:[%s13186_s14 + $0x5b0] sm:$0xff] }
 0x864   : > { %6288 = vmatpush.msrb.mxu3 %v7509_v2  ;;  %v7596_v2 = vld [vmem:[%s13186_s14 + $0x538] sm:$0xff] }
 0x865   : > { %6266 = vmatpush.msrb.mxu1 %v7495_v56  ;;  %6345 = vmatpush.msrb.mxu0 %v7526_v9  ;;  %v7579_v56 = vld [vmem:[%s13186_s14 + $0x4b0] sm:$0xff]  ;;  %v7610_v9 = vld [vmem:[%s13186_s14 + $0x5a8] sm:$0xff] }
 0x867   : > { %6267 = vmatpush.msrb.mxu1 %v7494_v61  ;;  %6346 = vmatpush.msrb.mxu0 %v7525_v15  ;;  %v7564_v61 = vld [vmem:[%s13186_s14 + $0x438] sm:$0xff]  ;;  %v7578_v15 = vld [vmem:[%s13186_s14 + $0x4a8] sm:$0xff] }
 0x869   : > { %6268 = vmatpush.msrb.mxu1 %v7493_v17  ;;  %v7595_v17 = vld [vmem:[%s13186_s14 + $0x530] sm:$0xff] }
 0x89b   : > { %v6016_v8 = vpop.f32.mrf.mxu2 }
 0x89c   : > { %v6017_v30 = vadd.f32 %v6016_v8, %v5940_v18  ;;  %v7609_v8 = vld [vmem:[%s13186_s14 + $0x5a0] sm:$0xff] }
 0x8a3   : > { %v6039_v19 = vpop.f32.mrf.mxu0 }
 0x8a4   : > { %v6040_v31 = vadd.f32 %v6039_v19, %v6017_v30  ;;  %v7577_v30 = vld [vmem:[%s13186_s14 + $0x4a0] sm:$0xff]  ;;  %v7594_v19 = vld [vmem:[%s13186_s14 + $0x528] sm:$0xff] }
 0x8a5   : > { %v5970_v39 = vpop.f32.mrf.mxu3 }
 0x8a6   : > { %v6050_v33 = vadd.f32 %v6040_v31, %v11233_v22  ;;  %v5971_v13 = vadd.f32 %v5970_v39, %v5940_v18  ;;  %v7588_v22 = vld [vmem:[%s13186_s14 + $0x4f8] sm:$0xff]  ;;  %v7563_v18 = vld [vmem:[%s13186_s14 + $0x430] sm:$0xff]  ;;  %v7562_v39 = vld [vmem:[%s13186_s14 + $0x428] sm:$0xff] }
 0x8a7   : > { %v5993_v59 = vpop.f32.mrf.mxu1  ;;  %v7608_v31 = vld [vmem:[%s13186_s14 + $0x598] sm:$0xff] }
 0x8a8   : > { %vm6054_vm3 = vcmp.gt.f32.partialorder %v6050_v33, 0.0  ;;  %v6058_v48 = vmul.f32 0.01, %v6050_v33  ;;  %v5994_v5 = vadd.f32 %v5993_v59, %v5971_v13  ;;  %v7593_v13 = vld [vmem:[%s13186_s14 + $0x520] sm:$0xff]  ;;  %v7607_v59 = vld [vmem:[%s13186_s14 + $0x590] sm:$0xff] }
 0x8aa   : > { %v11943_v20 = vsel %vm6054_vm3, %v6050_v33, %v6058_v48  ;;  %v6049_v60 = vadd.f32 %v5994_v5, %v11205_v10  ;;  %v7587_v10 = vld [vmem:[%s13186_s14 + $0x4f0] sm:$0xff]  ;;  %v7576_v33 = vld [vmem:[%s13186_s14 + $0x498] sm:$0xff]  ;;  %v7561_v48 = vld [vmem:[%s13186_s14 + $0x420] sm:$0xff] }
 0x8ab   : > { %6212 = vmatmul.f32.vlgmr.msra.gmra.mxu2 %v11943_v20  ;;  %v6133_v34 = vrot.slane %v11943_v20, 1  ;;  %v6328_v14 = vrot.slane %v11943_v20, 3  ;;  %v6250_v47 = vrot.slane %v11943_v20, 2  ;;  %v7575_v5 = vld [vmem:[%s13186_s14 + $0x490] sm:$0xff] }
 0x8ac   : > { %vm6053_vm4 = vcmp.gt.f32.partialorder %v6049_v60, 0.0  ;;  %v6057_v24 = vmul.f32 0.01, %v6049_v60  ;;  %6507 = vmatpush.msra.mxu2 %v7620_v54  ;;  %v7592_v54 = vld [vmem:[%s13186_s14 + $0x518] sm:$0xff] }
 0x8ad   : > { %6172 = vmatmul.f32.vlgmr.msra.gmra.mxu3 %v6133_v34  ;;  %v7560_v34 = vld [vmem:[%s13186_s14 + $0x418] sm:$0xff] }
 0x8ae   : > { %v11960_v7 = vsel %vm6053_vm4, %v6049_v60, %v6057_v24  ;;  %6429 = vmatpush.msra.mxu3 %v7588_v22  ;;  %6508 = vmatpush.msra.mxu2 %v7619_v50  ;;  %v7606_v60 = vld [vmem:[%s13186_s14 + $0x588] sm:$0xff]  ;;  %v7591_v50 = vld [vmem:[%s13186_s14 + $0x510] sm:$0xff]  ;;  %v7605_v24 = vld [vmem:[%s13186_s14 + $0x580] sm:$0xff] }
 0x8af   : > { %6192 = vmatmul.f32.vlgmr.msra.gmra.mxu0 %v11960_v7  ;;  %v6132_v58 = vrot.slane %v11960_v7, 1  ;;  %v6327_v28 = vrot.slane %v11960_v7, 3  ;;  %v6249_v44 = vrot.slane %v11960_v7, 2  ;;  %v7574_v22 = vld [vmem:[%s13186_s14 + $0x488] sm:$0xff] }
 0x8b0   : > { %6430 = vmatpush.msra.mxu3 %v7587_v10  ;;  %6487 = vmatpush.msra.mxu0 %v7604_v42  ;;  %v7559_v10 = vld [vmem:[%s13186_s14 + $0x410] sm:$0xff]  ;;  %v6484_v42 = vrot.slane %v11943_v20, 5 }
 0x8b1   : > { %6509 = vmatpush.msra.mxu2 %v7618_v62  ;;  %6152 = vmatmul.f32.vlgmr.msra.gmra.mxu1 %v6132_v58  ;;  %v7684_v62 = vld [vmem:[%s13186_s14 + $0x7f8] sm:$0xff]  ;;  %v7573_v58 = vld [vmem:[%s13186_s14 + $0x480] sm:$0xff] }
 0x8b2   : > { %6409 = vmatpush.msra.mxu1 %v7572_v21  ;;  %6431 = vmatpush.msra.mxu3 %v7586_v4  ;;  %v7590_v21 = vld [vmem:[%s13186_s14 + $0x508] sm:$0xff]  ;;  %v6406_v4 = vrot.slane %v11943_v20, 4 }
 0x8b3   : > { %6488 = vmatpush.msra.mxu0 %v7603_v23  ;;  %6510 = vmatpush.msra.mxu2 %v7617_v40  ;;  %v7652_v23 = vld [vmem:[%s13186_s14 + $0x6f8] sm:$0xff]  ;;  %v7683_v40 = vld [vmem:[%s13186_s14 + $0x7f0] sm:$0xff] }
 0x8b4   : > { %6367 = vmatmul.f32.vlgmr.msrb.gmra.mxu2 %v6328_v14  ;;  %6410 = vmatpush.msra.mxu1 %v7571_v43  ;;  %v7558_v43 = vld [vmem:[%s13186_s14 + $0x408] sm:$0xff]  ;;  %v7589_v14 = vld [vmem:[%s13186_s14 + $0x500] sm:$0xff] }
 0x8b5   : > { %6432 = vmatpush.msra.mxu3 %v7585_v53  ;;  %6489 = vmatpush.msra.mxu0 %v7602_v16  ;;  %v7651_v53 = vld [vmem:[%s13186_s14 + $0x6f0] sm:$0xff]  ;;  %v6483_v16 = vrot.slane %v11960_v7, 5 }
 0x8b6   : > { %6511 = vmatpush.msra.mxu2 %v7616_v32  ;;  %6289 = vmatmul.f32.vlgmr.msrb.gmra.mxu3 %v6250_v47  ;;  %v7668_v32 = vld [vmem:[%s13186_s14 + $0x778] sm:$0xff]  ;;  %v7682_v47 = vld [vmem:[%s13186_s14 + $0x7e8] sm:$0xff] }
 0x8b7   : > { %6411 = vmatpush.msra.mxu1 %v7570_v36  ;;  %6433 = vmatpush.msra.mxu3 %v7584_v51  ;;  %v7557_v36 = vld [vmem:[%s13186_s14 + $0x400] sm:$0xff]  ;;  %v7650_v51 = vld [vmem:[%s13186_s14 + $0x6e8] sm:$0xff] }
 0x8b8   : > { %6490 = vmatpush.msra.mxu0 %v7601_v46  ;;  %6512 = vmatpush.msra.mxu2 %v7615_v35  ;;  %v7667_v46 = vld [vmem:[%s13186_s14 + $0x770] sm:$0xff]  ;;  %v6405_v35 = vrot.slane %v11960_v7, 4 }
 0x8b9   : > { %6347 = vmatmul.f32.vlgmr.msrb.gmra.mxu0 %v6327_v28  ;;  %6412 = vmatpush.msra.mxu1 %v7569_v57  ;;  %v7636_v57 = vld [vmem:[%s13186_s14 + $0x678] sm:$0xff]  ;;  %v7681_v28 = vld [vmem:[%s13186_s14 + $0x7e0] sm:$0xff] }
 0x8ba   : > { %6434 = vmatpush.msra.mxu3 %v7583_v0  ;;  %6491 = vmatpush.msra.mxu0 %v7600_v29  ;;  %v7649_v0 = vld [vmem:[%s13186_s14 + $0x6e0] sm:$0xff]  ;;  %v7666_v29 = vld [vmem:[%s13186_s14 + $0x768] sm:$0xff] }
 0x8bb   : > { %6513 = vmatpush.msra.mxu2 %v7614_v37  ;;  %6269 = vmatmul.f32.vlgmr.msrb.gmra.mxu1 %v6249_v44  ;;  %v7635_v37 = vld [vmem:[%s13186_s14 + $0x670] sm:$0xff]  ;;  %v7680_v44 = vld [vmem:[%s13186_s14 + $0x7d8] sm:$0xff] }
 0x8bc   : > { %6413 = vmatpush.msra.mxu1 %v7568_v3  ;;  %6435 = vmatpush.msra.mxu3 %v7582_v63  ;;  %v7648_v3 = vld [vmem:[%s13186_s14 + $0x6d8] sm:$0xff]  ;;  %v7665_v63 = vld [vmem:[%s13186_s14 + $0x760] sm:$0xff] }
 0x8bd   : > { %6492 = vmatpush.msra.mxu0 %v7599_v52  ;;  %6514 = vmatpush.msra.mxu2 %v7613_v27  ;;  %v7634_v52 = vld [vmem:[%s13186_s14 + $0x668] sm:$0xff]  ;;  %v7679_v27 = vld [vmem:[%s13186_s14 + $0x7d0] sm:$0xff] }
 0x8be   : > { %6414 = vmatpush.msra.mxu1 %v7567_v55  ;;  %6436 = vmatpush.msra.mxu3 %v7581_v11  ;;  %v7647_v55 = vld [vmem:[%s13186_s14 + $0x6d0] sm:$0xff]  ;;  %v7664_v11 = vld [vmem:[%s13186_s14 + $0x758] sm:$0xff] }
 0x8bf   : > { %6493 = vmatpush.msra.mxu0 %v7598_v25  ;;  %6515 = vmatpush.msra.mxu2 %v7612_v38  ;;  %v7633_v25 = vld [vmem:[%s13186_s14 + $0x660] sm:$0xff]  ;;  %v7678_v38 = vld [vmem:[%s13186_s14 + $0x7c8] sm:$0xff] }
 0x8c0   : > { %6415 = vmatpush.msra.mxu1 %v7566_v12  ;;  %6437 = vmatpush.msra.mxu3 %v7580_v41  ;;  %v7646_v12 = vld [vmem:[%s13186_s14 + $0x6c8] sm:$0xff]  ;;  %v7663_v41 = vld [vmem:[%s13186_s14 + $0x750] sm:$0xff] }
 0x8c1   : > { %6494 = vmatpush.msra.mxu0 %v7597_v1  ;;  %6516 = vmatpush.msra.mxu2 %v7611_v49  ;;  %v7632_v1 = vld [vmem:[%s13186_s14 + $0x658] sm:$0xff]  ;;  %v7677_v49 = vld [vmem:[%s13186_s14 + $0x7c0] sm:$0xff] }
 0x8c2   : > { %6416 = vmatpush.msra.mxu1 %v7565_v45  ;;  %6438 = vmatpush.msra.mxu3 %v7579_v56  ;;  %v7645_v45 = vld [vmem:[%s13186_s14 + $0x6c0] sm:$0xff]  ;;  %v7662_v56 = vld [vmem:[%s13186_s14 + $0x748] sm:$0xff] }
 0x8c3   : > { %6495 = vmatpush.msra.mxu0 %v7596_v2  ;;  %6517 = vmatpush.msra.mxu2 %v7610_v9  ;;  %v7631_v2 = vld [vmem:[%s13186_s14 + $0x650] sm:$0xff]  ;;  %v7676_v9 = vld [vmem:[%s13186_s14 + $0x7b8] sm:$0xff] }
 0x8c4   : > { %6417 = vmatpush.msra.mxu1 %v7564_v61  ;;  %6439 = vmatpush.msra.mxu3 %v7578_v15  ;;  %v7644_v61 = vld [vmem:[%s13186_s14 + $0x6b8] sm:$0xff]  ;;  %v7661_v15 = vld [vmem:[%s13186_s14 + $0x740] sm:$0xff] }
 0x8c5   : > { %6496 = vmatpush.msra.mxu0 %v7595_v17  ;;  %6518 = vmatpush.msra.mxu2 %v7609_v8  ;;  %v7630_v17 = vld [vmem:[%s13186_s14 + $0x648] sm:$0xff]  ;;  %v7675_v8 = vld [vmem:[%s13186_s14 + $0x7b0] sm:$0xff] }
 0x8c6   : > { %6418 = vmatpush.msra.mxu1 %v7563_v18  ;;  %6440 = vmatpush.msra.mxu3 %v7577_v30  ;;  %v7643_v18 = vld [vmem:[%s13186_s14 + $0x6b0] sm:$0xff]  ;;  %v7660_v30 = vld [vmem:[%s13186_s14 + $0x738] sm:$0xff] }
 0x8c7   : > { %6497 = vmatpush.msra.mxu0 %v7594_v19  ;;  %6519 = vmatpush.msra.mxu2 %v7608_v31  ;;  %v7629_v19 = vld [vmem:[%s13186_s14 + $0x640] sm:$0xff]  ;;  %v7674_v31 = vld [vmem:[%s13186_s14 + $0x7a8] sm:$0xff] }
 0x8c8   : > { %6419 = vmatpush.msra.mxu1 %v7562_v39  ;;  %6441 = vmatpush.msra.mxu3 %v7576_v33  ;;  %v7642_v39 = vld [vmem:[%s13186_s14 + $0x6a8] sm:$0xff]  ;;  %v7659_v33 = vld [vmem:[%s13186_s14 + $0x730] sm:$0xff] }
 0x8c9   : > { %6498 = vmatpush.msra.mxu0 %v7593_v13  ;;  %6520 = vmatpush.msra.mxu2 %v7607_v59  ;;  %v7628_v13 = vld [vmem:[%s13186_s14 + $0x638] sm:$0xff]  ;;  %v7673_v59 = vld [vmem:[%s13186_s14 + $0x7a0] sm:$0xff] }
 0x8ca   : > { %6420 = vmatpush.msra.mxu1 %v7561_v48  ;;  %6442 = vmatpush.msra.mxu3 %v7575_v5  ;;  %v7641_v48 = vld [vmem:[%s13186_s14 + $0x6a0] sm:$0xff]  ;;  %v7658_v5 = vld [vmem:[%s13186_s14 + $0x728] sm:$0xff] }
 0x8cb   : > { %6499 = vmatpush.msra.mxu0 %v7592_v54  ;;  %6521 = vmatpush.msra.mxu2 %v7606_v60  ;;  %v7627_v54 = vld [vmem:[%s13186_s14 + $0x630] sm:$0xff]  ;;  %v7672_v60 = vld [vmem:[%s13186_s14 + $0x798] sm:$0xff] }
 0x8cc   : > { %6421 = vmatpush.msra.mxu1 %v7560_v34  ;;  %6443 = vmatpush.msra.mxu3 %v7574_v22  ;;  %v7640_v34 = vld [vmem:[%s13186_s14 + $0x698] sm:$0xff]  ;;  %v7657_v22 = vld [vmem:[%s13186_s14 + $0x720] sm:$0xff] }
 0x8cd   : > { %6500 = vmatpush.msra.mxu0 %v7591_v50  ;;  %6522 = vmatpush.msra.mxu2 %v7605_v24  ;;  %v7626_v50 = vld [vmem:[%s13186_s14 + $0x628] sm:$0xff]  ;;  %v7671_v24 = vld [vmem:[%s13186_s14 + $0x790] sm:$0xff] }
 0x8ce   : > { %6523 = vmatmul.f32.vlgmr.msra.gmra.mxu2 %v6484_v42  ;;  %6422 = vmatpush.msra.mxu1 %v7559_v10  ;;  %v7639_v10 = vld [vmem:[%s13186_s14 + $0x690] sm:$0xff]  ;;  %v7656_v42 = vld [vmem:[%s13186_s14 + $0x718] sm:$0xff] }
 0x8cf   : > { %6663 = vmatpush.msrb.mxu2 %v7684_v62  ;;  %6444 = vmatpush.msra.mxu3 %v7573_v58  ;;  %v7625_v62 = vld [vmem:[%s13186_s14 + $0x620] sm:$0xff]  ;;  %v7670_v58 = vld [vmem:[%s13186_s14 + $0x788] sm:$0xff] }
 0x8d0   : > { %6501 = vmatpush.msra.mxu0 %v7590_v21  ;;  %6445 = vmatmul.f32.vlgmr.msra.gmra.mxu3 %v6406_v4  ;;  %v7638_v21 = vld [vmem:[%s13186_s14 + $0x688] sm:$0xff]  ;;  %v7655_v4 = vld [vmem:[%s13186_s14 + $0x710] sm:$0xff] }
 0x8d1   : > { %6585 = vmatpush.msrb.mxu3 %v7652_v23  ;;  %6664 = vmatpush.msrb.mxu2 %v7683_v40  ;;  %v7624_v23 = vld [vmem:[%s13186_s14 + $0x618] sm:$0xff]  ;;  %v7669_v40 = vld [vmem:[%s13186_s14 + $0x780] sm:$0xff] }
 0x8d2   : > { %6423 = vmatpush.msra.mxu1 %v7558_v43  ;;  %6502 = vmatpush.msra.mxu0 %v7589_v14  ;;  %v7637_v43 = vld [vmem:[%s13186_s14 + $0x680] sm:$0xff]  ;;  %v6640_v14 = vrot.slane %v11943_v20, 7 }
 0x8d3   : > { %6503 = vmatmul.f32.vlgmr.msra.gmra.mxu0 %v6483_v16  ;;  %6586 = vmatpush.msrb.mxu3 %v7651_v53  ;;  %v7748_v53 = vld [vmem:[%s13186_s14 + $0x9f8] sm:$0xff]  ;;  %v7623_v16 = vld [vmem:[%s13186_s14 + $0x610] sm:$0xff] }
 0x8d4   : > { %6643 = vmatpush.msrb.mxu0 %v7668_v32  ;;  %6665 = vmatpush.msrb.mxu2 %v7682_v47  ;;  %v7654_v32 = vld [vmem:[%s13186_s14 + $0x708] sm:$0xff]  ;;  %v6562_v47 = vrot.slane %v11943_v20, 6  ;;  %v7715_v20 = vld [vmem:[%s13186_s14 + $0x8f0] sm:$0xff] }
 0x8d5   : > { %6424 = vmatpush.msra.mxu1 %v7557_v36  ;;  %6587 = vmatpush.msrb.mxu3 %v7650_v51  ;;  %v7716_v36 = vld [vmem:[%s13186_s14 + $0x8f8] sm:$0xff]  ;;  %v7747_v51 = vld [vmem:[%s13186_s14 + $0x9f0] sm:$0xff] }
 0x8d6   : > { %6425 = vmatmul.f32.vlgmr.msra.gmra.mxu1 %v6405_v35  ;;  %6644 = vmatpush.msrb.mxu0 %v7667_v46  ;;  %v7622_v46 = vld [vmem:[%s13186_s14 + $0x608] sm:$0xff]  ;;  %v7653_v35 = vld [vmem:[%s13186_s14 + $0x700] sm:$0xff] }
 0x8d7   : > { %6565 = vmatpush.msrb.mxu1 %v7636_v57  ;;  %6666 = vmatpush.msrb.mxu2 %v7681_v28  ;;  %v6639_v57 = vrot.slane %v11960_v7, 7  ;;  %v7732_v28 = vld [vmem:[%s13186_s14 + $0x978] sm:$0xff] }
 0x8d8   : > { %6588 = vmatpush.msrb.mxu3 %v7649_v0  ;;  %6645 = vmatpush.msrb.mxu0 %v7666_v29  ;;  %v7746_v0 = vld [vmem:[%s13186_s14 + $0x9e8] sm:$0xff]  ;;  %v7621_v29 = vld [vmem:[%s13186_s14 + $0x600] sm:$0xff] }
 0x8d9   : > { %6566 = vmatpush.msrb.mxu1 %v7635_v37  ;;  %6667 = vmatpush.msrb.mxu2 %v7680_v44  ;;  %v7714_v37 = vld [vmem:[%s13186_s14 + $0x8e8] sm:$0xff]  ;;  %v7731_v44 = vld [vmem:[%s13186_s14 + $0x970] sm:$0xff] }
 0x8da   : > { %6589 = vmatpush.msrb.mxu3 %v7648_v3  ;;  %6646 = vmatpush.msrb.mxu0 %v7665_v63  ;;  %v6561_v3 = vrot.slane %v11960_v7, 6  ;;  %v7700_v63 = vld [vmem:[%s13186_s14 + $0x878] sm:$0xff]  ;;  %v7699_v7 = vld [vmem:[%s13186_s14 + $0x870] sm:$0xff] }
 0x8db   : > { %6567 = vmatpush.msrb.mxu1 %v7634_v52  ;;  %6668 = vmatpush.msrb.mxu2 %v7679_v27  ;;  %v7745_v52 = vld [vmem:[%s13186_s14 + $0x9e0] sm:$0xff] }
 0x8dc   : > { %6590 = vmatpush.msrb.mxu3 %v7647_v55  ;;  %6647 = vmatpush.msrb.mxu0 %v7664_v11  ;;  %v7713_v27 = vld [vmem:[%s13186_s14 + $0x8e0] sm:$0xff]  ;;  %v7730_v55 = vld [vmem:[%s13186_s14 + $0x968] sm:$0xff]  ;;  %v7744_v11 = vld [vmem:[%s13186_s14 + $0x9d8] sm:$0xff] }
 0x8dd   : > { %6568 = vmatpush.msrb.mxu1 %v7633_v25  ;;  %6669 = vmatpush.msrb.mxu2 %v7678_v38  ;;  %v7712_v25 = vld [vmem:[%s13186_s14 + $0x8d8] sm:$0xff]  ;;  %v7729_v38 = vld [vmem:[%s13186_s14 + $0x960] sm:$0xff] }
 0x8de   : > { %6591 = vmatpush.msrb.mxu3 %v7646_v12  ;;  %6648 = vmatpush.msrb.mxu0 %v7663_v41  ;;  %v7698_v12 = vld [vmem:[%s13186_s14 + $0x868] sm:$0xff]  ;;  %v7743_v41 = vld [vmem:[%s13186_s14 + $0x9d0] sm:$0xff] }
 0x8df   : > { %6569 = vmatpush.msrb.mxu1 %v7632_v1  ;;  %6670 = vmatpush.msrb.mxu2 %v7677_v49  ;;  %v7711_v1 = vld [vmem:[%s13186_s14 + $0x8d0] sm:$0xff]  ;;  %v7728_v49 = vld [vmem:[%s13186_s14 + $0x958] sm:$0xff] }
 0x8e0   : > { %6592 = vmatpush.msrb.mxu3 %v7645_v45  ;;  %6649 = vmatpush.msrb.mxu0 %v7662_v56  ;;  %v6019_v45 = vpop.f32.mrf.mxu2  ;;  %v7697_v56 = vld [vmem:[%s13186_s14 + $0x860] sm:$0xff] }
 0x8e1   : > { %6570 = vmatpush.msrb.mxu1 %v7631_v2  ;;  %6671 = vmatpush.msrb.mxu2 %v7676_v9  ;;  %v7742_v2 = vld [vmem:[%s13186_s14 + $0x9c8] sm:$0xff] }
 0x8e2   : > { %6593 = vmatpush.msrb.mxu3 %v7644_v61  ;;  %6650 = vmatpush.msrb.mxu0 %v7661_v15  ;;  %v7710_v9 = vld [vmem:[%s13186_s14 + $0x8c8] sm:$0xff]  ;;  %v7727_v61 = vld [vmem:[%s13186_s14 + $0x950] sm:$0xff]  ;;  %v5945_v15 = vpop.permute.xlu2 %5944 }
 0x8e3   : > { %6571 = vmatpush.msrb.mxu1 %v7630_v17  ;;  %6672 = vmatpush.msrb.mxu2 %v7675_v8  ;;  %v6042_v17 = vpop.f32.mrf.mxu0  ;;  %v7696_v8 = vld [vmem:[%s13186_s14 + $0x858] sm:$0xff] }
 0x8e4   : > { %6594 = vmatpush.msrb.mxu3 %v7643_v18  ;;  %6651 = vmatpush.msrb.mxu0 %v7660_v30  ;;  %v7741_v18 = vld [vmem:[%s13186_s14 + $0x9c0] sm:$0xff]  ;;  %v6020_v30 = vadd.f32 %v6019_v45, %v5945_v15  ;;  %v7796_v45 = vld [vmem:[%s13186_s14 + $0xb78] sm:$0xff] }
 0x8e5   : > { %6572 = vmatpush.msrb.mxu1 %v7629_v19  ;;  %6673 = vmatpush.msrb.mxu2 %v7674_v31  ;;  %v5973_v19 = vpop.f32.mrf.mxu3  ;;  %v7709_v31 = vld [vmem:[%s13186_s14 + $0x8c0] sm:$0xff] }
 0x8e6   : > { %6595 = vmatpush.msrb.mxu3 %v7642_v39  ;;  %6652 = vmatpush.msrb.mxu0 %v7659_v33  ;;  %v7726_v39 = vld [vmem:[%s13186_s14 + $0x948] sm:$0xff]  ;;  %v7695_v33 = vld [vmem:[%s13186_s14 + $0x850] sm:$0xff] }
 0x8e7   : > { %6573 = vmatpush.msrb.mxu1 %v7628_v13  ;;  %6674 = vmatpush.msrb.mxu2 %v7673_v59  ;;  %v7740_v13 = vld [vmem:[%s13186_s14 + $0x9b8] sm:$0xff]  ;;  %v6043_v59 = vadd.f32 %v6042_v17, %v6020_v30  ;;  %v7809_v17 = vld [vmem:[%s13186_s14 + $0xbe0] sm:$0xff]  ;;  %v7763_v30 = vld [vmem:[%s13186_s14 + $0xa70] sm:$0xff] }
 0x8e8   : > { %6596 = vmatpush.msrb.mxu3 %v7641_v48  ;;  %6653 = vmatpush.msrb.mxu0 %v7658_v5  ;;  %v7708_v48 = vld [vmem:[%s13186_s14 + $0x8b8] sm:$0xff]  ;;  %v7725_v5 = vld [vmem:[%s13186_s14 + $0x940] sm:$0xff] }
 0x8e9   : > { %6574 = vmatpush.msrb.mxu1 %v7627_v54  ;;  %6675 = vmatpush.msrb.mxu2 %v7672_v60  ;;  %v5974_v54 = vadd.f32 %v5973_v19, %v5945_v15  ;;  %v7694_v60 = vld [vmem:[%s13186_s14 + $0x848] sm:$0xff]  ;;  %v7764_v15 = vld [vmem:[%s13186_s14 + $0xa78] sm:$0xff] }
 0x8ea   : > { %6597 = vmatpush.msrb.mxu3 %v7640_v34  ;;  %6654 = vmatpush.msrb.mxu0 %v7657_v22  ;;  %v7739_v34 = vld [vmem:[%s13186_s14 + $0x9b0] sm:$0xff]  ;;  %v5996_v22 = vpop.f32.mrf.mxu1  ;;  %v7808_v19 = vld [vmem:[%s13186_s14 + $0xbd8] sm:$0xff] }
 0x8eb   : > { %6575 = vmatpush.msrb.mxu1 %v7626_v50  ;;  %6676 = vmatpush.msrb.mxu2 %v7671_v24  ;;  %v7707_v50 = vld [vmem:[%s13186_s14 + $0x8b0] sm:$0xff]  ;;  %v7724_v24 = vld [vmem:[%s13186_s14 + $0x938] sm:$0xff] }
 0x8ec   : > { %6598 = vmatpush.msrb.mxu3 %v7639_v10  ;;  %6655 = vmatpush.msrb.mxu0 %v7656_v42  ;;  %v7693_v10 = vld [vmem:[%s13186_s14 + $0x840] sm:$0xff]  ;;  %v7738_v42 = vld [vmem:[%s13186_s14 + $0x9a8] sm:$0xff] }
 0x8ed   : > { %6576 = vmatpush.msrb.mxu1 %v7625_v62  ;;  %6677 = vmatpush.msrb.mxu2 %v7670_v58  ;;  %v6052_v62 = vadd.f32 %v6043_v59, %v11247_v6  ;;  %v7706_v58 = vld [vmem:[%s13186_s14 + $0x8a8] sm:$0xff]  ;;  %v7737_v6 = vld [vmem:[%s13186_s14 + $0x9a0] sm:$0xff]  ;;  %v7775_v59 = vld [vmem:[%s13186_s14 + $0xad0] sm:$0xff] }
 0x8ee   : > { %6599 = vmatpush.msrb.mxu3 %v7638_v21  ;;  %6656 = vmatpush.msrb.mxu0 %v7655_v4  ;;  %v7723_v21 = vld [vmem:[%s13186_s14 + $0x930] sm:$0xff]  ;;  %v5997_v4 = vadd.f32 %v5996_v22, %v5974_v54  ;;  %v7806_v54 = vld [vmem:[%s13186_s14 + $0xbc8] sm:$0xff]  ;;  %v7760_v22 = vld [vmem:[%s13186_s14 + $0xa58] sm:$0xff] }
 0x8ef   : > { %6577 = vmatpush.msrb.mxu1 %v7624_v23  ;;  %6678 = vmatpush.msrb.mxu2 %v7669_v40  ;;  %v7692_v23 = vld [vmem:[%s13186_s14 + $0x838] sm:$0xff]  ;;  %v7705_v40 = vld [vmem:[%s13186_s14 + $0x8a0] sm:$0xff]  ;;  %vm6056_vm13 = vcmp.gt.f32.partialorder %v6052_v62, 0.0 }
 0x8f0   : > { %6679 = vmatmul.f32.vlgmr.msrb.gmra.mxu2 %v6640_v14  ;;  %6600 = vmatpush.msrb.mxu3 %v7637_v43  ;;  %v7722_v43 = vld [vmem:[%s13186_s14 + $0x928] sm:$0xff]  ;;  %v7691_v14 = vld [vmem:[%s13186_s14 + $0x830] sm:$0xff] }
 0x8f1   : > { %6817 = vmatpush.msra.mxu2 %v7748_v53  ;;  %6578 = vmatpush.msrb.mxu1 %v7623_v16  ;;  %v7736_v53 = vld [vmem:[%s13186_s14 + $0x998] sm:$0xff]  ;;  %v6060_v16 = vmul.f32 0.01, %v6052_v62 }
 0x8f2   : > { %6657 = vmatpush.msrb.mxu0 %v7654_v32  ;;  %6601 = vmatmul.f32.vlgmr.msrb.gmra.mxu3 %v6562_v47  ;;  %v7704_v32 = vld [vmem:[%s13186_s14 + $0x898] sm:$0xff]  ;;  %v7721_v47 = vld [vmem:[%s13186_s14 + $0x920] sm:$0xff] }
 0x8f3   : > { %6737 = vmatpush.msra.mxu3 %v7716_v36  ;;  %6818 = vmatpush.msra.mxu2 %v7747_v51  ;;  %v6051_v36 = vadd.f32 %v5997_v4, %v11219_v26  ;;  %v7690_v51 = vld [vmem:[%s13186_s14 + $0x828] sm:$0xff]  ;;  %v7720_v26 = vld [vmem:[%s13186_s14 + $0x918] sm:$0xff] }
 0x8f4   : > { %6579 = vmatpush.msrb.mxu1 %v7622_v46  ;;  %6658 = vmatpush.msrb.mxu0 %v7653_v35  ;;  %v7735_v46 = vld [vmem:[%s13186_s14 + $0x990] sm:$0xff]  ;;  %v7758_v4 = vld [vmem:[%s13186_s14 + $0xa48] sm:$0xff] }
 0x8f5   : > { %6659 = vmatmul.f32.vlgmr.msrb.gmra.mxu0 %v6639_v57  ;;  %6738 = vmatpush.msra.mxu3 %v7715_v20  ;;  %v7703_v35 = vld [vmem:[%s13186_s14 + $0x890] sm:$0xff]  ;;  %v7689_v20 = vld [vmem:[%s13186_s14 + $0x820] sm:$0xff]  ;;  %v7734_v57 = vld [vmem:[%s13186_s14 + $0x988] sm:$0xff]  ;;  %vm6055_vm1 = vcmp.gt.f32.partialorder %v6051_v36, 0.0 }
 0x8f6   : > { %6797 = vmatpush.msra.mxu0 %v7732_v28  ;;  %6819 = vmatpush.msra.mxu2 %v7746_v0  ;;  %v12509_v28 = vsel %vm6056_vm13, %v6052_v62, %v6060_v16  ;;  %v7702_v0 = vld [vmem:[%s13186_s14 + $0x888] sm:$0xff]  ;;  %v7804_v62 = vld [vmem:[%s13186_s14 + $0xbb8] sm:$0xff]  ;;  %v7787_v16 = vld [vmem:[%s13186_s14 + $0xb30] sm:$0xff] }
 0x8f7   : > { %6580 = vmatpush.msrb.mxu1 %v7621_v29  ;;  %6739 = vmatpush.msra.mxu3 %v7714_v37  ;;  %v7719_v29 = vld [vmem:[%s13186_s14 + $0x910] sm:$0xff]  ;;  %v6059_v37 = vmul.f32 0.01, %v6051_v36 }
 0x8f8   : > { %6581 = vmatmul.f32.vlgmr.msrb.gmra.mxu1 %v6561_v3  ;;  %6798 = vmatpush.msra.mxu0 %v7731_v44  ;;  %v7688_v44 = vld [vmem:[%s13186_s14 + $0x818] sm:$0xff]  ;;  %v7733_v3 = vld [vmem:[%s13186_s14 + $0x980] sm:$0xff] }
 0x8f9   : > { %6717 = vmatpush.msra.mxu1 %v7700_v63  ;;  %6820 = vmatpush.msra.mxu2 %v7745_v52  ;;  %v7701_v63 = vld [vmem:[%s13186_s14 + $0x880] sm:$0xff]  ;;  %v6794_v52 = vrot.slane %v12509_v28, 1 }
 0x8fa   : > { %6740 = vmatpush.msra.mxu3 %v7713_v27  ;;  %6799 = vmatpush.msra.mxu0 %v7730_v55  ;;  %v7812_v27 = vld [vmem:[%s13186_s14 + $0xbf8] sm:$0xff]  ;;  %v7687_v55 = vld [vmem:[%s13186_s14 + $0x810] sm:$0xff] }
 0x8fb   : > { %6718 = vmatpush.msra.mxu1 %v7699_v7  ;;  %6821 = vmatpush.msra.mxu2 %v7744_v11  ;;  %v7718_v7 = vld [vmem:[%s13186_s14 + $0x908] sm:$0xff]  ;;  %v12536_v11 = vsel %vm6055_vm1, %v6051_v36, %v6059_v37  ;;  %v7769_v36 = vld [vmem:[%s13186_s14 + $0xaa0] sm:$0xff]  ;;  %v7784_v37 = vld [vmem:[%s13186_s14 + $0xb18] sm:$0xff] }
 0x8fc   : > { %6741 = vmatpush.msra.mxu3 %v7712_v25  ;;  %6800 = vmatpush.msra.mxu0 %v7729_v38  ;;  %v7780_v25 = vld [vmem:[%s13186_s14 + $0xaf8] sm:$0xff]  ;;  %v7811_v38 = vld [vmem:[%s13186_s14 + $0xbf0] sm:$0xff] }
 0x8fd   : > { %6719 = vmatpush.msra.mxu1 %v7698_v12  ;;  %6822 = vmatpush.msra.mxu2 %v7743_v41  ;;  %v7686_v12 = vld [vmem:[%s13186_s14 + $0x808] sm:$0xff]  ;;  %v7717_v41 = vld [vmem:[%s13186_s14 + $0x900] sm:$0xff] }
 0x8fe   : > { %6742 = vmatpush.msra.mxu3 %v7711_v1  ;;  %6801 = vmatpush.msra.mxu0 %v7728_v49  ;;  %v7779_v1 = vld [vmem:[%s13186_s14 + $0xaf0] sm:$0xff]  ;;  %v6793_v49 = vrot.slane %v12536_v11, 1 }
 0x8ff   : > { %6720 = vmatpush.msra.mxu1 %v7697_v56  ;;  %6823 = vmatpush.msra.mxu2 %v7742_v2  ;;  %v7810_v56 = vld [vmem:[%s13186_s14 + $0xbe8] sm:$0xff]  ;;  %v7685_v2 = vld [vmem:[%s13186_s14 + $0x800] sm:$0xff] }
 0x900   : > { %6743 = vmatpush.msra.mxu3 %v7710_v9  ;;  %6802 = vmatpush.msra.mxu0 %v7727_v61  ;;  %v7778_v9 = vld [vmem:[%s13186_s14 + $0xae8] sm:$0xff]  ;;  %v7795_v61 = vld [vmem:[%s13186_s14 + $0xb70] sm:$0xff] }
 0x901   : > { %6721 = vmatpush.msra.mxu1 %v7696_v8  ;;  %6824 = vmatpush.msra.mxu2 %v7741_v18  ;;  %v7777_v8 = vld [vmem:[%s13186_s14 + $0xae0] sm:$0xff]  ;;  %v7794_v18 = vld [vmem:[%s13186_s14 + $0xb68] sm:$0xff] }
 0x902   : > { %6744 = vmatpush.msra.mxu3 %v7709_v31  ;;  %6803 = vmatpush.msra.mxu0 %v7726_v39  ;;  %v7776_v31 = vld [vmem:[%s13186_s14 + $0xad8] sm:$0xff]  ;;  %v7793_v39 = vld [vmem:[%s13186_s14 + $0xb60] sm:$0xff] }
 0x903   : > { %6722 = vmatpush.msra.mxu1 %v7695_v33  ;;  %6825 = vmatpush.msra.mxu2 %v7740_v13  ;;  %v7762_v33 = vld [vmem:[%s13186_s14 + $0xa68] sm:$0xff]  ;;  %v7807_v13 = vld [vmem:[%s13186_s14 + $0xbd0] sm:$0xff] }
 0x904   : > { %6745 = vmatpush.msra.mxu3 %v7708_v48  ;;  %6804 = vmatpush.msra.mxu0 %v7725_v5  ;;  %v7792_v48 = vld [vmem:[%s13186_s14 + $0xb58] sm:$0xff]  ;;  %v7761_v5 = vld [vmem:[%s13186_s14 + $0xa60] sm:$0xff] }
 0x905   : > { %6723 = vmatpush.msra.mxu1 %v7694_v60  ;;  %6826 = vmatpush.msra.mxu2 %v7739_v34  ;;  %v7774_v60 = vld [vmem:[%s13186_s14 + $0xac8] sm:$0xff]  ;;  %v7791_v34 = vld [vmem:[%s13186_s14 + $0xb50] sm:$0xff] }
 0x906   : > { %6746 = vmatpush.msra.mxu3 %v7707_v50  ;;  %6805 = vmatpush.msra.mxu0 %v7724_v24  ;;  %v7805_v50 = vld [vmem:[%s13186_s14 + $0xbc0] sm:$0xff] }
 0x907   : > { %6724 = vmatpush.msra.mxu1 %v7693_v10  ;;  %6827 = vmatpush.msra.mxu2 %v7738_v42  ;;  %v7773_v24 = vld [vmem:[%s13186_s14 + $0xac0] sm:$0xff]  ;;  %v7790_v10 = vld [vmem:[%s13186_s14 + $0xb48] sm:$0xff]  ;;  %v7759_v42 = vld [vmem:[%s13186_s14 + $0xa50] sm:$0xff] }
 0x908   : > { %6747 = vmatpush.msra.mxu3 %v7706_v58  ;;  %6806 = vmatpush.msra.mxu0 %v7723_v21  ;;  %v7772_v58 = vld [vmem:[%s13186_s14 + $0xab8] sm:$0xff]  ;;  %v7789_v21 = vld [vmem:[%s13186_s14 + $0xb40] sm:$0xff] }
 0x909   : > { %6725 = vmatpush.msra.mxu1 %v7692_v23  ;;  %6828 = vmatpush.msra.mxu2 %v7737_v6  ;;  %v7803_v23 = vld [vmem:[%s13186_s14 + $0xbb0] sm:$0xff] }
 0x90a   : > { %6748 = vmatpush.msra.mxu3 %v7705_v40  ;;  %6807 = vmatpush.msra.mxu0 %v7722_v43  ;;  %v7771_v6 = vld [vmem:[%s13186_s14 + $0xab0] sm:$0xff]  ;;  %v7788_v40 = vld [vmem:[%s13186_s14 + $0xb38] sm:$0xff]  ;;  %v7757_v43 = vld [vmem:[%s13186_s14 + $0xa40] sm:$0xff] }
 0x90b   : > { %6726 = vmatpush.msra.mxu1 %v7691_v14  ;;  %6829 = vmatpush.msra.mxu2 %v7736_v53  ;;  %v7802_v14 = vld [vmem:[%s13186_s14 + $0xba8] sm:$0xff] }
 0x90c   : > { %6749 = vmatpush.msra.mxu3 %v7704_v32  ;;  %6808 = vmatpush.msra.mxu0 %v7721_v47  ;;  %v7770_v53 = vld [vmem:[%s13186_s14 + $0xaa8] sm:$0xff]  ;;  %v7756_v32 = vld [vmem:[%s13186_s14 + $0xa38] sm:$0xff]  ;;  %v7801_v47 = vld [vmem:[%s13186_s14 + $0xba0] sm:$0xff] }
 0x90d   : > { %6727 = vmatpush.msra.mxu1 %v7690_v51  ;;  %6830 = vmatpush.msra.mxu2 %v7735_v46  ;;  %v7786_v51 = vld [vmem:[%s13186_s14 + $0xb28] sm:$0xff]  ;;  %v7755_v46 = vld [vmem:[%s13186_s14 + $0xa30] sm:$0xff] }
 0x90e   : > { %6750 = vmatpush.msra.mxu3 %v7703_v35  ;;  %6809 = vmatpush.msra.mxu0 %v7720_v26  ;;  %v7800_v35 = vld [vmem:[%s13186_s14 + $0xb98] sm:$0xff] }
 0x90f   : > { %6728 = vmatpush.msra.mxu1 %v7689_v20  ;;  %6831 = vmatpush.msra.mxu2 %v7734_v57  ;;  %v7768_v26 = vld [vmem:[%s13186_s14 + $0xa98] sm:$0xff]  ;;  %v7785_v20 = vld [vmem:[%s13186_s14 + $0xb20] sm:$0xff]  ;;  %v7754_v57 = vld [vmem:[%s13186_s14 + $0xa28] sm:$0xff] }
 0x910   : > { %6751 = vmatpush.msra.mxu3 %v7702_v0  ;;  %6810 = vmatpush.msra.mxu0 %v7719_v29  ;;  %v7799_v0 = vld [vmem:[%s13186_s14 + $0xb90] sm:$0xff] }
 0x911   : > { %6729 = vmatpush.msra.mxu1 %v7688_v44  ;;  %6832 = vmatpush.msra.mxu2 %v7733_v3  ;;  %v7767_v29 = vld [vmem:[%s13186_s14 + $0xa90] sm:$0xff]  ;;  %v7753_v44 = vld [vmem:[%s13186_s14 + $0xa20] sm:$0xff]  ;;  %v7798_v3 = vld [vmem:[%s13186_s14 + $0xb88] sm:$0xff] }
 0x912   : > { %6833 = vmatmul.f32.vlgmr.msra.gmra.mxu2 %v6794_v52  ;;  %6752 = vmatpush.msra.mxu3 %v7701_v63  ;;  %v7766_v63 = vld [vmem:[%s13186_s14 + $0xa88] sm:$0xff]  ;;  %v7783_v52 = vld [vmem:[%s13186_s14 + $0xb10] sm:$0xff] }
 0x913   : > { %6973 = vmatpush.msrb.mxu2 %v7812_v27  ;;  %6730 = vmatpush.msra.mxu1 %v7687_v55  ;;  %v7752_v27 = vld [vmem:[%s13186_s14 + $0xa18] sm:$0xff]  ;;  %v7797_v55 = vld [vmem:[%s13186_s14 + $0xb80] sm:$0xff] }
 0x914   : > { %6811 = vmatpush.msra.mxu0 %v7718_v7  ;;  %6753 = vmatmul.f32.vlgmr.msra.gmra.mxu3 %v12509_v28  ;;  %v7765_v7 = vld [vmem:[%s13186_s14 + $0xa80] sm:$0xff] }
 0x915   : > { %6895 = vmatpush.msrb.mxu3 %v7780_v25  ;;  %6974 = vmatpush.msrb.mxu2 %v7811_v38  ;;  %v6950_v25 = vrot.slane %v12509_v28, 3  ;;  %v7876_v38 = vld [vmem:[%s13186_s14 + $0xdf8] sm:$0xff] }
 0x916   : > { %6731 = vmatpush.msra.mxu1 %v7686_v12  ;;  %6812 = vmatpush.msra.mxu0 %v7717_v41  ;;  %v7751_v12 = vld [vmem:[%s13186_s14 + $0xa10] sm:$0xff]  ;;  %v7782_v41 = vld [vmem:[%s13186_s14 + $0xb08] sm:$0xff] }
 0x917   : > { %6813 = vmatmul.f32.vlgmr.msra.gmra.mxu0 %v6793_v49  ;;  %6896 = vmatpush.msrb.mxu3 %v7779_v1  ;;  %v6872_v1 = vrot.slane %v12509_v28, 2  ;;  %v7844_v49 = vld [vmem:[%s13186_s14 + $0xcf8] sm:$0xff] }
 0x918   : > { %6953 = vmatpush.msrb.mxu0 %v7796_v45  ;;  %6975 = vmatpush.msrb.mxu2 %v7810_v56  ;;  %v7875_v45 = vld [vmem:[%s13186_s14 + $0xdf0] sm:$0xff]  ;;  %v7750_v56 = vld [vmem:[%s13186_s14 + $0xa08] sm:$0xff] }
 0x919   : > { %6732 = vmatpush.msra.mxu1 %v7685_v2  ;;  %6897 = vmatpush.msrb.mxu3 %v7778_v9  ;;  %v7781_v2 = vld [vmem:[%s13186_s14 + $0xb00] sm:$0xff]  ;;  %v7843_v9 = vld [vmem:[%s13186_s14 + $0xcf0] sm:$0xff] }
 0x91a   : > { %6733 = vmatmul.f32.vlgmr.msra.gmra.mxu1 %v12536_v11  ;;  %6954 = vmatpush.msrb.mxu0 %v7795_v61  ;;  %v6949_v61 = vrot.slane %v12536_v11, 3 }
 0x91b   : > { %6875 = vmatpush.msrb.mxu1 %v7764_v15  ;;  %6976 = vmatpush.msrb.mxu2 %v7809_v17  ;;  %v7860_v15 = vld [vmem:[%s13186_s14 + $0xd78] sm:$0xff]  ;;  %v7874_v17 = vld [vmem:[%s13186_s14 + $0xde8] sm:$0xff] }
 0x91c   : > { %6898 = vmatpush.msrb.mxu3 %v7777_v8  ;;  %6955 = vmatpush.msrb.mxu0 %v7794_v18  ;;  %v7749_v8 = vld [vmem:[%s13186_s14 + $0xa00] sm:$0xff]  ;;  %v7842_v18 = vld [vmem:[%s13186_s14 + $0xce8] sm:$0xff] }
 0x91d   : > { %6876 = vmatpush.msrb.mxu1 %v7763_v30  ;;  %6977 = vmatpush.msrb.mxu2 %v7808_v19  ;;  %v7859_v30 = vld [vmem:[%s13186_s14 + $0xd70] sm:$0xff]  ;;  %v6871_v19 = vrot.slane %v12536_v11, 2 }
 0x91e   : > { %6899 = vmatpush.msrb.mxu3 %v7776_v31  ;;  %6956 = vmatpush.msrb.mxu0 %v7793_v39  ;;  %v7828_v31 = vld [vmem:[%s13186_s14 + $0xc78] sm:$0xff]  ;;  %v7873_v39 = vld [vmem:[%s13186_s14 + $0xde0] sm:$0xff] }
 0x91f   : > { %6877 = vmatpush.msrb.mxu1 %v7762_v33  ;;  %6978 = vmatpush.msrb.mxu2 %v7807_v13  ;;  %v7841_v33 = vld [vmem:[%s13186_s14 + $0xce0] sm:$0xff]  ;;  %v7858_v13 = vld [vmem:[%s13186_s14 + $0xd68] sm:$0xff] }
 0x920   : > { %6900 = vmatpush.msrb.mxu3 %v7775_v59  ;;  %6957 = vmatpush.msrb.mxu0 %v7792_v48  ;;  %v7827_v59 = vld [vmem:[%s13186_s14 + $0xc70] sm:$0xff]  ;;  %v7872_v48 = vld [vmem:[%s13186_s14 + $0xdd8] sm:$0xff] }
 0x921   : > { %6878 = vmatpush.msrb.mxu1 %v7761_v5  ;;  %6979 = vmatpush.msrb.mxu2 %v7806_v54  ;;  %v7840_v5 = vld [vmem:[%s13186_s14 + $0xcd8] sm:$0xff]  ;;  %v7857_v54 = vld [vmem:[%s13186_s14 + $0xd60] sm:$0xff] }
 0x922   : > { %6901 = vmatpush.msrb.mxu3 %v7774_v60  ;;  %6958 = vmatpush.msrb.mxu0 %v7791_v34  ;;  %v7826_v60 = vld [vmem:[%s13186_s14 + $0xc68] sm:$0xff]  ;;  %v7871_v34 = vld [vmem:[%s13186_s14 + $0xdd0] sm:$0xff] }
 0x923   : > { %6879 = vmatpush.msrb.mxu1 %v7760_v22  ;;  %6980 = vmatpush.msrb.mxu2 %v7805_v50  ;;  %v7839_v22 = vld [vmem:[%s13186_s14 + $0xcd0] sm:$0xff]  ;;  %v7856_v50 = vld [vmem:[%s13186_s14 + $0xd58] sm:$0xff] }
 0x924   : > { %6902 = vmatpush.msrb.mxu3 %v7773_v24  ;;  %6959 = vmatpush.msrb.mxu0 %v7790_v10  ;;  %v7825_v24 = vld [vmem:[%s13186_s14 + $0xc60] sm:$0xff]  ;;  %v7870_v10 = vld [vmem:[%s13186_s14 + $0xdc8] sm:$0xff] }
 0x925   : > { %6880 = vmatpush.msrb.mxu1 %v7759_v42  ;;  %6981 = vmatpush.msrb.mxu2 %v7804_v62  ;;  %v7838_v42 = vld [vmem:[%s13186_s14 + $0xcc8] sm:$0xff]  ;;  %v7855_v62 = vld [vmem:[%s13186_s14 + $0xd50] sm:$0xff] }
 0x926   : > { %6903 = vmatpush.msrb.mxu3 %v7772_v58  ;;  %6960 = vmatpush.msrb.mxu0 %v7789_v21  ;;  %v7824_v58 = vld [vmem:[%s13186_s14 + $0xc58] sm:$0xff]  ;;  %v7869_v21 = vld [vmem:[%s13186_s14 + $0xdc0] sm:$0xff] }
 0x927   : > { %6881 = vmatpush.msrb.mxu1 %v7758_v4  ;;  %6982 = vmatpush.msrb.mxu2 %v7803_v23  ;;  %v7837_v4 = vld [vmem:[%s13186_s14 + $0xcc0] sm:$0xff]  ;;  %v7854_v23 = vld [vmem:[%s13186_s14 + $0xd48] sm:$0xff] }
 0x928   : > { %6904 = vmatpush.msrb.mxu3 %v7771_v6  ;;  %6961 = vmatpush.msrb.mxu0 %v7788_v40  ;;  %v7823_v6 = vld [vmem:[%s13186_s14 + $0xc50] sm:$0xff]  ;;  %v7868_v40 = vld [vmem:[%s13186_s14 + $0xdb8] sm:$0xff] }
 0x929   : > { %6882 = vmatpush.msrb.mxu1 %v7757_v43  ;;  %6983 = vmatpush.msrb.mxu2 %v7802_v14  ;;  %v7836_v43 = vld [vmem:[%s13186_s14 + $0xcb8] sm:$0xff]  ;;  %v7853_v14 = vld [vmem:[%s13186_s14 + $0xd40] sm:$0xff] }
 0x92a   : > { %6905 = vmatpush.msrb.mxu3 %v7770_v53  ;;  %6962 = vmatpush.msrb.mxu0 %v7787_v16  ;;  %v7822_v53 = vld [vmem:[%s13186_s14 + $0xc48] sm:$0xff]  ;;  %v7867_v16 = vld [vmem:[%s13186_s14 + $0xdb0] sm:$0xff] }
 0x92b   : > { %6883 = vmatpush.msrb.mxu1 %v7756_v32  ;;  %6984 = vmatpush.msrb.mxu2 %v7801_v47  ;;  %v7835_v32 = vld [vmem:[%s13186_s14 + $0xcb0] sm:$0xff]  ;;  %v7852_v47 = vld [vmem:[%s13186_s14 + $0xd38] sm:$0xff] }
 0x92c   : > { %6906 = vmatpush.msrb.mxu3 %v7769_v36  ;;  %6963 = vmatpush.msrb.mxu0 %v7786_v51  ;;  %v7821_v36 = vld [vmem:[%s13186_s14 + $0xc40] sm:$0xff]  ;;  %v7866_v51 = vld [vmem:[%s13186_s14 + $0xda8] sm:$0xff] }
 0x92d   : > { %6884 = vmatpush.msrb.mxu1 %v7755_v46  ;;  %6985 = vmatpush.msrb.mxu2 %v7800_v35  ;;  %v7834_v46 = vld [vmem:[%s13186_s14 + $0xca8] sm:$0xff]  ;;  %v7851_v35 = vld [vmem:[%s13186_s14 + $0xd30] sm:$0xff] }
 0x92e   : > { %6907 = vmatpush.msrb.mxu3 %v7768_v26  ;;  %6964 = vmatpush.msrb.mxu0 %v7785_v20  ;;  %v7820_v26 = vld [vmem:[%s13186_s14 + $0xc38] sm:$0xff]  ;;  %v7865_v20 = vld [vmem:[%s13186_s14 + $0xda0] sm:$0xff] }
 0x92f   : > { %6885 = vmatpush.msrb.mxu1 %v7754_v57  ;;  %6986 = vmatpush.msrb.mxu2 %v7799_v0  ;;  %v7833_v57 = vld [vmem:[%s13186_s14 + $0xca0] sm:$0xff]  ;;  %v7850_v0 = vld [vmem:[%s13186_s14 + $0xd28] sm:$0xff] }
 0x930   : > { %6908 = vmatpush.msrb.mxu3 %v7767_v29  ;;  %6965 = vmatpush.msrb.mxu0 %v7784_v37  ;;  %v7819_v29 = vld [vmem:[%s13186_s14 + $0xc30] sm:$0xff]  ;;  %v7864_v37 = vld [vmem:[%s13186_s14 + $0xd98] sm:$0xff] }
 0x931   : > { %6886 = vmatpush.msrb.mxu1 %v7753_v44  ;;  %6987 = vmatpush.msrb.mxu2 %v7798_v3  ;;  %v7832_v44 = vld [vmem:[%s13186_s14 + $0xc98] sm:$0xff]  ;;  %v7849_v3 = vld [vmem:[%s13186_s14 + $0xd20] sm:$0xff] }
 0x932   : > { %6909 = vmatpush.msrb.mxu3 %v7766_v63  ;;  %6966 = vmatpush.msrb.mxu0 %v7783_v52  ;;  %v7818_v63 = vld [vmem:[%s13186_s14 + $0xc28] sm:$0xff]  ;;  %v7863_v52 = vld [vmem:[%s13186_s14 + $0xd90] sm:$0xff] }
 0x933   : > { %6887 = vmatpush.msrb.mxu1 %v7752_v27  ;;  %6988 = vmatpush.msrb.mxu2 %v7797_v55  ;;  %v7831_v27 = vld [vmem:[%s13186_s14 + $0xc90] sm:$0xff]  ;;  %v7848_v55 = vld [vmem:[%s13186_s14 + $0xd18] sm:$0xff] }
 0x934   : > { %6989 = vmatmul.f32.vlgmr.msrb.gmra.mxu2 %v6950_v25  ;;  %6910 = vmatpush.msrb.mxu3 %v7765_v7  ;;  %v7817_v7 = vld [vmem:[%s13186_s14 + $0xc20] sm:$0xff]  ;;  %v7862_v25 = vld [vmem:[%s13186_s14 + $0xd88] sm:$0xff] }
 0x935   : > { %7129 = vmatpush.msra.mxu2 %v7876_v38  ;;  %6888 = vmatpush.msrb.mxu1 %v7751_v12  ;;  %v7830_v38 = vld [vmem:[%s13186_s14 + $0xc88] sm:$0xff]  ;;  %v7847_v12 = vld [vmem:[%s13186_s14 + $0xd10] sm:$0xff] }
 0x936   : > { %6967 = vmatpush.msrb.mxu0 %v7782_v41  ;;  %6911 = vmatmul.f32.vlgmr.msrb.gmra.mxu3 %v6872_v1  ;;  %v7816_v41 = vld [vmem:[%s13186_s14 + $0xc18] sm:$0xff]  ;;  %v7861_v1 = vld [vmem:[%s13186_s14 + $0xd80] sm:$0xff] }
 0x937   : > { %7051 = vmatpush.msra.mxu3 %v7844_v49  ;;  %7130 = vmatpush.msra.mxu2 %v7875_v45  ;;  %v7829_v49 = vld [vmem:[%s13186_s14 + $0xc80] sm:$0xff]  ;;  %v7106_v45 = vrot.slane %v12509_v28, 5 }
 0x938   : > { %6889 = vmatpush.msrb.mxu1 %v7750_v56  ;;  %6968 = vmatpush.msrb.mxu0 %v7781_v2  ;;  %v7940_v56 = vld [vmem:[%s13186_s14 + $0xff8] sm:$0xff]  ;;  %v7815_v2 = vld [vmem:[%s13186_s14 + $0xc10] sm:$0xff] }
 0x939   : > { %6969 = vmatmul.f32.vlgmr.msrb.gmra.mxu0 %v6949_v61  ;;  %7052 = vmatpush.msra.mxu3 %v7843_v9  ;;  %v7846_v9 = vld [vmem:[%s13186_s14 + $0xd08] sm:$0xff]  ;;  %v7028_v61 = vrot.slane %v12509_v28, 4 }
 0x93a   : > { %7109 = vmatpush.msra.mxu0 %v7860_v15  ;;  %7131 = vmatpush.msra.mxu2 %v7874_v17  ;;  %v7908_v15 = vld [vmem:[%s13186_s14 + $0xef8] sm:$0xff]  ;;  %v7939_v17 = vld [vmem:[%s13186_s14 + $0xff0] sm:$0xff] }
 0x93b   : > { %6890 = vmatpush.msrb.mxu1 %v7749_v8  ;;  %7053 = vmatpush.msra.mxu3 %v7842_v18  ;;  %v7814_v8 = vld [vmem:[%s13186_s14 + $0xc08] sm:$0xff]  ;;  %v7845_v18 = vld [vmem:[%s13186_s14 + $0xd00] sm:$0xff] }
 0x93c   : > { %6891 = vmatmul.f32.vlgmr.msrb.gmra.mxu1 %v6871_v19  ;;  %7110 = vmatpush.msra.mxu0 %v7859_v30  ;;  %v7907_v30 = vld [vmem:[%s13186_s14 + $0xef0] sm:$0xff]  ;;  %v7105_v19 = vrot.slane %v12536_v11, 5 }
 0x93d   : > { %7031 = vmatpush.msra.mxu1 %v7828_v31  ;;  %7132 = vmatpush.msra.mxu2 %v7873_v39  ;;  %v7924_v31 = vld [vmem:[%s13186_s14 + $0xf78] sm:$0xff]  ;;  %v7938_v39 = vld [vmem:[%s13186_s14 + $0xfe8] sm:$0xff] }
 0x93e   : > { %7054 = vmatpush.msra.mxu3 %v7841_v33  ;;  %7111 = vmatpush.msra.mxu0 %v7858_v13  ;;  %v7813_v33 = vld [vmem:[%s13186_s14 + $0xc00] sm:$0xff]  ;;  %v7906_v13 = vld [vmem:[%s13186_s14 + $0xee8] sm:$0xff] }
 0x93f   : > { %7032 = vmatpush.msra.mxu1 %v7827_v59  ;;  %7133 = vmatpush.msra.mxu2 %v7872_v48  ;;  %v7923_v59 = vld [vmem:[%s13186_s14 + $0xf70] sm:$0xff]  ;;  %v7027_v48 = vrot.slane %v12536_v11, 4 }
 0x940   : > { %7055 = vmatpush.msra.mxu3 %v7840_v5  ;;  %7112 = vmatpush.msra.mxu0 %v7857_v54  ;;  %v7892_v5 = vld [vmem:[%s13186_s14 + $0xe78] sm:$0xff]  ;;  %v7937_v54 = vld [vmem:[%s13186_s14 + $0xfe0] sm:$0xff] }
 0x941   : > { %7033 = vmatpush.msra.mxu1 %v7826_v60  ;;  %7134 = vmatpush.msra.mxu2 %v7871_v34  ;;  %v7905_v60 = vld [vmem:[%s13186_s14 + $0xee0] sm:$0xff]  ;;  %v7922_v34 = vld [vmem:[%s13186_s14 + $0xf68] sm:$0xff] }
 0x942   : > { %7056 = vmatpush.msra.mxu3 %v7839_v22  ;;  %7113 = vmatpush.msra.mxu0 %v7856_v50  ;;  %v7891_v22 = vld [vmem:[%s13186_s14 + $0xe70] sm:$0xff]  ;;  %v7936_v50 = vld [vmem:[%s13186_s14 + $0xfd8] sm:$0xff] }
 0x943   : > { %7034 = vmatpush.msra.mxu1 %v7825_v24  ;;  %7135 = vmatpush.msra.mxu2 %v7870_v10  ;;  %v7904_v24 = vld [vmem:[%s13186_s14 + $0xed8] sm:$0xff]  ;;  %v7921_v10 = vld [vmem:[%s13186_s14 + $0xf60] sm:$0xff] }
 0x944   : > { %7057 = vmatpush.msra.mxu3 %v7838_v42  ;;  %7114 = vmatpush.msra.mxu0 %v7855_v62  ;;  %v7890_v42 = vld [vmem:[%s13186_s14 + $0xe68] sm:$0xff]  ;;  %v7935_v62 = vld [vmem:[%s13186_s14 + $0xfd0] sm:$0xff] }
 0x945   : > { %7035 = vmatpush.msra.mxu1 %v7824_v58  ;;  %7136 = vmatpush.msra.mxu2 %v7869_v21  ;;  %v7903_v58 = vld [vmem:[%s13186_s14 + $0xed0] sm:$0xff]  ;;  %v7920_v21 = vld [vmem:[%s13186_s14 + $0xf58] sm:$0xff] }
 0x946   : > { %7058 = vmatpush.msra.mxu3 %v7837_v4  ;;  %7115 = vmatpush.msra.mxu0 %v7854_v23  ;;  %v7889_v4 = vld [vmem:[%s13186_s14 + $0xe60] sm:$0xff]  ;;  %v7934_v23 = vld [vmem:[%s13186_s14 + $0xfc8] sm:$0xff] }
 0x947   : > { %7036 = vmatpush.msra.mxu1 %v7823_v6  ;;  %7137 = vmatpush.msra.mxu2 %v7868_v40  ;;  %v7902_v6 = vld [vmem:[%s13186_s14 + $0xec8] sm:$0xff]  ;;  %v7919_v40 = vld [vmem:[%s13186_s14 + $0xf50] sm:$0xff] }
 0x948   : > { %7059 = vmatpush.msra.mxu3 %v7836_v43  ;;  %7116 = vmatpush.msra.mxu0 %v7853_v14  ;;  %v7888_v43 = vld [vmem:[%s13186_s14 + $0xe58] sm:$0xff]  ;;  %v7933_v14 = vld [vmem:[%s13186_s14 + $0xfc0] sm:$0xff] }
 0x949   : > { %7037 = vmatpush.msra.mxu1 %v7822_v53  ;;  %7138 = vmatpush.msra.mxu2 %v7867_v16  ;;  %v7901_v53 = vld [vmem:[%s13186_s14 + $0xec0] sm:$0xff]  ;;  %v7918_v16 = vld [vmem:[%s13186_s14 + $0xf48] sm:$0xff] }
 0x94a   : > { %7060 = vmatpush.msra.mxu3 %v7835_v32  ;;  %7117 = vmatpush.msra.mxu0 %v7852_v47  ;;  %v7887_v32 = vld [vmem:[%s13186_s14 + $0xe50] sm:$0xff]  ;;  %v7932_v47 = vld [vmem:[%s13186_s14 + $0xfb8] sm:$0xff] }
 0x94b   : > { %7038 = vmatpush.msra.mxu1 %v7821_v36  ;;  %7139 = vmatpush.msra.mxu2 %v7866_v51  ;;  %v7900_v36 = vld [vmem:[%s13186_s14 + $0xeb8] sm:$0xff]  ;;  %v7917_v51 = vld [vmem:[%s13186_s14 + $0xf40] sm:$0xff] }
 0x94c   : > { %7061 = vmatpush.msra.mxu3 %v7834_v46  ;;  %7118 = vmatpush.msra.mxu0 %v7851_v35  ;;  %v7886_v46 = vld [vmem:[%s13186_s14 + $0xe48] sm:$0xff]  ;;  %v7931_v35 = vld [vmem:[%s13186_s14 + $0xfb0] sm:$0xff] }
 0x94d   : > { %7039 = vmatpush.msra.mxu1 %v7820_v26  ;;  %7140 = vmatpush.msra.mxu2 %v7865_v20  ;;  %v7899_v26 = vld [vmem:[%s13186_s14 + $0xeb0] sm:$0xff]  ;;  %v7916_v20 = vld [vmem:[%s13186_s14 + $0xf38] sm:$0xff] }
 0x94e   : > { %7062 = vmatpush.msra.mxu3 %v7833_v57  ;;  %7119 = vmatpush.msra.mxu0 %v7850_v0  ;;  %v7885_v57 = vld [vmem:[%s13186_s14 + $0xe40] sm:$0xff]  ;;  %v7930_v0 = vld [vmem:[%s13186_s14 + $0xfa8] sm:$0xff] }
 0x94f   : > { %7040 = vmatpush.msra.mxu1 %v7819_v29  ;;  %7141 = vmatpush.msra.mxu2 %v7864_v37  ;;  %v7898_v29 = vld [vmem:[%s13186_s14 + $0xea8] sm:$0xff]  ;;  %v7915_v37 = vld [vmem:[%s13186_s14 + $0xf30] sm:$0xff] }
 0x950   : > { %7063 = vmatpush.msra.mxu3 %v7832_v44  ;;  %7120 = vmatpush.msra.mxu0 %v7849_v3  ;;  %v7884_v44 = vld [vmem:[%s13186_s14 + $0xe38] sm:$0xff]  ;;  %v7929_v3 = vld [vmem:[%s13186_s14 + $0xfa0] sm:$0xff] }
 0x951   : > { %7041 = vmatpush.msra.mxu1 %v7818_v63  ;;  %7142 = vmatpush.msra.mxu2 %v7863_v52  ;;  %v7897_v63 = vld [vmem:[%s13186_s14 + $0xea0] sm:$0xff]  ;;  %v7914_v52 = vld [vmem:[%s13186_s14 + $0xf28] sm:$0xff] }
 0x952   : > { %7064 = vmatpush.msra.mxu3 %v7831_v27  ;;  %7121 = vmatpush.msra.mxu0 %v7848_v55  ;;  %v7883_v27 = vld [vmem:[%s13186_s14 + $0xe30] sm:$0xff]  ;;  %v7928_v55 = vld [vmem:[%s13186_s14 + $0xf98] sm:$0xff] }
 0x953   : > { %7042 = vmatpush.msra.mxu1 %v7817_v7  ;;  %7143 = vmatpush.msra.mxu2 %v7862_v25  ;;  %v7896_v7 = vld [vmem:[%s13186_s14 + $0xe98] sm:$0xff]  ;;  %v7913_v25 = vld [vmem:[%s13186_s14 + $0xf20] sm:$0xff] }
 0x954   : > { %7065 = vmatpush.msra.mxu3 %v7830_v38  ;;  %7122 = vmatpush.msra.mxu0 %v7847_v12  ;;  %v7882_v38 = vld [vmem:[%s13186_s14 + $0xe28] sm:$0xff]  ;;  %v7927_v12 = vld [vmem:[%s13186_s14 + $0xf90] sm:$0xff] }
 0x955   : > { %7043 = vmatpush.msra.mxu1 %v7816_v41  ;;  %7144 = vmatpush.msra.mxu2 %v7861_v1  ;;  %v7895_v41 = vld [vmem:[%s13186_s14 + $0xe90] sm:$0xff]  ;;  %v7912_v1 = vld [vmem:[%s13186_s14 + $0xf18] sm:$0xff] }
 0x956   : > { %7145 = vmatmul.f32.vlgmr.msra.gmra.mxu2 %v7106_v45  ;;  %7066 = vmatpush.msra.mxu3 %v7829_v49  ;;  %v7881_v49 = vld [vmem:[%s13186_s14 + $0xe20] sm:$0xff]  ;;  %v7926_v45 = vld [vmem:[%s13186_s14 + $0xf88] sm:$0xff] }
 0x957   : > { %7285 = vmatpush.msrb.mxu2 %v7940_v56  ;;  %7044 = vmatpush.msra.mxu1 %v7815_v2  ;;  %v7894_v56 = vld [vmem:[%s13186_s14 + $0xe88] sm:$0xff]  ;;  %v7911_v2 = vld [vmem:[%s13186_s14 + $0xf10] sm:$0xff] }
 0x958   : > { %7123 = vmatpush.msra.mxu0 %v7846_v9  ;;  %7067 = vmatmul.f32.vlgmr.msra.gmra.mxu3 %v7028_v61  ;;  %v7880_v9 = vld [vmem:[%s13186_s14 + $0xe18] sm:$0xff]  ;;  %v7925_v61 = vld [vmem:[%s13186_s14 + $0xf80] sm:$0xff] }
 0x959   : > { %7207 = vmatpush.msrb.mxu3 %v7908_v15  ;;  %7286 = vmatpush.msrb.mxu2 %v7939_v17  ;;  %v7893_v15 = vld [vmem:[%s13186_s14 + $0xe80] sm:$0xff]  ;;  %v7262_v17 = vrot.slane %v12509_v28, 7 }
 0x95a   : > { %7045 = vmatpush.msra.mxu1 %v7814_v8  ;;  %7124 = vmatpush.msra.mxu0 %v7845_v18  ;;  %v7879_v8 = vld [vmem:[%s13186_s14 + $0xe10] sm:$0xff]  ;;  %v7910_v18 = vld [vmem:[%s13186_s14 + $0xf08] sm:$0xff] }
 0x95b   : > { %7125 = vmatmul.f32.vlgmr.msra.gmra.mxu0 %v7105_v19  ;;  %7208 = vmatpush.msrb.mxu3 %v7907_v30  ;;  %v7184_v30 = vrot.slane %v12509_v28, 6  ;;  %v7878_v19 = vld [vmem:[%s13186_s14 + $0xe08] sm:$0xff]  ;;  %v7183_v28 = vrot.slane %v12536_v11, 6 }
 0x95c   : > { %7265 = vmatpush.msrb.mxu0 %v7924_v31  ;;  %7287 = vmatpush.msrb.mxu2 %v7938_v39  ;;  %v7909_v31 = vld [vmem:[%s13186_s14 + $0xf00] sm:$0xff]  ;;  %v7261_v39 = vrot.slane %v12536_v11, 7  ;;  %v7318_v11 = vld [vmem:[%s13188_s16 + $0x38] sm:$0xff] }
 0x95d   : > { %7046 = vmatpush.msra.mxu1 %v7813_v33  ;;  %7209 = vmatpush.msrb.mxu3 %v7906_v13  ;;  %v7877_v33 = vld [vmem:[%s13186_s14 + $0xe00] sm:$0xff]  ;;  %v6173_v13 = vpop.f32.mrf.mxu3 }
 0x95e   : > { %7047 = vmatmul.f32.vlgmr.msra.gmra.mxu1 %v7027_v48  ;;  %7266 = vmatpush.msrb.mxu0 %v7923_v59  ;;  %v6153_v59 = vpop.f32.mrf.mxu1  ;;  %v6213_v48 = vpop.f32.mrf.mxu2 }
 0x95f   : > { %7187 = vmatpush.msrb.mxu1 %v7892_v5  ;;  %7288 = vmatpush.msrb.mxu2 %v7937_v54  ;;  %v6193_v5 = vpop.f32.mrf.mxu0 }
 0x960   : > { %7210 = vmatpush.msrb.mxu3 %v7905_v60  ;;  %7267 = vmatpush.msrb.mxu0 %v7922_v34 }
 0x961   : > { %7188 = vmatpush.msrb.mxu1 %v7891_v22  ;;  %7289 = vmatpush.msrb.mxu2 %v7936_v50  ;;  %v6174_v50 = vadd.f32 %v6173_v13, %v6153_v59 }
 0x962   : > { %7211 = vmatpush.msrb.mxu3 %v7904_v24  ;;  %7268 = vmatpush.msrb.mxu0 %v7921_v10 }
 0x963   : > { %7189 = vmatpush.msrb.mxu1 %v7890_v42  ;;  %7290 = vmatpush.msrb.mxu2 %v7935_v62  ;;  %v6194_v62 = vadd.f32 %v6193_v5, %v6174_v50 }
 0x964   : > { %7212 = vmatpush.msrb.mxu3 %v7903_v58  ;;  %7269 = vmatpush.msrb.mxu0 %v7920_v21 }
 0x965   : > { %7190 = vmatpush.msrb.mxu1 %v7889_v4  ;;  %7291 = vmatpush.msrb.mxu2 %v7934_v23  ;;  %v6290_v54 = vpop.f32.mrf.mxu3  ;;  %v6214_v4 = vadd.f32 %v6213_v48, %v6194_v62 }
 0x966   : > { %7213 = vmatpush.msrb.mxu3 %v7902_v6  ;;  %7270 = vmatpush.msrb.mxu0 %v7919_v40  ;;  %v6270_v60 = vpop.f32.mrf.mxu1  ;;  %v6368_v34 = vpop.f32.mrf.mxu2  ;;  %v7317_v6 = vld [vmem:[%s13188_s16 + $0x30] sm:$0xff] }
 0x967   : > { %7191 = vmatpush.msrb.mxu1 %v7888_v43  ;;  %7292 = vmatpush.msrb.mxu2 %v7933_v14  ;;  %v6348_v22 = vpop.f32.mrf.mxu0  ;;  %v6291_v21 = vadd.f32 %v6290_v54, %v6270_v60 }
 0x968   : > { %7214 = vmatpush.msrb.mxu3 %v7901_v53  ;;  %7271 = vmatpush.msrb.mxu0 %v7918_v16  ;;  %v7316_v53 = vld [vmem:[%s13188_s16 + $0x28] sm:$0xff]  ;;  %v6369_v16 = vadd.f32 %v6368_v34, %v6348_v22  ;;  %v7306_v34 = vld [vmem:[%s13187_s15] sm:$0x1] }
 0x969   : > { %7192 = vmatpush.msrb.mxu1 %v7887_v32  ;;  %7293 = vmatpush.msrb.mxu2 %v7932_v47  ;;  %v6293_v40 = vadd.f32 %v6291_v21, %v6214_v4 }
 0x96a   : > { %7215 = vmatpush.msrb.mxu3 %v7900_v36  ;;  %7272 = vmatpush.msrb.mxu0 %v7917_v51  ;;  %v7315_v36 = vld [vmem:[%s13188_s16 + $0x20] sm:$0xff] }
 0x96b   : > { %7193 = vmatpush.msrb.mxu1 %v7886_v46  ;;  %7294 = vmatpush.msrb.mxu2 %v7931_v35  ;;  %v6371_v51 = vadd.f32 %v6369_v16, %v6293_v40  ;;  %v7314_v46 = vld [vmem:[%s13188_s16 + $0x18] sm:$0xff] }
 0x96c   : > { %7216 = vmatpush.msrb.mxu3 %v7899_v26  ;;  %7273 = vmatpush.msrb.mxu0 %v7916_v20  ;;  %v7313_v20 = vld [vmem:[%s13188_s16 + $0x10] sm:$0xff] }
 0x96d   : > { %7194 = vmatpush.msrb.mxu1 %v7885_v57  ;;  %7295 = vmatpush.msrb.mxu2 %v7930_v0  ;;  %v6446_v24 = vpop.f32.mrf.mxu3 }
 0x96e   : > { %7217 = vmatpush.msrb.mxu3 %v7898_v29  ;;  %7274 = vmatpush.msrb.mxu0 %v7915_v37  ;;  %v6426_v10 = vpop.f32.mrf.mxu1  ;;  %v6524_v42 = vpop.f32.mrf.mxu2 }
 0x96f   : > { %7195 = vmatpush.msrb.mxu1 %v7884_v44  ;;  %7296 = vmatpush.msrb.mxu2 %v7929_v3  ;;  %v6504_v58 = vpop.f32.mrf.mxu0  ;;  %v6447_v32 = vadd.f32 %v6446_v24, %v6426_v10  ;;  %v7312_v44 = vld [vmem:[%s13188_s16 + $0x8] sm:$0xff] }
 0x970   : > { %7218 = vmatpush.msrb.mxu3 %v7897_v63  ;;  %7275 = vmatpush.msrb.mxu0 %v7914_v52  ;;  %v6525_v57 = vadd.f32 %v6524_v42, %v6504_v58  ;;  %v7311_v63 = vld [vmem:[%s13188_s16] sm:$0xff] }
 0x971   : > { %7196 = vmatpush.msrb.mxu1 %v7883_v27  ;;  %7297 = vmatpush.msrb.mxu2 %v7928_v55  ;;  %v6449_v35 = vadd.f32 %v6447_v32, %v6371_v51  ;;  %v7319_v42 = vld [vmem:[%s13189_s17] sm:$0x1] }
 0x972   : > { %7219 = vmatpush.msrb.mxu3 %v7896_v7  ;;  %7276 = vmatpush.msrb.mxu0 %v7913_v25 }
 0x973   : > { %7197 = vmatpush.msrb.mxu1 %v7882_v38  ;;  %7298 = vmatpush.msrb.mxu2 %v7927_v12  ;;  %v6527_v3 = vadd.f32 %v6525_v57, %v6449_v35 }
 0x974   : > { %7220 = vmatpush.msrb.mxu3 %v7895_v41  ;;  %7277 = vmatpush.msrb.mxu0 %v7912_v1 }
 0x975   : > { %7198 = vmatpush.msrb.mxu1 %v7881_v49  ;;  %7299 = vmatpush.msrb.mxu2 %v7926_v45  ;;  %v6602_v23 = vpop.f32.mrf.mxu3 }
 0x976   : > { %7221 = vmatpush.msrb.mxu3 %v7894_v56  ;;  %7278 = vmatpush.msrb.mxu0 %v7911_v2  ;;  %v6582_v43 = vpop.f32.mrf.mxu1  ;;  %v6680_v14 = vpop.f32.mrf.mxu2 }
 0x977   : > { %7199 = vmatpush.msrb.mxu1 %v7880_v9  ;;  %7300 = vmatpush.msrb.mxu2 %v7925_v61  ;;  %v6660_v47 = vpop.f32.mrf.mxu0  ;;  %v6603_v0 = vadd.f32 %v6602_v23, %v6582_v43 }
 0x978   : > { %7301 = vmatmul.f32.vlgmr.msrb.gmra.mxu2 %v7262_v17  ;;  %7222 = vmatpush.msrb.mxu3 %v7893_v15  ;;  %v6681_v55 = vadd.f32 %v6680_v14, %v6660_v47 }
 0x979   : > { %7200 = vmatpush.msrb.mxu1 %v7879_v8  ;;  %7279 = vmatpush.msrb.mxu0 %v7910_v18  ;;  %v6605_v27 = vadd.f32 %v6603_v0, %v6527_v3 }
 0x97a   : > { %7223 = vmatmul.f32.vlgmr.msrb.gmra.mxu3 %v7184_v30 }
 0x97b   : > { %7201 = vmatpush.msrb.mxu1 %v7878_v19  ;;  %7280 = vmatpush.msrb.mxu0 %v7909_v31  ;;  %v6683_v38 = vadd.f32 %v6681_v55, %v6605_v27 }
 0x97c   : > { %7281 = vmatmul.f32.vlgmr.msrb.gmra.mxu0 %v7261_v39 }
 0x97d   : > { %7202 = vmatpush.msrb.mxu1 %v7877_v33 }
 0x97e   : > { %7203 = vmatmul.f32.vlgmr.msrb.gmra.mxu1 %v7183_v28 }
 0x97f   : > { %7332 = vmatpush.msra.mxu1 %v7318_v11 }
 0x981   : > { %7333 = vmatpush.msra.mxu1 %v7317_v6 }
 0x983   : > { %7334 = vmatpush.msra.mxu1 %v7316_v53 }
 0x985   : > { %7335 = vmatpush.msra.mxu1 %v7315_v36 }
 0x987   : > { %7336 = vmatpush.msra.mxu1 %v7314_v46 }
 0x989   : > { %7337 = vmatpush.msra.mxu1 %v7313_v20 }
 0x98b   : > { %7338 = vmatpush.msra.mxu1 %v7312_v44 }
 0x98d   : > { %7339 = vmatpush.msra.mxu1 %v7311_v63 }
 0x994   : > { %v6814_v52 = vpop.f32.mrf.mxu0 }
 0x995   : > { %v6834_v37 = vpop.f32.mrf.mxu2 }
 0x996   : > { %v6835_v45 = vadd.f32 %v6834_v37, %v6814_v52 }
 0x997   : > { %v6754_v26 = vpop.f32.mrf.mxu3  ;;  %v6734_v29 = vpop.f32.mrf.mxu1 }
 0x998   : > { %v6755_v7 = vadd.f32 %v6754_v26, %v6734_v29 }
 0x99a   : > { %v6757_v1 = vadd.f32 %v6755_v7, %v6683_v38 }
 0x99c   : > { %v6837_v2 = vadd.f32 %v6835_v45, %v6757_v1 }
 0x9b6   : > { %v6970_v49 = vpop.f32.mrf.mxu0 }
 0x9b7   : > { %v6990_v41 = vpop.f32.mrf.mxu2 }
 0x9b8   : > { %v6991_v8 = vadd.f32 %v6990_v41, %v6970_v49 }
 0x9b9   : > { %v6912_v25 = vpop.f32.mrf.mxu3  ;;  %v6892_v12 = vpop.f32.mrf.mxu1 }
 0x9ba   : > { %v6913_v56 = vadd.f32 %v6912_v25, %v6892_v12 }
 0x9bc   : > { %v6915_v61 = vadd.f32 %v6913_v56, %v6837_v2 }
 0x9be   : > { %v6993_v19 = vadd.f32 %v6991_v8, %v6915_v61 }
 0x9d8   : > { %v7126_v30 = vpop.f32.mrf.mxu0 }
 0x9d9   : > { %v7146_v17 = vpop.f32.mrf.mxu2 }
 0x9da   : > { %v7147_v39 = vadd.f32 %v7146_v17, %v7126_v30 }
 0x9db   : > { %v7068_v9 = vpop.f32.mrf.mxu3  ;;  %v7048_v15 = vpop.f32.mrf.mxu1 }
 0x9dc   : > { %v7069_v18 = vadd.f32 %v7068_v9, %v7048_v15 }
 0x9de   : > { %v7071_v31 = vadd.f32 %v7069_v18, %v6993_v19 }
 0x9e0   : > { %v7149_v59 = vadd.f32 %v7147_v39, %v7071_v31 }
 0x9f9   : > { %v7282_v5 = vpop.f32.mrf.mxu0 }
 0x9fb   : > { %v7204_v33 = vpop.f32.mrf.mxu1  ;;  %v7302_v28 = vpop.f32.mrf.mxu2 }
 0x9fc   : > { %v7303_v54 = vadd.f32 %v7302_v28, %v7282_v5 }
 0x9fd   : > { %v7224_v13 = vpop.f32.mrf.mxu3 }
 0x9fe   : > { %v7225_v48 = vadd.f32 %v7224_v13, %v7204_v33 }
 0xa00   : > { %v7227_v60 = vadd.f32 %v7225_v48, %v7149_v59 }
 0xa02   : > { %v7305_v22 = vadd.f32 %v7303_v54, %v7227_v60 }
 0xa04   : > { %v7307_v50 = vadd.f32 %v7306_v34, %v7305_v22 }
 0xa06   : > { %v7309_v24 = vmul.f32 0.01, %v7307_v50  ;;  %vm7308_vm2 = vcmp.gt.f32.partialorder %v7307_v50, 0.0 }
 0xa08   : > { %v7310_v10 = vsel %vm7308_vm2, %v7307_v50, %v7309_v24 }
 0xa09   : > { %7941 = vmatmul.msk.f32.vlgmr.msra.gmra.mxu1 %vm7320_vm5, %v7310_v10 }
 0xa86   : > { %v7341_v62 = vpop.f32.mrf.mxu1 }
 0xa87   : > { %v7342_v58 = vadd.f32 %v7341_v62, %v7319_v42 }
 0xa89   : > { %7345 = vst.msk [vmem:[%s571_s21] sm:$0x1] %vm7344_vm6, %v7342_v58 }
 0xa8a PF: > { %s28_s27 = sadd.s32 1, %s8102_s27  }
 0xa8b   : > { %p25_p4 = scmp.ge.s32.totalorder %s28_s27, 4  }
 0xa8d   :  { %27 = sbr.rel (!%p25_p4) target bundleno = 4 (0x4), region = 137 }

</bundles_post_ra>
